<compile_context>
chip_gen: v5e
topology: v5e:2x2
jax: 0.10.0
libtpu: 0.0.40
codegen_flags: <defaults>
</compile_context>

<pallas_src>
import numpy as np
import jax
import jax.numpy as jnp
from jax.experimental import pallas as pl
from jax.experimental.pallas import tpu as pltpu


# ------------------------------- Pallas kernel -------------------------------

def make_sbnet_kernel(n_layers, eps=1e-5):
    """Fused image path: RGB->OD, n x [stats, folded norm+FiLM+1x1conv, sigmoid], OD->RGB.

    Per batch element.  Kernel refs: x, then per layer (gb, wc, bc), then out.
      gb : (1, 2, nf) f32   rows = (1+gamma, beta), precomputed in the wrapper
      wc : (nf, cout) bf16  1x1 conv weight
      bc : (1, cout)  f32   1x1 conv bias
    """

    def kernel(x_ref, *refs):
        o_ref = refs[-1]
        p = refs[:-1]

        # RGB -> OD (f32), (HW, C).
        x = -jnp.log(x_ref[0] + 1e-12)

        for li in range(n_layers):                      # unrolled at trace time
            gb_ref, wc_ref, bc_ref = p[3 * li:3 * li + 3]
            gb = gb_ref[0]                              # (2, nf) f32
            g1 = gb[0:1, :]                             # 1 + gamma, (1, nf)
            beta = gb[1:2, :]                           # (1, nf)

            # InstanceNorm stats over the spatial axis (single-pass, f32).
            mean = jnp.mean(x, axis=0, keepdims=True)   # (1, nf)
            ex2 = jnp.mean(x * x, axis=0, keepdims=True)
            var = jnp.maximum(ex2 - mean * mean, 0.0)
            a = g1 * jax.lax.rsqrt(var + eps)           # folds invstd and (1+gamma)

            wc = wc_ref[...]                            # (nf, cout) bf16
            # FiLM's beta folded into the conv bias: (1,nf)@(nf,cout) micro-matmul.
            bias = jnp.dot(beta.astype(jnp.bfloat16), wc,
                           preferred_element_type=jnp.float32) + bc_ref[...]

            # Single fused sweep over the activation (sub, mul, cast), then MXU conv.
            xc = ((x - mean) * a).astype(jnp.bfloat16)
            y = jnp.dot(xc, wc, preferred_element_type=jnp.float32) + bias

            # sigmoid via tanh identity: EUP transcendental, no VALU divide.
            x = 0.5 * jnp.tanh(0.5 * y) + 0.5

        # OD -> RGB.
        o_ref[0] = jnp.exp(-x - 1e-12)

    return kernel


# -------------------------- style MLP (hoisted, XLA) --------------------------

def style_mlp(layers, s):
    """fc1->relu->fc2->relu->fc3, chunked into (1+gamma, beta), batched over B (f32)."""
    out = []
    for lp in layers:
        h = jax.nn.relu(s @ lp["w1"] + lp["b1"])
        h = jax.nn.relu(h @ lp["w2"] + lp["b2"])
        gb = h @ lp["w3"] + lp["b3"]                    # (B, 2*nf)
        nf = gb.shape[-1] // 2
        out.append(jnp.stack([1.0 + gb[:, :nf], gb[:, nf:]], axis=1))  # (B, 2, nf)
    return out


# --------------------------------- wrapper -----------------------------------

def sbnet_forward(layers, x_nchw, s, ms=None, c_ratio=None):
    """SBNet.forward, non-linear path (linear=False, the constructor default).

    x_nchw: (B, C, H, W) image in (0, 1];  s: (B, embedding_size).
    """
    # TODO(synk): linear=True path (torch.bmm with `ms` + clip) not implemented;
    #             `ms` / `c_ratio` are unused by the non-linear path (as in PyTorch).
    del ms, c_ratio
    B, C, H, W = x_nchw.shape
    HW = H * W

    x = jnp.transpose(x_nchw, (0, 2, 3, 1)).reshape(B, HW, C)   # NHWC, flattened
    gbs = style_mlp(layers, s)                                  # hoisted out of the kernel

    flat = [x]
    in_specs = [pl.BlockSpec((1, HW, C), lambda b: (b, 0, 0))]
    for li, lp in enumerate(layers):
        gb, wc, bc = gbs[li], lp["wc"], lp["bc"]
        flat += [gb, wc, bc]
        in_specs += [
            pl.BlockSpec((1,) + gb.shape[1:], lambda b: (b, 0, 0)),   # (1, 2, nf)
            pl.BlockSpec(wc.shape, lambda b: (0, 0)),                 # weights resident
            pl.BlockSpec(bc.shape, lambda b: (0, 0)),
        ]

    out = pl.pallas_call(
        make_sbnet_kernel(len(layers)),
        out_shape=jax.ShapeDtypeStruct((B, HW, C), jnp.float32),
        grid=(B,),
        in_specs=in_specs,
        out_specs=pl.BlockSpec((1, HW, C), lambda b: (b, 0, 0)),
        compiler_params=pltpu.CompilerParams(
            dimension_semantics=("parallel",),          # split batch across TensorCores
            vmem_limit_bytes=32 * 1024 * 1024),
    )(*flat)

    return jnp.transpose(out.reshape(B, H, W, C), (0, 3, 1, 2))   # back to NCHW


# ------------------------------ parameter init -------------------------------

def init_params(key, channels=3, embedding_size=64, hidden_dim=256):
    feature_dims = ([(channels, hidden_dim)]
                    + [(hidden_dim, hidden_dim)] * 3
                    + [(hidden_dim, channels)])
    keys = jax.random.split(key, 4 * len(feature_dims))

    def linear(k, fan_in, fan_out):
        # PyTorch nn.Linear / nn.Conv2d default init: U(-1/sqrt(fan_in), +...).
        bound = 1.0 / float(np.sqrt(fan_in))
        kw, kb = jax.random.split(k)
        w = jax.random.uniform(kw, (fan_in, fan_out), jnp.float32, -bound, bound)
        b = jax.random.uniform(kb, (1, fan_out), jnp.float32, -bound, bound)
        return w, b

    layers, ki = [], 0
    for nf, cout in feature_dims:
        sd2 = 2 * nf
        w1, b1 = linear(keys[ki], embedding_size, sd2); ki += 1
        w2, b2 = linear(keys[ki], sd2, sd2); ki += 1
        w3, b3 = linear(keys[ki], sd2, sd2); ki += 1
        wc, bc = linear(keys[ki], nf, cout); ki += 1
        layers.append(dict(
            w1=w1, b1=b1, w2=w2, b2=b2, w3=w3, b3=b3,   # style MLP stays f32 (wrapper)
            wc=wc.astype(jnp.bfloat16), bc=bc,          # conv weight bf16, bias f32
        ))
    return layers


# --------------------------- pure-JAX reference (f32) ------------------------

def sbnet_reference(layers, x_nchw, s):
    gbs = style_mlp(layers, s)
    x = -jnp.log(x_nchw + 1e-12)
    for li, lp in enumerate(layers):
        g1 = gbs[li][:, 0][:, :, None, None]            # 1 + gamma, (B, nf, 1, 1)
        beta = gbs[li][:, 1][:, :, None, None]
        mean = jnp.mean(x, axis=(2, 3), keepdims=True)
        var = jnp.var(x, axis=(2, 3), keepdims=True)
        xhat = (x - mean) * jax.lax.rsqrt(var + 1e-5)
        x = g1 * xhat + beta
        x = (jnp.einsum("bchw,co->bohw", x, lp["wc"].astype(jnp.float32))
             + lp["bc"].reshape(1, -1, 1, 1))
        x = jax.nn.sigmoid(x)
    return jnp.exp(-x - 1e-12)


# ----------------------------------- main -------------------------------------

if __name__ == "__main__":
    channels, embedding_size, hidden_dim = 3, 64, 256
    B, H, W = 2, 16, 16

    key = jax.random.PRNGKey(0)
    pkey, xkey, skey = jax.random.split(key, 3)

    layers = init_params(pkey, channels, embedding_size, hidden_dim)
    x = jax.random.uniform(xkey, (B, channels, H, W), jnp.float32,
                           minval=0.05, maxval=1.0)     # RGB image in (0, 1]
    s = jax.random.normal(skey, (B, embedding_size), jnp.float32)

    fwd = jax.jit(sbnet_forward)
    out = fwd(layers, x, s)
    jax.block_until_ready(out)

    assert out.shape == (B, channels, H, W), out.shape
    assert bool(jnp.all(jnp.isfinite(out)))

    ref = sbnet_reference(layers, x, s)
    err = float(jnp.max(jnp.abs(out - ref)))
    assert err < 5e-2, f"max abs error vs f32 reference: {err}"

    print("KERNEL_OK")
</pallas_src>

<mosaic_0001>
module attributes {stable_mosaic.version = 11 : i64} {
  func.func @kernel(%arg0: i32, %arg1: memref<1x256x3xf32, #tpu.memory_space<vmem>>, %arg2: memref<1x2x3xf32, #tpu.memory_space<vmem>>, %arg3: memref<3x256xbf16, #tpu.memory_space<vmem>>, %arg4: memref<1x256xf32, #tpu.memory_space<vmem>>, %arg5: memref<1x2x256xf32, #tpu.memory_space<vmem>>, %arg6: memref<256x256xbf16, #tpu.memory_space<vmem>>, %arg7: memref<1x256xf32, #tpu.memory_space<vmem>>, %arg8: memref<1x2x256xf32, #tpu.memory_space<vmem>>, %arg9: memref<256x256xbf16, #tpu.memory_space<vmem>>, %arg10: memref<1x256xf32, #tpu.memory_space<vmem>>, %arg11: memref<1x2x256xf32, #tpu.memory_space<vmem>>, %arg12: memref<256x256xbf16, #tpu.memory_space<vmem>>, %arg13: memref<1x256xf32, #tpu.memory_space<vmem>>, %arg14: memref<1x2x256xf32, #tpu.memory_space<vmem>>, %arg15: memref<256x3xbf16, #tpu.memory_space<vmem>>, %arg16: memref<1x3xf32, #tpu.memory_space<vmem>>, %arg17: memref<1x256x3xf32, #tpu.memory_space<vmem>>) attributes {dimension_semantics = [#tpu.dimension_semantics<parallel>], iteration_bounds = array<i64: 2>, scalar_prefetch = 0 : i64, scratch_operands = 0 : i64, tpu.core_type = #tpu.core_type<tc>, window_params = [{transform_indices = @transform_0, window_bounds = array<i64: 1, 256, 3>}, {transform_indices = @transform_1, window_bounds = array<i64: 1, 2, 3>}, {pipeline_mode = #tpu.pipeline_mode<synchronous>, transform_indices = @transform_2, window_bounds = array<i64: 3, 256>}, {pipeline_mode = #tpu.pipeline_mode<synchronous>, transform_indices = @transform_3, window_bounds = array<i64: 1, 256>}, {transform_indices = @transform_4, window_bounds = array<i64: 1, 2, 256>}, {pipeline_mode = #tpu.pipeline_mode<synchronous>, transform_indices = @transform_5, window_bounds = array<i64: 256, 256>}, {pipeline_mode = #tpu.pipeline_mode<synchronous>, transform_indices = @transform_6, window_bounds = array<i64: 1, 256>}, {transform_indices = @transform_7, window_bounds = array<i64: 1, 2, 256>}, {pipeline_mode = #tpu.pipeline_mode<synchronous>, transform_indices = @transform_8, window_bounds = array<i64: 256, 256>}, {pipeline_mode = #tpu.pipeline_mode<synchronous>, transform_indices = @transform_9, window_bounds = array<i64: 1, 256>}, {transform_indices = @transform_10, window_bounds = array<i64: 1, 2, 256>}, {pipeline_mode = #tpu.pipeline_mode<synchronous>, transform_indices = @transform_11, window_bounds = array<i64: 256, 256>}, {pipeline_mode = #tpu.pipeline_mode<synchronous>, transform_indices = @transform_12, window_bounds = array<i64: 1, 256>}, {transform_indices = @transform_13, window_bounds = array<i64: 1, 2, 256>}, {pipeline_mode = #tpu.pipeline_mode<synchronous>, transform_indices = @transform_14, window_bounds = array<i64: 256, 3>}, {pipeline_mode = #tpu.pipeline_mode<synchronous>, transform_indices = @transform_15, window_bounds = array<i64: 1, 3>}, {transform_indices = @transform_16, window_bounds = array<i64: 1, 256, 3>}]} {
    %c0 = arith.constant 0 : index
    %c0_0 = arith.constant 0 : index
    %c0_1 = arith.constant 0 : index
    %0 = vector.load %arg1[%c0, %c0_0, %c0_1] : memref<1x256x3xf32, #tpu.memory_space<vmem>>, vector<1x256x3xf32>
    %1 = vector.shape_cast %0 : vector<1x256x3xf32> to vector<256x3xf32>
    %cst = arith.constant 9.99999996E-13 : f32
    %2 = vector.broadcast %cst : f32 to vector<256x3xf32>
    %3 = arith.addf %1, %2 : vector<256x3xf32>
    %4 = math.log %3 : vector<256x3xf32>
    %cst_2 = arith.constant 0.000000e+00 : f32
    %5 = vector.broadcast %cst_2 : f32 to vector<256x3xf32>
    %6 = arith.subf %5, %4 : vector<256x3xf32>
    %c0_3 = arith.constant 0 : index
    %c0_4 = arith.constant 0 : index
    %c0_5 = arith.constant 0 : index
    %7 = vector.load %arg2[%c0_3, %c0_4, %c0_5] : memref<1x2x3xf32, #tpu.memory_space<vmem>>, vector<1x2x3xf32>
    %8 = vector.shape_cast %7 : vector<1x2x3xf32> to vector<2x3xf32>
    %9 = vector.extract_strided_slice %8 {offsets = [0, 0], sizes = [1, 3], strides = [1, 1]} : vector<2x3xf32> to vector<1x3xf32>
    %10 = vector.extract_strided_slice %8 {offsets = [1, 0], sizes = [1, 3], strides = [1, 1]} : vector<2x3xf32> to vector<1x3xf32>
    %cst_6 = arith.constant dense<0.000000e+00> : vector<3xf32>
    %11 = vector.multi_reduction <add>, %6, %cst_6 [0] : vector<256x3xf32> to vector<3xf32>
    %12 = vector.shape_cast %11 : vector<3xf32> to vector<1x3xf32>
    %cst_7 = arith.constant 2.560000e+02 : f32
    %13 = vector.broadcast %cst_7 : f32 to vector<1x3xf32>
    %14 = arith.divf %12, %13 : vector<1x3xf32>
    %15 = arith.mulf %6, %6 : vector<256x3xf32>
    %cst_8 = arith.constant dense<0.000000e+00> : vector<3xf32>
    %16 = vector.multi_reduction <add>, %15, %cst_8 [0] : vector<256x3xf32> to vector<3xf32>
    %17 = vector.shape_cast %16 : vector<3xf32> to vector<1x3xf32>
    %cst_9 = arith.constant 2.560000e+02 : f32
    %18 = vector.broadcast %cst_9 : f32 to vector<1x3xf32>
    %19 = arith.divf %17, %18 : vector<1x3xf32>
    %20 = arith.mulf %14, %14 : vector<1x3xf32>
    %21 = arith.subf %19, %20 : vector<1x3xf32>
    %cst_10 = arith.constant 0.000000e+00 : f32
    %22 = vector.broadcast %cst_10 : f32 to vector<1x3xf32>
    %23 = arith.maximumf %21, %22 : vector<1x3xf32>
    %cst_11 = arith.constant 9.99999974E-6 : f32
    %24 = vector.broadcast %cst_11 : f32 to vector<1x3xf32>
    %25 = arith.addf %23, %24 : vector<1x3xf32>
    %26 = math.rsqrt %25 : vector<1x3xf32>
    %27 = arith.mulf %9, %26 : vector<1x3xf32>
    %c0_12 = arith.constant 0 : index
    %c0_13 = arith.constant 0 : index
    %28 = vector.load %arg3[%c0_12, %c0_13] : memref<3x256xbf16, #tpu.memory_space<vmem>>, vector<3x256xbf16>
    %29 = arith.truncf %10 : vector<1x3xf32> to vector<1x3xbf16>
    %cst_14 = arith.constant dense<0.000000e+00> : vector<1x256xf32>
    %30 = tpu.matmul %29, %28, %cst_14 {dimension_numbers = #tpu.dot_dimension_numbers<[1], [0], [0], [1], [0, 0, 1, 1], [], []>} : vector<1x3xbf16>, vector<3x256xbf16>, vector<1x256xf32> -> vector<1x256xf32>
    %c0_15 = arith.constant 0 : index
    %c0_16 = arith.constant 0 : index
    %31 = vector.load %arg4[%c0_15, %c0_16] : memref<1x256xf32, #tpu.memory_space<vmem>>, vector<1x256xf32>
    %32 = arith.addf %30, %31 : vector<1x256xf32>
    %33 = vector.broadcast %14 : vector<1x3xf32> to vector<256x3xf32>
    %34 = arith.subf %6, %33 : vector<256x3xf32>
    %35 = vector.broadcast %27 : vector<1x3xf32> to vector<256x3xf32>
    %36 = arith.mulf %34, %35 : vector<256x3xf32>
    %37 = arith.truncf %36 : vector<256x3xf32> to vector<256x3xbf16>
    %cst_17 = arith.constant dense<0.000000e+00> : vector<256x256xf32>
    %38 = tpu.matmul %37, %28, %cst_17 {dimension_numbers = #tpu.dot_dimension_numbers<[1], [0], [0], [1], [0, 0, 1, 1], [], []>} : vector<256x3xbf16>, vector<3x256xbf16>, vector<256x256xf32> -> vector<256x256xf32>
    %39 = vector.broadcast %32 : vector<1x256xf32> to vector<256x256xf32>
    %40 = arith.addf %38, %39 : vector<256x256xf32>
    %cst_18 = arith.constant 5.000000e-01 : f32
    %41 = vector.broadcast %cst_18 : f32 to vector<256x256xf32>
    %42 = arith.mulf %41, %40 : vector<256x256xf32>
    %43 = math.tanh %42 : vector<256x256xf32>
    %cst_19 = arith.constant 5.000000e-01 : f32
    %44 = vector.broadcast %cst_19 : f32 to vector<256x256xf32>
    %45 = arith.mulf %44, %43 : vector<256x256xf32>
    %cst_20 = arith.constant 5.000000e-01 : f32
    %46 = vector.broadcast %cst_20 : f32 to vector<256x256xf32>
    %47 = arith.addf %45, %46 : vector<256x256xf32>
    %c0_21 = arith.constant 0 : index
    %c0_22 = arith.constant 0 : index
    %c0_23 = arith.constant 0 : index
    %48 = vector.load %arg5[%c0_21, %c0_22, %c0_23] : memref<1x2x256xf32, #tpu.memory_space<vmem>>, vector<1x2x256xf32>
    %49 = vector.shape_cast %48 : vector<1x2x256xf32> to vector<2x256xf32>
    %50 = vector.extract_strided_slice %49 {offsets = [0, 0], sizes = [1, 256], strides = [1, 1]} : vector<2x256xf32> to vector<1x256xf32>
    %51 = vector.extract_strided_slice %49 {offsets = [1, 0], sizes = [1, 256], strides = [1, 1]} : vector<2x256xf32> to vector<1x256xf32>
    %cst_24 = arith.constant dense<0.000000e+00> : vector<256xf32>
    %52 = vector.multi_reduction <add>, %47, %cst_24 [0] : vector<256x256xf32> to vector<256xf32>
    %53 = vector.shape_cast %52 : vector<256xf32> to vector<1x256xf32>
    %cst_25 = arith.constant 2.560000e+02 : f32
    %54 = vector.broadcast %cst_25 : f32 to vector<1x256xf32>
    %55 = arith.divf %53, %54 : vector<1x256xf32>
    %56 = arith.mulf %47, %47 : vector<256x256xf32>
    %cst_26 = arith.constant dense<0.000000e+00> : vector<256xf32>
    %57 = vector.multi_reduction <add>, %56, %cst_26 [0] : vector<256x256xf32> to vector<256xf32>
    %58 = vector.shape_cast %57 : vector<256xf32> to vector<1x256xf32>
    %cst_27 = arith.constant 2.560000e+02 : f32
    %59 = vector.broadcast %cst_27 : f32 to vector<1x256xf32>
    %60 = arith.divf %58, %59 : vector<1x256xf32>
    %61 = arith.mulf %55, %55 : vector<1x256xf32>
    %62 = arith.subf %60, %61 : vector<1x256xf32>
    %cst_28 = arith.constant 0.000000e+00 : f32
    %63 = vector.broadcast %cst_28 : f32 to vector<1x256xf32>
    %64 = arith.maximumf %62, %63 : vector<1x256xf32>
    %cst_29 = arith.constant 9.99999974E-6 : f32
    %65 = vector.broadcast %cst_29 : f32 to vector<1x256xf32>
    %66 = arith.addf %64, %65 : vector<1x256xf32>
    %67 = math.rsqrt %66 : vector<1x256xf32>
    %68 = arith.mulf %50, %67 : vector<1x256xf32>
    %c0_30 = arith.constant 0 : index
    %c0_31 = arith.constant 0 : index
    %69 = vector.load %arg6[%c0_30, %c0_31] : memref<256x256xbf16, #tpu.memory_space<vmem>>, vector<256x256xbf16>
    %70 = arith.truncf %51 : vector<1x256xf32> to vector<1x256xbf16>
    %cst_32 = arith.constant dense<0.000000e+00> : vector<1x256xf32>
    %71 = tpu.matmul %70, %69, %cst_32 {dimension_numbers = #tpu.dot_dimension_numbers<[1], [0], [0], [1], [0, 0, 1, 1], [], []>} : vector<1x256xbf16>, vector<256x256xbf16>, vector<1x256xf32> -> vector<1x256xf32>
    %c0_33 = arith.constant 0 : index
    %c0_34 = arith.constant 0 : index
    %72 = vector.load %arg7[%c0_33, %c0_34] : memref<1x256xf32, #tpu.memory_space<vmem>>, vector<1x256xf32>
    %73 = arith.addf %71, %72 : vector<1x256xf32>
    %74 = vector.broadcast %55 : vector<1x256xf32> to vector<256x256xf32>
    %75 = arith.subf %47, %74 : vector<256x256xf32>
    %76 = vector.broadcast %68 : vector<1x256xf32> to vector<256x256xf32>
    %77 = arith.mulf %75, %76 : vector<256x256xf32>
    %78 = arith.truncf %77 : vector<256x256xf32> to vector<256x256xbf16>
    %cst_35 = arith.constant dense<0.000000e+00> : vector<256x256xf32>
    %79 = tpu.matmul %78, %69, %cst_35 {dimension_numbers = #tpu.dot_dimension_numbers<[1], [0], [0], [1], [0, 0, 1, 1], [], []>} : vector<256x256xbf16>, vector<256x256xbf16>, vector<256x256xf32> -> vector<256x256xf32>
    %80 = vector.broadcast %73 : vector<1x256xf32> to vector<256x256xf32>
    %81 = arith.addf %79, %80 : vector<256x256xf32>
    %cst_36 = arith.constant 5.000000e-01 : f32
    %82 = vector.broadcast %cst_36 : f32 to vector<256x256xf32>
    %83 = arith.mulf %82, %81 : vector<256x256xf32>
    %84 = math.tanh %83 : vector<256x256xf32>
    %cst_37 = arith.constant 5.000000e-01 : f32
    %85 = vector.broadcast %cst_37 : f32 to vector<256x256xf32>
    %86 = arith.mulf %85, %84 : vector<256x256xf32>
    %cst_38 = arith.constant 5.000000e-01 : f32
    %87 = vector.broadcast %cst_38 : f32 to vector<256x256xf32>
    %88 = arith.addf %86, %87 : vector<256x256xf32>
    %c0_39 = arith.constant 0 : index
    %c0_40 = arith.constant 0 : index
    %c0_41 = arith.constant 0 : index
    %89 = vector.load %arg8[%c0_39, %c0_40, %c0_41] : memref<1x2x256xf32, #tpu.memory_space<vmem>>, vector<1x2x256xf32>
    %90 = vector.shape_cast %89 : vector<1x2x256xf32> to vector<2x256xf32>
    %91 = vector.extract_strided_slice %90 {offsets = [0, 0], sizes = [1, 256], strides = [1, 1]} : vector<2x256xf32> to vector<1x256xf32>
    %92 = vector.extract_strided_slice %90 {offsets = [1, 0], sizes = [1, 256], strides = [1, 1]} : vector<2x256xf32> to vector<1x256xf32>
    %cst_42 = arith.constant dense<0.000000e+00> : vector<256xf32>
    %93 = vector.multi_reduction <add>, %88, %cst_42 [0] : vector<256x256xf32> to vector<256xf32>
    %94 = vector.shape_cast %93 : vector<256xf32> to vector<1x256xf32>
    %cst_43 = arith.constant 2.560000e+02 : f32
    %95 = vector.broadcast %cst_43 : f32 to vector<1x256xf32>
    %96 = arith.divf %94, %95 : vector<1x256xf32>
    %97 = arith.mulf %88, %88 : vector<256x256xf32>
    %cst_44 = arith.constant dense<0.000000e+00> : vector<256xf32>
    %98 = vector.multi_reduction <add>, %97, %cst_44 [0] : vector<256x256xf32> to vector<256xf32>
    %99 = vector.shape_cast %98 : vector<256xf32> to vector<1x256xf32>
    %cst_45 = arith.constant 2.560000e+02 : f32
    %100 = vector.broadcast %cst_45 : f32 to vector<1x256xf32>
    %101 = arith.divf %99, %100 : vector<1x256xf32>
    %102 = arith.mulf %96, %96 : vector<1x256xf32>
    %103 = arith.subf %101, %102 : vector<1x256xf32>
    %cst_46 = arith.constant 0.000000e+00 : f32
    %104 = vector.broadcast %cst_46 : f32 to vector<1x256xf32>
    %105 = arith.maximumf %103, %104 : vector<1x256xf32>
    %cst_47 = arith.constant 9.99999974E-6 : f32
    %106 = vector.broadcast %cst_47 : f32 to vector<1x256xf32>
    %107 = arith.addf %105, %106 : vector<1x256xf32>
    %108 = math.rsqrt %107 : vector<1x256xf32>
    %109 = arith.mulf %91, %108 : vector<1x256xf32>
    %c0_48 = arith.constant 0 : index
    %c0_49 = arith.constant 0 : index
    %110 = vector.load %arg9[%c0_48, %c0_49] : memref<256x256xbf16, #tpu.memory_space<vmem>>, vector<256x256xbf16>
    %111 = arith.truncf %92 : vector<1x256xf32> to vector<1x256xbf16>
    %cst_50 = arith.constant dense<0.000000e+00> : vector<1x256xf32>
    %112 = tpu.matmul %111, %110, %cst_50 {dimension_numbers = #tpu.dot_dimension_numbers<[1], [0], [0], [1], [0, 0, 1, 1], [], []>} : vector<1x256xbf16>, vector<256x256xbf16>, vector<1x256xf32> -> vector<1x256xf32>
    %c0_51 = arith.constant 0 : index
    %c0_52 = arith.constant 0 : index
    %113 = vector.load %arg10[%c0_51, %c0_52] : memref<1x256xf32, #tpu.memory_space<vmem>>, vector<1x256xf32>
    %114 = arith.addf %112, %113 : vector<1x256xf32>
    %115 = vector.broadcast %96 : vector<1x256xf32> to vector<256x256xf32>
    %116 = arith.subf %88, %115 : vector<256x256xf32>
    %117 = vector.broadcast %109 : vector<1x256xf32> to vector<256x256xf32>
    %118 = arith.mulf %116, %117 : vector<256x256xf32>
    %119 = arith.truncf %118 : vector<256x256xf32> to vector<256x256xbf16>
    %cst_53 = arith.constant dense<0.000000e+00> : vector<256x256xf32>
    %120 = tpu.matmul %119, %110, %cst_53 {dimension_numbers = #tpu.dot_dimension_numbers<[1], [0], [0], [1], [0, 0, 1, 1], [], []>} : vector<256x256xbf16>, vector<256x256xbf16>, vector<256x256xf32> -> vector<256x256xf32>
    %121 = vector.broadcast %114 : vector<1x256xf32> to vector<256x256xf32>
    %122 = arith.addf %120, %121 : vector<256x256xf32>
    %cst_54 = arith.constant 5.000000e-01 : f32
    %123 = vector.broadcast %cst_54 : f32 to vector<256x256xf32>
    %124 = arith.mulf %123, %122 : vector<256x256xf32>
    %125 = math.tanh %124 : vector<256x256xf32>
    %cst_55 = arith.constant 5.000000e-01 : f32
    %126 = vector.broadcast %cst_55 : f32 to vector<256x256xf32>
    %127 = arith.mulf %126, %125 : vector<256x256xf32>
    %cst_56 = arith.constant 5.000000e-01 : f32
    %128 = vector.broadcast %cst_56 : f32 to vector<256x256xf32>
    %129 = arith.addf %127, %128 : vector<256x256xf32>
    %c0_57 = arith.constant 0 : index
    %c0_58 = arith.constant 0 : index
    %c0_59 = arith.constant 0 : index
    %130 = vector.load %arg11[%c0_57, %c0_58, %c0_59] : memref<1x2x256xf32, #tpu.memory_space<vmem>>, vector<1x2x256xf32>
    %131 = vector.shape_cast %130 : vector<1x2x256xf32> to vector<2x256xf32>
    %132 = vector.extract_strided_slice %131 {offsets = [0, 0], sizes = [1, 256], strides = [1, 1]} : vector<2x256xf32> to vector<1x256xf32>
    %133 = vector.extract_strided_slice %131 {offsets = [1, 0], sizes = [1, 256], strides = [1, 1]} : vector<2x256xf32> to vector<1x256xf32>
    %cst_60 = arith.constant dense<0.000000e+00> : vector<256xf32>
    %134 = vector.multi_reduction <add>, %129, %cst_60 [0] : vector<256x256xf32> to vector<256xf32>
    %135 = vector.shape_cast %134 : vector<256xf32> to vector<1x256xf32>
    %cst_61 = arith.constant 2.560000e+02 : f32
    %136 = vector.broadcast %cst_61 : f32 to vector<1x256xf32>
    %137 = arith.divf %135, %136 : vector<1x256xf32>
    %138 = arith.mulf %129, %129 : vector<256x256xf32>
    %cst_62 = arith.constant dense<0.000000e+00> : vector<256xf32>
    %139 = vector.multi_reduction <add>, %138, %cst_62 [0] : vector<256x256xf32> to vector<256xf32>
    %140 = vector.shape_cast %139 : vector<256xf32> to vector<1x256xf32>
    %cst_63 = arith.constant 2.560000e+02 : f32
    %141 = vector.broadcast %cst_63 : f32 to vector<1x256xf32>
    %142 = arith.divf %140, %141 : vector<1x256xf32>
    %143 = arith.mulf %137, %137 : vector<1x256xf32>
    %144 = arith.subf %142, %143 : vector<1x256xf32>
    %cst_64 = arith.constant 0.000000e+00 : f32
    %145 = vector.broadcast %cst_64 : f32 to vector<1x256xf32>
    %146 = arith.maximumf %144, %145 : vector<1x256xf32>
    %cst_65 = arith.constant 9.99999974E-6 : f32
    %147 = vector.broadcast %cst_65 : f32 to vector<1x256xf32>
    %148 = arith.addf %146, %147 : vector<1x256xf32>
    %149 = math.rsqrt %148 : vector<1x256xf32>
    %150 = arith.mulf %132, %149 : vector<1x256xf32>
    %c0_66 = arith.constant 0 : index
    %c0_67 = arith.constant 0 : index
    %151 = vector.load %arg12[%c0_66, %c0_67] : memref<256x256xbf16, #tpu.memory_space<vmem>>, vector<256x256xbf16>
    %152 = arith.truncf %133 : vector<1x256xf32> to vector<1x256xbf16>
    %cst_68 = arith.constant dense<0.000000e+00> : vector<1x256xf32>
    %153 = tpu.matmul %152, %151, %cst_68 {dimension_numbers = #tpu.dot_dimension_numbers<[1], [0], [0], [1], [0, 0, 1, 1], [], []>} : vector<1x256xbf16>, vector<256x256xbf16>, vector<1x256xf32> -> vector<1x256xf32>
    %c0_69 = arith.constant 0 : index
    %c0_70 = arith.constant 0 : index
    %154 = vector.load %arg13[%c0_69, %c0_70] : memref<1x256xf32, #tpu.memory_space<vmem>>, vector<1x256xf32>
    %155 = arith.addf %153, %154 : vector<1x256xf32>
    %156 = vector.broadcast %137 : vector<1x256xf32> to vector<256x256xf32>
    %157 = arith.subf %129, %156 : vector<256x256xf32>
    %158 = vector.broadcast %150 : vector<1x256xf32> to vector<256x256xf32>
    %159 = arith.mulf %157, %158 : vector<256x256xf32>
    %160 = arith.truncf %159 : vector<256x256xf32> to vector<256x256xbf16>
    %cst_71 = arith.constant dense<0.000000e+00> : vector<256x256xf32>
    %161 = tpu.matmul %160, %151, %cst_71 {dimension_numbers = #tpu.dot_dimension_numbers<[1], [0], [0], [1], [0, 0, 1, 1], [], []>} : vector<256x256xbf16>, vector<256x256xbf16>, vector<256x256xf32> -> vector<256x256xf32>
    %162 = vector.broadcast %155 : vector<1x256xf32> to vector<256x256xf32>
    %163 = arith.addf %161, %162 : vector<256x256xf32>
    %cst_72 = arith.constant 5.000000e-01 : f32
    %164 = vector.broadcast %cst_72 : f32 to vector<256x256xf32>
    %165 = arith.mulf %164, %163 : vector<256x256xf32>
    %166 = math.tanh %165 : vector<256x256xf32>
    %cst_73 = arith.constant 5.000000e-01 : f32
    %167 = vector.broadcast %cst_73 : f32 to vector<256x256xf32>
    %168 = arith.mulf %167, %166 : vector<256x256xf32>
    %cst_74 = arith.constant 5.000000e-01 : f32
    %169 = vector.broadcast %cst_74 : f32 to vector<256x256xf32>
    %170 = arith.addf %168, %169 : vector<256x256xf32>
    %c0_75 = arith.constant 0 : index
    %c0_76 = arith.constant 0 : index
    %c0_77 = arith.constant 0 : index
    %171 = vector.load %arg14[%c0_75, %c0_76, %c0_77] : memref<1x2x256xf32, #tpu.memory_space<vmem>>, vector<1x2x256xf32>
    %172 = vector.shape_cast %171 : vector<1x2x256xf32> to vector<2x256xf32>
    %173 = vector.extract_strided_slice %172 {offsets = [0, 0], sizes = [1, 256], strides = [1, 1]} : vector<2x256xf32> to vector<1x256xf32>
    %174 = vector.extract_strided_slice %172 {offsets = [1, 0], sizes = [1, 256], strides = [1, 1]} : vector<2x256xf32> to vector<1x256xf32>
    %cst_78 = arith.constant dense<0.000000e+00> : vector<256xf32>
    %175 = vector.multi_reduction <add>, %170, %cst_78 [0] : vector<256x256xf32> to vector<256xf32>
    %176 = vector.shape_cast %175 : vector<256xf32> to vector<1x256xf32>
    %cst_79 = arith.constant 2.560000e+02 : f32
    %177 = vector.broadcast %cst_79 : f32 to vector<1x256xf32>
    %178 = arith.divf %176, %177 : vector<1x256xf32>
    %179 = arith.mulf %170, %170 : vector<256x256xf32>
    %cst_80 = arith.constant dense<0.000000e+00> : vector<256xf32>
    %180 = vector.multi_reduction <add>, %179, %cst_80 [0] : vector<256x256xf32> to vector<256xf32>
    %181 = vector.shape_cast %180 : vector<256xf32> to vector<1x256xf32>
    %cst_81 = arith.constant 2.560000e+02 : f32
    %182 = vector.broadcast %cst_81 : f32 to vector<1x256xf32>
    %183 = arith.divf %181, %182 : vector<1x256xf32>
    %184 = arith.mulf %178, %178 : vector<1x256xf32>
    %185 = arith.subf %183, %184 : vector<1x256xf32>
    %cst_82 = arith.constant 0.000000e+00 : f32
    %186 = vector.broadcast %cst_82 : f32 to vector<1x256xf32>
    %187 = arith.maximumf %185, %186 : vector<1x256xf32>
    %cst_83 = arith.constant 9.99999974E-6 : f32
    %188 = vector.broadcast %cst_83 : f32 to vector<1x256xf32>
    %189 = arith.addf %187, %188 : vector<1x256xf32>
    %190 = math.rsqrt %189 : vector<1x256xf32>
    %191 = arith.mulf %173, %190 : vector<1x256xf32>
    %c0_84 = arith.constant 0 : index
    %c0_85 = arith.constant 0 : index
    %192 = vector.load %arg15[%c0_84, %c0_85] : memref<256x3xbf16, #tpu.memory_space<vmem>>, vector<256x3xbf16>
    %193 = arith.truncf %174 : vector<1x256xf32> to vector<1x256xbf16>
    %cst_86 = arith.constant dense<0.000000e+00> : vector<1x3xf32>
    %194 = tpu.matmul %193, %192, %cst_86 {dimension_numbers = #tpu.dot_dimension_numbers<[1], [0], [0], [1], [0, 0, 1, 1], [], []>} : vector<1x256xbf16>, vector<256x3xbf16>, vector<1x3xf32> -> vector<1x3xf32>
    %c0_87 = arith.constant 0 : index
    %c0_88 = arith.constant 0 : index
    %195 = vector.load %arg16[%c0_87, %c0_88] : memref<1x3xf32, #tpu.memory_space<vmem>>, vector<1x3xf32>
    %196 = arith.addf %194, %195 : vector<1x3xf32>
    %197 = vector.broadcast %178 : vector<1x256xf32> to vector<256x256xf32>
    %198 = arith.subf %170, %197 : vector<256x256xf32>
    %199 = vector.broadcast %191 : vector<1x256xf32> to vector<256x256xf32>
    %200 = arith.mulf %198, %199 : vector<256x256xf32>
    %201 = arith.truncf %200 : vector<256x256xf32> to vector<256x256xbf16>
    %cst_89 = arith.constant dense<0.000000e+00> : vector<256x3xf32>
    %202 = tpu.matmul %201, %192, %cst_89 {dimension_numbers = #tpu.dot_dimension_numbers<[1], [0], [0], [1], [0, 0, 1, 1], [], []>} : vector<256x256xbf16>, vector<256x3xbf16>, vector<256x3xf32> -> vector<256x3xf32>
    %203 = vector.broadcast %196 : vector<1x3xf32> to vector<256x3xf32>
    %204 = arith.addf %202, %203 : vector<256x3xf32>
    %cst_90 = arith.constant 5.000000e-01 : f32
    %205 = vector.broadcast %cst_90 : f32 to vector<256x3xf32>
    %206 = arith.mulf %205, %204 : vector<256x3xf32>
    %207 = math.tanh %206 : vector<256x3xf32>
    %cst_91 = arith.constant 5.000000e-01 : f32
    %208 = vector.broadcast %cst_91 : f32 to vector<256x3xf32>
    %209 = arith.mulf %208, %207 : vector<256x3xf32>
    %cst_92 = arith.constant 5.000000e-01 : f32
    %210 = vector.broadcast %cst_92 : f32 to vector<256x3xf32>
    %211 = arith.addf %209, %210 : vector<256x3xf32>
    %cst_93 = arith.constant 0.000000e+00 : f32
    %212 = vector.broadcast %cst_93 : f32 to vector<256x3xf32>
    %213 = arith.subf %212, %211 : vector<256x3xf32>
    %cst_94 = arith.constant 9.99999996E-13 : f32
    %214 = vector.broadcast %cst_94 : f32 to vector<256x3xf32>
    %215 = arith.subf %213, %214 : vector<256x3xf32>
    %216 = math.exp %215 : vector<256x3xf32>
    %c0_95 = arith.constant 0 : index
    %c0_96 = arith.constant 0 : index
    %c0_97 = arith.constant 0 : index
    %217 = vector.load %arg17[%c0_95, %c0_96, %c0_97] : memref<1x256x3xf32, #tpu.memory_space<vmem>>, vector<1x256x3xf32>
    %218 = vector.shape_cast %217 : vector<1x256x3xf32> to vector<256x3xf32>
    %219 = vector.shape_cast %216 : vector<256x3xf32> to vector<1x256x3xf32>
    tpu.vector_store %arg17[%c0_95, %c0_96, %c0_97], %219 {strides = array<i32>} : memref<1x256x3xf32, #tpu.memory_space<vmem>>, vector<1x256x3xf32>,
    return
  }
  func.func @transform_0(%arg0: i32) -> (i32, i32, i32) {
    %c0_i32 = arith.constant 0 : i32
    %c0_i32_0 = arith.constant 0 : i32
    %c0_i32_1 = arith.constant 0 : i32
    return %arg0, %c0_i32, %c0_i32_0 : i32, i32, i32
  }
  func.func @transform_1(%arg0: i32) -> (i32, i32, i32) {
    %c0_i32 = arith.constant 0 : i32
    %c0_i32_0 = arith.constant 0 : i32
    %c0_i32_1 = arith.constant 0 : i32
    return %arg0, %c0_i32, %c0_i32_0 : i32, i32, i32
  }
  func.func @transform_2(%arg0: i32) -> (i32, i32) {
    %c0_i32 = arith.constant 0 : i32
    %c0_i32_0 = arith.constant 0 : i32
    %c0_i32_1 = arith.constant 0 : i32
    return %c0_i32, %c0_i32_0 : i32, i32
  }
  func.func @transform_3(%arg0: i32) -> (i32, i32) {
    %c0_i32 = arith.constant 0 : i32
    %c0_i32_0 = arith.constant 0 : i32
    %c0_i32_1 = arith.constant 0 : i32
    return %c0_i32, %c0_i32_0 : i32, i32
  }
  func.func @transform_4(%arg0: i32) -> (i32, i32, i32) {
    %c0_i32 = arith.constant 0 : i32
    %c0_i32_0 = arith.constant 0 : i32
    %c0_i32_1 = arith.constant 0 : i32
    return %arg0, %c0_i32, %c0_i32_0 : i32, i32, i32
  }
  func.func @transform_5(%arg0: i32) -> (i32, i32) {
    %c0_i32 = arith.constant 0 : i32
    %c0_i32_0 = arith.constant 0 : i32
    %c0_i32_1 = arith.constant 0 : i32
    return %c0_i32, %c0_i32_0 : i32, i32
  }
  func.func @transform_6(%arg0: i32) -> (i32, i32) {
    %c0_i32 = arith.constant 0 : i32
    %c0_i32_0 = arith.constant 0 : i32
    %c0_i32_1 = arith.constant 0 : i32
    return %c0_i32, %c0_i32_0 : i32, i32
  }
  func.func @transform_7(%arg0: i32) -> (i32, i32, i32) {
    %c0_i32 = arith.constant 0 : i32
    %c0_i32_0 = arith.constant 0 : i32
    %c0_i32_1 = arith.constant 0 : i32
    return %arg0, %c0_i32, %c0_i32_0 : i32, i32, i32
  }
  func.func @transform_8(%arg0: i32) -> (i32, i32) {
    %c0_i32 = arith.constant 0 : i32
    %c0_i32_0 = arith.constant 0 : i32
    %c0_i32_1 = arith.constant 0 : i32
    return %c0_i32, %c0_i32_0 : i32, i32
  }
  func.func @transform_9(%arg0: i32) -> (i32, i32) {
    %c0_i32 = arith.constant 0 : i32
    %c0_i32_0 = arith.constant 0 : i32
    %c0_i32_1 = arith.constant 0 : i32
    return %c0_i32, %c0_i32_0 : i32, i32
  }
  func.func @transform_10(%arg0: i32) -> (i32, i32, i32) {
    %c0_i32 = arith.constant 0 : i32
    %c0_i32_0 = arith.constant 0 : i32
    %c0_i32_1 = arith.constant 0 : i32
    return %arg0, %c0_i32, %c0_i32_0 : i32, i32, i32
  }
  func.func @transform_11(%arg0: i32) -> (i32, i32) {
    %c0_i32 = arith.constant 0 : i32
    %c0_i32_0 = arith.constant 0 : i32
    %c0_i32_1 = arith.constant 0 : i32
    return %c0_i32, %c0_i32_0 : i32, i32
  }
  func.func @transform_12(%arg0: i32) -> (i32, i32) {
    %c0_i32 = arith.constant 0 : i32
    %c0_i32_0 = arith.constant 0 : i32
    %c0_i32_1 = arith.constant 0 : i32
    return %c0_i32, %c0_i32_0 : i32, i32
  }
  func.func @transform_13(%arg0: i32) -> (i32, i32, i32) {
    %c0_i32 = arith.constant 0 : i32
    %c0_i32_0 = arith.constant 0 : i32
    %c0_i32_1 = arith.constant 0 : i32
    return %arg0, %c0_i32, %c0_i32_0 : i32, i32, i32
  }
  func.func @transform_14(%arg0: i32) -> (i32, i32) {
    %c0_i32 = arith.constant 0 : i32
    %c0_i32_0 = arith.constant 0 : i32
    %c0_i32_1 = arith.constant 0 : i32
    return %c0_i32, %c0_i32_0 : i32, i32
  }
  func.func @transform_15(%arg0: i32) -> (i32, i32) {
    %c0_i32 = arith.constant 0 : i32
    %c0_i32_0 = arith.constant 0 : i32
    %c0_i32_1 = arith.constant 0 : i32
    return %c0_i32, %c0_i32_0 : i32, i32
  }
  func.func @transform_16(%arg0: i32) -> (i32, i32, i32) {
    %c0_i32 = arith.constant 0 : i32
    %c0_i32_0 = arith.constant 0 : i32
    %c0_i32_1 = arith.constant 0 : i32
    return %arg0, %c0_i32, %c0_i32_0 : i32, i32, i32
  }
}

</mosaic_0001>

<bundles_post_ra>
// kernel: sbnet_forward.1
= control target key start
LH: loop header
LB: loop body
LE: loop exit
PB: predicated region body
PF: predicated region fallthrough
CT: control target
= control target key end

     0   :  { %s8168_s21 = smov 0   ;;  %s14361_s0 = inlined_call_operand.vmem [shape: f32[2,256,3], index: 0, kind: input, shape index: {}]   ;;  %s14362_s1 = inlined_call_operand.vmem [shape: f32[2,2,3], index: 1, kind: input, shape index: {}]   ;;  %s14363_s2 = inlined_call_operand.vmem [shape: bf16[3,256], index: 2, kind: input, shape index: {}]   ;;  %s14364_s3 = inlined_call_operand.vmem [shape: f32[1,256], index: 3, kind: input, shape index: {}]   ;;  %s14365_s4 = inlined_call_operand.vmem [shape: f32[2,2,256], index: 4, kind: input, shape index: {}]   ;;  %s14366_s5 = inlined_call_operand.vmem [shape: bf16[256,256], index: 5, kind: input, shape index: {}]   ;;  %s14367_s6 = inlined_call_operand.vmem [shape: f32[1,256], index: 6, kind: input, shape index: {}]   ;;  %s14368_s7 = inlined_call_operand.vmem [shape: f32[2,2,256], index: 7, kind: input, shape index: {}]   ;;  %s14369_s8 = inlined_call_operand.vmem [shape: bf16[256,256], index: 8, kind: input, shape index: {}]   ;;  %s14370_s9 = inlined_call_operand.vmem [shape: f32[1,256], index: 9, kind: input, shape index: {}]   ;;  %s14371_s10 = inlined_call_operand.vmem [shape: f32[2,2,256], index: 10, kind: input, shape index: {}]   ;;  %s14372_s11 = inlined_call_operand.vmem [shape: bf16[256,256], index: 11, kind: input, shape index: {}]   ;;  %s14373_s12 = inlined_call_operand.vmem [shape: f32[1,256], index: 12, kind: input, shape index: {}]   ;;  %s14374_s13 = inlined_call_operand.vmem [shape: f32[2,2,256], index: 13, kind: input, shape index: {}]   ;;  %s14375_s14 = inlined_call_operand.vmem [shape: bf16[256,3], index: 14, kind: input, shape index: {}]   ;;  %s14376_s15 = inlined_call_operand.vmem [shape: f32[1,3], index: 15, kind: input, shape index: {}]   ;;  %s14377_s16 = inlined_call_operand.vmem [shape: f32[2,256,3], index: 16, kind: output, shape index: {}]  }
   0x1   :  { %14712 = sst [smem:[#allocation58_spill]] %s14361_s0 }
   0x2 LB: > { %s6661_s22 = sadd.s32 4294967295, %s8079_s21   ;;  %p6665_p0 = scmp.ge.s32.totalorder %s8079_s21, 1  ;;  %s8079_s21 = sphi %s8168_s21, %s26_s21  }
   0x3   : > { %p511_p1 = scmp.lt.s32.totalorder %s8079_s21, 3 }
   0x5   : > { %p512_p2 = pnand %p6665_p0, %p511_p1 }
   0x7   : > { %515 = sbr.rel (%p512_p2) target bundleno = 2511 (0x9cf), region = 84 }
   0xc   : > { %v976_v0 = vld [vmem:[%s14363_s2] sm:$0xf]  ;;  %vm994_vm0 = vcmask 1040384   ;;  %p585_p3 = scmp.lt.s32.totalorder %s6661_s22, 1  ;;  %vm995_vm1 = vcmask 1041408   ;;  %v8081_v1 = vmov 65535  }
   0xd   : > { %983 = vst [vmem:[#allocation1] ss:$4 sm:$0xff] %v976_v0  ;;  %v996_v2 = vsel %vm994_vm0, 4294967295, %v8081_v1  ;;  %s14713_s28 = sld [smem:[#allocation58_spill]]  ;;  %vm781_vm2 = vcmask 23552  }
   0xe   : > { %s15394_s22 = smov (!%p585_p3, %s6661_s22), 1  ;;  %v8182_v3 = vsel %vm995_vm1, %v996_v2, 0 }
   0xf   : > { %s7195_s25 = sshll.u32 %s15394_s22, 8  ;;  %s6668_s30 = sshll.u32 %s15394_s22, 1 }
  0x10   : > { %s593_s18 = scalar_lea.vmem %s14362_s1, %s6668_s30  ;;  %s9329_s17 = sshll.u32 %s15394_s22, 2 }
  0x11   : > { %s598_s0 = scalar_lea.vmem %s14365_s4, %s9329_s17  ;;  %s608_s19 = scalar_lea.vmem %s14371_s10, %s9329_s17 }
  0x13   : > { %s8193_s29 = scalar_lea.vmem %s14713_s28, %s7195_s25 }
  0x14   : > { %v8184_v4 = vld.sshfl [vmem:[#allocation1] sm:$0xff pattern:$0x73625140]  ;;  %v985_v5 = vld.sshfl [vmem:[#allocation1 + $0x8] sm:$0xff pattern:$0x73625140] }
  0x15   : > { %1111 = vst [vmem:[#allocation1] ss:$4 sm:$0xff] %v976_v0  ;;  %v1000_v6 = vand.u32 %v8182_v3, %v985_v5  ;;  %v620_v7 = vld [vmem:[%s8193_s29] sm:$0xff]  ;;  %v621_v8 = vld [vmem:[%s8193_s29 + $0x8] sm:$0xff]  ;;  %v622_v13 = vld [vmem:[%s8193_s29 + $0x10] sm:$0xff] }
  0x16   : > { %v652_v14 = vadd.f32 1e-12, %v620_v7  ;;  %v623_v15 = vld [vmem:[%s8193_s29 + $0x18] sm:$0xff]  ;;  %v653_v16 = vadd.f32 1e-12, %v621_v8  ;;  %v624_v17 = vld [vmem:[%s8193_s29 + $0x20] sm:$0xff] }
  0x17   : > { %1022 = vmatpush.bf16.msra.mxu1 %v1000_v6  ;;  %v654_v18 = vadd.f32 1e-12, %v622_v13  ;;  %v625_v19 = vld [vmem:[%s8193_s29 + $0x28] sm:$0xff]  ;;  %v655_v20 = vadd.f32 1e-12, %v623_v15  ;;  %v626_v22 = vld [vmem:[%s8193_s29 + $0x30] sm:$0xff] }
  0x18   : > { %7339 = vlog2.f32 %v652_v14  ;;  %v656_v21 = vadd.f32 1e-12, %v624_v17  ;;  %v657_v23 = vadd.f32 1e-12, %v625_v19  ;;  %v627_v24 = vld [vmem:[%s8193_s29 + $0x38] sm:$0xff]  ;;  %v628_v27 = vld [vmem:[%s8193_s29 + $0x40] sm:$0xff] }
  0x19   : > { %7341 = vlog2.f32 %v653_v16  ;;  %v658_v25 = vadd.f32 1e-12, %v626_v22  ;;  %v659_v29 = vadd.f32 1e-12, %v627_v24  ;;  %v629_v30 = vld [vmem:[%s8193_s29 + $0x48] sm:$0xff]  ;;  %v630_v35 = vld [vmem:[%s8193_s29 + $0x50] sm:$0xff] }
  0x1a   : > { %7343 = vlog2.f32 %v654_v18  ;;  %v660_v32 = vadd.f32 1e-12, %v628_v27  ;;  %v661_v38 = vadd.f32 1e-12, %v629_v30  ;;  %v631_v39 = vld [vmem:[%s8193_s29 + $0x58] sm:$0xff]  ;;  %v632_v42 = vld [vmem:[%s8193_s29 + $0x60] sm:$0xff] }
  0x1b   : > { %7345 = vlog2.f32 %v655_v20  ;;  %v662_v43 = vadd.f32 1e-12, %v630_v35  ;;  %v633_v45 = vld [vmem:[%s8193_s29 + $0x68] sm:$0xff]  ;;  %v663_v50 = vadd.f32 1e-12, %v631_v39  ;;  %v634_v55 = vld [vmem:[%s8193_s29 + $0x70] sm:$0xff] }
  0x1c   : > { %v1112_v9 = vld.sshfl [vmem:[#allocation1] sm:$0xff pattern:$0x73625140]  ;;  %v1113_v10 = vld.sshfl [vmem:[#allocation1 + $0x8] sm:$0xff pattern:$0x73625140]  ;;  %7347 = vlog2.f32 %v656_v21 }
  0x1d   : > { %v1162_v11 = vand.u32 %v1112_v9, %v8182_v3  ;;  %v1164_v12 = vand.u32 %v1113_v10, %v8182_v3  ;;  %7349 = vlog2.f32 %v657_v23  ;;  %v664_v51 = vadd.f32 1e-12, %v632_v42  ;;  %v635_v58 = vld [vmem:[%s8193_s29 + $0x78] sm:$0xff]  ;;  %v636_v7 = vld [vmem:[%s8193_s29 + $0x80] sm:$0xff]  ;;  %v638_v18 = vld [vmem:[%s8193_s29 + $0x90] sm:$0xff] }
  0x1e   : > { %v7340_v26 = vpop.eup %7339  ;;  %7351 = vlog2.f32 %v658_v25  ;;  %v665_v56 = vadd.f32 1e-12, %v633_v45  ;;  %v666_v8 = vadd.f32 1e-12, %v634_v55  ;;  %v667_v9 = vadd.f32 1e-12, %v635_v58 }
  0x1f   : > { %1173 = vmatpush.bf16.msra.mxu2 %v1162_v11  ;;  %1262 = vmatpush.bf16.msra.mxu3 %v1164_v12  ;;  %v7342_v28 = vpop.eup %7341  ;;  %v685_v33 = vmul.f32 0.6931472, %v7340_v26  ;;  %7353 = vlog2.f32 %v659_v29  ;;  %v637_v11 = vld [vmem:[%s8193_s29 + $0x88] sm:$0xff]  ;;  %v639_v23 = vld [vmem:[%s8193_s29 + $0x98] sm:$0xff]  ;;  %v668_v24 = vadd.f32 1e-12, %v636_v7 }
  0x20   : > { %v7344_v31 = vpop.eup %7343  ;;  %v687_v36 = vmul.f32 0.6931472, %v7342_v28  ;;  %7355 = vlog2.f32 %v660_v32  ;;  %v669_v25 = vadd.f32 1e-12, %v637_v11  ;;  %v640_v28 = vld [vmem:[%s8193_s29 + $0xa0] sm:$0xff]  ;;  %v641_v29 = vld [vmem:[%s8193_s29 + $0xa8] sm:$0xff] }
  0x21   : > { %v7346_v34 = vpop.eup %7345  ;;  %v689_v40 = vmul.f32 0.6931472, %v7344_v31  ;;  %v8210_v44 = vsub.f32 0.0, %v685_v33  ;;  %7357 = vlog2.f32 %v661_v38  ;;  %v643_v35 = vld [vmem:[%s8193_s29 + $0xb8] sm:$0xff]  ;;  %v671_v39 = vadd.f32 1e-12, %v639_v23 }
  0x22   : > { %v7348_v37 = vpop.eup %7347  ;;  %v691_v46 = vmul.f32 0.6931472, %v7346_v34  ;;  %v8213_v48 = vsub.f32 0.0, %v687_v36  ;;  %7359 = vlog2.f32 %v662_v43  ;;  %v642_v34 = vld [vmem:[%s8193_s29 + $0xb0] sm:$0xff]  ;;  %v644_v36 = vld [vmem:[%s8193_s29 + $0xc0] sm:$0xff]  ;;  %v645_v43 = vld [vmem:[%s8193_s29 + $0xc8] sm:$0xff] }
  0x23   : > { %v7350_v41 = vpop.eup %7349  ;;  %v693_v47 = vmul.f32 0.6931472, %v7348_v37  ;;  %v8215_v53 = vsub.f32 0.0, %v689_v40  ;;  %v782_v57 = vsel %vm781_vm2, %v8210_v44, 0.0  ;;  %7361 = vlog2.f32 %v663_v50  ;;  %v646_v45 = vld [vmem:[%s8193_s29 + $0xd0] sm:$0xff]  ;;  %v647_v50 = vld [vmem:[%s8193_s29 + $0xd8] sm:$0xff] }
  0x24   : > { %v7352_v49 = vpop.eup %7351  ;;  %v695_v52 = vmul.f32 0.6931472, %v7350_v41  ;;  %v8221_v60 = vsub.f32 0.0, %v691_v46  ;;  %v783_v62 = vsel %vm781_vm2, %v8213_v48, 0.0  ;;  %7363 = vlog2.f32 %v664_v51  ;;  %v648_v51 = vld [vmem:[%s8193_s29 + $0xe0] sm:$0xff]  ;;  %v649_v7 = vld [vmem:[%s8193_s29 + $0xe8] sm:$0xff] }
  0x25   : > { %v7354_v54 = vpop.eup %7353  ;;  %v697_v59 = vmul.f32 0.6931472, %v7352_v49  ;;  %v8223_v61 = vsub.f32 0.0, %v693_v47  ;;  %v784_v0 = vadd.f32 %v783_v62, %v782_v57  ;;  %v785_v5 = vsel %vm781_vm2, %v8215_v53, 0.0 }
  0x26   : > { %v7356_v63 = vpop.eup %7355  ;;  %v699_v1 = vmul.f32 0.6931472, %v7354_v54  ;;  %v8227_v2 = vsub.f32 0.0, %v695_v52  ;;  %7365 = vlog2.f32 %v665_v56  ;;  %v787_v14 = vsel %vm781_vm2, %v8221_v60, 0.0 }
  0x27   : > { %v7358_v6 = vpop.eup %7357  ;;  %v786_v10 = vadd.f32 %v785_v5, %v784_v0  ;;  %v701_v12 = vmul.f32 0.6931472, %v7356_v63  ;;  %v8233_v13 = vsub.f32 0.0, %v697_v59  ;;  %v789_v15 = vsel %vm781_vm2, %v8223_v61, 0.0 }
  0x28   : > { %v7360_v16 = vpop.eup %7359  ;;  %v703_v19 = vmul.f32 0.6931472, %v7358_v6  ;;  %v8240_v20 = vsub.f32 0.0, %v699_v1  ;;  %v791_v21 = vsel %vm781_vm2, %v8227_v2, 0.0  ;;  %7367 = vlog2.f32 %v666_v8  ;;  %v650_v8 = vld [vmem:[%s8193_s29 + $0xf0] sm:$0xff] }
  0x29   : > { %v788_v17 = vadd.f32 %v787_v14, %v786_v10  ;;  %v7362_v22 = vpop.eup %7361  ;;  %v705_v30 = vmul.f32 0.6931472, %v7360_v16  ;;  %7369 = vlog2.f32 %v667_v9  ;;  %v8247_v31 = vsub.f32 0.0, %v701_v12 }
  0x2a   : > { %v7364_v27 = vpop.eup %7363  ;;  %v793_v32 = vsel %vm781_vm2, %v8233_v13, 0.0  ;;  %v670_v37 = vadd.f32 1e-12, %v638_v18  ;;  %v707_v40 = vmul.f32 0.6931472, %v7362_v22  ;;  %v8254_v41 = vsub.f32 0.0, %v703_v19 }
  0x2b   : > { %v790_v26 = vadd.f32 %v789_v15, %v788_v17  ;;  %v795_v42 = vsel %vm781_vm2, %v8240_v20, 0.0  ;;  %v672_v46 = vadd.f32 1e-12, %v640_v28  ;;  %v673_v47 = vadd.f32 1e-12, %v641_v29 }
  0x2c   : > { %v7366_v33 = vpop.eup %7365  ;;  %7371 = vlog2.f32 %v668_v24  ;;  %v709_v52 = vmul.f32 0.6931472, %v7364_v27  ;;  %v8262_v54 = vsub.f32 0.0, %v705_v30  ;;  %v797_v55 = vsel %vm781_vm2, %v8247_v31, 0.0 }
  0x2d   : > { %v792_v38 = vadd.f32 %v791_v21, %v790_v26  ;;  %7373 = vlog2.f32 %v669_v25  ;;  %v674_v57 = vadd.f32 1e-12, %v642_v34  ;;  %v675_v58 = vadd.f32 1e-12, %v643_v35 }
  0x2e   : > { %v7368_v56 = vpop.eup %7367  ;;  %v711_v59 = vmul.f32 0.6931472, %v7366_v33  ;;  %v676_v0 = vadd.f32 1e-12, %v644_v36  ;;  %v8266_v1 = vadd.f32 1e-12, %v645_v43  ;;  %7375 = vlog2.f32 %v670_v37 }
  0x2f   : > { %v794_v49 = vadd.f32 %v793_v32, %v792_v38  ;;  %v7370_v63 = vpop.eup %7369  ;;  %v8268_v5 = vsub.f32 0.0, %v707_v40  ;;  %v799_v6 = vsel %vm781_vm2, %v8254_v41, 0.0  ;;  %v8274_v9 = vadd.f32 1e-12, %v646_v45 }
  0x30   : > { %v8276_v10 = vadd.f32 1e-12, %v647_v50  ;;  %v8278_v12 = vadd.f32 1e-12, %v648_v51  ;;  %v713_v14 = vmul.f32 0.6931472, %v7368_v56  ;;  %7377 = vlog2.f32 %v671_v39 }
  0x31   : > { %v796_v62 = vadd.f32 %v795_v42, %v794_v49  ;;  %v8280_v15 = vsub.f32 0.0, %v709_v52  ;;  %v801_v16 = vsel %vm781_vm2, %v8262_v54, 0.0  ;;  %v715_v18 = vmul.f32 0.6931472, %v7370_v63 }
  0x32   : > { %v7372_v17 = vpop.eup %7371  ;;  %v8284_v19 = vsub.f32 0.0, %v711_v59  ;;  %v803_v23 = vsel %vm781_vm2, %v8268_v5, 0.0  ;;  %v859_v24 = vmul.f32 %v8210_v44, %v8210_v44  ;;  %v860_v25 = vmul.f32 %v8213_v48, %v8213_v48 }
  0x33   : > { %v798_v11 = vadd.f32 %v797_v55, %v796_v62  ;;  %v7374_v22 = vpop.eup %7373  ;;  %v861_v26 = vmul.f32 %v8215_v53, %v8215_v53  ;;  %v8294_v27 = vadd.f32 1e-12, %v649_v7  ;;  %v8296_v28 = vadd.f32 1e-12, %v650_v8 }
  0x34   : > { %7379 = vlog2.f32 %v672_v46  ;;  %v717_v30 = vmul.f32 0.6931472, %v7372_v17  ;;  %v8298_v32 = vsub.f32 0.0, %v713_v14  ;;  %v805_v33 = vsel %vm781_vm2, %v8280_v15, 0.0  ;;  %v7376_v34 = vpop.eup %7375  ;;  %v651_v46 = vld [vmem:[%s8193_s29 + $0xf8] sm:$0xff]  ;;  %s603_s29 = scalar_lea.vmem %s14368_s7, %s9329_s17 }
  0x35   : > { %v800_v21 = vadd.f32 %v799_v6, %v798_v11  ;;  %7381 = vlog2.f32 %v673_v47  ;;  %v719_v35 = vmul.f32 0.6931472, %v7374_v22  ;;  %v8302_v36 = vsub.f32 0.0, %v715_v18 }
  0x36   : > { %v862_v38 = vmul.f32 %v8221_v60, %v8221_v60  ;;  %v807_v39 = vsel %vm781_vm2, %v8284_v19, 0.0  ;;  %v891_v40 = vsel %vm781_vm2, %v859_v24, 0.0  ;;  %v892_v42 = vsel %vm781_vm2, %v860_v25, 0.0  ;;  %v7378_v45 = vpop.eup %7377 }
  0x37   : > { %v802_v29 = vadd.f32 %v801_v16, %v800_v21  ;;  %v894_v43 = vsel %vm781_vm2, %v861_v26, 0.0  ;;  %7383 = vlog2.f32 %v674_v57  ;;  %v863_v49 = vmul.f32 %v8223_v61, %v8223_v61 }
  0x38   : > { %v893_v50 = vadd.f32 %v892_v42, %v891_v40  ;;  %v721_v51 = vmul.f32 0.6931472, %v7376_v34  ;;  %7385 = vlog2.f32 %v675_v58  ;;  %v8314_v52 = vsub.f32 0.0, %v717_v30 }
  0x39   : > { %v804_v37 = vadd.f32 %v803_v23, %v802_v29  ;;  %v809_v55 = vsel %vm781_vm2, %v8298_v32, 0.0  ;;  %v864_v62 = vmul.f32 %v8227_v2, %v8227_v2  ;;  %v896_v57 = vsel %vm781_vm2, %v862_v38, 0.0 }
  0x3a   : > { %v7380_v56 = vpop.eup %7379  ;;  %v895_v63 = vadd.f32 %v894_v43, %v893_v50  ;;  %v8321_v7 = vadd.f32 1e-12, %v651_v46  ;;  %v723_v8 = vmul.f32 0.6931472, %v7378_v45  ;;  %v8323_v11 = vsub.f32 0.0, %v719_v35 }
  0x3b   : > { %v806_v47 = vadd.f32 %v805_v33, %v804_v37  ;;  %v7382_v6 = vpop.eup %7381  ;;  %v811_v58 = vsel %vm781_vm2, %v8302_v36, 0.0  ;;  %7387 = vlog2.f32 %v676_v0  ;;  %v865_v16 = vmul.f32 %v8233_v13, %v8233_v13 }
  0x3c   : > { %v898_v17 = vsel %vm781_vm2, %v863_v49, 0.0  ;;  %v725_v18 = vmul.f32 0.6931472, %v7380_v56  ;;  %v8330_v21 = vsub.f32 0.0, %v721_v51  ;;  %v813_v22 = vsel %vm781_vm2, %v8314_v52, 0.0 }
  0x3d   : > { %v808_v59 = vadd.f32 %v807_v39, %v806_v47  ;;  %v897_v23 = vadd.f32 %v896_v57, %v895_v63  ;;  %v7384_v24 = vpop.eup %7383  ;;  %7389 = vlog2.f32 %v8266_v1  ;;  %v866_v0 = vmul.f32 %v8240_v20, %v8240_v20 }
  0x3e   : > { %v900_v26 = vsel %vm781_vm2, %v864_v62, 0.0  ;;  %v7386_v29 = vpop.eup %7385  ;;  %v727_v30 = vmul.f32 0.6931472, %v7382_v6  ;;  %v8338_v33 = vsub.f32 0.0, %v723_v8  ;;  %v815_v34 = vsel %vm781_vm2, %v8323_v11, 0.0 }
  0x3f   : > { %v810_v14 = vadd.f32 %v809_v55, %v808_v59  ;;  %v899_v35 = vadd.f32 %v898_v17, %v897_v23  ;;  %7391 = vlog2.f32 %v8274_v9  ;;  %v867_v1 = vmul.f32 %v8247_v31, %v8247_v31 }
  0x40   : > { %v902_v38 = vsel %vm781_vm2, %v865_v16, 0.0  ;;  %v729_v39 = vmul.f32 0.6931472, %v7384_v24  ;;  %v8346_v40 = vsub.f32 0.0, %v725_v18  ;;  %v817_v42 = vsel %vm781_vm2, %v8330_v21, 0.0 }
  0x41   : > { %v812_v25 = vadd.f32 %v811_v58, %v810_v14  ;;  %v901_v43 = vadd.f32 %v900_v26, %v899_v35  ;;  %v7388_v45 = vpop.eup %7387  ;;  %7393 = vlog2.f32 %v8276_v10  ;;  %v868_v9 = vmul.f32 %v8254_v41, %v8254_v41 }
  0x42   : > { %v904_v47 = vsel %vm781_vm2, %v866_v0, 0.0  ;;  %v731_v49 = vmul.f32 0.6931472, %v7386_v29  ;;  %v8354_v50 = vsub.f32 0.0, %v727_v30  ;;  %v819_v51 = vsel %vm781_vm2, %v8338_v33, 0.0 }
  0x43   : > { %v814_v37 = vadd.f32 %v813_v22, %v812_v25  ;;  %v903_v55 = vadd.f32 %v902_v38, %v901_v43  ;;  %v7390_v56 = vpop.eup %7389  ;;  %7395 = vlog2.f32 %v8278_v12  ;;  %v869_v10 = vmul.f32 %v8262_v54, %v8262_v54 }
  0x44   : > { %v906_v62 = vsel %vm781_vm2, %v867_v1, 0.0  ;;  %v733_v63 = vmul.f32 0.6931472, %v7388_v45  ;;  %v8362_v57 = vsub.f32 0.0, %v729_v39  ;;  %v821_v6 = vsel %vm781_vm2, %v8346_v40, 0.0 }
  0x45   : > { %v816_v46 = vadd.f32 %v815_v34, %v814_v37  ;;  %v905_v8 = vadd.f32 %v904_v47, %v903_v55  ;;  %v7392_v58 = vpop.eup %7391  ;;  %7397 = vlog2.f32 %v8294_v27  ;;  %v870_v12 = vmul.f32 %v8268_v5, %v8268_v5 }
  0x46   : > { %v908_v16 = vsel %vm781_vm2, %v868_v9, 0.0  ;;  %v735_v17 = vmul.f32 0.6931472, %v7390_v56  ;;  %v8370_v18 = vsub.f32 0.0, %v731_v49  ;;  %v823_v22 = vsel %vm781_vm2, %v8354_v50, 0.0 }
  0x47   : > { %v818_v59 = vadd.f32 %v817_v42, %v816_v46  ;;  %v907_v23 = vadd.f32 %v906_v62, %v905_v8  ;;  %v7394_v24 = vpop.eup %7393  ;;  %7399 = vlog2.f32 %v8296_v28  ;;  %v871_v27 = vmul.f32 %v8280_v15, %v8280_v15 }
  0x48   : > { %v910_v0 = vsel %vm781_vm2, %v869_v10, 0.0  ;;  %v737_v26 = vmul.f32 0.6931472, %v7392_v58  ;;  %v8378_v29 = vsub.f32 0.0, %v733_v63  ;;  %v825_v30 = vsel %vm781_vm2, %v8362_v57, 0.0 }
  0x49   : > { %v820_v14 = vadd.f32 %v819_v51, %v818_v59  ;;  %v909_v34 = vadd.f32 %v908_v16, %v907_v23  ;;  %v7396_v35 = vpop.eup %7395  ;;  %v872_v1 = vmul.f32 %v8284_v19, %v8284_v19  ;;  %v912_v28 = vsel %vm781_vm2, %v870_v12, 0.0 }
  0x4a   : > { %v739_v38 = vmul.f32 0.6931472, %v7394_v24  ;;  %v8385_v39 = vsub.f32 0.0, %v735_v17  ;;  %v827_v42 = vsel %vm781_vm2, %v8370_v18, 0.0  ;;  %7401 = vlog2.f32 %v8321_v7 }
  0x4b   : > { %v822_v25 = vadd.f32 %v821_v6, %v820_v14  ;;  %v911_v43 = vadd.f32 %v910_v0, %v909_v34  ;;  %v7398_v45 = vpop.eup %7397  ;;  %v873_v9 = vmul.f32 %v8298_v32, %v8298_v32  ;;  %v914_v47 = vsel %vm781_vm2, %v871_v27, 0.0 }
  0x4c   : > { %v741_v49 = vmul.f32 0.6931472, %v7396_v35  ;;  %v8393_v51 = vsub.f32 0.0, %v737_v26  ;;  %v829_v55 = vsel %vm781_vm2, %v8378_v29, 0.0  ;;  %v874_v62 = vmul.f32 %v8302_v36, %v8302_v36 }
  0x4d   : > { %v824_v37 = vadd.f32 %v823_v22, %v822_v25  ;;  %v913_v56 = vadd.f32 %v912_v28, %v911_v43  ;;  %v7400_v59 = vpop.eup %7399  ;;  %v916_v7 = vsel %vm781_vm2, %v872_v1, 0.0  ;;  %v743_v63 = vmul.f32 0.6931472, %v7398_v45 }
  0x4e   : > { %v8400_v6 = vsub.f32 0.0, %v739_v38  ;;  %v831_v8 = vsel %vm781_vm2, %v8385_v39, 0.0  ;;  %v875_v12 = vmul.f32 %v8314_v52, %v8314_v52  ;;  %v918_v16 = vsel %vm781_vm2, %v873_v9, 0.0 }
  0x4f   : > { %v826_v46 = vadd.f32 %v825_v30, %v824_v37  ;;  %v915_v58 = vadd.f32 %v914_v47, %v913_v56  ;;  %v8407_v17 = vsub.f32 0.0, %v741_v49  ;;  %v833_v22 = vsel %vm781_vm2, %v8393_v51, 0.0 }
  0x50   : > { %v7402_v24 = vpop.eup %7401  ;;  %v745_v25 = vmul.f32 0.6931472, %v7400_v59  ;;  %v876_v0 = vmul.f32 %v8323_v11, %v8323_v11  ;;  %v920_v26 = vsel %vm781_vm2, %v874_v62, 0.0  ;;  %v8414_v30 = vsub.f32 0.0, %v743_v63 }
  0x51   : > { %v828_v10 = vadd.f32 %v827_v42, %v826_v46  ;;  %v917_v23 = vadd.f32 %v916_v7, %v915_v58  ;;  %v835_v34 = vsel %vm781_vm2, %v8400_v6, 0.0  ;;  %v877_v1 = vmul.f32 %v8330_v21, %v8330_v21 }
  0x52   : > { %v922_v28 = vsel %vm781_vm2, %v875_v12, 0.0  ;;  %v747_v38 = vmul.f32 0.6931472, %v7402_v24  ;;  %v837_v42 = vsel %vm781_vm2, %v8407_v17, 0.0  ;;  %v8423_v45 = vsub.f32 0.0, %v745_v25 }
  0x53   : > { %v830_v14 = vadd.f32 %v829_v55, %v828_v10  ;;  %v919_v35 = vadd.f32 %v918_v16, %v917_v23  ;;  %v878_v9 = vmul.f32 %v8338_v33, %v8338_v33  ;;  %v924_v47 = vsel %vm781_vm2, %v876_v0, 0.0 }
  0x54   : > { %v839_v49 = vsel %vm781_vm2, %v8414_v30, 0.0  ;;  %v879_v59 = vmul.f32 %v8346_v40, %v8346_v40  ;;  %v926_v10 = vsel %vm781_vm2, %v877_v1, 0.0  ;;  %v8433_v62 = vsub.f32 0.0, %v747_v38 }
  0x55   : > { %v832_v27 = vadd.f32 %v831_v8, %v830_v14  ;;  %v921_v43 = vadd.f32 %v920_v26, %v919_v35  ;;  %v841_v8 = vsel %vm781_vm2, %v8423_v45, 0.0  ;;  %v880_v58 = vmul.f32 %v8354_v50, %v8354_v50 }
  0x56   : > { %v928_v14 = vsel %vm781_vm2, %v878_v9, 0.0  ;;  %v881_v16 = vmul.f32 %v8362_v57, %v8362_v57  ;;  %v843_v25 = vsel %vm781_vm2, %v8433_v62, 0.0  ;;  %v8082_v1 = vmov 256.0  }
  0x57   : > { %v834_v37 = vadd.f32 %v833_v22, %v832_v27  ;;  %v923_v55 = vadd.f32 %v922_v28, %v921_v43  ;;  %v930_v22 = vsel %vm781_vm2, %v879_v59, 0.0  ;;  %v882_v27 = vmul.f32 %v8370_v18, %v8370_v18 }
  0x58   : > { %v932_v0 = vsel %vm781_vm2, %v880_v58, 0.0  ;;  %v934_v35 = vsel %vm781_vm2, %v881_v16, 0.0  ;;  %7403 = vrcp.f32 %v8082_v1  ;;  %v884_v38 = vmul.f32 %v8385_v39, %v8385_v39 }
  0x59   : > { %v836_v46 = vadd.f32 %v835_v34, %v834_v37  ;;  %v925_v7 = vadd.f32 %v924_v47, %v923_v55  ;;  %v883_v34 = vmul.f32 %v8378_v29, %v8378_v29  ;;  %v886_v55 = vmul.f32 %v8400_v6, %v8400_v6 }
  0x5b   : > { %v838_v56 = vadd.f32 %v837_v42, %v836_v46  ;;  %v927_v12 = vadd.f32 %v926_v10, %v925_v7  ;;  %v936_v42 = vsel %vm781_vm2, %v882_v27, 0.0  ;;  %v885_v46 = vmul.f32 %v8393_v51, %v8393_v51 }
  0x5c   : > { %v938_v9 = vsel %vm781_vm2, %v883_v34, 0.0  ;;  %v887_v7 = vmul.f32 %v8407_v17, %v8407_v17  ;;  %v944_v16 = vsel %vm781_vm2, %v886_v55, 0.0 }
  0x5d   : > { %v840_v63 = vadd.f32 %v839_v49, %v838_v56  ;;  %v929_v24 = vadd.f32 %v928_v14, %v927_v12  ;;  %v940_v56 = vsel %vm781_vm2, %v884_v38, 0.0  ;;  %v888_v12 = vmul.f32 %v8414_v30, %v8414_v30 }
  0x5e   : > { %v7404_v59 = vpop.eup %7403 }
  0x5f   : > { %v842_v23 = vadd.f32 %v841_v8, %v840_v63  ;;  %v931_v26 = vadd.f32 %v930_v22, %v929_v24  ;;  %v942_v63 = vsel %vm781_vm2, %v885_v46, 0.0  ;;  %v852_v14 = vmul.f32 256.0, %v7404_v59 }
  0x60   : > { %v946_v24 = vsel %vm781_vm2, %v887_v7, 0.0  ;;  %v948_v34 = vsel %vm781_vm2, %v888_v12, 0.0  ;;  %vm856_vm3 = vweird.f32 %v7404_v59 }
  0x61   : > { %v844_v37 = vadd.f32 %v843_v25, %v842_v23  ;;  %v933_v28 = vadd.f32 %v932_v0, %v931_v26  ;;  %v889_v23 = vmul.f32 %v8423_v45, %v8423_v45  ;;  %v853_v0 = vsub.f32 1.0, %v852_v14 }
  0x62   : > { %v890_v26 = vmul.f32 %v8433_v62, %v8433_v62 }
  0x63   : > { %v935_v43 = vadd.f32 %v934_v35, %v933_v28  ;;  %v845_v47 = vrot.slane %v844_v37, 4  ;;  %v854_v38 = vmul.f32 %v7404_v59, %v853_v0 }
  0x65   : > { %v937_v49 = vadd.f32 %v936_v42, %v935_v43  ;;  %v846_v8 = vadd.f32 %v845_v47, %v844_v37  ;;  %v950_v37 = vsel %vm781_vm2, %v889_v23, 0.0  ;;  %v952_v42 = vsel %vm781_vm2, %v890_v26, 0.0 }
  0x66   : > { %v855_v47 = vadd.f32 %v7404_v59, %v854_v38  ;;  %v998_v23 = vand.u32 %v8182_v3, %v8184_v4 }
  0x67   : > { %v939_v10 = vadd.f32 %v938_v9, %v937_v49  ;;  %v847_v25 = vrot.slane %v846_v8, 2 }
  0x68   : > { %1009 = vmatpush.bf16.msra.mxu0 %v998_v23 }
  0x69   : > { %v941_v58 = vadd.f32 %v940_v56, %v939_v10  ;;  %v848_v1 = vadd.f32 %v847_v25, %v846_v8  ;;  %v8474_v10 = vsel %vm856_vm3, %v7404_v59, %v855_v47 }
  0x6a   : > { %14714 = vst [vmem:[#allocation2_spill] sm:$0xff] %v8474_v10 }
  0x6b   : > { %v943_v22 = vadd.f32 %v942_v63, %v941_v58  ;;  %v849_v46 = vrot.slane %v848_v1, 1 }
  0x6d   : > { %v945_v27 = vadd.f32 %v944_v16, %v943_v22  ;;  %v850_v55 = vadd.f32 %v849_v46, %v848_v1  ;;  %v780_v16 = vld [vmem:[%s593_s18] sm:$0x3]  ;;  %s14228_s18 = scalar_lea.vmem %s14377_s16, %s7195_s25 }
  0x6e   : > { %v977_v59 = vpack.c.bf16 %v780_v16, %v780_v16 }
  0x6f   : > { %v947_v35 = vadd.f32 %v946_v24, %v945_v27  ;;  %v8478_v63 = vmul.f32 %v8474_v10, %v850_v55 }
  0x70   : > { %v980_v25 = vshrl.u32 %v977_v59, 16 }
  0x71   : > { %v949_v28 = vadd.f32 %v948_v34, %v947_v35  ;;  %v961_v12 = vmul.f32 %v8478_v63, %v8478_v63  ;;  %v1028_v38 = vsub.f32 %v8210_v44, %v8478_v63  ;;  %v1031_v44 = vsub.f32 %v8221_v60, %v8478_v63 }
  0x72   : > { %6680 = vmatmul.msk.bf16.vlgmr.msra.gmra.mxu1 %vm781_vm2, %v980_v25  ;;  %6679 = vmatmul.msk.bf16.vlgmr.msra.gmra.mxu0 %vm781_vm2, %v980_v25  ;;  %v1037_v59 = vsub.f32 %v8254_v41, %v8478_v63  ;;  %v1039_v25 = vsub.f32 %v8268_v5, %v8478_v63 }
  0x73   : > { %v951_v43 = vadd.f32 %v950_v37, %v949_v28 }
  0x75   : > { %v953_v9 = vadd.f32 %v952_v42, %v951_v43  ;;  %v1029_v42 = vsub.f32 %v8213_v48, %v8478_v63 }
  0x77   : > { %v954_v49 = vrot.slane %v953_v9, 4 }
  0x79   : > { %v955_v56 = vadd.f32 %v954_v49, %v953_v9  ;;  %v1030_v49 = vsub.f32 %v8215_v53, %v8478_v63 }
  0x7b   : > { %v956_v7 = vrot.slane %v955_v56, 2 }
  0x7d   : > { %v957_v8 = vadd.f32 %v956_v7, %v955_v56  ;;  %v1032_v7 = vsub.f32 %v8223_v61, %v8478_v63 }
  0x7f   : > { %v958_v58 = vrot.slane %v957_v8, 1 }
  0x81   : > { %v959_v14 = vadd.f32 %v958_v58, %v957_v8  ;;  %v1033_v8 = vsub.f32 %v8227_v2, %v8478_v63 }
  0x83   : > { %v960_v22 = vmul.f32 %v959_v14, %v8474_v10  ;;  %v1034_v14 = vsub.f32 %v8233_v13, %v8478_v63 }
  0x85   : > { %v962_v24 = vsub.f32 %v960_v22, %v961_v12  ;;  %v1035_v12 = vsub.f32 %v8240_v20, %v8478_v63  ;;  %v1036_v22 = vsub.f32 %v8247_v31, %v8478_v63 }
  0x87   : > { %v963_v27 = vmax.f32 %v962_v24, 0.0  ;;  %v1038_v24 = vsub.f32 %v8262_v54, %v8478_v63 }
  0x89   : > { %v964_v0 = vadd.f32 1e-05, %v963_v27 }
  0x8b   : > { %7405 = vrsqrt.f32 %v964_v0  ;;  %vm971_vm4 = vweird.f32 %v964_v0 }
  0x91   : > { %v7406_v26 = vpop.eup %7405 }
  0x92   : > { %v966_v34 = vmul.f32 %v7406_v26, %v964_v0  ;;  %vm972_vm5 = vweird.f32 %v7406_v26  ;;  %v1040_v0 = vsub.f32 %v8280_v15, %v8478_v63  ;;  %v1043_v15 = vsub.f32 %v8302_v36, %v8478_v63  ;;  %v978_v36 = vld [vmem:[%s14364_s3] sm:$0x3] }
  0x93   : > { %vm973_vm6 = vmor %vm971_vm4, %vm972_vm5 }
  0x94   : > { %v967_v35 = vmul.f32 %v7406_v26, %v966_v34 }
  0x96   : > { %v968_v37 = vmul.f32 0.5, %v967_v35 }
  0x98   : > { %v969_v1 = vsub.f32 1.5, %v968_v37 }
  0x9a   : > { %v970_v28 = vmul.f32 %v7406_v26, %v969_v1  ;;  %v1042_v1 = vsub.f32 %v8298_v32, %v8478_v63  ;;  %v1045_v32 = vsub.f32 %v8323_v11, %v8478_v63 }
  0x9c   : > { %v974_v3 = vsel %vm973_vm6, %v7406_v26, %v970_v28  ;;  %v1041_v26 = vsub.f32 %v8284_v19, %v8478_v63 }
  0x9d   : > { %v975_v4 = vmul.f32 %v974_v3, %v780_v16 }
  0x9f   : > { %v8494_v43 = vperm.slane %v975_v4, 0 }
  0xa1   : > { %v1061_v46 = vmul.f32 %v8494_v43, %v1028_v38  ;;  %v1062_v9 = vmul.f32 %v8494_v43, %v1029_v42  ;;  %v1063_v55 = vmul.f32 %v8494_v43, %v1030_v49  ;;  %v1064_v48 = vmul.f32 %v8494_v43, %v1031_v44 }
  0xa2   : > { %v1065_v53 = vmul.f32 %v8494_v43, %v1032_v7  ;;  %v1066_v58 = vmul.f32 %v8494_v43, %v1033_v8  ;;  %v1067_v61 = vmul.f32 %v8494_v43, %v1034_v14  ;;  %v1068_v16 = vmul.f32 %v8494_v43, %v1035_v12 }
  0xa3   : > { %v1093_v47 = vpack.c.bf16 %v1062_v9, %v1061_v46  ;;  %v1094_v56 = vpack.c.bf16 %v1064_v48, %v1063_v55  ;;  %v1069_v13 = vmul.f32 %v8494_v43, %v1036_v22  ;;  %v1070_v23 = vmul.f32 %v8494_v43, %v1037_v59 }
  0xa4   : > { %v1095_v60 = vpack.c.bf16 %v1066_v58, %v1065_v53  ;;  %v1096_v2 = vpack.c.bf16 %v1068_v16, %v1067_v61  ;;  %v1071_v31 = vmul.f32 %v8494_v43, %v1038_v24  ;;  %v1072_v27 = vmul.f32 %v8494_v43, %v1039_v25 }
  0xa5   : > { %6681 = vmatmul.msk.bf16.vlgmr.msra.gmra.mxu2 %vm781_vm2, %v1093_v47  ;;  %6697 = vmatmul.msk.bf16.vlgmr.msra.gmra.mxu3 %vm781_vm2, %v1093_v47  ;;  %v1097_v20 = vpack.c.bf16 %v1070_v23, %v1069_v13  ;;  %v1073_v54 = vmul.f32 %v8494_v43, %v1040_v0  ;;  %v1074_v34 = vmul.f32 %v8494_v43, %v1041_v26  ;;  %v988_v46 = vperm.slane %v978_v36, 1 }
  0xa6   : > { %v1098_v41 = vpack.c.bf16 %v1072_v27, %v1071_v31  ;;  %v1075_v19 = vmul.f32 %v8494_v43, %v1042_v1  ;;  %v1076_v3 = vmul.f32 %v8494_v43, %v1043_v15  ;;  %v1044_v42 = vsub.f32 %v8314_v52, %v8478_v63 }
  0xa7   : > { %v1099_v5 = vpack.c.bf16 %v1074_v34, %v1073_v54  ;;  %v1078_v47 = vmul.f32 %v8494_v43, %v1045_v32  ;;  %v987_v49 = vperm.slane %v978_v36, 0  ;;  %v1046_v58 = vsub.f32 %v8330_v21, %v8478_v63 }
  0xa8   : > { %v1100_v38 = vpack.c.bf16 %v1076_v3, %v1075_v19  ;;  %v1077_v9 = vmul.f32 %v8494_v43, %v1044_v42  ;;  %v1049_v24 = vsub.f32 %v8354_v50, %v8478_v63 }
  0xa9   : > { %v1079_v14 = vmul.f32 %v8494_v43, %v1046_v58 }
  0xaa   : > { %v1101_v55 = vpack.c.bf16 %v1078_v47, %v1077_v9  ;;  %v1082_v31 = vmul.f32 %v8494_v43, %v1049_v24  ;;  %v1052_v47 = vsub.f32 %v8378_v29, %v8478_v63 }
  0xb5   : > { %6682 = vmatmul.msk.bf16.gmra.mxu2 %vm781_vm2, %v1094_v56  ;;  %6698 = vmatmul.msk.bf16.gmra.mxu3 %vm781_vm2, %v1094_v56 }
  0xc5   : > { %6683 = vmatmul.msk.bf16.gmra.mxu2 %vm781_vm2, %v1095_v60  ;;  %6699 = vmatmul.msk.bf16.gmra.mxu3 %vm781_vm2, %v1095_v60  ;;  %v1047_v60 = vsub.f32 %v8338_v33, %v8478_v63 }
  0xc7   : > { %v1080_v12 = vmul.f32 %v8494_v43, %v1047_v60 }
  0xc9   : > { %v1102_v59 = vpack.c.bf16 %v1080_v12, %v1079_v14 }
  0xd5   : > { %6684 = vmatmul.msk.bf16.gmra.mxu2 %vm781_vm2, %v1096_v2  ;;  %6700 = vmatmul.msk.bf16.gmra.mxu3 %vm781_vm2, %v1096_v2 }
  0xe5   : > { %6685 = vmatmul.msk.bf16.gmra.mxu2 %vm781_vm2, %v1097_v20  ;;  %6701 = vmatmul.msk.bf16.gmra.mxu3 %vm781_vm2, %v1097_v20  ;;  %v1048_v20 = vsub.f32 %v8346_v40, %v8478_v63 }
  0xe7   : > { %v1081_v25 = vmul.f32 %v8494_v43, %v1048_v20 }
  0xe9   : > { %v1103_v54 = vpack.c.bf16 %v1082_v31, %v1081_v25 }
  0xef   : > { %v1024_v35 = vpop.f32.mrf.mxu1  ;;  %v1011_v37 = vpop.f32.mrf.mxu0 }
  0xf0   : > { %v1025_v44 = vadd.f32 %v1024_v35, %v988_v46  ;;  %v1012_v48 = vadd.f32 %v1011_v37, %v987_v49  ;;  %v1050_v35 = vsub.f32 %v8362_v57, %v8478_v63  ;;  %v1051_v37 = vsub.f32 %v8370_v18, %v8478_v63  ;;  %v6771_v57 = vld [vmem:[%s14366_s5 + $0x70] sm:$0xf]  ;;  %v7216_v18 = vld [vmem:[%s14366_s5 + $0x74] sm:$0xf0] }
  0xf1   : > { %v8635_v42 = vor.u32 %v7216_v18, %v6771_v57  ;;  %v1053_v49 = vsub.f32 %v8385_v39, %v8478_v63 }
  0xf2   : > { %v8565_v56 = vperm.slane %v1025_v44, 0  ;;  %v8569_v52 = vperm.slane %v1012_v48, 0  ;;  %v1083_v1 = vmul.f32 %v8494_v43, %v1050_v35  ;;  %v1084_v15 = vmul.f32 %v8494_v43, %v1051_v37  ;;  %v6835_v44 = vld [vmem:[%s14366_s5 + $0xf0] sm:$0xf] }
  0xf3   : > { %7313 = vmatpush.bf16.msrb.mxu2 %v8635_v42  ;;  %2064 = vmatpush.bf16.msrb.mxu0 %v8635_v42  ;;  %v1056_v37 = vsub.f32 %v8407_v17, %v8478_v63 }
  0xf5   : > { %6686 = vmatmul.msk.bf16.gmra.mxu2 %vm781_vm2, %v1098_v41  ;;  %6702 = vmatmul.msk.bf16.gmra.mxu3 %vm781_vm2, %v1098_v41 }
  0xf7   : > { %v1026_v28 = vpop.f32.mrf.mxu1  ;;  %v1013_v4 = vpop.f32.mrf.mxu0 }
 0x105   : > { %6687 = vmatmul.msk.bf16.gmra.mxu2 %vm781_vm2, %v1099_v5  ;;  %6703 = vmatmul.msk.bf16.gmra.mxu3 %vm781_vm2, %v1099_v5 }
 0x115   : > { %6688 = vmatmul.msk.bf16.gmra.mxu2 %vm781_vm2, %v1100_v38  ;;  %6704 = vmatmul.msk.bf16.gmra.mxu3 %vm781_vm2, %v1100_v38  ;;  %v1104_v38 = vpack.c.bf16 %v1084_v15, %v1083_v1  ;;  %v1057_v1 = vsub.f32 %v8414_v30, %v8478_v63  ;;  %v6827_v15 = vld [vmem:[%s14366_s5 + $0xe0] sm:$0xf] }
 0x117   : > { %v1090_v57 = vmul.f32 %v8494_v43, %v1057_v1 }
 0x125   : > { %6689 = vmatmul.msk.bf16.gmra.mxu2 %vm781_vm2, %v1101_v55  ;;  %6705 = vmatmul.msk.bf16.gmra.mxu3 %vm781_vm2, %v1101_v55  ;;  %v7232_v55 = vld [vmem:[%s14366_s5 + $0xf4] sm:$0xf0] }
 0x126   : > { %v8657_v48 = vor.u32 %v7232_v55, %v6835_v44  ;;  %v1058_v44 = vsub.f32 %v8423_v45, %v8478_v63  ;;  %v1059_v55 = vsub.f32 %v8433_v62, %v8478_v63  ;;  %v7212_v45 = vld [vmem:[%s14366_s5 + $0x54] sm:$0xf0] }
 0x128   : > { %v1175_v11 = vpop.f32.mrf.mxu2  ;;  %v1264_v7 = vpop.f32.mrf.mxu3  ;;  %7321 = vmatpush.bf16.msrb.mxu3 %v8657_v48  ;;  %2077 = vmatpush.bf16.msrb.mxu1 %v8657_v48 }
 0x129   : > { %v8572_v8 = vadd.f32 %v1175_v11, %v8569_v52  ;;  %v8575_v53 = vadd.f32 %v1264_v7, %v8565_v56  ;;  %v1085_v11 = vmul.f32 %v8494_v43, %v1052_v47  ;;  %v1086_v7 = vmul.f32 %v8494_v43, %v1053_v49 }
 0x12b   : > { %v1105_v14 = vpack.c.bf16 %v1086_v7, %v1085_v11  ;;  %v1091_v11 = vmul.f32 %v8494_v43, %v1058_v44  ;;  %v1092_v7 = vmul.f32 %v8494_v43, %v1059_v55 }
 0x130   : > { %v1177_v61 = vpop.f32.mrf.mxu2  ;;  %v1266_v16 = vpop.f32.mrf.mxu3 }
 0x131   : > { %v8584_v2 = vadd.f32 %v1177_v61, %v8569_v52  ;;  %v8587_v22 = vadd.f32 %v1266_v16, %v8565_v56 }
 0x135   : > { %6690 = vmatmul.msk.bf16.gmra.mxu2 %vm781_vm2, %v1102_v59  ;;  %6706 = vmatmul.msk.bf16.gmra.mxu3 %vm781_vm2, %v1102_v59 }
 0x138   : > { %v1180_v21 = vpop.f32.mrf.mxu2  ;;  %v1269_v13 = vpop.f32.mrf.mxu3 }
 0x139   : > { %v8592_v33 = vadd.f32 %v1180_v21, %v8569_v52  ;;  %v8595_v23 = vadd.f32 %v1269_v13, %v8565_v56  ;;  %v1054_v21 = vsub.f32 %v8393_v51, %v8478_v63  ;;  %v1055_v13 = vsub.f32 %v8400_v6, %v8478_v63  ;;  %v7214_v51 = vld [vmem:[%s14366_s5 + $0x64] sm:$0xf0] }
 0x13b   : > { %v1087_v20 = vmul.f32 %v8494_v43, %v1054_v21  ;;  %v1088_v24 = vmul.f32 %v8494_v43, %v1055_v13  ;;  %v6819_v13 = vld [vmem:[%s14366_s5 + $0xd0] sm:$0xf]  ;;  %v1348_v1 = vmul.f32 0.5, %v8592_v33 }
 0x140   : > { %v1182_v27 = vpop.f32.mrf.mxu2  ;;  %v1271_v41 = vpop.f32.mrf.mxu3 }
 0x141   : > { %v8604_v0 = vadd.f32 %v1182_v27, %v8569_v52  ;;  %v8607_v26 = vadd.f32 %v1271_v41, %v8565_v56  ;;  %v1106_v27 = vpack.c.bf16 %v1088_v24, %v1087_v20  ;;  %v6763_v41 = vld [vmem:[%s14366_s5 + $0x60] sm:$0xf]  ;;  %v7228_v20 = vld [vmem:[%s14366_s5 + $0xd4] sm:$0xf0] }
 0x142   : > { %v8767_v24 = vor.u32 %v7228_v20, %v6819_v13  ;;  %v7210_v13 = vld [vmem:[%s14366_s5 + $0x44] sm:$0xf0] }
 0x145   : > { %6691 = vmatmul.msk.bf16.gmra.mxu2 %vm781_vm2, %v1103_v54  ;;  %6707 = vmatmul.msk.bf16.gmra.mxu3 %vm781_vm2, %v1103_v54  ;;  %v8693_v54 = vor.u32 %v7214_v51, %v6763_v41 }
 0x147   : > { %7314 = vmatpush.bf16.msrb.mxu2 %v8693_v54  ;;  %2065 = vmatpush.bf16.msrb.mxu0 %v8693_v54 }
 0x148   : > { %v1185_v40 = vpop.f32.mrf.mxu2  ;;  %v1274_v34 = vpop.f32.mrf.mxu3 }
 0x149   : > { %v8612_v50 = vadd.f32 %v1185_v40, %v8569_v52  ;;  %v8615_v5 = vadd.f32 %v1274_v34, %v8565_v56 }
 0x14b   : > { %v1352_v33 = vmul.f32 0.5, %v8612_v50 }
 0x150   : > { %v1187_v28 = vpop.f32.mrf.mxu2  ;;  %v1276_v19 = vpop.f32.mrf.mxu3 }
 0x151   : > { %v8624_v3 = vadd.f32 %v1187_v28, %v8569_v52  ;;  %v8627_v4 = vadd.f32 %v1276_v19, %v8565_v56  ;;  %v7230_v28 = vld [vmem:[%s14366_s5 + $0xe4] sm:$0xf0] }
 0x152   : > { %v8715_v19 = vor.u32 %v7230_v28, %v6827_v15  ;;  %v1349_v15 = vmul.f32 0.5, %v8595_v23 }
 0x153   : > { %v1355_v50 = vmul.f32 0.5, %v8627_v4 }
 0x154   : > { %7322 = vmatpush.bf16.msrb.mxu3 %v8715_v19  ;;  %2078 = vmatpush.bf16.msrb.mxu1 %v8715_v19 }
 0x155   : > { %6692 = vmatmul.msk.bf16.gmra.mxu2 %vm781_vm2, %v1104_v38  ;;  %6708 = vmatmul.msk.bf16.gmra.mxu3 %vm781_vm2, %v1104_v38  ;;  %v1089_v38 = vmul.f32 %v8494_v43, %v1056_v37  ;;  %v1347_v37 = vmul.f32 0.5, %v8587_v22 }
 0x157   : > { %v1107_v18 = vpack.c.bf16 %v1090_v57, %v1089_v38 }
 0x158   : > { %v1190_v32 = vpop.f32.mrf.mxu2  ;;  %v1279_v36 = vpop.f32.mrf.mxu3  ;;  %7323 = vmatpush.bf16.msrb.mxu3 %v8767_v24  ;;  %2079 = vmatpush.bf16.msrb.mxu1 %v8767_v24 }
 0x159   : > { %v8642_v46 = vadd.f32 %v1190_v32, %v8569_v52  ;;  %v8645_v9 = vadd.f32 %v1279_v36, %v8565_v56 }
 0x160   : > { %v1192_v29 = vpop.f32.mrf.mxu2  ;;  %v1281_v39 = vpop.f32.mrf.mxu3 }
 0x161   : > { %v8664_v58 = vadd.f32 %v1192_v29, %v8569_v52  ;;  %v8667_v60 = vadd.f32 %v1281_v39, %v8565_v56 }
 0x165   : > { %6693 = vmatmul.msk.bf16.gmra.mxu2 %vm781_vm2, %v1105_v14  ;;  %6709 = vmatmul.msk.bf16.gmra.mxu3 %vm781_vm2, %v1105_v14  ;;  %v1108_v14 = vpack.c.bf16 %v1092_v7, %v1091_v11 }
 0x168   : > { %v1195_v12 = vpop.f32.mrf.mxu2  ;;  %v1284_v61 = vpop.f32.mrf.mxu3 }
 0x169   : > { %v8672_v16 = vadd.f32 %v1195_v12, %v8569_v52  ;;  %v8675_v59 = vadd.f32 %v1284_v61, %v8565_v56  ;;  %v6755_v12 = vld [vmem:[%s14366_s5 + $0x50] sm:$0xf] }
 0x16a   : > { %v8749_v61 = vor.u32 %v7212_v45, %v6755_v12 }
 0x16c   : > { %7315 = vmatpush.bf16.msrb.mxu2 %v8749_v61  ;;  %2066 = vmatpush.bf16.msrb.mxu0 %v8749_v61 }
 0x170   : > { %v8683_v25 = vpop.f32.mrf.mxu2  ;;  %v8685_v31 = vpop.f32.mrf.mxu3 }
 0x175   : > { %6694 = vmatmul.msk.bf16.gmra.mxu2 %vm781_vm2, %v1106_v27  ;;  %6710 = vmatmul.msk.bf16.gmra.mxu3 %vm781_vm2, %v1106_v27  ;;  %v1344_v27 = vmul.f32 0.5, %v8572_v8 }
 0x177   : > { %7407 = vtanh.f32 %v1344_v27 }
 0x178   : > { %v1200_v6 = vpop.f32.mrf.mxu2  ;;  %v1289_v40 = vpop.f32.mrf.mxu3 }
 0x179   : > { %v8700_v34 = vadd.f32 %v1200_v6, %v8569_v52  ;;  %v8703_v35 = vadd.f32 %v1289_v40, %v8565_v56  ;;  %v1345_v6 = vmul.f32 0.5, %v8575_v53  ;;  %v1346_v40 = vmul.f32 0.5, %v8584_v2 }
 0x17a   : > { %v1350_v2 = vmul.f32 0.5, %v8604_v0 }
 0x17b   : > { %7409 = vtanh.f32 %v1345_v6 }
 0x17c   : > { %7411 = vtanh.f32 %v1346_v40 }
 0x17d   : > { %7413 = vtanh.f32 %v1347_v37  ;;  %v7408_v53 = vpop.eup %7407 }
 0x17e   : > { %7415 = vtanh.f32 %v1348_v1  ;;  %v1472_v44 = vmul.f32 0.5, %v7408_v53 }
 0x17f   : > { %7417 = vtanh.f32 %v1349_v15  ;;  %v1356_v15 = vmul.f32 0.5, %v8642_v46 }
 0x180   : > { %v8721_v17 = vpop.f32.mrf.mxu2  ;;  %v8723_v30 = vpop.f32.mrf.mxu3  ;;  %7419 = vtanh.f32 %v1350_v2  ;;  %v1357_v2 = vmul.f32 0.5, %v8645_v9 }
 0x181   : > { %v7410_v22 = vpop.eup %7409 }
 0x182   : > { %v1473_v11 = vmul.f32 0.5, %v7410_v22 }
 0x184   : > { %v8807_v27 = vadd.f32 0.5, %v1473_v11 }
 0x185   : > { %6695 = vmatmul.msk.bf16.gmra.mxu2 %vm781_vm2, %v1107_v18  ;;  %6711 = vmatmul.msk.bf16.gmra.mxu3 %vm781_vm2, %v1107_v18  ;;  %v1351_v18 = vmul.f32 0.5, %v8607_v26  ;;  %v1354_v26 = vmul.f32 0.5, %v8624_v3 }
 0x186   : > { %v1678_v22 = vmul.f32 %v8807_v27, %v8807_v27 }
 0x187   : > { %7421 = vtanh.f32 %v1351_v18 }
 0x188   : > { %v1205_v32 = vpop.f32.mrf.mxu2  ;;  %v1294_v36 = vpop.f32.mrf.mxu3  ;;  %7423 = vtanh.f32 %v1352_v33 }
 0x189   : > { %v8728_v47 = vadd.f32 %v1205_v32, %v8569_v52  ;;  %v8731_v49 = vadd.f32 %v1294_v36, %v8565_v56  ;;  %v7412_v32 = vpop.eup %7411  ;;  %v1353_v36 = vmul.f32 0.5, %v8615_v5 }
 0x18a   : > { %v7414_v23 = vpop.eup %7413  ;;  %v1474_v55 = vmul.f32 0.5, %v7412_v32 }
 0x18b   : > { %v1475_v7 = vmul.f32 0.5, %v7414_v23  ;;  %v7416_v12 = vpop.eup %7415  ;;  %7425 = vtanh.f32 %v1353_v36 }
 0x18c   : > { %v7418_v45 = vpop.eup %7417  ;;  %v8799_v5 = vadd.f32 0.5, %v1474_v55  ;;  %v1476_v3 = vmul.f32 0.5, %v7416_v12  ;;  %7427 = vtanh.f32 %v1354_v26 }
 0x18d   : > { %v7420_v20 = vpop.eup %7419  ;;  %v8809_v6 = vadd.f32 0.5, %v1475_v7  ;;  %v1477_v37 = vmul.f32 0.5, %v7418_v45  ;;  %7429 = vtanh.f32 %v1355_v50 }
 0x18e   : > { %v7422_v4 = vpop.eup %7421  ;;  %v1679_v53 = vmul.f32 %v8799_v5, %v8799_v5  ;;  %v8825_v46 = vadd.f32 0.5, %v1476_v3  ;;  %v1478_v32 = vmul.f32 0.5, %v7420_v20  ;;  %7431 = vtanh.f32 %v1356_v15  ;;  %v7226_v20 = vld [vmem:[%s14366_s5 + $0xc4] sm:$0xf0] }
 0x18f   : > { %14715 = vst [vmem:[#allocation3_spill] sm:$0xff] %v8809_v6  ;;  %v7424_v1 = vpop.eup %7423  ;;  %v1680_v18 = vmul.f32 %v8809_v6, %v8809_v6  ;;  %v8827_v36 = vadd.f32 0.5, %v1477_v37  ;;  %v1638_v50 = vadd.f32 %v8809_v6, %v8807_v27  ;;  %7433 = vtanh.f32 %v1357_v2 }
 0x190   : > { %v8739_v29 = vpop.f32.mrf.mxu2  ;;  %v8741_v39 = vpop.f32.mrf.mxu3  ;;  %14716 = vst [vmem:[#allocation4_spill] sm:$0xff] %v8825_v46  ;;  %v1480_v7 = vmul.f32 0.5, %v7424_v1  ;;  %v8846_v37 = vadd.f32 0.5, %v1478_v32  ;;  %v1359_v1 = vmul.f32 0.5, %v8667_v60  ;;  %v1361_v60 = vmul.f32 0.5, %v8675_v59 }
 0x191   : > { %14717 = vst [vmem:[#allocation5_spill] sm:$0xff] %v8827_v36  ;;  %v1287_v59 = vadd.f32 %v8685_v31, %v8565_v56 }
 0x192   : > { %14718 = vst [vmem:[#allocation6_spill] sm:$0xff] %v8846_v37 }
 0x195   : > { %6696 = vmatmul.msk.bf16.gmra.mxu2 %vm781_vm2, %v1108_v14  ;;  %6712 = vmatmul.msk.bf16.gmra.mxu3 %vm781_vm2, %v1108_v14 }
 0x198   : > { %v1210_v62 = vpop.f32.mrf.mxu2  ;;  %v1299_v63 = vpop.f32.mrf.mxu3 }
 0x199   : > { %v8756_v43 = vadd.f32 %v1210_v62, %v8569_v52  ;;  %v8759_v21 = vadd.f32 %v1299_v63, %v8565_v56  ;;  %v8797_v62 = vadd.f32 0.5, %v1472_v44  ;;  %v6747_v63 = vld [vmem:[%s14366_s5 + $0x40] sm:$0xf]  ;;  %v1479_v44 = vmul.f32 0.5, %v7422_v4 }
 0x19a   : > { %v8811_v40 = vor.u32 %v7210_v13, %v6747_v63  ;;  %v1358_v63 = vmul.f32 0.5, %v8664_v58  ;;  %v6811_v13 = vld [vmem:[%s14366_s5 + $0xc0] sm:$0xf]  ;;  %v1778_v4 = vadd.f32 %v1680_v18, %v1678_v22  ;;  %v1682_v58 = vmul.f32 %v8827_v36, %v8827_v36 }
 0x19b   : > { %v1601_v9 = vadd.f32 %v8799_v5, %v8797_v62  ;;  %v8849_v15 = vor.u32 %v7226_v20, %v6811_v13 }
 0x19c   : > { %7316 = vmatpush.bf16.msrb.mxu2 %v8811_v40  ;;  %2067 = vmatpush.bf16.msrb.mxu0 %v8811_v40  ;;  %7435 = vtanh.f32 %v1358_v63  ;;  %v1779_v63 = vadd.f32 %v1778_v4, %v1682_v58 }
 0x19d   : > { %v1602_v2 = vadd.f32 %v1601_v9, %v8825_v46  ;;  %7324 = vmatpush.bf16.msrb.mxu3 %v8849_v15  ;;  %2080 = vmatpush.bf16.msrb.mxu1 %v8849_v15  ;;  %v1683_v9 = vmul.f32 %v8846_v37, %v8846_v37  ;;  %7437 = vtanh.f32 %v1359_v1 }
 0x1a0   : > { %v8772_v41 = vpop.f32.mrf.mxu2  ;;  %v8774_v51 = vpop.f32.mrf.mxu3 }
 0x1a8   : > { %v1215_v28 = vpop.f32.mrf.mxu2  ;;  %v1304_v8 = vpop.f32.mrf.mxu3 }
 0x1a9   : > { %v8782_v38 = vadd.f32 %v1215_v28, %v8569_v52  ;;  %v8785_v57 = vadd.f32 %v1304_v8, %v8565_v56  ;;  %v7426_v28 = vpop.eup %7425  ;;  %v1677_v8 = vmul.f32 %v8797_v62, %v8797_v62 }
 0x1aa   : > { %v1481_v12 = vmul.f32 0.5, %v7426_v28  ;;  %v7428_v26 = vpop.eup %7427  ;;  %v1681_v28 = vmul.f32 %v8825_v46, %v8825_v46 }
 0x1ab   : > { %v1741_v45 = vadd.f32 %v1679_v53, %v1677_v8  ;;  %v7430_v3 = vpop.eup %7429  ;;  %v8855_v8 = vadd.f32 0.5, %v1479_v44  ;;  %v1360_v53 = vmul.f32 0.5, %v8672_v16  ;;  %v1482_v18 = vmul.f32 0.5, %v7428_v26 }
 0x1ac   : > { %v8861_v22 = vadd.f32 0.5, %v1481_v12  ;;  %v1483_v32 = vmul.f32 0.5, %v7430_v3  ;;  %v7432_v44 = vpop.eup %7431  ;;  %v1639_v16 = vadd.f32 %v1638_v50, %v8827_v36  ;;  %v1603_v50 = vadd.f32 %v1602_v2, %v8846_v37 }
 0x1ad   : > { %14719 = vst [vmem:[#allocation7_spill] sm:$0xff] %v8855_v8  ;;  %v7434_v26 = vpop.eup %7433  ;;  %v1742_v13 = vadd.f32 %v1741_v45, %v1681_v28  ;;  %7439 = vtanh.f32 %v1360_v53  ;;  %v8885_v1 = vadd.f32 0.5, %v1482_v18  ;;  %v1484_v28 = vmul.f32 0.5, %v7432_v44 }
 0x1ae   : > { %14721 = vst [vmem:[#allocation9_spill] sm:$0xff] %v8861_v22  ;;  %v1640_v20 = vadd.f32 %v1639_v16, %v8855_v8  ;;  %7441 = vtanh.f32 %v1361_v60  ;;  %v1686_v31 = vmul.f32 %v8861_v22, %v8861_v22  ;;  %v8887_v36 = vadd.f32 0.5, %v1483_v32  ;;  %v7436_v46 = vpop.eup %7435 }
 0x1af   : > { %14722 = vst [vmem:[#allocation10_spill] sm:$0xff] %v8885_v1  ;;  %v1743_v4 = vadd.f32 %v1742_v13, %v1683_v9  ;;  %v1485_v58 = vmul.f32 0.5, %v7434_v26  ;;  %v1363_v53 = vmul.f32 0.5, %v1287_v59  ;;  %v7438_v60 = vpop.eup %7437  ;;  %v1364_v18 = vmul.f32 0.5, %v8700_v34 }
 0x1b0   : > { %v8791_v14 = vpop.f32.mrf.mxu2  ;;  %v8793_v0 = vpop.f32.mrf.mxu3  ;;  %14723 = vst [vmem:[#allocation11_spill] sm:$0xff] %v8887_v36  ;;  %v1641_v6 = vadd.f32 %v1640_v20, %v8861_v22  ;;  %v1292_v32 = vadd.f32 %v8723_v30, %v8565_v56  ;;  %v1687_v9 = vmul.f32 %v8885_v1, %v8885_v1  ;;  %v1688_v59 = vmul.f32 %v8887_v36, %v8887_v36 }
 0x1b1   : > { %v8902_v13 = vadd.f32 0.5, %v1485_v58  ;;  %v1365_v34 = vmul.f32 0.5, %v8703_v35  ;;  %v1486_v30 = vmul.f32 0.5, %v7436_v46 }
 0x1b3   : > { %14725 = vst [vmem:[#allocation13_spill] sm:$0xff] %v8902_v13 }
 0x1b8   : > { %v1220_v33 = vpop.f32.mrf.mxu2  ;;  %v1309_v23 = vpop.f32.mrf.mxu3 }
 0x1b9   : > { %v8830_v55 = vadd.f32 %v1220_v33, %v8569_v52  ;;  %v8833_v11 = vadd.f32 %v1309_v23, %v8565_v56  ;;  %v8859_v33 = vadd.f32 0.5, %v1480_v7  ;;  %v1198_v23 = vadd.f32 %v8683_v25, %v8569_v52 }
 0x1ba   : > { %v1684_v25 = vmul.f32 %v8855_v8, %v8855_v8  ;;  %v1203_v8 = vadd.f32 %v8721_v17, %v8569_v52  ;;  %v8900_v17 = vadd.f32 0.5, %v1484_v28 }
 0x1bb   : > { %14720 = vst [vmem:[#allocation8_spill] sm:$0xff] %v8859_v33  ;;  %v1685_v3 = vmul.f32 %v8859_v33, %v8859_v33  ;;  %v1362_v45 = vmul.f32 0.5, %v1198_v23  ;;  %v1604_v16 = vadd.f32 %v1603_v50, %v8859_v33  ;;  %v7440_v23 = vpop.eup %7439 }
 0x1bc   : > { %v1780_v2 = vadd.f32 %v1779_v63, %v1684_v25  ;;  %v7442_v26 = vpop.eup %7441  ;;  %14724 = vst [vmem:[#allocation12_spill] sm:$0xff] %v8900_v17  ;;  %v1366_v50 = vmul.f32 0.5, %v1203_v8  ;;  %v1689_v46 = vmul.f32 %v8900_v17, %v8900_v17  ;;  %v1690_v8 = vmul.f32 %v8902_v13, %v8902_v13 }
 0x1bd   : > { %v1744_v37 = vadd.f32 %v1743_v4, %v1685_v3  ;;  %7443 = vtanh.f32 %v1362_v45  ;;  %v1488_v45 = vmul.f32 0.5, %v7440_v23  ;;  %v1367_v4 = vmul.f32 0.5, %v1292_v32 }
 0x1be   : > { %v1781_v44 = vadd.f32 %v1780_v2, %v1686_v31  ;;  %7445 = vtanh.f32 %v1363_v53  ;;  %v1487_v31 = vmul.f32 0.5, %v7438_v60  ;;  %v1605_v28 = vadd.f32 %v1604_v16, %v8885_v1 }
 0x1bf   : > { %7447 = vtanh.f32 %v1364_v18  ;;  %v1745_v58 = vadd.f32 %v1744_v37, %v1687_v9  ;;  %v1642_v53 = vadd.f32 %v1641_v6, %v8887_v36  ;;  %v1489_v35 = vmul.f32 0.5, %v7442_v26 }
 0x1c0   : > { %v8873_v7 = vpop.f32.mrf.mxu2  ;;  %v8875_v12 = vpop.f32.mrf.mxu3  ;;  %7449 = vtanh.f32 %v1365_v34  ;;  %v1208_v2 = vadd.f32 %v8739_v29, %v8569_v52  ;;  %v1782_v23 = vadd.f32 %v1781_v44, %v1688_v59  ;;  %v8919_v18 = vadd.f32 0.5, %v1486_v30 }
 0x1c1   : > { %7451 = vtanh.f32 %v1366_v50  ;;  %v1297_v37 = vadd.f32 %v8741_v39, %v8565_v56  ;;  %v8923_v16 = vadd.f32 0.5, %v1487_v31  ;;  %v8925_v32 = vadd.f32 0.5, %v1488_v45 }
 0x1c2   : > { %14726 = vst [vmem:[#allocation14_spill] sm:$0xff] %v8919_v18  ;;  %7453 = vtanh.f32 %v1367_v4  ;;  %v1368_v9 = vmul.f32 0.5, %v8728_v47  ;;  %v1606_v26 = vadd.f32 %v1605_v28, %v8900_v17  ;;  %v1643_v29 = vadd.f32 %v1642_v53, %v8902_v13 }
 0x1c3   : > { %v7444_v60 = vpop.eup %7443  ;;  %14727 = vst [vmem:[#allocation15_spill] sm:$0xff] %v8923_v16  ;;  %v8930_v34 = vadd.f32 0.5, %v1489_v35  ;;  %v1369_v44 = vmul.f32 0.5, %v8731_v49  ;;  %v1370_v30 = vmul.f32 0.5, %v1208_v2  ;;  %v1691_v47 = vmul.f32 %v8919_v18, %v8919_v18 }
 0x1c4   : > { %v7446_v6 = vpop.eup %7445  ;;  %14728 = vst [vmem:[#allocation16_spill] sm:$0xff] %v8925_v32  ;;  %v1490_v39 = vmul.f32 0.5, %v7444_v60  ;;  %v1607_v45 = vadd.f32 %v1606_v26, %v8919_v18  ;;  %v1371_v28 = vmul.f32 0.5, %v1297_v37  ;;  %v1644_v35 = vadd.f32 %v1643_v29, %v8923_v16  ;;  %v7208_v37 = vld [vmem:[%s14366_s5 + $0x34] sm:$0xf0] }
 0x1c5   : > { %14729 = vst [vmem:[#allocation17_spill] sm:$0xff] %v8930_v34  ;;  %v7448_v59 = vpop.eup %7447  ;;  %v1491_v4 = vmul.f32 0.5, %v7446_v6  ;;  %v1692_v49 = vmul.f32 %v8923_v16, %v8923_v16  ;;  %7455 = vtanh.f32 %v1368_v9  ;;  %v1213_v60 = vadd.f32 %v8772_v41, %v8569_v52 }
 0x1c6   : > { %v7450_v53 = vpop.eup %7449  ;;  %v1492_v2 = vmul.f32 0.5, %v7448_v59  ;;  %7457 = vtanh.f32 %v1369_v44  ;;  %v8955_v26 = vadd.f32 0.5, %v1490_v39  ;;  %v1302_v9 = vadd.f32 %v8774_v51, %v8565_v56 }
 0x1c7   : > { %7459 = vtanh.f32 %v1370_v30  ;;  %v8961_v44 = vadd.f32 0.5, %v1491_v4  ;;  %v1493_v41 = vmul.f32 0.5, %v7450_v53  ;;  %v1372_v59 = vmul.f32 0.5, %v8756_v43 }
 0x1c8   : > { %v1225_v63 = vpop.f32.mrf.mxu2  ;;  %v1314_v25 = vpop.f32.mrf.mxu3  ;;  %14730 = vst [vmem:[#allocation18_spill] sm:$0xff] %v8955_v26  ;;  %7461 = vtanh.f32 %v1371_v28  ;;  %v1373_v17 = vmul.f32 0.5, %v8759_v21  ;;  %v1608_v39 = vadd.f32 %v1607_v45, %v8925_v32  ;;  %v8968_v51 = vadd.f32 0.5, %v1492_v2 }
 0x1c9   : > { %v8906_v20 = vadd.f32 %v1225_v63, %v8569_v52  ;;  %v8909_v3 = vadd.f32 %v1314_v25, %v8565_v56  ;;  %v1746_v63 = vadd.f32 %v1745_v58, %v1689_v46  ;;  %v1783_v25 = vadd.f32 %v1782_v23, %v1690_v8  ;;  %v7452_v46 = vpop.eup %7451  ;;  %v6739_v23 = vld [vmem:[%s14366_s5 + $0x30] sm:$0xf]  ;;  %14731 = vst [vmem:[#allocation19_spill] sm:$0xff] %v8961_v44 }
 0x1ca   : > { %v1693_v58 = vmul.f32 %v8925_v32, %v8925_v32  ;;  %v1694_v8 = vmul.f32 %v8930_v34, %v8930_v34  ;;  %v7454_v6 = vpop.eup %7453  ;;  %v8959_v29 = vor.u32 %v7208_v37, %v6739_v23  ;;  %v1494_v18 = vmul.f32 0.5, %v7452_v46  ;;  %14732 = vst [vmem:[#allocation20_spill] sm:$0xff] %v8968_v51 }
 0x1cb   : > { %v1747_v16 = vadd.f32 %v1746_v63, %v1691_v47  ;;  %v1784_v13 = vadd.f32 %v1783_v25, %v1692_v49  ;;  %v1495_v30 = vmul.f32 0.5, %v7454_v6  ;;  %v1374_v4 = vmul.f32 0.5, %v1213_v60  ;;  %v7456_v23 = vpop.eup %7455  ;;  %v6803_v6 = vld [vmem:[%s14366_s5 + $0xb0] sm:$0xf] }
 0x1cc   : > { %7317 = vmatpush.bf16.msrb.mxu2 %v8959_v29  ;;  %2068 = vmatpush.bf16.msrb.mxu0 %v8959_v29  ;;  %v1645_v28 = vadd.f32 %v1644_v35, %v8930_v34  ;;  %v1375_v63 = vmul.f32 0.5, %v1302_v9  ;;  %v7458_v21 = vpop.eup %7457  ;;  %v1695_v49 = vmul.f32 %v8955_v26, %v8955_v26  ;;  %v1696_v45 = vmul.f32 %v8961_v44, %v8961_v44  ;;  %v7224_v9 = vld [vmem:[%s14366_s5 + $0xb4] sm:$0xf0] }
 0x1cd   : > { %v1748_v53 = vadd.f32 %v1747_v16, %v1693_v58  ;;  %v1785_v43 = vadd.f32 %v1784_v13, %v1694_v8  ;;  %v8979_v46 = vadd.f32 0.5, %v1493_v41  ;;  %7463 = vtanh.f32 %v1372_v59  ;;  %v7460_v2 = vpop.eup %7459 }
 0x1ce   : > { %v1609_v16 = vadd.f32 %v1608_v39, %v8955_v26  ;;  %v1646_v13 = vadd.f32 %v1645_v28, %v8961_v44  ;;  %v8983_v35 = vadd.f32 0.5, %v1494_v18  ;;  %7465 = vtanh.f32 %v1373_v17  ;;  %v7462_v58 = vpop.eup %7461 }
 0x1cf   : > { %14733 = vst [vmem:[#allocation21_spill] sm:$0xff] %v8979_v46  ;;  %v1697_v8 = vmul.f32 %v8968_v51, %v8968_v51  ;;  %v8987_v60 = vadd.f32 0.5, %v1495_v30  ;;  %v1496_v37 = vmul.f32 0.5, %v7456_v23  ;;  %7467 = vtanh.f32 %v1374_v4 }
 0x1d0   : > { %v8933_v50 = vpop.f32.mrf.mxu2  ;;  %v8935_v31 = vpop.f32.mrf.mxu3  ;;  %14734 = vst [vmem:[#allocation22_spill] sm:$0xff] %v8983_v35  ;;  %v1497_v41 = vmul.f32 0.5, %v7458_v21  ;;  %7469 = vtanh.f32 %v1375_v63  ;;  %v1218_v17 = vadd.f32 %v8791_v14, %v8569_v52  ;;  %v8997_v18 = vor.u32 %v7224_v9, %v6803_v6 }
 0x1d1   : > { %14735 = vst [vmem:[#allocation23_spill] sm:$0xff] %v8987_v60  ;;  %v1749_v59 = vadd.f32 %v1748_v53, %v1695_v49  ;;  %v1786_v39 = vadd.f32 %v1785_v43, %v1696_v45  ;;  %v1698_v30 = vmul.f32 %v8979_v46, %v8979_v46  ;;  %v1307_v4 = vadd.f32 %v8793_v0, %v8565_v56 }
 0x1d2   : > { %v1699_v23 = vmul.f32 %v8983_v35, %v8983_v35  ;;  %v1498_v28 = vmul.f32 0.5, %v7460_v2  ;;  %v1499_v44 = vmul.f32 0.5, %v7462_v58  ;;  %v1376_v63 = vmul.f32 0.5, %v8782_v38  ;;  %7325 = vmatpush.bf16.msrb.mxu3 %v8997_v18  ;;  %2081 = vmatpush.bf16.msrb.mxu1 %v8997_v18 }
 0x1d3   : > { %v7464_v14 = vpop.eup %7463  ;;  %v1610_v53 = vadd.f32 %v1609_v16, %v8968_v51  ;;  %v1647_v43 = vadd.f32 %v1646_v13, %v8979_v46  ;;  %v1700_v21 = vmul.f32 %v8987_v60, %v8987_v60  ;;  %v1377_v0 = vmul.f32 0.5, %v8785_v57 }
 0x1d4   : > { %v7466_v49 = vpop.eup %7465  ;;  %v1750_v45 = vadd.f32 %v1749_v59, %v1697_v8  ;;  %v9013_v2 = vadd.f32 0.5, %v1496_v37  ;;  %v9015_v58 = vadd.f32 0.5, %v1497_v41  ;;  %v1378_v38 = vmul.f32 0.5, %v1218_v17 }
 0x1d5   : > { %v7468_v34 = vpop.eup %7467  ;;  %v1787_v16 = vadd.f32 %v1786_v39, %v1698_v30  ;;  %v1611_v13 = vadd.f32 %v1610_v53, %v8983_v35  ;;  %v1648_v46 = vadd.f32 %v1647_v43, %v8987_v60  ;;  %v1379_v51 = vmul.f32 0.5, %v1307_v4 }
 0x1d6   : > { %14736 = vst [vmem:[#allocation24_spill] sm:$0xff] %v9013_v2  ;;  %v7470_v26 = vpop.eup %7469  ;;  %v1751_v57 = vadd.f32 %v1750_v45, %v1699_v23  ;;  %v9023_v32 = vadd.f32 0.5, %v1498_v28  ;;  %v9025_v8 = vadd.f32 0.5, %v1499_v44  ;;  %7471 = vtanh.f32 %v1376_v63 }
 0x1d7   : > { %14737 = vst [vmem:[#allocation25_spill] sm:$0xff] %v9015_v58  ;;  %v1788_v37 = vadd.f32 %v1787_v16, %v1700_v21  ;;  %v1500_v41 = vmul.f32 0.5, %v7464_v14  ;;  %v1501_v17 = vmul.f32 0.5, %v7466_v49  ;;  %7473 = vtanh.f32 %v1377_v0 }
 0x1d8   : > { %v8971_v25 = vpop.f32.mrf.mxu2  ;;  %v8973_v47 = vpop.f32.mrf.mxu3  ;;  %14738 = vst [vmem:[#allocation26_spill] sm:$0xff] %v9023_v32  ;;  %v1701_v59 = vmul.f32 %v9013_v2, %v9013_v2  ;;  %v1702_v39 = vmul.f32 %v9015_v58, %v9015_v58  ;;  %7475 = vtanh.f32 %v1378_v38  ;;  %v1223_v30 = vadd.f32 %v8873_v7, %v8569_v52 }
 0x1d9   : > { %14739 = vst [vmem:[#allocation27_spill] sm:$0xff] %v9025_v8  ;;  %v1612_v4 = vadd.f32 %v1611_v13, %v9013_v2  ;;  %v1502_v23 = vmul.f32 0.5, %v7468_v34  ;;  %v1503_v44 = vmul.f32 0.5, %v7470_v26  ;;  %7477 = vtanh.f32 %v1379_v51 }
 0x1da   : > { %v1703_v28 = vmul.f32 %v9023_v32, %v9023_v32  ;;  %v1704_v63 = vmul.f32 %v9025_v8, %v9025_v8  ;;  %v1380_v14 = vmul.f32 0.5, %v8830_v55  ;;  %v1312_v53 = vadd.f32 %v8875_v12, %v8565_v56 }
 0x1db   : > { %v1649_v43 = vadd.f32 %v1648_v46, %v9015_v58  ;;  %v9042_v21 = vadd.f32 0.5, %v1500_v41  ;;  %v9044_v7 = vadd.f32 0.5, %v1501_v17  ;;  %v1381_v34 = vmul.f32 0.5, %v8833_v11 }
 0x1dc   : > { %v7472_v26 = vpop.eup %7471  ;;  %v1752_v51 = vadd.f32 %v1751_v57, %v1701_v59  ;;  %v1789_v0 = vadd.f32 %v1788_v37, %v1702_v39  ;;  %v1382_v49 = vmul.f32 0.5, %v1223_v30  ;;  %v1613_v16 = vadd.f32 %v1612_v4, %v9023_v32 }
 0x1dd   : > { %14740 = vst [vmem:[#allocation28_spill] sm:$0xff] %v9042_v21  ;;  %v7474_v55 = vpop.eup %7473  ;;  %v1650_v12 = vadd.f32 %v1649_v43, %v9025_v8  ;;  %v9053_v46 = vadd.f32 0.5, %v1502_v23  ;;  %v9055_v13 = vadd.f32 0.5, %v1503_v44  ;;  %7479 = vtanh.f32 %v1380_v14 }
 0x1de   : > { %14741 = vst [vmem:[#allocation29_spill] sm:$0xff] %v9044_v7  ;;  %v7476_v41 = vpop.eup %7475  ;;  %v1753_v17 = vadd.f32 %v1752_v51, %v1703_v28  ;;  %v1790_v11 = vadd.f32 %v1789_v0, %v1704_v63  ;;  %v1383_v57 = vmul.f32 0.5, %v1312_v53  ;;  %v1705_v59 = vmul.f32 %v9042_v21, %v9042_v21 }
 0x1df   : > { %14742 = vst [vmem:[#allocation30_spill] sm:$0xff] %v9053_v46  ;;  %v7478_v37 = vpop.eup %7477  ;;  %v1706_v39 = vmul.f32 %v9044_v7, %v9044_v7  ;;  %v1504_v30 = vmul.f32 0.5, %v7472_v26  ;;  %7481 = vtanh.f32 %v1381_v34  ;;  %v1614_v4 = vadd.f32 %v1613_v16, %v9042_v21 }
 0x1e0   : > { %v9017_v6 = vpop.f32.mrf.mxu2  ;;  %v9019_v9 = vpop.f32.mrf.mxu3  ;;  %14743 = vst [vmem:[#allocation31_spill] sm:$0xff] %v9055_v13  ;;  %v1505_v23 = vmul.f32 0.5, %v7474_v55  ;;  %7483 = vtanh.f32 %v1382_v49  ;;  %v1228_v44 = vadd.f32 %v8933_v50, %v8569_v52  ;;  %v1651_v28 = vadd.f32 %v1650_v12, %v9044_v7 }
 0x1e1   : > { %v1707_v63 = vmul.f32 %v9053_v46, %v9053_v46  ;;  %v1708_v14 = vmul.f32 %v9055_v13, %v9055_v13  ;;  %v1317_v53 = vadd.f32 %v8935_v31, %v8565_v56  ;;  %v1506_v43 = vmul.f32 0.5, %v7476_v41 }
 0x1e2   : > { %v1507_v34 = vmul.f32 0.5, %v7478_v37  ;;  %7485 = vtanh.f32 %v1383_v57  ;;  %v1384_v26 = vmul.f32 0.5, %v8906_v20  ;;  %v1754_v51 = vadd.f32 %v1753_v17, %v1705_v59 }
 0x1e3   : > { %v1791_v0 = vadd.f32 %v1790_v11, %v1706_v39  ;;  %v9072_v49 = vadd.f32 0.5, %v1504_v30  ;;  %v1385_v50 = vmul.f32 0.5, %v8909_v3  ;;  %v7480_v55 = vpop.eup %7479  ;;  %v1615_v16 = vadd.f32 %v1614_v4, %v9053_v46 }
 0x1e4   : > { %v9076_v12 = vadd.f32 0.5, %v1505_v23  ;;  %v1386_v7 = vmul.f32 0.5, %v1228_v44  ;;  %v1755_v57 = vadd.f32 %v1754_v51, %v1707_v63  ;;  %v1652_v20 = vadd.f32 %v1651_v28, %v9055_v13  ;;  %v6731_v44 = vld [vmem:[%s14366_s5 + $0x20] sm:$0xf]  ;;  %v7206_v28 = vld [vmem:[%s14366_s5 + $0x24] sm:$0xf0] }
 0x1e5   : > { %v7482_v41 = vpop.eup %7481  ;;  %v1792_v17 = vadd.f32 %v1791_v0, %v1708_v14  ;;  %v1387_v11 = vmul.f32 0.5, %v1317_v53  ;;  %v9083_v59 = vadd.f32 0.5, %v1506_v43  ;;  %v9085_v3 = vadd.f32 0.5, %v1507_v34 }
 0x1e6   : > { %v7484_v37 = vpop.eup %7483  ;;  %7487 = vtanh.f32 %v1384_v26  ;;  %v1231_v39 = vadd.f32 %v8971_v25, %v8569_v52  ;;  %v1709_v30 = vmul.f32 %v9072_v49, %v9072_v49  ;;  %v1508_v4 = vmul.f32 0.5, %v7480_v55 }
 0x1e7   : > { %7489 = vtanh.f32 %v1385_v50  ;;  %v1320_v23 = vadd.f32 %v8973_v47, %v8565_v56  ;;  %v1710_v25 = vmul.f32 %v9076_v12, %v9076_v12  ;;  %v1509_v14 = vmul.f32 0.5, %v7482_v41 }
 0x1e8   : > { %v9047_v45 = vpop.f32.mrf.mxu2  ;;  %v9049_v38 = vpop.f32.mrf.mxu3  ;;  %7491 = vtanh.f32 %v1386_v7  ;;  %v9101_v53 = vor.u32 %v7206_v28, %v6731_v44  ;;  %v1616_v43 = vadd.f32 %v1615_v16, %v9072_v49  ;;  %v1653_v47 = vadd.f32 %v1652_v20, %v9076_v12 }
 0x1e9   : > { %v7486_v63 = vpop.eup %7485  ;;  %v1510_v34 = vmul.f32 0.5, %v7484_v37  ;;  %7493 = vtanh.f32 %v1387_v11  ;;  %v1711_v26 = vmul.f32 %v9083_v59, %v9083_v59  ;;  %v1712_v51 = vmul.f32 %v9085_v3, %v9085_v3 }
 0x1ea   : > { %v1388_v0 = vmul.f32 0.5, %v1231_v39  ;;  %v1233_v50 = vadd.f32 %v9017_v6, %v8569_v52  ;;  %7318 = vmatpush.bf16.msrb.mxu2 %v9101_v53  ;;  %2069 = vmatpush.bf16.msrb.mxu0 %v9101_v53  ;;  %v9113_v7 = vadd.f32 0.5, %v1508_v4  ;;  %v1511_v55 = vmul.f32 0.5, %v7486_v63 }
 0x1eb   : > { %v1389_v16 = vmul.f32 0.5, %v1320_v23  ;;  %v1322_v41 = vadd.f32 %v9019_v9, %v8565_v56  ;;  %v1756_v11 = vadd.f32 %v1755_v57, %v1709_v30  ;;  %v1793_v37 = vadd.f32 %v1792_v17, %v1710_v25  ;;  %v6795_v25 = vld [vmem:[%s14366_s5 + $0xa0] sm:$0xf] }
 0x1ec   : > { %v7488_v20 = vpop.eup %7487  ;;  %v9117_v44 = vadd.f32 0.5, %v1509_v14  ;;  %v1617_v6 = vadd.f32 %v1616_v43, %v9083_v59  ;;  %v1654_v46 = vadd.f32 %v1653_v47, %v9085_v3  ;;  %v9121_v8 = vadd.f32 0.5, %v1510_v34  ;;  %v7222_v14 = vld [vmem:[%s14366_s5 + $0xa4] sm:$0xf0] }
 0x1ed   : > { %v7490_v13 = vpop.eup %7489  ;;  %v1757_v63 = vadd.f32 %v1756_v11, %v1711_v26  ;;  %v1794_v23 = vadd.f32 %v1793_v37, %v1712_v51  ;;  %7495 = vtanh.f32 %v1388_v0  ;;  %v1390_v58 = vmul.f32 0.5, %v1233_v50 }
 0x1ee   : > { %v7492_v4 = vpop.eup %7491  ;;  %v1713_v57 = vmul.f32 %v9113_v7, %v9113_v7  ;;  %v9125_v17 = vadd.f32 0.5, %v1511_v55  ;;  %7497 = vtanh.f32 %v1389_v16  ;;  %v1391_v30 = vmul.f32 0.5, %v1322_v41 }
 0x1ef   : > { %v7494_v9 = vpop.eup %7493  ;;  %v1714_v43 = vmul.f32 %v9117_v44, %v9117_v44  ;;  %v1512_v47 = vmul.f32 0.5, %v7488_v20  ;;  %v1236_v34 = vadd.f32 %v9047_v45, %v8569_v52  ;;  %v9137_v26 = vor.u32 %v7222_v14, %v6795_v25 }
 0x1f0   : > { %v9078_v21 = vpop.f32.mrf.mxu2  ;;  %v9080_v31 = vpop.f32.mrf.mxu3  ;;  %14744 = vst [vmem:[#allocation32_spill] sm:$0xff] %v9125_v17  ;;  %v1618_v51 = vadd.f32 %v1617_v6, %v9113_v7  ;;  %v1715_v0 = vmul.f32 %v9121_v8, %v9121_v8  ;;  %v1513_v50 = vmul.f32 0.5, %v7490_v13  ;;  %v1325_v55 = vadd.f32 %v9049_v38, %v8565_v56 }
 0x1f1   : > { %v1514_v16 = vmul.f32 0.5, %v7492_v4  ;;  %v1515_v41 = vmul.f32 0.5, %v7494_v9  ;;  %7499 = vtanh.f32 %v1390_v58  ;;  %v1238_v20 = vadd.f32 %v9078_v21, %v8569_v52  ;;  %7326 = vmatpush.bf16.msrb.mxu3 %v9137_v26  ;;  %2082 = vmatpush.bf16.msrb.mxu1 %v9137_v26 }
 0x1f2   : > { %v1655_v45 = vadd.f32 %v1654_v46, %v9117_v44  ;;  %v1716_v11 = vmul.f32 %v9125_v17, %v9125_v17  ;;  %7501 = vtanh.f32 %v1391_v30  ;;  %v1327_v13 = vadd.f32 %v9080_v31, %v8565_v56 }
 0x1f3   : > { %v7496_v38 = vpop.eup %7495  ;;  %v1758_v37 = vadd.f32 %v1757_v63, %v1713_v57  ;;  %v1795_v6 = vadd.f32 %v1794_v23, %v1714_v43  ;;  %v9153_v58 = vadd.f32 0.5, %v1512_v47  ;;  %v1392_v4 = vmul.f32 0.5, %v1236_v34 }
 0x1f4   : > { %v7498_v25 = vpop.eup %7497  ;;  %v1619_v14 = vadd.f32 %v1618_v51, %v9121_v8  ;;  %v1656_v46 = vadd.f32 %v1655_v45, %v9125_v17  ;;  %v9157_v32 = vadd.f32 0.5, %v1513_v50  ;;  %v1393_v2 = vmul.f32 0.5, %v1325_v55 }
 0x1f5   : > { %14745 = vst [vmem:[#allocation33_spill] sm:$0xff] %v9153_v58  ;;  %v1759_v30 = vadd.f32 %v1758_v37, %v1715_v0  ;;  %v9159_v60 = vadd.f32 0.5, %v1514_v16  ;;  %v9161_v31 = vadd.f32 0.5, %v1515_v41  ;;  %v1394_v63 = vmul.f32 0.5, %v1238_v20  ;;  %v7204_v41 = vld [vmem:[%s14366_s5 + $0x14] sm:$0xf0] }
 0x1f6   : > { %14746 = vst [vmem:[#allocation34_spill] sm:$0xff] %v9157_v32  ;;  %v1796_v23 = vadd.f32 %v1795_v6, %v1716_v11  ;;  %v1516_v57 = vmul.f32 0.5, %v7496_v38  ;;  %v1395_v43 = vmul.f32 0.5, %v1327_v13  ;;  %v1620_v35 = vadd.f32 %v1619_v14, %v9153_v58  ;;  %v7220_v13 = vld [vmem:[%s14366_s5 + $0x94] sm:$0xf0] }
 0x1f7   : > { %14747 = vst [vmem:[#allocation35_spill] sm:$0xff] %v9159_v60  ;;  %v7500_v34 = vpop.eup %7499  ;;  %v1517_v51 = vmul.f32 0.5, %v7498_v25  ;;  %7503 = vtanh.f32 %v1392_v4  ;;  %v1717_v0 = vmul.f32 %v9153_v58, %v9153_v58  ;;  %v1657_v55 = vadd.f32 %v1656_v46, %v9157_v32 }
 0x1f8   : > { %v1240_v39 = vpop.f32.mrf.mxu2  ;;  %v1329_v28 = vpop.f32.mrf.mxu3  ;;  %14748 = vst [vmem:[#allocation36_spill] sm:$0xff] %v9161_v31  ;;  %v1718_v16 = vmul.f32 %v9157_v32, %v9157_v32  ;;  %7505 = vtanh.f32 %v1393_v2  ;;  %v1720_v20 = vmul.f32 %v9161_v31, %v9161_v31  ;;  %v6787_v2 = vld [vmem:[%s14366_s5 + $0x90] sm:$0xf]  ;;  %v9189_v38 = vadd.f32 0.5, %v1516_v57 }
 0x1f9   : > { %v1241_v47 = vadd.f32 %v1240_v39, %v8569_v52  ;;  %v1330_v50 = vadd.f32 %v1329_v28, %v8565_v56  ;;  %v7502_v45 = vpop.eup %7501  ;;  %v6723_v39 = vld [vmem:[%s14366_s5 + $0x10] sm:$0xf]  ;;  %v1719_v28 = vmul.f32 %v9159_v60, %v9159_v60  ;;  %7507 = vtanh.f32 %v1394_v63 }
 0x1fa   : > { %v9181_v11 = vor.u32 %v7204_v41, %v6723_v39  ;;  %14749 = vst [vmem:[#allocation37_spill] sm:$0xff] %v9189_v38  ;;  %7509 = vtanh.f32 %v1395_v43  ;;  %v9191_v6 = vor.u32 %v7220_v13, %v6787_v2  ;;  %v9193_v4 = vadd.f32 0.5, %v1517_v51  ;;  %v6715_v43 = vld [vmem:[%s14366_s5] sm:$0xf]  ;;  %v7231_v13 = vld [vmem:[%s14366_s5 + $0xf4] sm:$0xf] }
 0x1fb   : > { %v1396_v37 = vmul.f32 0.5, %v1241_v47  ;;  %v1518_v25 = vmul.f32 0.5, %v7500_v34  ;;  %v1519_v14 = vmul.f32 0.5, %v7502_v45  ;;  %v1397_v46 = vmul.f32 0.5, %v1330_v50  ;;  %v7202_v47 = vld [vmem:[%s14366_s5 + $0x4] sm:$0xf0] }
 0x1fc   : > { %14750 = vst [vmem:[#allocation38_spill] sm:$0xff] %v9193_v4  ;;  %2070 = vmatpush.bf16.msrb.mxu0 %v9181_v11  ;;  %7319 = vmatpush.bf16.msrb.mxu2 %v9181_v11  ;;  %v1760_v41 = vadd.f32 %v1759_v30, %v1717_v0  ;;  %v1797_v32 = vadd.f32 %v1796_v23, %v1718_v16  ;;  %v6779_v34 = vld [vmem:[%s14366_s5 + $0x80] sm:$0xf]  ;;  %v7218_v45 = vld [vmem:[%s14366_s5 + $0x84] sm:$0xf0] }
 0x1fd   : > { %2083 = vmatpush.bf16.msrb.mxu1 %v9191_v6  ;;  %v7504_v51 = vpop.eup %7503  ;;  %v1621_v30 = vadd.f32 %v1620_v35, %v9159_v60  ;;  %v1658_v23 = vadd.f32 %v1657_v55, %v9161_v31  ;;  %7327 = vmatpush.bf16.msrb.mxu3 %v9191_v6  ;;  %v9212_v50 = vor.u32 %v7202_v47, %v6715_v43  ;;  %v7215_v0 = vld [vmem:[%s14366_s5 + $0x74] sm:$0xf]  ;;  %v6773_v35 = vld [vmem:[%s14366_s5 + $0x78] sm:$0xf0]  ;;  %7511 = vtanh.f32 %v1396_v37 }
 0x1fe   : > { %v7506_v16 = vpop.eup %7505  ;;  %v1761_v55 = vadd.f32 %v1760_v41, %v1719_v28  ;;  %v9224_v2 = vor.u32 %v7218_v45, %v6779_v34  ;;  %v6837_v43 = vld [vmem:[%s14366_s5 + $0xf8] sm:$0xf0]  ;;  %v1798_v31 = vadd.f32 %v1797_v32, %v1720_v20  ;;  %7513 = vtanh.f32 %v1397_v46 }
 0x1ff   : > { %v7508_v47 = vpop.eup %7507  ;;  %v6776_v36 = vor.u32 %v7215_v0, %v6773_v35  ;;  %v6840_v28 = vor.u32 %v7231_v13, %v6837_v43  ;;  %v9235_v41 = vadd.f32 0.5, %v1518_v25  ;;  %v1721_v32 = vmul.f32 %v9189_v38, %v9189_v38  ;;  %v7213_v25 = vld [vmem:[%s14366_s5 + $0x64] sm:$0xf] }
 0x200   : > { %v1242_v21 = vpop.f32.mrf.mxu2  ;;  %v1331_v9 = vpop.f32.mrf.mxu3  ;;  %2071 = vmatpush.bf16.msrb.mxu0 %v9212_v50  ;;  %7320 = vmatpush.bf16.msrb.mxu2 %v9212_v50  ;;  %v1659_v20 = vadd.f32 %v1658_v23, %v9193_v4  ;;  %v9242_v46 = vadd.f32 0.5, %v1519_v14  ;;  %v7229_v14 = vld [vmem:[%s14366_s5 + $0xe4] sm:$0xf]  ;;  %v6829_v23 = vld [vmem:[%s14366_s5 + $0xe8] sm:$0xf0]  ;;  %v1522_v43 = vmul.f32 0.5, %v7508_v47 }
 0x201   : > { %v1243_v57 = vadd.f32 %v1242_v21, %v8569_v52  ;;  %v1332_v21 = vadd.f32 %v1331_v9, %v8565_v56  ;;  %v7510_v37 = vpop.eup %7509  ;;  %14751 = vst [vmem:[#allocation39_spill] sm:$0xff] %v9235_v41  ;;  %2084 = vmatpush.bf16.msrb.mxu1 %v9224_v2  ;;  %7328 = vmatpush.bf16.msrb.mxu3 %v9224_v2 }
 0x202   : > { %14752 = vst [vmem:[#allocation40_spill] sm:$0xff] %v9242_v46  ;;  %v1762_v1 = vadd.f32 %v1761_v55, %v1721_v32  ;;  %v1723_v33 = vmul.f32 %v9235_v41, %v9235_v41 }
 0x203   : > { %v1398_v34 = vmul.f32 0.5, %v1243_v57  ;;  %v1399_v0 = vmul.f32 0.5, %v1332_v21  ;;  %v1722_v57 = vmul.f32 %v9193_v4, %v9193_v4  ;;  %v1521_v21 = vmul.f32 0.5, %v7506_v16  ;;  %v7211_v16 = vld [vmem:[%s14366_s5 + $0x54] sm:$0xf] }
 0x204   : > { %2090 = vmatpush.bf16.msra.mxu0 %v6776_v36  ;;  %2463 = vmatpush.bf16.msra.mxu2 %v6776_v36  ;;  %v6832_v4 = vor.u32 %v7229_v14, %v6829_v23  ;;  %v1724_v36 = vmul.f32 %v9242_v46, %v9242_v46  ;;  %v1660_v23 = vadd.f32 %v1659_v20, %v9242_v46 }
 0x205   : > { %2103 = vmatpush.bf16.msra.mxu1 %v6840_v28  ;;  %2552 = vmatpush.bf16.msra.mxu3 %v6840_v28  ;;  %7515 = vtanh.f32 %v1398_v34  ;;  %v1799_v34 = vadd.f32 %v1798_v31, %v1722_v57  ;;  %v7209_v31 = vld [vmem:[%s14366_s5 + $0x44] sm:$0xf] }
 0x206   : > { %7517 = vtanh.f32 %v1399_v0 }
 0x207   : > { %v1800_v20 = vadd.f32 %v1799_v34, %v1724_v36 }
 0x208   : > { %v1245_v63 = vpop.f32.mrf.mxu2  ;;  %v1334_v39 = vpop.f32.mrf.mxu3 }
 0x209   : > { %v1246_v9 = vadd.f32 %v1245_v63, %v8569_v52  ;;  %v1622_v63 = vadd.f32 %v1621_v30, %v9189_v38  ;;  %v1335_v45 = vadd.f32 %v1334_v39, %v8565_v56  ;;  %v6765_v39 = vld [vmem:[%s14366_s5 + $0x68] sm:$0xf0]  ;;  %v1520_v30 = vmul.f32 0.5, %v7504_v51  ;;  %v7512_v51 = vpop.eup %7511  ;;  %2104 = vmatpush.bf16.msra.mxu1 %v6832_v4  ;;  %2553 = vmatpush.bf16.msra.mxu3 %v6832_v4 }
 0x20a   : > { %v6768_v13 = vor.u32 %v7213_v25, %v6765_v39  ;;  %v1523_v38 = vmul.f32 0.5, %v7510_v37  ;;  %v7514_v58 = vpop.eup %7513  ;;  %v6821_v37 = vld [vmem:[%s14366_s5 + $0xd8] sm:$0xf0]  ;;  %v6749_v4 = vld [vmem:[%s14366_s5 + $0x48] sm:$0xf0] }
 0x20b   : > { %v1400_v35 = vmul.f32 0.5, %v1246_v9  ;;  %v1401_v9 = vmul.f32 0.5, %v1335_v45  ;;  %v9274_v55 = vadd.f32 0.5, %v1520_v30  ;;  %v9279_v45 = vadd.f32 0.5, %v1521_v21 }
 0x20c   : > { %2091 = vmatpush.bf16.msra.mxu0 %v6768_v13  ;;  %2464 = vmatpush.bf16.msra.mxu2 %v6768_v13  ;;  %v1623_v14 = vadd.f32 %v1622_v63, %v9235_v41  ;;  %v1524_v30 = vmul.f32 0.5, %v7512_v51  ;;  %v1525_v17 = vmul.f32 0.5, %v7514_v58  ;;  %v7516_v63 = vpop.eup %7515 }
 0x20d   : > { %14753 = vst [vmem:[#allocation41_spill] sm:$0xff] %v9274_v55  ;;  %7519 = vtanh.f32 %v1400_v35  ;;  %v1763_v35 = vadd.f32 %v1762_v1, %v1723_v33  ;;  %v6752_v33 = vor.u32 %v7209_v31, %v6749_v4  ;;  %v7225_v1 = vld [vmem:[%s14366_s5 + $0xc4] sm:$0xf]  ;;  %v7518_v57 = vpop.eup %7517  ;;  %v1725_v13 = vmul.f32 %v9274_v55, %v9274_v55  ;;  %v6805_v4 = vld [vmem:[%s14366_s5 + $0xb8] sm:$0xf0] }
 0x20e   : > { %14754 = vst [vmem:[#allocation42_spill] sm:$0xff] %v9279_v45  ;;  %7521 = vtanh.f32 %v1401_v9  ;;  %v1624_v58 = vadd.f32 %v1623_v14, %v9274_v55  ;;  %v1726_v21 = vmul.f32 %v9279_v45, %v9279_v45  ;;  %v9304_v36 = vadd.f32 0.5, %v1524_v30 }
 0x20f   : > { %v1526_v14 = vmul.f32 0.5, %v7516_v63 }
 0x210   : > { %v1247_v22 = vpop.f32.mrf.mxu2  ;;  %v1336_v60 = vpop.f32.mrf.mxu3  ;;  %v1801_v46 = vadd.f32 %v1800_v20, %v1726_v21  ;;  %v6733_v20 = vld [vmem:[%s14366_s5 + $0x28] sm:$0xf0] }
 0x211   : > { %v1248_v25 = vadd.f32 %v1247_v22, %v8569_v52  ;;  %v1337_v39 = vadd.f32 %v1336_v60, %v8565_v56  ;;  %v6757_v22 = vld [vmem:[%s14366_s5 + $0x58] sm:$0xf0]  ;;  %v7227_v60 = vld [vmem:[%s14366_s5 + $0xd4] sm:$0xf] }
 0x212   : > { %v6760_v28 = vor.u32 %v7211_v16, %v6757_v22  ;;  %v6824_v0 = vor.u32 %v7227_v60, %v6821_v37  ;;  %v9285_v16 = vadd.f32 0.5, %v1523_v38  ;;  %v6813_v38 = vld [vmem:[%s14366_s5 + $0xc8] sm:$0xf0]  ;;  %v9306_v22 = vadd.f32 0.5, %v1525_v17  ;;  %v6741_v17 = vld [vmem:[%s14366_s5 + $0x38] sm:$0xf0] }
 0x213   : > { %v1402_v47 = vmul.f32 0.5, %v1248_v25  ;;  %v1403_v32 = vmul.f32 0.5, %v1337_v39  ;;  %v9283_v25 = vadd.f32 0.5, %v1522_v43  ;;  %v6816_v9 = vor.u32 %v7225_v1, %v6813_v38  ;;  %v7520_v39 = vpop.eup %7519 }
 0x214   : > { %2092 = vmatpush.bf16.msra.mxu0 %v6760_v28  ;;  %2105 = vmatpush.bf16.msra.mxu1 %v6824_v0  ;;  %14755 = vst [vmem:[#allocation43_spill] sm:$0xff] %v9306_v22  ;;  %v1728_v34 = vmul.f32 %v9285_v16, %v9285_v16  ;;  %v7522_v1 = vpop.eup %7521  ;;  %v1764_v38 = vadd.f32 %v1763_v35, %v1725_v13  ;;  %v7205_v35 = vld [vmem:[%s14366_s5 + $0x24] sm:$0xf]  ;;  %v9342_v13 = vadd.f32 0.5, %v1526_v14 }
 0x215   : > { %7523 = vtanh.f32 %v1402_v47  ;;  %2465 = vmatpush.bf16.msra.mxu2 %v6760_v28  ;;  %2554 = vmatpush.bf16.msra.mxu3 %v6824_v0  ;;  %v1661_v28 = vadd.f32 %v1660_v23, %v9279_v45  ;;  %v1727_v37 = vmul.f32 %v9283_v25, %v9283_v25  ;;  %v7223_v0 = vld [vmem:[%s14366_s5 + $0xb4] sm:$0xf]  ;;  %v1625_v41 = vadd.f32 %v1624_v58, %v9283_v25 }
 0x216   : > { %7525 = vtanh.f32 %v1403_v32  ;;  %v7207_v32 = vld [vmem:[%s14366_s5 + $0x34] sm:$0xf]  ;;  %v6808_v45 = vor.u32 %v7223_v0, %v6805_v4  ;;  %v1802_v58 = vadd.f32 %v1801_v46, %v1728_v34  ;;  %v6736_v21 = vor.u32 %v7205_v35, %v6733_v20 }
 0x217   : > { %v6744_v31 = vor.u32 %v7207_v32, %v6741_v17  ;;  %v1529_v46 = vmul.f32 0.5, %v7522_v1  ;;  %v7203_v1 = vld [vmem:[%s14366_s5 + $0x14] sm:$0xf] }
 0x218   : > { %v1250_v43 = vpop.f32.mrf.mxu2  ;;  %v1339_v51 = vpop.f32.mrf.mxu3  ;;  %2093 = vmatpush.bf16.msra.mxu0 %v6752_v33  ;;  %2106 = vmatpush.bf16.msra.mxu1 %v6816_v9 }
 0x219   : > { %v1251_v60 = vadd.f32 %v1250_v43, %v8569_v52  ;;  %v1340_v47 = vadd.f32 %v1339_v51, %v8565_v56  ;;  %2466 = vmatpush.bf16.msra.mxu2 %v6752_v33  ;;  %v1527_v43 = vmul.f32 0.5, %v7518_v57  ;;  %v1528_v51 = vmul.f32 0.5, %v7520_v39  ;;  %2555 = vmatpush.bf16.msra.mxu3 %v6816_v9  ;;  %v7221_v9 = vld [vmem:[%s14366_s5 + $0xa4] sm:$0xf]  ;;  %v6797_v39 = vld [vmem:[%s14366_s5 + $0xa8] sm:$0xf0] }
 0x21a   : > { %v1729_v33 = vmul.f32 %v9304_v36, %v9304_v36  ;;  %v1730_v57 = vmul.f32 %v9306_v22, %v9306_v22  ;;  %v6800_v17 = vor.u32 %v7221_v9, %v6797_v39 }
 0x21b   : > { %v1404_v23 = vmul.f32 0.5, %v1251_v60  ;;  %v1405_v30 = vmul.f32 0.5, %v1340_v47  ;;  %v7524_v55 = vpop.eup %7523  ;;  %v1765_v60 = vadd.f32 %v1764_v38, %v1727_v37  ;;  %v1662_v47 = vadd.f32 %v1661_v28, %v9285_v16 }
 0x21c   : > { %v7526_v63 = vpop.eup %7525  ;;  %2094 = vmatpush.bf16.msra.mxu0 %v6744_v31  ;;  %2107 = vmatpush.bf16.msra.mxu1 %v6808_v45  ;;  %v9350_v28 = vadd.f32 0.5, %v1527_v43  ;;  %v9352_v37 = vadd.f32 0.5, %v1528_v51  ;;  %v1530_v0 = vmul.f32 0.5, %v7524_v55  ;;  %v6725_v55 = vld [vmem:[%s14366_s5 + $0x18] sm:$0xf0] }
 0x21d   : > { %7527 = vtanh.f32 %v1404_v23  ;;  %2467 = vmatpush.bf16.msra.mxu2 %v6744_v31  ;;  %2556 = vmatpush.bf16.msra.mxu3 %v6808_v45  ;;  %v1531_v14 = vmul.f32 0.5, %v7526_v63  ;;  %v1626_v31 = vadd.f32 %v1625_v41, %v9304_v36  ;;  %v1766_v4 = vadd.f32 %v1765_v60, %v1729_v33  ;;  %v6789_v63 = vld [vmem:[%s14366_s5 + $0x98] sm:$0xf0]  ;;  %v9374_v60 = vld [vmem:[%s598_s0] sm:$0xf]  ;;  %s613_s0 = scalar_lea.vmem %s14374_s13, %s9329_s17 }
 0x21e   : > { %7529 = vtanh.f32 %v1405_v30  ;;  %14756 = vst [vmem:[#allocation44_spill] sm:$0xff] %v9350_v28  ;;  %v1663_v38 = vadd.f32 %v1662_v47, %v9306_v22  ;;  %v1803_v45 = vadd.f32 %v1802_v58, %v1730_v57  ;;  %v6728_v51 = vor.u32 %v7203_v1, %v6725_v55  ;;  %v7217_v55 = vld [vmem:[%s14366_s5 + $0x84] sm:$0xf] }
 0x21f   : > { %14757 = vst [vmem:[#allocation45_spill] sm:$0xff] %v9352_v37  ;;  %v1884_v20 = vperm.slane %v9374_v60, 1  ;;  %v1885_v9 = vperm.slane %v9374_v60, 3  ;;  %v1731_v58 = vmul.f32 %v9342_v13, %v9342_v13  ;;  %v9380_v57 = vadd.f32 0.5, %v1529_v46  ;;  %v6717_v46 = vld [vmem:[%s14366_s5 + $0x8] sm:$0xf0] }
 0x220   : > { %v1252_v34 = vpop.f32.mrf.mxu2  ;;  %v1341_v32 = vpop.f32.mrf.mxu3  ;;  %2095 = vmatpush.bf16.msra.mxu0 %v6736_v21  ;;  %2108 = vmatpush.bf16.msra.mxu1 %v6800_v17 }
 0x221   : > { %v1253_v23 = vadd.f32 %v1252_v34, %v8569_v52  ;;  %v1342_v30 = vadd.f32 %v1341_v32, %v8565_v56  ;;  %v7219_v52 = vld [vmem:[%s14366_s5 + $0x94] sm:$0xf]  ;;  %2468 = vmatpush.bf16.msra.mxu2 %v6736_v21  ;;  %2557 = vmatpush.bf16.msra.mxu3 %v6800_v17  ;;  %14758 = vst [vmem:[#allocation46_spill] sm:$0xff] %v9380_v57  ;;  %v9382_v34 = vadd.f32 0.5, %v1530_v0  ;;  %v7201_v17 = vld [vmem:[%s14366_s5 + $0x4] sm:$0xf] }
 0x222   : > { %v6792_v35 = vor.u32 %v7219_v52, %v6789_v63  ;;  %v9384_v21 = vpack.c.bf16 %v1884_v20, %v1884_v20  ;;  %v9386_v32 = vpack.c.bf16 %v1885_v9, %v1885_v9  ;;  %v1732_v0 = vmul.f32 %v9350_v28, %v9350_v28  ;;  %v6781_v52 = vld [vmem:[%s14366_s5 + $0x88] sm:$0xf0] }
 0x223   : > { %v7528_v56 = vpop.eup %7527  ;;  %v1406_v41 = vmul.f32 0.5, %v1253_v23  ;;  %v1407_v43 = vmul.f32 0.5, %v1342_v30  ;;  %14759 = vst [vmem:[#allocation47_spill] sm:$0xff] %v9382_v34  ;;  %v1627_v23 = vadd.f32 %v1626_v31, %v9342_v13  ;;  %v9397_v30 = vadd.f32 0.5, %v1531_v14 }
 0x224   : > { %v7530_v47 = vpop.eup %7529  ;;  %v1532_v33 = vmul.f32 0.5, %v7528_v56  ;;  %2096 = vmatpush.bf16.msra.mxu0 %v6728_v51  ;;  %2109 = vmatpush.bf16.msra.mxu1 %v6792_v35  ;;  %v6720_v1 = vor.u32 %v7201_v17, %v6717_v46  ;;  %v1733_v56 = vmul.f32 %v9352_v37, %v9352_v37  ;;  %v1892_v31 = vshrl.u32 %v9384_v21, 16 }
 0x225   : > { %v1533_v39 = vmul.f32 0.5, %v7530_v47  ;;  %7531 = vtanh.f32 %v1406_v41  ;;  %14760 = vst [vmem:[#allocation48_spill] sm:$0xff] %v9397_v30  ;;  %2469 = vmatpush.bf16.msra.mxu2 %v6728_v51  ;;  %v14458_v14 = vshrl.u32 %v9386_v32, 16  ;;  %2558 = vmatpush.bf16.msra.mxu3 %v6792_v35  ;;  %v1734_v63 = vmul.f32 %v9380_v57, %v9380_v57 }
 0x226   : > { %7533 = vtanh.f32 %v1407_v43  ;;  %v9407_v41 = vadd.f32 0.5, %v1532_v33  ;;  %v1664_v43 = vadd.f32 %v1663_v38, %v9350_v28  ;;  %v6784_v20 = vor.u32 %v7217_v55, %v6781_v52  ;;  %2072 = vmatmul.bf16.vlgmr.msrb.gmra.mxu0 %v1892_v31 }
 0x227   : > { %v9414_v47 = vadd.f32 0.5, %v1533_v39  ;;  %v1767_v9 = vadd.f32 %v1766_v4, %v1731_v58  ;;  %v1628_v51 = vadd.f32 %v1627_v23, %v9352_v37  ;;  %v1735_v33 = vmul.f32 %v9382_v34, %v9382_v34  ;;  %2085 = vmatmul.bf16.vlgmr.msrb.gmra.mxu1 %v14458_v14 }
 0x228   : > { %14761 = vst [vmem:[#allocation49_spill] sm:$0xff] %v9407_v41  ;;  %v1804_v38 = vadd.f32 %v1803_v45, %v1732_v0  ;;  %v1665_v17 = vadd.f32 %v1664_v43, %v9380_v57  ;;  %v1736_v39 = vmul.f32 %v9397_v30, %v9397_v30  ;;  %2097 = vmatpush.bf16.msra.mxu0 %v6720_v1 }
 0x229   : > { %14762 = vst [vmem:[#allocation50_spill] sm:$0xff] %v9414_v47  ;;  %2110 = vmatpush.bf16.msra.mxu1 %v6784_v20  ;;  %v1768_v58 = vadd.f32 %v1767_v9, %v1733_v56  ;;  %v1629_v46 = vadd.f32 %v1628_v51, %v9382_v34  ;;  %v1737_v23 = vmul.f32 %v9407_v41, %v9407_v41 }
 0x22a   : > { %v1805_v45 = vadd.f32 %v1804_v38, %v1734_v63  ;;  %v1666_v0 = vadd.f32 %v1665_v17, %v9397_v30  ;;  %v1738_v52 = vmul.f32 %v9414_v47, %v9414_v47  ;;  %2470 = vmatpush.bf16.msra.mxu2 %v6720_v1  ;;  %2559 = vmatpush.bf16.msra.mxu3 %v6784_v20  ;;  %v14799_v30 = vld [vmem:[#allocation26_spill] sm:$0xff] }
 0x22b   : > { %v7532_v35 = vpop.eup %7531  ;;  %v1769_v56 = vadd.f32 %v1768_v58, %v1735_v33  ;;  %v1630_v9 = vadd.f32 %v1629_v46, %v9407_v41 }
 0x22c   : > { %v7534_v4 = vpop.eup %7533  ;;  %v1534_v55 = vmul.f32 0.5, %v7532_v35  ;;  %2285 = vmatpush.bf16.msrb.mxu0 %v8635_v42  ;;  %v1806_v14 = vadd.f32 %v1805_v45, %v1736_v39  ;;  %v1667_v35 = vadd.f32 %v1666_v0, %v9414_v47  ;;  %v14796_v47 = vld [vmem:[#allocation21_spill] sm:$0xff] }
 0x22d   : > { %2374 = vmatpush.bf16.msrb.mxu1 %v8657_v48  ;;  %v1535_v43 = vmul.f32 0.5, %v7534_v4  ;;  %v1770_v48 = vadd.f32 %v1769_v56, %v1737_v23 }
 0x22e   : > { %v9435_v51 = vadd.f32 0.5, %v1534_v55  ;;  %v1807_v1 = vadd.f32 %v1806_v14, %v1738_v52 }
 0x22f   : > { %v9438_v42 = vadd.f32 0.5, %v1535_v43 }
 0x230   : > { %14763 = vst [vmem:[#allocation51_spill] sm:$0xff] %v9435_v51  ;;  %v1631_v63 = vadd.f32 %v1630_v9, %v9435_v51  ;;  %v1739_v38 = vmul.f32 %v9435_v51, %v9435_v51  ;;  %2286 = vmatpush.bf16.msrb.mxu0 %v8693_v54  ;;  %v14797_v51 = vld [vmem:[#allocation23_spill] sm:$0xff] }
 0x231   : > { %14764 = vst [vmem:[#allocation52_spill] sm:$0xff] %v9438_v42  ;;  %2375 = vmatpush.bf16.msrb.mxu1 %v8715_v19  ;;  %v1668_v20 = vadd.f32 %v1667_v35, %v9438_v42  ;;  %v1740_v33 = vmul.f32 %v9438_v42, %v9438_v42 }
 0x232   : > { %v1632_v17 = vrot.slane %v1631_v63, 4  ;;  %v1771_v39 = vadd.f32 %v1770_v48, %v1739_v38 }
 0x233   : > { %v1669_v4 = vrot.slane %v1668_v20, 4  ;;  %v1808_v58 = vadd.f32 %v1807_v1, %v1740_v33 }
 0x234   : > { %v1633_v46 = vadd.f32 %v1632_v17, %v1631_v63  ;;  %v1772_v23 = vrot.slane %v1771_v39, 4  ;;  %2287 = vmatpush.bf16.msrb.mxu0 %v8749_v61  ;;  %v14765_v61 = vshrl.u32 %v9386_v32, 16 }
 0x235   : > { %2376 = vmatpush.bf16.msrb.mxu1 %v8767_v24  ;;  %v1670_v55 = vadd.f32 %v1669_v4, %v1668_v20  ;;  %v1809_v54 = vrot.slane %v1808_v58, 4 }
 0x236   : > { %v1634_v45 = vrot.slane %v1633_v46, 2  ;;  %v1773_v19 = vadd.f32 %v1772_v23, %v1771_v39  ;;  %2098 = vmatmul.bf16.vlgmr.msra.gmra.mxu0 %v1892_v31 }
 0x237   : > { %v1671_v14 = vrot.slane %v1670_v55, 2  ;;  %v1810_v0 = vadd.f32 %v1809_v54, %v1808_v58  ;;  %2111 = vmatmul.bf16.vlgmr.msra.gmra.mxu1 %v14765_v61  ;;  %v14767_v61 = vld [vmem:[#allocation4_spill] sm:$0xff] }
 0x238   : > { %v1635_v52 = vadd.f32 %v1634_v45, %v1633_v46  ;;  %v1774_v43 = vrot.slane %v1773_v19, 2  ;;  %2288 = vmatpush.bf16.msrb.mxu0 %v8811_v40 }
 0x239   : > { %2377 = vmatpush.bf16.msrb.mxu1 %v8849_v15  ;;  %v1672_v56 = vadd.f32 %v1671_v14, %v1670_v55  ;;  %v1811_v9 = vrot.slane %v1810_v0, 2  ;;  %v14766_v14 = vld [vmem:[#allocation3_spill] sm:$0xff]  ;;  %v14803_v55 = vld [vmem:[#allocation30_spill] sm:$0xff] }
 0x23a   : > { %v1636_v35 = vrot.slane %v1635_v52, 1  ;;  %v1775_v48 = vadd.f32 %v1774_v43, %v1773_v19  ;;  %v14777_v43 = vld [vmem:[#allocation11_spill] sm:$0xff] }
 0x23b   : > { %v1673_v24 = vrot.slane %v1672_v56, 1  ;;  %v1812_v63 = vadd.f32 %v1811_v9, %v1810_v0  ;;  %v14788_v9 = vld [vmem:[#allocation16_spill] sm:$0xff]  ;;  %v14789_v0 = vld [vmem:[#allocation18_spill] sm:$0xff] }
 0x23c   : > { %v1637_v38 = vadd.f32 %v1636_v35, %v1635_v52  ;;  %v1776_v1 = vrot.slane %v1775_v48, 1  ;;  %2289 = vmatpush.bf16.msrb.mxu0 %v8959_v29  ;;  %v14787_v35 = vld [vmem:[#allocation40_spill] sm:$0xff] }
 0x23d   : > { %2378 = vmatpush.bf16.msrb.mxu1 %v8997_v18  ;;  %v1674_v40 = vadd.f32 %v1673_v24, %v1672_v56  ;;  %v1813_v15 = vrot.slane %v1812_v63, 1  ;;  %v14772_v56 = vld [vmem:[#allocation8_spill] sm:$0xff] }
 0x23e   : > { %v9459_v20 = vmul.f32 %v1637_v38, %v8474_v10  ;;  %v1777_v33 = vadd.f32 %v1776_v1, %v1775_v48  ;;  %v14768_v38 = vld [vmem:[#allocation6_spill] sm:$0xff]  ;;  %v14779_v1 = vld [vmem:[#allocation36_spill] sm:$0xff] }
 0x23f   : > { %v9462_v21 = vmul.f32 %v1674_v40, %v8474_v10  ;;  %v1814_v31 = vadd.f32 %v1813_v15, %v1812_v63  ;;  %v14771_v15 = vld [vmem:[#allocation32_spill] sm:$0xff] }
 0x240   : > { %v1815_v32 = vmul.f32 %v1777_v33, %v8474_v10  ;;  %2290 = vmatpush.bf16.msrb.mxu0 %v9101_v53  ;;  %v1817_v18 = vmul.f32 %v9459_v20, %v9459_v20  ;;  %v14807_v37 = vsub.f32 %v8799_v5, %v9459_v20  ;;  %v14808_v28 = vsub.f32 %v9072_v49, %v9459_v20 }
 0x241   : > { %v1816_v17 = vmul.f32 %v1814_v31, %v8474_v10  ;;  %v1818_v29 = vmul.f32 %v9462_v21, %v9462_v21  ;;  %2379 = vmatpush.bf16.msrb.mxu1 %v9137_v26  ;;  %v14778_v31 = vld [vmem:[#allocation34_spill] sm:$0xff]  ;;  %v14794_v10 = vld [vmem:[#allocation20_spill] sm:$0xff]  ;;  %v14800_v26 = vld [vmem:[#allocation25_spill] sm:$0xff]  ;;  %v14809_v41 = vsub.f32 %v9083_v59, %v9459_v20  ;;  %v14811_v5 = vsub.f32 %v14766_v14, %v9462_v21 }
 0x242   : > { %v1819_v4 = vsub.f32 %v1815_v32, %v1817_v18  ;;  %v14775_v32 = vld [vmem:[#allocation35_spill] sm:$0xff]  ;;  %v14782_v18 = vld [vmem:[#allocation37_spill] sm:$0xff]  ;;  %v14812_v49 = vsub.f32 %v9076_v12, %v9462_v21  ;;  %v14813_v59 = vsub.f32 %v9085_v3, %v9462_v21  ;;  %v14816_v3 = vsub.f32 %v9113_v7, %v9459_v20 }
 0x243   : > { %v1820_v39 = vsub.f32 %v1816_v17, %v1818_v29 }
 0x244   : > { %2291 = vmatpush.bf16.msrb.mxu0 %v9181_v11  ;;  %v1821_v46 = vmax.f32 %v1819_v4, 0.0  ;;  %v14774_v11 = vld [vmem:[#allocation33_spill] sm:$0xff]  ;;  %v14780_v4 = vld [vmem:[#allocation12_spill] sm:$0xff] }
 0x245   : > { %v1822_v58 = vmax.f32 %v1820_v39, 0.0  ;;  %2380 = vmatpush.bf16.msrb.mxu1 %v9191_v6  ;;  %v14769_v39 = vld [vmem:[#allocation5_spill] sm:$0xff]  ;;  %v14802_v6 = vld [vmem:[#allocation28_spill] sm:$0xff] }
 0x246   : > { %v1823_v53 = vadd.f32 1e-05, %v1821_v46 }
 0x247   : > { %v1824_v23 = vadd.f32 1e-05, %v1822_v58  ;;  %v14784_v58 = vld [vmem:[#allocation13_spill] sm:$0xff] }
 0x248   : > { %2292 = vmatpush.bf16.msrb.mxu0 %v9212_v50  ;;  %vm1831_vm11 = vweird.f32 %v1823_v53  ;;  %v14792_v50 = vld [vmem:[#allocation19_spill] sm:$0xff] }
 0x249   : > { %7535 = vrsqrt.f32 %v1824_v23  ;;  %2381 = vmatpush.bf16.msrb.mxu1 %v9224_v2  ;;  %vm1841_vm9 = vweird.f32 %v1824_v23  ;;  %v14790_v2 = vld [vmem:[#allocation41_spill] sm:$0xff] }
 0x24a   : > { %7537 = vrsqrt.f32 %v1823_v53 }
 0x24f   : > { %v7536_v54 = vpop.eup %7535 }
 0x250   : > { %v7538_v19 = vpop.eup %7537  ;;  %v1836_v52 = vmul.f32 %v7536_v54, %v1824_v23  ;;  %vm1842_vm7 = vweird.f32 %v7536_v54  ;;  %v14781_v23 = vld [vmem:[#allocation14_spill] sm:$0xff] }
 0x251   : > { %v1826_v48 = vmul.f32 %v7538_v19, %v1823_v53  ;;  %vm1832_vm8 = vweird.f32 %v7538_v19  ;;  %vm1843_vm10 = vmor %vm1841_vm9, %vm1842_vm7  ;;  %v14785_v53 = vld [vmem:[#allocation15_spill] sm:$0xff] }
 0x252   : > { %v1837_v63 = vmul.f32 %v7536_v54, %v1836_v52  ;;  %v14770_v52 = vld [vmem:[#allocation7_spill] sm:$0xff]  ;;  %vm1833_vm12 = vmor %vm1831_vm11, %vm1832_vm8 }
 0x253   : > { %v1827_v33 = vmul.f32 %v7538_v19, %v1826_v48  ;;  %v14819_v7 = vsub.f32 %v14770_v52, %v9462_v21  ;;  %v14822_v52 = vsub.f32 %v14772_v56, %v9459_v20 }
 0x254   : > { %v1838_v29 = vmul.f32 0.5, %v1837_v63 }
 0x255   : > { %v1828_v46 = vmul.f32 0.5, %v1827_v33  ;;  %v14773_v33 = vld [vmem:[#allocation10_spill] sm:$0xff] }
 0x256   : > { %v1839_v63 = vsub.f32 1.5, %v1838_v29  ;;  %v14776_v29 = vld [vmem:[#allocation9_spill] sm:$0xff] }
 0x257   : > { %v1829_v45 = vsub.f32 1.5, %v1828_v46  ;;  %v14783_v46 = vld [vmem:[#allocation39_spill] sm:$0xff]  ;;  %v14826_v56 = vsub.f32 %v14776_v29, %v9462_v21  ;;  %v14830_v29 = vsub.f32 %v14780_v4, %v9459_v20 }
 0x258   : > { %v1840_v17 = vmul.f32 %v7536_v54, %v1839_v63  ;;  %v14791_v63 = vld [vmem:[#allocation17_spill] sm:$0xff]  ;;  %v14833_v4 = vsub.f32 %v14783_v46, %v9459_v20  ;;  %v14837_v46 = vsub.f32 %v14787_v35, %v9462_v21 }
 0x259   : > { %v1830_v40 = vmul.f32 %v7538_v19, %v1829_v45 }
 0x25a   : > { %v1844_v24 = vsel %vm1843_vm10, %v7536_v54, %v1840_v17  ;;  %v14786_v17 = vld [vmem:[#allocation38_spill] sm:$0xff] }
 0x25b   : > { %v1847_v45 = vrot.slane %v1844_v24, 6  ;;  %v1834_v48 = vsel %vm1833_vm12, %v7538_v19, %v1830_v40 }
 0x25d   : > { %v1848_v24 = vsel %vm995_vm1, %v1834_v48, %v1847_v45  ;;  %v14793_v45 = vld [vmem:[#allocation42_spill] sm:$0xff] }
 0x25e   : > { %v1850_v40 = vmul.f32 %v1848_v24, %v9374_v60  ;;  %v14795_v60 = vld [vmem:[#allocation22_spill] sm:$0xff] }
 0x260   : > { %v2181_v42 = vperm.slane %v1850_v40, 0  ;;  %v2182_v54 = vperm.slane %v1850_v40, 2 }
 0x262   : > { %v9594_v57 = vperm.slane %v2181_v42, 0  ;;  %v9596_v40 = vperm.slane %v2182_v54, 0  ;;  %v14806_v54 = vsub.f32 %v8797_v62, %v9459_v20  ;;  %v14810_v62 = vsub.f32 %v8807_v27, %v9462_v21 }
 0x264   : > { %v2187_v34 = vmul.f32 %v9594_v57, %v14806_v54  ;;  %v2189_v48 = vmul.f32 %v9594_v57, %v14807_v37  ;;  %v2219_v22 = vmul.f32 %v9594_v57, %v14808_v28  ;;  %v2221_v24 = vmul.f32 %v9594_v57, %v14809_v41 }
 0x265   : > { %v2188_v54 = vmul.f32 %v9596_v40, %v14810_v62  ;;  %v2190_v37 = vmul.f32 %v9596_v40, %v14811_v5  ;;  %v2220_v28 = vmul.f32 %v9596_v40, %v14812_v49  ;;  %v2222_v41 = vmul.f32 %v9596_v40, %v14813_v59 }
 0x266   : > { %v9642_v42 = vpack.c.bf16 %v2189_v48, %v2187_v34  ;;  %v9644_v27 = vpack.c.bf16 %v2221_v24, %v2219_v22  ;;  %v14814_v62 = vsub.f32 %v14767_v61, %v9459_v20  ;;  %v14815_v5 = vsub.f32 %v14768_v38, %v9459_v20 }
 0x267   : > { %v9654_v49 = vpack.c.bf16 %v2190_v37, %v2188_v54  ;;  %v9656_v19 = vpack.c.bf16 %v2222_v41, %v2220_v28  ;;  %v2223_v22 = vmul.f32 %v9594_v57, %v14816_v3  ;;  %v14817_v34 = vsub.f32 %v9121_v8, %v9459_v20 }
 0x268   : > { %v2191_v14 = vmul.f32 %v9594_v57, %v14814_v62  ;;  %v2193_v12 = vmul.f32 %v9594_v57, %v14815_v5  ;;  %2293 = vmatmul.bf16.vlgmr.msrb.gmra.mxu0 %v9642_v42  ;;  %2333 = vmatmul.bf16.vlgmr.msrb.gmra.mxu2 %v9644_v27  ;;  %v14818_v48 = vsub.f32 %v14769_v39, %v9462_v21 }
 0x269   : > { %v2225_v61 = vmul.f32 %v9594_v57, %v14817_v34  ;;  %v2194_v54 = vmul.f32 %v9596_v40, %v14819_v7  ;;  %2382 = vmatmul.bf16.vlgmr.msrb.gmra.mxu1 %v9654_v49  ;;  %2422 = vmatmul.bf16.vlgmr.msrb.gmra.mxu3 %v9656_v19  ;;  %v14820_v37 = vsub.f32 %v9117_v44, %v9462_v21 }
 0x26a   : > { %v9668_v38 = vpack.c.bf16 %v2193_v12, %v2191_v14  ;;  %v2192_v24 = vmul.f32 %v9596_v40, %v14818_v48  ;;  %v14821_v39 = vsub.f32 %v14771_v15, %v9462_v21  ;;  %v2195_v62 = vmul.f32 %v9594_v57, %v14822_v52 }
 0x26b   : > { %v9680_v8 = vpack.c.bf16 %v2225_v61, %v2223_v22  ;;  %v2224_v28 = vmul.f32 %v9596_v40, %v14820_v37  ;;  %v14823_v14 = vsub.f32 %v14773_v33, %v9459_v20  ;;  %v14824_v44 = vsub.f32 %v14774_v11, %v9459_v20 }
 0x26c   : > { %v2226_v59 = vmul.f32 %v9596_v40, %v14821_v39  ;;  %v9690_v41 = vpack.c.bf16 %v2194_v54, %v2192_v24  ;;  %v14825_v3 = vsub.f32 %v14775_v32, %v9459_v20  ;;  %v2196_v34 = vmul.f32 %v9596_v40, %v14826_v56 }
 0x26d   : > { %v2197_v5 = vmul.f32 %v9594_v57, %v14823_v14  ;;  %v2227_v12 = vmul.f32 %v9594_v57, %v14824_v44  ;;  %v14827_v33 = vsub.f32 %v14777_v43, %v9462_v21  ;;  %v14828_v48 = vsub.f32 %v14778_v31, %v9462_v21 }
 0x26e   : > { %v9704_v15 = vpack.c.bf16 %v2226_v59, %v2224_v28  ;;  %v2229_v22 = vmul.f32 %v9594_v57, %v14825_v3  ;;  %v14829_v32 = vsub.f32 %v14779_v1, %v9462_v21  ;;  %v2199_v54 = vmul.f32 %v9594_v57, %v14830_v29 }
 0x26f   : > { %v2198_v61 = vmul.f32 %v9596_v40, %v14827_v33  ;;  %v9718_v11 = vpack.c.bf16 %v2197_v5, %v2195_v62  ;;  %v2228_v24 = vmul.f32 %v9596_v40, %v14828_v48  ;;  %v14831_v28 = vsub.f32 %v14781_v23, %v9459_v20 }
 0x270   : > { %v2230_v7 = vmul.f32 %v9596_v40, %v14829_v32  ;;  %v9732_v43 = vpack.c.bf16 %v2229_v22, %v2227_v12  ;;  %v14832_v39 = vsub.f32 %v14782_v18, %v9459_v20  ;;  %v2233_v52 = vmul.f32 %v9594_v57, %v14833_v4 }
 0x271   : > { %v9734_v37 = vpack.c.bf16 %v2198_v61, %v2196_v34  ;;  %v2201_v31 = vmul.f32 %v9594_v57, %v14831_v28  ;;  %v14834_v62 = vsub.f32 %v14784_v58, %v9462_v21  ;;  %v14835_v23 = vsub.f32 %v14785_v53, %v9462_v21 }
 0x272   : > { %v2231_v1 = vmul.f32 %v9594_v57, %v14832_v39  ;;  %v9744_v59 = vpack.c.bf16 %v2230_v7, %v2228_v24  ;;  %v14836_v44 = vsub.f32 %v14786_v17, %v9462_v21  ;;  %v2234_v3 = vmul.f32 %v9596_v40, %v14837_v46 }
 0x273   : > { %v2200_v14 = vmul.f32 %v9596_v40, %v14834_v62  ;;  %v2202_v5 = vmul.f32 %v9596_v40, %v14835_v23  ;;  %v9758_v18 = vpack.c.bf16 %v2201_v31, %v2199_v54  ;;  %v14838_v58 = vsub.f32 %v14788_v9, %v9459_v20 }
 0x274   : > { %v2232_v12 = vmul.f32 %v9596_v40, %v14836_v44  ;;  %v9772_v53 = vpack.c.bf16 %v2233_v52, %v2231_v1  ;;  %v14839_v34 = vsub.f32 %v14789_v0, %v9459_v20  ;;  %v14840_v33 = vsub.f32 %v14790_v2, %v9459_v20  ;;  %v14852_v44 = vld [vmem:[#allocation43_spill] sm:$0xff] }
 0x275   : > { %v2203_v22 = vmul.f32 %v9594_v57, %v14838_v58  ;;  %v9774_v56 = vpack.c.bf16 %v2202_v5, %v2200_v14  ;;  %v14841_v9 = vsub.f32 %v9283_v25, %v9459_v20  ;;  %v14842_v24 = vsub.f32 %v14791_v63, %v9462_v21 }
 0x276   : > { %v2205_v17 = vmul.f32 %v9594_v57, %v14839_v34  ;;  %v2235_v35 = vmul.f32 %v9594_v57, %v14840_v33  ;;  %v9784_v61 = vpack.c.bf16 %v2234_v3, %v2232_v12  ;;  %v14843_v0 = vsub.f32 %v14792_v50, %v9462_v21 }
 0x277   : > { %v2237_v48 = vmul.f32 %v9594_v57, %v14841_v9  ;;  %v2204_v32 = vmul.f32 %v9596_v40, %v14842_v24  ;;  %v14844_v29 = vsub.f32 %v14793_v45, %v9462_v21  ;;  %v14845_v25 = vsub.f32 %v9285_v16, %v9462_v21  ;;  %v14859_v9 = vld [vmem:[#allocation45_spill] sm:$0xff] }
 0x278   : > { %v2206_v7 = vmul.f32 %v9596_v40, %v14843_v0  ;;  %v9798_v2 = vpack.c.bf16 %v2205_v17, %v2203_v22  ;;  %v14846_v63 = vsub.f32 %v14794_v10, %v9459_v20  ;;  %v14847_v1 = vsub.f32 %v14795_v60, %v9459_v20  ;;  %v14861_v0 = vld [vmem:[#allocation47_spill] sm:$0xff]  ;;  %2298 = vmatmul.bf16.gmra.mxu0 %v9668_v38 }
 0x279   : > { %v2236_v54 = vmul.f32 %v9596_v40, %v14844_v29  ;;  %v2238_v28 = vmul.f32 %v9596_v40, %v14845_v25  ;;  %v9812_v50 = vpack.c.bf16 %v2237_v48, %v2235_v35  ;;  %v14848_v4 = vsub.f32 %v9304_v36, %v9459_v20  ;;  %2338 = vmatmul.bf16.gmra.mxu2 %v9680_v8 }
 0x27a   : > { %v2207_v31 = vmul.f32 %v9594_v57, %v14846_v63  ;;  %v9814_v39 = vpack.c.bf16 %v2206_v7, %v2204_v32  ;;  %v2209_v45 = vmul.f32 %v9594_v57, %v14847_v1  ;;  %v14849_v10 = vsub.f32 %v9342_v13, %v9459_v20  ;;  %v14854_v13 = vld [vmem:[#allocation44_spill] sm:$0xff]  ;;  %v14866_v1 = vld [vmem:[#allocation46_spill] sm:$0xff]  ;;  %2387 = vmatmul.bf16.gmra.mxu1 %v9690_v41 }
 0x27b   : > { %v2239_v16 = vmul.f32 %v9594_v57, %v14848_v4  ;;  %v9824_v52 = vpack.c.bf16 %v2238_v28, %v2236_v54  ;;  %v14850_v14 = vsub.f32 %v14796_v47, %v9462_v21  ;;  %v14851_v60 = vsub.f32 %v14797_v51, %v9462_v21  ;;  %v14856_v47 = vld [vmem:[#allocation24_spill] sm:$0xff]  ;;  %2427 = vmatmul.bf16.gmra.mxu3 %v9704_v15 }
 0x27c   : > { %v2241_v62 = vmul.f32 %v9594_v57, %v14849_v10  ;;  %v9838_v36 = vpack.c.bf16 %v2209_v45, %v2207_v31  ;;  %v14853_v12 = vsub.f32 %v14852_v44, %v9462_v21  ;;  %v14855_v3 = vsub.f32 %v14854_v13, %v9462_v21 }
 0x27d   : > { %v2208_v23 = vmul.f32 %v9596_v40, %v14850_v14  ;;  %v2210_v5 = vmul.f32 %v9596_v40, %v14851_v60  ;;  %v14857_v22 = vsub.f32 %v14856_v47, %v9459_v20  ;;  %v14858_v33 = vsub.f32 %v14799_v30, %v9459_v20  ;;  %v14864_v30 = vld [vmem:[#allocation27_spill] sm:$0xff] }
 0x27e   : > { %v2240_v46 = vmul.f32 %v9596_v40, %v14853_v12  ;;  %v2242_v58 = vmul.f32 %v9596_v40, %v14855_v3  ;;  %v9852_v51 = vpack.c.bf16 %v2241_v62, %v2239_v16  ;;  %v14860_v48 = vsub.f32 %v14859_v9, %v9459_v20  ;;  %v14868_v16 = vld [vmem:[#allocation48_spill] sm:$0xff] }
 0x27f   : > { %v2211_v34 = vmul.f32 %v9594_v57, %v14857_v22  ;;  %v9854_v17 = vpack.c.bf16 %v2210_v5, %v2208_v23  ;;  %v2213_v35 = vmul.f32 %v9594_v57, %v14858_v33  ;;  %v14862_v7 = vsub.f32 %v14861_v0, %v9459_v20 }
 0x280   : > { %v2243_v24 = vmul.f32 %v9594_v57, %v14860_v48  ;;  %v9864_v32 = vpack.c.bf16 %v2242_v58, %v2240_v46  ;;  %v14863_v54 = vsub.f32 %v14800_v26, %v9462_v21  ;;  %v14865_v28 = vsub.f32 %v14864_v30, %v9462_v21  ;;  %v14872_v46 = vld [vmem:[#allocation49_spill] sm:$0xff]  ;;  %v14874_v58 = vld [vmem:[#allocation51_spill] sm:$0xff]  ;;  %v14880_v48 = vld [vmem:[#allocation50_spill] sm:$0xff] }
 0x281   : > { %v2245_v29 = vmul.f32 %v9594_v57, %v14862_v7  ;;  %v9880_v31 = vpack.c.bf16 %v2213_v35, %v2211_v34  ;;  %v14867_v45 = vsub.f32 %v14866_v1, %v9462_v21  ;;  %v14869_v26 = vsub.f32 %v14868_v16, %v9462_v21  ;;  %v14878_v35 = vld [vmem:[#allocation31_spill] sm:$0xff]  ;;  %v14882_v7 = vld [vmem:[#allocation52_spill] sm:$0xff] }
 0x282   : > { %v2212_v25 = vmul.f32 %v9596_v40, %v14863_v54  ;;  %v2214_v63 = vmul.f32 %v9596_v40, %v14865_v28  ;;  %v14870_v23 = vsub.f32 %v14802_v6, %v9459_v20  ;;  %v14871_v44 = vsub.f32 %v14803_v55, %v9459_v20  ;;  %v14876_v6 = vld [vmem:[#allocation29_spill] sm:$0xff] }
 0x283   : > { %v2244_v4 = vmul.f32 %v9596_v40, %v14867_v45  ;;  %v2246_v10 = vmul.f32 %v9596_v40, %v14869_v26  ;;  %v9892_v62 = vpack.c.bf16 %v2245_v29, %v2243_v24  ;;  %v14873_v13 = vsub.f32 %v14872_v46, %v9459_v20 }
 0x284   : > { %v9894_v14 = vpack.c.bf16 %v2214_v63, %v2212_v25  ;;  %v2215_v60 = vmul.f32 %v9594_v57, %v14870_v23  ;;  %v2217_v12 = vmul.f32 %v9594_v57, %v14871_v44  ;;  %v14875_v47 = vsub.f32 %v14874_v58, %v9459_v20 }
 0x285   : > { %v9900_v5 = vpack.c.bf16 %v2246_v10, %v2244_v4  ;;  %v2247_v3 = vmul.f32 %v9594_v57, %v14873_v13  ;;  %v14877_v34 = vsub.f32 %v14876_v6, %v9462_v21  ;;  %v14879_v55 = vsub.f32 %v14878_v35, %v9462_v21 }
 0x286   : > { %v2249_v22 = vmul.f32 %v9594_v57, %v14875_v47  ;;  %v14881_v24 = vsub.f32 %v14880_v48, %v9462_v21  ;;  %v14883_v20 = vsub.f32 %v14882_v7, %v9462_v21  ;;  %v9930_v29 = vpack.c.bf16 %v2217_v12, %v2215_v60  ;;  %v1890_v21 = vld [vmem:[%s14367_s6] sm:$0x3] }
 0x287   : > { %v2216_v33 = vmul.f32 %v9596_v40, %v14877_v34  ;;  %v2218_v9 = vmul.f32 %v9596_v40, %v14879_v55  ;;  %v2061_v26 = vperm.slane %v1890_v21, 1 }
 0x288   : > { %v2248_v0 = vmul.f32 %v9596_v40, %v14881_v24  ;;  %v2250_v57 = vmul.f32 %v9596_v40, %v14883_v20  ;;  %v9932_v54 = vpack.c.bf16 %v2249_v22, %v2247_v3  ;;  %2303 = vmatmul.bf16.gmra.mxu0 %v9718_v11  ;;  %v2060_v40 = vperm.slane %v1890_v21, 0 }
 0x289   : > { %v9934_v25 = vpack.c.bf16 %v2218_v9, %v2216_v33  ;;  %2343 = vmatmul.bf16.gmra.mxu2 %v9732_v43 }
 0x28a   : > { %v9936_v30 = vpack.c.bf16 %v2250_v57, %v2248_v0  ;;  %2392 = vmatmul.bf16.gmra.mxu1 %v9734_v37 }
 0x28b   : > { %2432 = vmatmul.bf16.gmra.mxu3 %v9744_v59 }
 0x298   : > { %2308 = vmatmul.bf16.gmra.mxu0 %v9758_v18 }
 0x299   : > { %2348 = vmatmul.bf16.gmra.mxu2 %v9772_v53 }
 0x29a   : > { %2397 = vmatmul.bf16.gmra.mxu1 %v9774_v56 }
 0x29b   : > { %2437 = vmatmul.bf16.gmra.mxu3 %v9784_v61 }
 0x2a3   : > { %v2073_v28 = vpop.f32.mrf.mxu0 }
 0x2a4   : > { %v2086_v63 = vpop.f32.mrf.mxu1  ;;  %v2074_v1 = vadd.f32 %v2073_v28, %v2060_v40 }
 0x2a6   : > { %v2087_v45 = vadd.f32 %v2086_v63, %v2074_v1 }
 0x2a8   : > { %2313 = vmatmul.bf16.gmra.mxu0 %v9798_v2  ;;  %v9967_v13 = vperm.slane %v2087_v45, 0 }
 0x2a9   : > { %2353 = vmatmul.bf16.gmra.mxu2 %v9812_v50 }
 0x2aa   : > { %2402 = vmatmul.bf16.gmra.mxu1 %v9814_v39 }
 0x2ab   : > { %2442 = vmatmul.bf16.gmra.mxu3 %v9824_v52  ;;  %v2075_v4 = vpop.f32.mrf.mxu0 }
 0x2ac   : > { %v2088_v16 = vpop.f32.mrf.mxu1 }
 0x2b3   : > { %v2099_v10 = vpop.f32.mrf.mxu0 }
 0x2b4   : > { %v2112_v23 = vpop.f32.mrf.mxu1  ;;  %v2100_v60 = vadd.f32 %v2099_v10, %v2061_v26 }
 0x2b6   : > { %v9957_v44 = vadd.f32 %v2112_v23, %v2100_v60 }
 0x2b8   : > { %2318 = vmatmul.bf16.gmra.mxu0 %v9838_v36 }
 0x2b9   : > { %2358 = vmatmul.bf16.gmra.mxu2 %v9852_v51 }
 0x2ba   : > { %2407 = vmatmul.bf16.gmra.mxu1 %v9854_v17 }
 0x2bb   : > { %2447 = vmatmul.bf16.gmra.mxu3 %v9864_v32  ;;  %v2101_v12 = vpop.f32.mrf.mxu0 }
 0x2bc   : > { %v2114_v46 = vpop.f32.mrf.mxu1 }
 0x2c8   : > { %2323 = vmatmul.bf16.gmra.mxu0 %v9880_v31 }
 0x2c9   : > { %2363 = vmatmul.bf16.gmra.mxu2 %v9892_v62 }
 0x2ca   : > { %2412 = vmatmul.bf16.gmra.mxu1 %v9894_v14 }
 0x2cb   : > { %2452 = vmatmul.bf16.gmra.mxu3 %v9900_v5 }
 0x2d8   : > { %2328 = vmatmul.bf16.gmra.mxu0 %v9930_v29 }
 0x2d9   : > { %2368 = vmatmul.bf16.gmra.mxu2 %v9932_v54 }
 0x2da   : > { %2417 = vmatmul.bf16.gmra.mxu1 %v9934_v25 }
 0x2db   : > { %2457 = vmatmul.bf16.gmra.mxu3 %v9936_v30 }
 0x2e5   : > { %v2294_v3 = vpop.f32.mrf.mxu0 }
 0x2e6   : > { %v2295_v58 = vadd.f32 %v2294_v3, %v9967_v13  ;;  %v2383_v47 = vpop.f32.mrf.mxu1 }
 0x2e8   : > { %v9970_v22 = vadd.f32 %v2383_v47, %v2295_v58 }
 0x2e9   : > { %2471 = vmatmul.bf16.vlgmr.msra.gmra.mxu2 %v9642_v42 }
 0x2eb   : > { %2560 = vmatmul.bf16.vlgmr.msra.gmra.mxu3 %v9654_v49  ;;  %v2334_v6 = vpop.f32.mrf.mxu2 }
 0x2ec   : > { %v2335_v34 = vadd.f32 %v2334_v6, %v9967_v13  ;;  %v2423_v33 = vpop.f32.mrf.mxu3 }
 0x2ed   : > { %v9975_v35 = vpop.f32.mrf.mxu0 }
 0x2ee   : > { %v9977_v55 = vadd.f32 %v2423_v33, %v2335_v34  ;;  %v9979_v9 = vpop.f32.mrf.mxu1 }
 0x2f3   : > { %v2336_v48 = vpop.f32.mrf.mxu2 }
 0x2f4   : > { %v2337_v24 = vadd.f32 %v2336_v48, %v9967_v13  ;;  %v2425_v0 = vpop.f32.mrf.mxu3 }
 0x2f5   : > { %v2299_v7 = vpop.f32.mrf.mxu0 }
 0x2f6   : > { %v9982_v20 = vadd.f32 %v2425_v0, %v2337_v24  ;;  %v2300_v42 = vadd.f32 %v2299_v7, %v9967_v13 }
 0x2f7   : > { %v2388_v49 = vpop.f32.mrf.mxu1 }
 0x2f8   : > { %v9985_v57 = vadd.f32 %v2388_v49, %v2300_v42 }
 0x2f9   : > { %2476 = vmatmul.bf16.gmra.mxu2 %v9668_v38 }
 0x2fb   : > { %2565 = vmatmul.bf16.gmra.mxu3 %v9690_v41 }
 0x2fc   : > { %v2339_v21 = vpop.f32.mrf.mxu2 }
 0x2fd   : > { %v2340_v40 = vadd.f32 %v2339_v21, %v9967_v13  ;;  %v2301_v63 = vpop.f32.mrf.mxu0 }
 0x2fe   : > { %v2428_v28 = vpop.f32.mrf.mxu3 }
 0x2ff   : > { %v9990_v1 = vadd.f32 %v2428_v28, %v2340_v40  ;;  %v2390_v45 = vpop.f32.mrf.mxu1 }
 0x304   : > { %v2341_v4 = vpop.f32.mrf.mxu2 }
 0x305   : > { %v2342_v16 = vadd.f32 %v2341_v4, %v9967_v13  ;;  %v2304_v10 = vpop.f32.mrf.mxu0 }
 0x306   : > { %v2430_v26 = vpop.f32.mrf.mxu3  ;;  %v2305_v60 = vadd.f32 %v2304_v10, %v9967_v13 }
 0x307   : > { %v9993_v23 = vadd.f32 %v2430_v26, %v2342_v16  ;;  %v2393_v38 = vpop.f32.mrf.mxu1 }
 0x308   : > { %v9996_v12 = vadd.f32 %v2393_v38, %v2305_v60 }
 0x309   : > { %2481 = vmatmul.bf16.gmra.mxu2 %v9718_v11 }
 0x30b   : > { %2570 = vmatmul.bf16.gmra.mxu3 %v9734_v37 }
 0x30c   : > { %v2344_v41 = vpop.f32.mrf.mxu2 }
 0x30d   : > { %v2345_v46 = vadd.f32 %v2344_v41, %v9967_v13  ;;  %v2306_v58 = vpop.f32.mrf.mxu0 }
 0x30e   : > { %v2433_v3 = vpop.f32.mrf.mxu3 }
 0x30f   : > { %v10001_v47 = vadd.f32 %v2433_v3, %v2345_v46  ;;  %v2395_v6 = vpop.f32.mrf.mxu1 }
 0x314   : > { %v2346_v34 = vpop.f32.mrf.mxu2 }
 0x315   : > { %v2347_v33 = vadd.f32 %v2346_v34, %v9967_v13  ;;  %v2309_v24 = vpop.f32.mrf.mxu0  ;;  %v2297_v34 = vadd.f32 %v9975_v35, %v9967_v13  ;;  %v2307_v35 = vadd.f32 %v2306_v58, %v9967_v13 }
 0x316   : > { %v2435_v48 = vpop.f32.mrf.mxu3 }
 0x317   : > { %v10004_v0 = vadd.f32 %v2435_v48, %v2347_v33  ;;  %v2398_v7 = vpop.f32.mrf.mxu1 }
 0x319   : > { %2486 = vmatmul.bf16.gmra.mxu2 %v9758_v18 }
 0x31b   : > { %2575 = vmatmul.bf16.gmra.mxu3 %v9774_v56 }
 0x31c   : > { %v2349_v11 = vpop.f32.mrf.mxu2 }
 0x31d   : > { %v2350_v37 = vadd.f32 %v2349_v11, %v9967_v13  ;;  %v2311_v49 = vpop.f32.mrf.mxu0 }
 0x31e   : > { %v2438_v42 = vpop.f32.mrf.mxu3 }
 0x31f   : > { %v10009_v21 = vadd.f32 %v2438_v42, %v2350_v37  ;;  %v2400_v40 = vpop.f32.mrf.mxu1 }
 0x324   : > { %v2351_v28 = vpop.f32.mrf.mxu2 }
 0x325   : > { %v2352_v4 = vadd.f32 %v2351_v28, %v9967_v13  ;;  %v2314_v26 = vpop.f32.mrf.mxu0 }
 0x326   : > { %v2440_v16 = vpop.f32.mrf.mxu3 }
 0x327   : > { %v10012_v10 = vadd.f32 %v2440_v16, %v2352_v4  ;;  %v2403_v60 = vpop.f32.mrf.mxu1 }
 0x329   : > { %2491 = vmatmul.bf16.gmra.mxu2 %v9798_v2  ;;  %v2386_v2 = vadd.f32 %v9979_v9, %v2297_v34  ;;  %v2310_v9 = vadd.f32 %v2309_v24, %v9967_v13 }
 0x32b   : > { %2580 = vmatmul.bf16.gmra.mxu3 %v9814_v39  ;;  %v2302_v39 = vadd.f32 %v2301_v63, %v9967_v13  ;;  %v2643_v4 = vmul.f32 0.5, %v2386_v2  ;;  %v2399_v58 = vadd.f32 %v2398_v7, %v2310_v9 }
 0x32c   : > { %v2354_v18 = vpop.f32.mrf.mxu2 }
 0x32d   : > { %v2355_v56 = vadd.f32 %v2354_v18, %v9967_v13  ;;  %v2316_v41 = vpop.f32.mrf.mxu0  ;;  %v2391_v16 = vadd.f32 %v2390_v45, %v2302_v39  ;;  %v2641_v18 = vmul.f32 0.5, %v9970_v22  ;;  %7539 = vtanh.f32 %v2643_v4 }
 0x32e   : > { %v2443_v38 = vpop.f32.mrf.mxu3  ;;  %v2312_v45 = vadd.f32 %v2311_v49, %v9967_v13  ;;  %v2649_v22 = vmul.f32 0.5, %v9996_v12  ;;  %v2653_v4 = vmul.f32 0.5, %v2399_v58 }
 0x32f   : > { %v10017_v46 = vadd.f32 %v2443_v38, %v2355_v56  ;;  %v2405_v3 = vpop.f32.mrf.mxu1  ;;  %v2645_v38 = vmul.f32 0.5, %v9985_v57  ;;  %7541 = vtanh.f32 %v2641_v18  ;;  %v2315_v57 = vadd.f32 %v2314_v26, %v9967_v13 }
 0x330   : > { %v2401_v2 = vadd.f32 %v2400_v40, %v2312_v45 }
 0x331   : > { %7543 = vtanh.f32 %v2645_v38  ;;  %v2404_v49 = vadd.f32 %v2403_v60, %v2315_v57 }
 0x332   : > { %v2655_v9 = vmul.f32 0.5, %v2401_v2 }
 0x333   : > { %v2657_v60 = vmul.f32 0.5, %v2404_v49 }
 0x334   : > { %v2356_v33 = vpop.f32.mrf.mxu2 }
 0x335   : > { %v2357_v48 = vadd.f32 %v2356_v33, %v9967_v13  ;;  %v2319_v37 = vpop.f32.mrf.mxu0 }
 0x336   : > { %v2445_v11 = vpop.f32.mrf.mxu3  ;;  %v2320_v12 = vadd.f32 %v2319_v37, %v9967_v13 }
 0x337   : > { %v10024_v42 = vadd.f32 %v2445_v11, %v2357_v48  ;;  %v2408_v28 = vpop.f32.mrf.mxu1  ;;  %v2647_v48 = vmul.f32 0.5, %v2391_v16 }
 0x338   : > { %v2409_v58 = vadd.f32 %v2408_v28, %v2320_v12 }
 0x339   : > { %2496 = vmatmul.bf16.gmra.mxu2 %v9838_v36  ;;  %v2396_v36 = vadd.f32 %v2395_v6, %v2307_v35  ;;  %7545 = vtanh.f32 %v2647_v48  ;;  %v2317_v6 = vadd.f32 %v2316_v41, %v9967_v13 }
 0x33a   : > { %7547 = vtanh.f32 %v2649_v22 }
 0x33b   : > { %2585 = vmatmul.bf16.gmra.mxu3 %v9854_v17  ;;  %v2651_v24 = vmul.f32 0.5, %v2396_v36  ;;  %v2406_v48 = vadd.f32 %v2405_v3, %v2317_v6 }
 0x33c   : > { %v2359_v56 = vpop.f32.mrf.mxu2 }
 0x33d   : > { %v2360_v63 = vadd.f32 %v2359_v56, %v9967_v13  ;;  %v2321_v33 = vpop.f32.mrf.mxu0  ;;  %v7540_v56 = vpop.eup %7539  ;;  %7549 = vtanh.f32 %v2651_v24  ;;  %v2659_v3 = vmul.f32 0.5, %v2406_v48 }
 0x33e   : > { %v2448_v34 = vpop.f32.mrf.mxu3  ;;  %v7542_v18 = vpop.eup %7541  ;;  %v2771_v40 = vmul.f32 0.5, %v7540_v56  ;;  %7551 = vtanh.f32 %v2653_v4  ;;  %v2322_v41 = vadd.f32 %v2321_v33, %v9967_v13 }
 0x33f   : > { %v10033_v11 = vadd.f32 %v2448_v34, %v2360_v63  ;;  %v2410_v17 = vpop.f32.mrf.mxu1  ;;  %v7544_v63 = vpop.eup %7543  ;;  %v2769_v36 = vmul.f32 0.5, %v7542_v18  ;;  %7553 = vtanh.f32 %v2655_v9 }
 0x340   : > { %v7546_v34 = vpop.eup %7545  ;;  %v2773_v45 = vmul.f32 0.5, %v7544_v63  ;;  %v10047_v57 = vadd.f32 0.5, %v2771_v40  ;;  %v2411_v56 = vadd.f32 %v2410_v17, %v2322_v41  ;;  %7555 = vtanh.f32 %v2657_v60 }
 0x341   : > { %v7548_v22 = vpop.eup %7547  ;;  %v2775_v24 = vmul.f32 0.5, %v7546_v34  ;;  %v10050_v4 = vadd.f32 0.5, %v2769_v36  ;;  %7557 = vtanh.f32 %v2659_v3  ;;  %v2673_v60 = vmul.f32 0.5, %v9977_v55 }
 0x342   : > { %14884 = vst [vmem:[#allocation3_spill] sm:$0xff] %v10047_v57  ;;  %v10052_v6 = vadd.f32 0.5, %v2773_v45  ;;  %v2976_v17 = vmul.f32 %v10047_v57, %v10047_v57  ;;  %v2663_v9 = vmul.f32 0.5, %v2411_v56 }
 0x343   : > { %14885 = vst [vmem:[#allocation4_spill] sm:$0xff] %v10050_v4  ;;  %v10059_v12 = vadd.f32 0.5, %v2775_v24  ;;  %v2974_v41 = vmul.f32 %v10050_v4, %v10050_v4 }
 0x344   : > { %v2361_v39 = vpop.f32.mrf.mxu2  ;;  %14886 = vst [vmem:[#allocation6_spill] sm:$0xff] %v10052_v6 }
 0x345   : > { %v2362_v16 = vadd.f32 %v2361_v39, %v9967_v13  ;;  %v2324_v38 = vpop.f32.mrf.mxu0  ;;  %v7550_v39 = vpop.eup %7549  ;;  %14887 = vst [vmem:[#allocation5_spill] sm:$0xff] %v10059_v12  ;;  %v3038_v24 = vadd.f32 %v2976_v17, %v2974_v41 }
 0x346   : > { %v2450_v35 = vpop.f32.mrf.mxu3  ;;  %v2325_v37 = vadd.f32 %v2324_v38, %v9967_v13  ;;  %v2779_v40 = vmul.f32 0.5, %v7550_v39 }
 0x347   : > { %v10041_v7 = vadd.f32 %v2450_v35, %v2362_v16  ;;  %v2413_v26 = vpop.f32.mrf.mxu1  ;;  %v7552_v16 = vpop.eup %7551  ;;  %v2661_v35 = vmul.f32 0.5, %v2409_v58 }
 0x348   : > { %v2414_v18 = vadd.f32 %v2413_v26, %v2325_v37  ;;  %v7554_v48 = vpop.eup %7553  ;;  %v2978_v26 = vmul.f32 %v10052_v6, %v10052_v6  ;;  %v2781_v45 = vmul.f32 0.5, %v7552_v16  ;;  %v2898_v37 = vadd.f32 %v10047_v57, %v10050_v4 }
 0x349   : > { %2501 = vmatmul.bf16.gmra.mxu2 %v9880_v31  ;;  %7559 = vtanh.f32 %v2661_v35  ;;  %v7556_v58 = vpop.eup %7555  ;;  %v10072_v39 = vadd.f32 0.5, %v2779_v40  ;;  %v2783_v56 = vmul.f32 0.5, %v7554_v48 }
 0x34a   : > { %7561 = vtanh.f32 %v2663_v9  ;;  %v2899_v55 = vadd.f32 %v2898_v37, %v10052_v6  ;;  %v10078_v35 = vadd.f32 0.5, %v2781_v45 }
 0x34b   : > { %2590 = vmatmul.bf16.gmra.mxu3 %v9894_v14  ;;  %v2777_v14 = vmul.f32 0.5, %v7548_v22  ;;  %v2665_v22 = vmul.f32 0.5, %v2414_v18  ;;  %14889 = vst [vmem:[#allocation32_spill] sm:$0xff] %v10072_v39  ;;  %v10086_v37 = vadd.f32 0.5, %v2783_v56  ;;  %v2675_v56 = vmul.f32 0.5, %v9982_v20 }
 0x34c   : > { %v2364_v2 = vpop.f32.mrf.mxu2  ;;  %14890 = vst [vmem:[#allocation8_spill] sm:$0xff] %v10078_v35 }
 0x34d   : > { %v2365_v33 = vadd.f32 %v2364_v2, %v9967_v13  ;;  %v2326_v28 = vpop.f32.mrf.mxu0  ;;  %v10065_v36 = vadd.f32 0.5, %v2777_v14  ;;  %v2980_v2 = vmul.f32 %v10059_v12, %v10059_v12  ;;  %7563 = vtanh.f32 %v2665_v22  ;;  %14891 = vst [vmem:[#allocation10_spill] sm:$0xff] %v10086_v37 }
 0x34e   : > { %v2453_v31 = vpop.f32.mrf.mxu3  ;;  %v2327_v38 = vadd.f32 %v2326_v28, %v9967_v13  ;;  %v3039_v28 = vadd.f32 %v3038_v24, %v2978_v26  ;;  %v2984_v26 = vmul.f32 %v10072_v39, %v10072_v39 }
 0x34f   : > { %v10054_v49 = vadd.f32 %v2453_v31, %v2365_v33  ;;  %v2415_v63 = vpop.f32.mrf.mxu1  ;;  %14888 = vst [vmem:[#allocation7_spill] sm:$0xff] %v10065_v36  ;;  %v2982_v16 = vmul.f32 %v10065_v36, %v10065_v36 }
 0x350   : > { %v2416_v34 = vadd.f32 %v2415_v63, %v2327_v38  ;;  %v7558_v38 = vpop.eup %7557  ;;  %v2785_v63 = vmul.f32 0.5, %v7556_v58  ;;  %v3040_v48 = vadd.f32 %v3039_v28, %v2980_v2  ;;  %v2986_v2 = vmul.f32 %v10078_v35, %v10078_v35 }
 0x351   : > { %v7560_v41 = vpop.eup %7559  ;;  %v2787_v58 = vmul.f32 0.5, %v7558_v38 }
 0x352   : > { %v2667_v33 = vmul.f32 0.5, %v2416_v34  ;;  %v2900_v34 = vadd.f32 %v2899_v55, %v10059_v12  ;;  %v7562_v24 = vpop.eup %7561 }
 0x353   : > { %v7564_v28 = vpop.eup %7563  ;;  %v10103_v20 = vadd.f32 0.5, %v2787_v58 }
 0x354   : > { %v2366_v3 = vpop.f32.mrf.mxu2  ;;  %7565 = vtanh.f32 %v2667_v33  ;;  %v2901_v22 = vadd.f32 %v2900_v34, %v10065_v36  ;;  %v2677_v33 = vmul.f32 0.5, %v9990_v1  ;;  %v2791_v1 = vmul.f32 0.5, %v7562_v24 }
 0x355   : > { %v2367_v31 = vadd.f32 %v2366_v3, %v9967_v13  ;;  %v2329_v18 = vpop.f32.mrf.mxu0  ;;  %7567 = vtanh.f32 %v2673_v60  ;;  %v3041_v3 = vadd.f32 %v3040_v48, %v2982_v16  ;;  %v2789_v60 = vmul.f32 0.5, %v7560_v41  ;;  %14893 = vst [vmem:[#allocation35_spill] sm:$0xff] %v10103_v20 }
 0x356   : > { %v2455_v14 = vpop.f32.mrf.mxu3  ;;  %v2330_v40 = vadd.f32 %v2329_v18, %v9967_v13 }
 0x357   : > { %v10080_v17 = vadd.f32 %v2455_v14, %v2367_v31  ;;  %v2418_v9 = vpop.f32.mrf.mxu1  ;;  %v10093_v31 = vadd.f32 0.5, %v2785_v63  ;;  %v3042_v18 = vadd.f32 %v3041_v3, %v2984_v26  ;;  %v2679_v63 = vmul.f32 0.5, %v9993_v23 }
 0x358   : > { %v2419_v45 = vadd.f32 %v2418_v9, %v2330_v40  ;;  %v10111_v23 = vadd.f32 0.5, %v2789_v60 }
 0x359   : > { %2506 = vmatmul.bf16.gmra.mxu2 %v9930_v29  ;;  %14892 = vst [vmem:[#allocation33_spill] sm:$0xff] %v10093_v31  ;;  %v2902_v29 = vadd.f32 %v2901_v22, %v10072_v39  ;;  %v3043_v48 = vadd.f32 %v3042_v18, %v2986_v2  ;;  %v2990_v41 = vmul.f32 %v10093_v31, %v10093_v31  ;;  %v10116_v18 = vadd.f32 0.5, %v2791_v1 }
 0x35a   : > { %v2669_v14 = vmul.f32 0.5, %v2419_v45  ;;  %v7566_v34 = vpop.eup %7565  ;;  %14894 = vst [vmem:[#allocation9_spill] sm:$0xff] %v10111_v23 }
 0x35b   : > { %2595 = vmatmul.bf16.gmra.mxu3 %v9934_v25  ;;  %v2988_v25 = vmul.f32 %v10086_v37, %v10086_v37  ;;  %v2903_v40 = vadd.f32 %v2902_v29, %v10078_v35  ;;  %v7568_v22 = vpop.eup %7567  ;;  %14895 = vst [vmem:[#allocation11_spill] sm:$0xff] %v10116_v18 }
 0x35c   : > { %v2369_v55 = vpop.f32.mrf.mxu2  ;;  %7569 = vtanh.f32 %v2669_v14  ;;  %v2793_v14 = vmul.f32 0.5, %v7564_v28 }
 0x35d   : > { %v2370_v16 = vadd.f32 %v2369_v55, %v9967_v13  ;;  %v2331_v9 = vpop.f32.mrf.mxu0  ;;  %7571 = vtanh.f32 %v2675_v56  ;;  %v2904_v3 = vadd.f32 %v2903_v40, %v10086_v37  ;;  %v3044_v24 = vadd.f32 %v3043_v48, %v2988_v25 }
 0x35e   : > { %v2458_v38 = vpop.f32.mrf.mxu3  ;;  %v2332_v45 = vadd.f32 %v2331_v9, %v9967_v13  ;;  %7573 = vtanh.f32 %v2677_v33  ;;  %v2992_v55 = vmul.f32 %v10103_v20, %v10103_v20  ;;  %v2681_v56 = vmul.f32 0.5, %v10001_v47 }
 0x35f   : > { %v10107_v26 = vadd.f32 %v2458_v38, %v2370_v16  ;;  %v2420_v58 = vpop.f32.mrf.mxu1  ;;  %v2905_v2 = vadd.f32 %v2904_v3, %v10093_v31  ;;  %v2795_v16 = vmul.f32 0.5, %v7566_v34  ;;  %7575 = vtanh.f32 %v2679_v63 }
 0x360   : > { %v2421_v29 = vadd.f32 %v2420_v58, %v2332_v45  ;;  %v3045_v40 = vadd.f32 %v3044_v24, %v2990_v41  ;;  %v2994_v33 = vmul.f32 %v10111_v23, %v10111_v23  ;;  %v10122_v25 = vadd.f32 0.5, %v2793_v14 }
 0x361   : > { %v2906_v28 = vadd.f32 %v2905_v2, %v10103_v20  ;;  %v2683_v45 = vmul.f32 0.5, %v10004_v0  ;;  %v2996_v41 = vmul.f32 %v10116_v18, %v10116_v18  ;;  %v10129_v58 = vadd.f32 0.5, %v2795_v16 }
 0x362   : > { %v7570_v38 = vpop.eup %7569  ;;  %v2671_v60 = vmul.f32 0.5, %v2421_v29  ;;  %14896 = vst [vmem:[#allocation34_spill] sm:$0xff] %v10122_v25  ;;  %v3046_v3 = vadd.f32 %v3045_v40, %v2992_v55  ;;  %v2801_v14 = vmul.f32 0.5, %v7568_v22  ;;  %v10139_v40 = vperm.slane %v9957_v44, 0 }
 0x363   : > { %v2797_v9 = vmul.f32 0.5, %v7570_v38  ;;  %v7572_v63 = vpop.eup %7571  ;;  %v2907_v47 = vadd.f32 %v2906_v28, %v10111_v23  ;;  %14897 = vst [vmem:[#allocation36_spill] sm:$0xff] %v10129_v58  ;;  %v2685_v16 = vmul.f32 0.5, %v10009_v21  ;;  %v3000_v28 = vmul.f32 %v10129_v58, %v10129_v58 }
 0x364   : > { %v2371_v48 = vpop.f32.mrf.mxu2  ;;  %7577 = vtanh.f32 %v2671_v60  ;;  %v7574_v24 = vpop.eup %7573  ;;  %v3047_v2 = vadd.f32 %v3046_v3, %v2994_v33  ;;  %v2803_v60 = vmul.f32 0.5, %v7572_v63  ;;  %v2687_v44 = vmul.f32 0.5, %v10012_v10 }
 0x365   : > { %v2372_v1 = vadd.f32 %v2371_v48, %v9967_v13  ;;  %7579 = vtanh.f32 %v2681_v56  ;;  %v2908_v0 = vadd.f32 %v2907_v47, %v10116_v18  ;;  %v2998_v13 = vmul.f32 %v10122_v25, %v10122_v25  ;;  %v7576_v55 = vpop.eup %7575 }
 0x366   : > { %v2460_v34 = vpop.f32.mrf.mxu3  ;;  %v10136_v38 = vadd.f32 0.5, %v2797_v9  ;;  %7581 = vtanh.f32 %v2683_v45  ;;  %v3048_v22 = vadd.f32 %v3047_v2, %v2996_v41  ;;  %v10147_v9 = vadd.f32 0.5, %v2801_v14 }
 0x367   : > { %v10131_v29 = vadd.f32 %v2460_v34, %v2372_v1  ;;  %v2909_v56 = vadd.f32 %v2908_v0, %v10122_v25  ;;  %v2805_v63 = vmul.f32 0.5, %v7574_v24  ;;  %7583 = vtanh.f32 %v2685_v16 }
 0x368   : > { %14898 = vst [vmem:[#allocation12_spill] sm:$0xff] %v10136_v38  ;;  %v3049_v48 = vadd.f32 %v3048_v22, %v2998_v13  ;;  %v2689_v3 = vmul.f32 0.5, %v10017_v46  ;;  %v10155_v41 = vadd.f32 0.5, %v2803_v60  ;;  %v2807_v0 = vmul.f32 0.5, %v7576_v55 }
 0x369   : > { %2511 = vmatmul.bf16.gmra.mxu2 %v9644_v27  ;;  %14899 = vst [vmem:[#allocation14_spill] sm:$0xff] %v10147_v9  ;;  %v2910_v1 = vadd.f32 %v2909_v56, %v10129_v58  ;;  %v3002_v27 = vmul.f32 %v10136_v38, %v10136_v38  ;;  %7585 = vtanh.f32 %v2687_v44  ;;  %v2691_v13 = vmul.f32 0.5, %v10024_v42 }
 0x36a   : > { %v7578_v33 = vpop.eup %7577  ;;  %14900 = vst [vmem:[#allocation37_spill] sm:$0xff] %v10155_v41  ;;  %v3050_v14 = vadd.f32 %v3049_v48, %v3000_v28  ;;  %v2693_v16 = vmul.f32 0.5, %v10033_v11  ;;  %v10167_v28 = vadd.f32 0.5, %v2805_v63  ;;  %7587 = vtanh.f32 %v2689_v3 }
 0x36b   : > { %2600 = vmatmul.bf16.gmra.mxu3 %v9656_v19  ;;  %v2799_v21 = vmul.f32 0.5, %v7578_v33  ;;  %v7580_v34 = vpop.eup %7579  ;;  %v2911_v10 = vadd.f32 %v2910_v1, %v10136_v38  ;;  %v3006_v55 = vmul.f32 %v10147_v9, %v10147_v9  ;;  %v2695_v42 = vmul.f32 0.5, %v10041_v7 }
 0x36c   : > { %v2472_v45 = vpop.f32.mrf.mxu2  ;;  %v7582_v24 = vpop.eup %7581  ;;  %v3051_v46 = vadd.f32 %v3050_v14, %v3002_v27  ;;  %14902 = vst [vmem:[#allocation13_spill] sm:$0xff] %v10167_v28  ;;  %v2809_v33 = vmul.f32 0.5, %v7580_v34  ;;  %v3008_v11 = vmul.f32 %v10155_v41, %v10155_v41  ;;  %7589 = vtanh.f32 %v2691_v13 }
 0x36d   : > { %v2473_v19 = vadd.f32 %v2472_v45, %v10139_v40  ;;  %v10158_v2 = vadd.f32 0.5, %v2799_v21  ;;  %v7584_v1 = vpop.eup %7583  ;;  %v2811_v27 = vmul.f32 0.5, %v7582_v24  ;;  %v10175_v21 = vadd.f32 0.5, %v2807_v0 }
 0x36e   : > { %v2561_v47 = vpop.f32.mrf.mxu3  ;;  %7591 = vtanh.f32 %v2693_v16  ;;  %v3010_v7 = vmul.f32 %v10167_v28, %v10167_v28  ;;  %v2813_v24 = vmul.f32 0.5, %v7584_v1  ;;  %v2701_v1 = vmul.f32 0.5, %v10107_v26 }
 0x36f   : > { %14901 = vst [vmem:[#allocation39_spill] sm:$0xff] %v10158_v2  ;;  %v10161_v22 = vadd.f32 %v2561_v47, %v2473_v19  ;;  %v2912_v56 = vadd.f32 %v2911_v10, %v10158_v2  ;;  %v3004_v60 = vmul.f32 %v10158_v2, %v10158_v2  ;;  %v7586_v3 = vpop.eup %7585  ;;  %v10180_v19 = vadd.f32 0.5, %v2809_v33 }
 0x370   : > { %14903 = vst [vmem:[#allocation15_spill] sm:$0xff] %v10175_v21  ;;  %v2697_v47 = vmul.f32 0.5, %v10054_v49  ;;  %7593 = vtanh.f32 %v2695_v42  ;;  %v7588_v16 = vpop.eup %7587  ;;  %v3012_v33 = vmul.f32 %v10175_v21, %v10175_v21 }
 0x371   : > { %v2913_v44 = vadd.f32 %v2912_v56, %v10147_v9  ;;  %v3052_v48 = vadd.f32 %v3051_v46, %v3004_v60  ;;  %14904 = vst [vmem:[#allocation38_spill] sm:$0xff] %v10180_v19  ;;  %v10185_v46 = vadd.f32 0.5, %v2811_v27  ;;  %v2699_v56 = vmul.f32 0.5, %v10080_v17 }
 0x372   : > { %v3014_v42 = vmul.f32 %v10180_v19, %v10180_v19  ;;  %7595 = vtanh.f32 %v2697_v47  ;;  %v10197_v17 = vadd.f32 0.5, %v2813_v24  ;;  %v2817_v27 = vmul.f32 0.5, %v7588_v16 }
 0x373   : > { %v2914_v45 = vadd.f32 %v2913_v44, %v10155_v41  ;;  %v3053_v34 = vadd.f32 %v3052_v48, %v3006_v55  ;;  %14905 = vst [vmem:[#allocation40_spill] sm:$0xff] %v10185_v46  ;;  %v2815_v55 = vmul.f32 0.5, %v7586_v3  ;;  %v7590_v48 = vpop.eup %7589  ;;  %7597 = vtanh.f32 %v2699_v56 }
 0x374   : > { %v2474_v63 = vpop.f32.mrf.mxu2  ;;  %14906 = vst [vmem:[#allocation16_spill] sm:$0xff] %v10197_v17  ;;  %v2703_v3 = vmul.f32 0.5, %v10131_v29  ;;  %v2819_v26 = vmul.f32 0.5, %v7590_v48  ;;  %7599 = vtanh.f32 %v2701_v1  ;;  %v10210_v16 = vadd.f32 0.5, %v2817_v27 }
 0x375   : > { %v2475_v14 = vadd.f32 %v2474_v63, %v10139_v40  ;;  %v2915_v0 = vadd.f32 %v2914_v45, %v10167_v28  ;;  %v3054_v13 = vadd.f32 %v3053_v34, %v3008_v11  ;;  %v7592_v11 = vpop.eup %7591  ;;  %v3016_v63 = vmul.f32 %v10185_v46, %v10185_v46 }
 0x376   : > { %v2563_v10 = vpop.f32.mrf.mxu3  ;;  %v10204_v47 = vadd.f32 0.5, %v2815_v55  ;;  %v2821_v24 = vmul.f32 0.5, %v7592_v11  ;;  %14908 = vst [vmem:[#allocation41_spill] sm:$0xff] %v10210_v16  ;;  %7601 = vtanh.f32 %v2703_v3  ;;  %v10217_v48 = vadd.f32 0.5, %v2819_v26 }
 0x377   : > { %v10188_v60 = vadd.f32 %v2563_v10, %v2475_v14  ;;  %v2916_v49 = vadd.f32 %v2915_v0, %v10175_v21  ;;  %v3055_v44 = vadd.f32 %v3054_v13, %v3010_v7  ;;  %v7594_v7 = vpop.eup %7593  ;;  %v3022_v27 = vmul.f32 %v10210_v16, %v10210_v16 }
 0x378   : > { %14907 = vst [vmem:[#allocation18_spill] sm:$0xff] %v10204_v47  ;;  %v2823_v55 = vmul.f32 0.5, %v7594_v7  ;;  %v3024_v26 = vmul.f32 %v10217_v48, %v10217_v48 }
 0x379   : > { %2516 = vmatmul.bf16.gmra.mxu2 %v9680_v8  ;;  %v2917_v45 = vadd.f32 %v2916_v49, %v10180_v19  ;;  %v3056_v34 = vadd.f32 %v3055_v44, %v3012_v33  ;;  %v7596_v33 = vpop.eup %7595  ;;  %v3020_v44 = vmul.f32 %v10204_v47, %v10204_v47  ;;  %14909 = vst [vmem:[#allocation17_spill] sm:$0xff] %v10217_v48  ;;  %v2644_v58 = vmul.f32 0.5, %v10188_v60  ;;  %v7239_v60 = vld [vmem:[%s14369_s8 + $0x34] sm:$0xf] }
 0x37a   : > { %v7598_v11 = vpop.eup %7597 }
 0x37b   : > { %2605 = vmatmul.bf16.gmra.mxu3 %v9704_v15  ;;  %v2918_v8 = vadd.f32 %v2917_v45, %v10185_v46  ;;  %v3057_v14 = vadd.f32 %v3056_v34, %v3014_v42  ;;  %v3018_v15 = vmul.f32 %v10197_v17, %v10197_v17  ;;  %v10220_v45 = vadd.f32 0.5, %v2821_v24  ;;  %v7600_v7 = vpop.eup %7599 }
 0x37c   : > { %v2477_v10 = vpop.f32.mrf.mxu2  ;;  %v2825_v34 = vmul.f32 0.5, %v7596_v33  ;;  %v7602_v24 = vpop.eup %7601 }
 0x37d   : > { %v2478_v0 = vadd.f32 %v2477_v10, %v10139_v40  ;;  %v2919_v29 = vadd.f32 %v2918_v8, %v10197_v17  ;;  %v3058_v56 = vadd.f32 %v3057_v14, %v3016_v63  ;;  %14910 = vst [vmem:[#allocation19_spill] sm:$0xff] %v10220_v45  ;;  %v10225_v8 = vadd.f32 0.5, %v2823_v55  ;;  %v6899_v17 = vld [vmem:[%s14369_s8 + $0x70] sm:$0xf] }
 0x37e   : > { %v2566_v13 = vpop.f32.mrf.mxu3  ;;  %v2827_v14 = vmul.f32 0.5, %v7598_v11  ;;  %v10233_v33 = vadd.f32 0.5, %v2825_v34 }
 0x37f   : > { %v10213_v49 = vadd.f32 %v2566_v13, %v2478_v0  ;;  %v3059_v42 = vadd.f32 %v3058_v56, %v3018_v15  ;;  %v2920_v1 = vadd.f32 %v2919_v29, %v10204_v47  ;;  %14911 = vst [vmem:[#allocation42_spill] sm:$0xff] %v10225_v8  ;;  %v3026_v15 = vmul.f32 %v10220_v45, %v10220_v45 }
 0x380   : > { %14912 = vst [vmem:[#allocation20_spill] sm:$0xff] %v10233_v33  ;;  %v3030_v34 = vmul.f32 %v10233_v33, %v10233_v33 }
 0x381   : > { %v2921_v63 = vadd.f32 %v2920_v1, %v10210_v16  ;;  %v3060_v3 = vadd.f32 %v3059_v42, %v3020_v44  ;;  %v2829_v44 = vmul.f32 0.5, %v7600_v7  ;;  %v3028_v1 = vmul.f32 %v10225_v8, %v10225_v8  ;;  %v7241_v16 = vld [vmem:[%s14369_s8 + $0x44] sm:$0xf] }
 0x382   : > { %v2646_v18 = vmul.f32 0.5, %v10213_v49  ;;  %v6869_v49 = vld [vmem:[%s14369_s8 + $0x38] sm:$0xf0] }
 0x383   : > { %v2922_v10 = vadd.f32 %v2921_v63, %v10217_v48  ;;  %v3061_v0 = vadd.f32 %v3060_v3, %v3022_v27  ;;  %v10240_v27 = vadd.f32 0.5, %v2827_v14  ;;  %v2831_v63 = vmul.f32 0.5, %v7602_v24 }
 0x384   : > { %v2479_v13 = vpop.f32.mrf.mxu2  ;;  %v10246_v7 = vadd.f32 0.5, %v2829_v44 }
 0x385   : > { %v2480_v29 = vadd.f32 %v2479_v13, %v10139_v40  ;;  %v2923_v55 = vadd.f32 %v2922_v10, %v10220_v45  ;;  %v3062_v42 = vadd.f32 %v3061_v0, %v3024_v26  ;;  %14913 = vst [vmem:[#allocation22_spill] sm:$0xff] %v10240_v27  ;;  %v3032_v14 = vmul.f32 %v10240_v27, %v10240_v27 }
 0x386   : > { %v2568_v56 = vpop.f32.mrf.mxu3  ;;  %14914 = vst [vmem:[#allocation21_spill] sm:$0xff] %v10246_v7  ;;  %v10252_v0 = vadd.f32 0.5, %v2831_v63 }
 0x387   : > { %v10238_v11 = vadd.f32 %v2568_v56, %v2480_v29  ;;  %v2924_v3 = vadd.f32 %v2923_v55, %v10225_v8  ;;  %v3063_v48 = vadd.f32 %v3062_v42, %v3026_v15  ;;  %v3034_v56 = vmul.f32 %v10246_v7, %v10246_v7 }
 0x388   : > { %14915 = vst [vmem:[#allocation23_spill] sm:$0xff] %v10252_v0  ;;  %v3036_v42 = vmul.f32 %v10252_v0, %v10252_v0 }
 0x389   : > { %2521 = vmatmul.bf16.gmra.mxu2 %v9732_v43  ;;  %v2925_v26 = vadd.f32 %v2924_v3, %v10233_v33  ;;  %v3064_v10 = vadd.f32 %v3063_v48, %v3028_v1 }
 0x38b   : > { %2610 = vmatmul.bf16.gmra.mxu3 %v9744_v59  ;;  %v2926_v13 = vadd.f32 %v2925_v26, %v10240_v27  ;;  %v3065_v24 = vadd.f32 %v3064_v10, %v3030_v34 }
 0x38c   : > { %v2482_v15 = vpop.f32.mrf.mxu2 }
 0x38d   : > { %v2483_v43 = vadd.f32 %v2482_v15, %v10139_v40  ;;  %v2927_v44 = vadd.f32 %v2926_v13, %v10246_v7  ;;  %v3066_v48 = vadd.f32 %v3065_v24, %v3032_v14 }
 0x38e   : > { %v2571_v29 = vpop.f32.mrf.mxu3 }
 0x38f   : > { %v10259_v55 = vadd.f32 %v2571_v29, %v2483_v43  ;;  %v2928_v59 = vadd.f32 %v2927_v44, %v10252_v0  ;;  %v3067_v1 = vadd.f32 %v3066_v48, %v3034_v56 }
 0x391   : > { %v2929_v63 = vrot.slane %v2928_v59, 4  ;;  %v3068_v3 = vadd.f32 %v3067_v1, %v3036_v42  ;;  %v14916_v1 = vld [vmem:[#allocation2_spill] sm:$0xff] }
 0x393   : > { %v2930_v34 = vadd.f32 %v2929_v63, %v2928_v59  ;;  %v3069_v26 = vrot.slane %v3068_v3, 4 }
 0x394   : > { %v2484_v10 = vpop.f32.mrf.mxu2 }
 0x395   : > { %v2485_v15 = vadd.f32 %v2484_v10, %v10139_v40  ;;  %v2931_v33 = vrot.slane %v2930_v34, 2  ;;  %v3070_v8 = vadd.f32 %v3069_v26, %v3068_v3  ;;  %v6965_v10 = vld [vmem:[%s14369_s8 + $0xf8] sm:$0xf0] }
 0x396   : > { %v2573_v27 = vpop.f32.mrf.mxu3 }
 0x397   : > { %v10265_v13 = vadd.f32 %v2573_v27, %v2485_v15  ;;  %v2932_v14 = vadd.f32 %v2931_v33, %v2930_v34  ;;  %v3071_v24 = vrot.slane %v3070_v8, 2  ;;  %v7263_v34 = vld [vmem:[%s14369_s8 + $0xf4] sm:$0xf] }
 0x399   : > { %2526 = vmatmul.bf16.gmra.mxu2 %v9772_v53  ;;  %v2933_v43 = vrot.slane %v2932_v14, 1  ;;  %v3072_v29 = vadd.f32 %v3071_v24, %v3070_v8  ;;  %v6901_v8 = vld [vmem:[%s14369_s8 + $0x78] sm:$0xf0] }
 0x39b   : > { %2615 = vmatmul.bf16.gmra.mxu3 %v9784_v61  ;;  %v2934_v56 = vadd.f32 %v2933_v43, %v2932_v14  ;;  %v3073_v44 = vrot.slane %v3072_v29, 1  ;;  %v7247_v61 = vld [vmem:[%s14369_s8 + $0x74] sm:$0xf]  ;;  %v10298_v14 = vor.u32 %v7263_v34, %v6965_v10 }
 0x39c   : > { %v2487_v48 = vpop.f32.mrf.mxu2  ;;  %v10291_v26 = vor.u32 %v7247_v61, %v6901_v8 }
 0x39d   : > { %v2488_v59 = vadd.f32 %v2487_v48, %v10139_v40  ;;  %v10271_v63 = vmul.f32 %v2934_v56, %v14916_v1  ;;  %v3074_v3 = vadd.f32 %v3073_v44, %v3072_v29  ;;  %3849 = vmatpush.bf16.msrb.mxu3 %v10298_v14 }
 0x39e   : > { %v2576_v42 = vpop.f32.mrf.mxu3  ;;  %3760 = vmatpush.bf16.msrb.mxu2 %v10291_v26 }
 0x39f   : > { %14917 = vst [vmem:[#allocation26_spill] sm:$0xff] %v10271_v63  ;;  %v10273_v27 = vadd.f32 %v2576_v42, %v2488_v59  ;;  %v10276_v33 = vmul.f32 %v3074_v3, %v14916_v1  ;;  %v10280_v53 = vmul.f32 %v10271_v63, %v10271_v63 }
 0x3a4   : > { %v2489_v24 = vpop.f32.mrf.mxu2 }
 0x3a5   : > { %v2490_v43 = vadd.f32 %v2489_v24, %v10139_v40 }
 0x3a6   : > { %v2578_v29 = vpop.f32.mrf.mxu3 }
 0x3a7   : > { %v10303_v56 = vadd.f32 %v2578_v29, %v2490_v43 }
 0x3a9   : > { %2531 = vmatmul.bf16.gmra.mxu2 %v9812_v50 }
 0x3ab   : > { %2620 = vmatmul.bf16.gmra.mxu3 %v9824_v52 }
 0x3ac   : > { %v2492_v59 = vpop.f32.mrf.mxu2 }
 0x3ad   : > { %v2493_v42 = vadd.f32 %v2492_v59, %v10139_v40  ;;  %v7245_v59 = vld [vmem:[%s14369_s8 + $0x64] sm:$0xf] }
 0x3ae   : > { %v2581_v3 = vpop.f32.mrf.mxu3 }
 0x3af   : > { %v10316_v34 = vadd.f32 %v2581_v3, %v2493_v42  ;;  %v6893_v42 = vld [vmem:[%s14369_s8 + $0x68] sm:$0xf0] }
 0x3b0   : > { %v10336_v3 = vor.u32 %v7245_v59, %v6893_v42 }
 0x3b1   : > { %v2658_v39 = vmul.f32 0.5, %v10316_v34 }
 0x3b2   : > { %3761 = vmatpush.bf16.msrb.mxu2 %v10336_v3 }
 0x3b4   : > { %v10318_v10 = vpop.f32.mrf.mxu2 }
 0x3b6   : > { %v10320_v24 = vpop.f32.mrf.mxu3 }
 0x3b9   : > { %2536 = vmatmul.bf16.gmra.mxu2 %v9852_v51  ;;  %v7261_v51 = vld [vmem:[%s14369_s8 + $0xe4] sm:$0xf] }
 0x3bb   : > { %2625 = vmatmul.bf16.gmra.mxu3 %v9864_v32  ;;  %v6957_v32 = vld [vmem:[%s14369_s8 + $0xe8] sm:$0xf0] }
 0x3bc   : > { %v2497_v50 = vpop.f32.mrf.mxu2 }
 0x3bd   : > { %v2498_v52 = vadd.f32 %v2497_v50, %v10139_v40  ;;  %v10341_v50 = vor.u32 %v7261_v51, %v6957_v32 }
 0x3be   : > { %v2586_v43 = vpop.f32.mrf.mxu3 }
 0x3bf   : > { %v10325_v29 = vadd.f32 %v2586_v43, %v2498_v52  ;;  %3850 = vmatpush.bf16.msrb.mxu3 %v10341_v50 }
 0x3c4   : > { %v10344_v52 = vpop.f32.mrf.mxu2 }
 0x3c5   : > { %v2500_v36 = vadd.f32 %v10344_v52, %v10139_v40 }
 0x3c6   : > { %v10347_v43 = vpop.f32.mrf.mxu3 }
 0x3c9   : > { %2541 = vmatmul.bf16.gmra.mxu2 %v9892_v62 }
 0x3cb   : > { %2630 = vmatmul.bf16.gmra.mxu3 %v9900_v5  ;;  %v7243_v5 = vld [vmem:[%s14369_s8 + $0x54] sm:$0xf] }
 0x3cc   : > { %v2502_v59 = vpop.f32.mrf.mxu2 }
 0x3cd   : > { %v2503_v42 = vadd.f32 %v2502_v59, %v10139_v40 }
 0x3ce   : > { %v2591_v8 = vpop.f32.mrf.mxu3 }
 0x3cf   : > { %v10352_v61 = vadd.f32 %v2591_v8, %v2503_v42  ;;  %v6885_v8 = vld [vmem:[%s14369_s8 + $0x58] sm:$0xf0] }
 0x3d0   : > { %v10372_v59 = vor.u32 %v7243_v5, %v6885_v8 }
 0x3d2   : > { %3762 = vmatpush.bf16.msrb.mxu2 %v10372_v59 }
 0x3d4   : > { %v10354_v51 = vpop.f32.mrf.mxu2 }
 0x3d5   : > { %v2505_v52 = vadd.f32 %v10354_v51, %v10139_v40 }
 0x3d6   : > { %v10356_v32 = vpop.f32.mrf.mxu3 }
 0x3d9   : > { %2546 = vmatmul.bf16.gmra.mxu2 %v9932_v54  ;;  %v7259_v54 = vld [vmem:[%s14369_s8 + $0xd4] sm:$0xf] }
 0x3db   : > { %2635 = vmatmul.bf16.gmra.mxu3 %v9936_v30  ;;  %v6949_v30 = vld [vmem:[%s14369_s8 + $0xd8] sm:$0xf0] }
 0x3dc   : > { %v2507_v48 = vpop.f32.mrf.mxu2 }
 0x3dd   : > { %v2508_v44 = vadd.f32 %v2507_v48, %v10139_v40 }
 0x3de   : > { %v2596_v62 = vpop.f32.mrf.mxu3 }
 0x3df   : > { %v10361_v15 = vadd.f32 %v2596_v62, %v2508_v44  ;;  %v10377_v44 = vor.u32 %v7259_v54, %v6949_v30 }
 0x3e1   : > { %3851 = vmatpush.bf16.msrb.mxu3 %v10377_v44 }
 0x3e4   : > { %v10380_v48 = vpop.f32.mrf.mxu2 }
 0x3e6   : > { %v10383_v42 = vpop.f32.mrf.mxu3 }
 0x3ec   : > { %v2512_v62 = vpop.f32.mrf.mxu2 }
 0x3ed   : > { %v2513_v0 = vadd.f32 %v2512_v62, %v10139_v40  ;;  %v6877_v62 = vld [vmem:[%s14369_s8 + $0x48] sm:$0xf0] }
 0x3ee   : > { %v2601_v7 = vpop.f32.mrf.mxu3 }
 0x3ef   : > { %v10386_v5 = vadd.f32 %v2601_v7, %v2513_v0  ;;  %v7257_v7 = vld [vmem:[%s14369_s8 + $0xc4] sm:$0xf]  ;;  %v10404_v0 = vor.u32 %v7241_v16, %v6877_v62  ;;  %v7248_v16 = vld [vmem:[%s14369_s8 + $0x74] sm:$0xf0]  ;;  %v6963_v62 = vld [vmem:[%s14369_s8 + $0xf0] sm:$0xf] }
 0x3f1   : > { %3763 = vmatpush.bf16.msrb.mxu2 %v10404_v0 }
 0x3f4   : > { %v10388_v8 = vpop.f32.mrf.mxu2 }
 0x3f6   : > { %v10390_v2 = vpop.f32.mrf.mxu3 }
 0x3fc   : > { %v2517_v54 = vpop.f32.mrf.mxu2 }
 0x3fd   : > { %v2518_v30 = vadd.f32 %v2517_v54, %v10139_v40  ;;  %v6941_v54 = vld [vmem:[%s14369_s8 + $0xc8] sm:$0xf0] }
 0x3fe   : > { %v2606_v38 = vpop.f32.mrf.mxu3 }
 0x3ff   : > { %v10393_v45 = vadd.f32 %v2606_v38, %v2518_v30  ;;  %v10409_v38 = vor.u32 %v7257_v7, %v6941_v54  ;;  %v10426_v7 = vor.u32 %v7248_v16, %v6899_v17  ;;  %v7264_v54 = vld [vmem:[%s14369_s8 + $0xf4] sm:$0xf0]  ;;  %v6891_v16 = vld [vmem:[%s14369_s8 + $0x60] sm:$0xf] }
 0x400   : > { %v10431_v46 = vor.u32 %v7264_v54, %v6963_v62  ;;  %v7246_v62 = vld [vmem:[%s14369_s8 + $0x64] sm:$0xf0]  ;;  %v6955_v54 = vld [vmem:[%s14369_s8 + $0xe0] sm:$0xf] }
 0x401   : > { %3852 = vmatpush.bf16.msrb.mxu3 %v10409_v38  ;;  %3361 = vmatpush.bf16.msra.mxu0 %v10426_v7 }
 0x402   : > { %3374 = vmatpush.bf16.msra.mxu1 %v10431_v46 }
 0x404   : > { %v10412_v30 = vpop.f32.mrf.mxu2 }
 0x406   : > { %v10415_v47 = vpop.f32.mrf.mxu3 }
 0x40c   : > { %v2522_v19 = vpop.f32.mrf.mxu2 }
 0x40d   : > { %v2523_v21 = vadd.f32 %v2522_v19, %v10139_v40  ;;  %v2642_v19 = vmul.f32 0.5, %v10161_v22 }
 0x40e   : > { %v2611_v28 = vpop.f32.mrf.mxu3 }
 0x40f   : > { %v10436_v41 = vadd.f32 %v2611_v28, %v2523_v21  ;;  %v10452_v28 = vor.u32 %v7246_v62, %v6891_v16  ;;  %v7262_v21 = vld [vmem:[%s14369_s8 + $0xe4] sm:$0xf0]  ;;  %7603 = vtanh.f32 %v2642_v19  ;;  %v2648_v16 = vmul.f32 0.5, %v10238_v11 }
 0x410   : > { %v10458_v25 = vor.u32 %v7262_v21, %v6955_v54  ;;  %7605 = vtanh.f32 %v2644_v58  ;;  %v2650_v62 = vmul.f32 0.5, %v10259_v55  ;;  %v7255_v54 = vld [vmem:[%s14369_s8 + $0xb4] sm:$0xf]  ;;  %v10478_v19 = vor.u32 %v7239_v60, %v6869_v49  ;;  %v6933_v58 = vld [vmem:[%s14369_s8 + $0xb8] sm:$0xf0] }
 0x411   : > { %3362 = vmatpush.bf16.msra.mxu0 %v10452_v28  ;;  %7607 = vtanh.f32 %v2646_v18  ;;  %v10483_v18 = vor.u32 %v7255_v54, %v6933_v58  ;;  %v2652_v55 = vmul.f32 0.5, %v10265_v13  ;;  %v2654_v60 = vmul.f32 0.5, %v10273_v27  ;;  %v7244_v27 = vld [vmem:[%s14369_s8 + $0x54] sm:$0xf0] }
 0x412   : > { %3375 = vmatpush.bf16.msra.mxu1 %v10458_v25  ;;  %7609 = vtanh.f32 %v2648_v16  ;;  %3764 = vmatpush.bf16.msrb.mxu2 %v10478_v19  ;;  %v2495_v49 = vadd.f32 %v10318_v10, %v10139_v40  ;;  %v2656_v54 = vmul.f32 0.5, %v10303_v56  ;;  %v6947_v10 = vld [vmem:[%s14369_s8 + $0xd0] sm:$0xf] }
 0x413   : > { %7611 = vtanh.f32 %v2650_v62  ;;  %3853 = vmatpush.bf16.msrb.mxu3 %v10483_v18  ;;  %v6883_v62 = vld [vmem:[%s14369_s8 + $0x50] sm:$0xf] }
 0x414   : > { %v10438_v9 = vpop.f32.mrf.mxu2  ;;  %7613 = vtanh.f32 %v2652_v55  ;;  %v2584_v56 = vadd.f32 %v10320_v24, %v2495_v49  ;;  %v7260_v55 = vld [vmem:[%s14369_s8 + $0xd4] sm:$0xf0] }
 0x415   : > { %v7604_v11 = vpop.eup %7603  ;;  %7615 = vtanh.f32 %v2654_v60  ;;  %v10514_v12 = vor.u32 %v7260_v55, %v6947_v10 }
 0x416   : > { %v10440_v17 = vpop.f32.mrf.mxu3  ;;  %v7606_v21 = vpop.eup %7605  ;;  %v2770_v58 = vmul.f32 0.5, %v7604_v11  ;;  %v10506_v11 = vor.u32 %v7244_v27, %v6883_v62  ;;  %7617 = vtanh.f32 %v2656_v54  ;;  %v2660_v62 = vmul.f32 0.5, %v2584_v56 }
 0x417   : > { %v7608_v16 = vpop.eup %7607  ;;  %v2772_v13 = vmul.f32 0.5, %v7606_v21  ;;  %14919 = vst [vmem:[#allocation28_spill] sm:$0xff] %v10514_v12  ;;  %3376 = vmatpush.bf16.msra.mxu1 %v10514_v12  ;;  %7619 = vtanh.f32 %v2658_v39  ;;  %v2594_v39 = vadd.f32 %v10356_v32, %v2505_v52  ;;  %v2510_v32 = vadd.f32 %v10380_v48, %v10139_v40 }
 0x418   : > { %v7610_v37 = vpop.eup %7609  ;;  %v2774_v35 = vmul.f32 0.5, %v7608_v16  ;;  %14918 = vst [vmem:[#allocation25_spill] sm:$0xff] %v10506_v11  ;;  %3363 = vmatpush.bf16.msra.mxu0 %v10506_v11  ;;  %v10519_v24 = vadd.f32 0.5, %v2770_v58  ;;  %v2589_v58 = vadd.f32 %v10347_v43, %v2500_v36  ;;  %7621 = vtanh.f32 %v2660_v62 }
 0x419   : > { %v7612_v21 = vpop.eup %7611  ;;  %v10516_v6 = vadd.f32 0.5, %v2772_v13  ;;  %v2776_v60 = vmul.f32 0.5, %v7610_v37  ;;  %v2662_v37 = vmul.f32 0.5, %v10325_v29 }
 0x41a   : > { %v7614_v16 = vpop.eup %7613  ;;  %v10524_v54 = vadd.f32 0.5, %v2774_v35  ;;  %v2778_v34 = vmul.f32 0.5, %v7612_v21  ;;  %v2975_v56 = vmul.f32 %v10519_v24, %v10519_v24  ;;  %v2664_v43 = vmul.f32 0.5, %v2589_v58 }
 0x41b   : > { %v7616_v13 = vpop.eup %7615  ;;  %v2977_v10 = vmul.f32 %v10516_v6, %v10516_v6  ;;  %v10534_v55 = vadd.f32 0.5, %v2776_v60  ;;  %v2780_v21 = vmul.f32 0.5, %v7614_v16  ;;  %v2935_v36 = vadd.f32 %v10516_v6, %v10519_v24 }
 0x41c   : > { %v10462_v23 = vpop.f32.mrf.mxu2  ;;  %14920 = vst [vmem:[#allocation30_spill] sm:$0xff] %v10524_v54  ;;  %v7618_v35 = vpop.eup %7617  ;;  %v2979_v51 = vmul.f32 %v10524_v54, %v10524_v54  ;;  %v10540_v57 = vadd.f32 0.5, %v2778_v34  ;;  %v2782_v29 = vmul.f32 0.5, %v7616_v13  ;;  %7623 = vtanh.f32 %v2662_v37 }
 0x41d   : > { %v3075_v60 = vadd.f32 %v2977_v10, %v2975_v56  ;;  %v2981_v4 = vmul.f32 %v10534_v55, %v10534_v55  ;;  %v2784_v63 = vmul.f32 0.5, %v7618_v35  ;;  %v7620_v16 = vpop.eup %7619  ;;  %v2936_v12 = vadd.f32 %v2935_v36, %v10524_v54 }
 0x41e   : > { %v10465_v22 = vpop.f32.mrf.mxu3  ;;  %14921 = vst [vmem:[#allocation43_spill] sm:$0xff] %v10540_v57  ;;  %v10548_v11 = vadd.f32 0.5, %v2780_v21  ;;  %v2666_v34 = vmul.f32 0.5, %v10352_v61  ;;  %v2983_v37 = vmul.f32 %v10540_v57, %v10540_v57  ;;  %v2668_v58 = vmul.f32 0.5, %v2594_v39  ;;  %v7622_v56 = vpop.eup %7621 }
 0x41f   : > { %v3076_v52 = vadd.f32 %v3075_v60, %v2979_v51  ;;  %v2937_v10 = vadd.f32 %v2936_v12, %v10534_v55  ;;  %v10560_v35 = vadd.f32 0.5, %v2782_v29  ;;  %7625 = vtanh.f32 %v2664_v43  ;;  %v6875_v12 = vld [vmem:[%s14369_s8 + $0x40] sm:$0xf] }
 0x420   : > { %14922 = vst [vmem:[#allocation44_spill] sm:$0xff] %v10548_v11  ;;  %v10562_v61 = vadd.f32 0.5, %v2784_v63  ;;  %v2786_v36 = vmul.f32 0.5, %v7620_v16  ;;  %v2985_v51 = vmul.f32 %v10548_v11, %v10548_v11  ;;  %7627 = vtanh.f32 %v2666_v34  ;;  %v6939_v63 = vld [vmem:[%s14369_s8 + $0xc0] sm:$0xf] }
 0x421   : > { %v3077_v21 = vadd.f32 %v3076_v52, %v2981_v4  ;;  %v2938_v54 = vadd.f32 %v2937_v10, %v10540_v57  ;;  %v2599_v39 = vadd.f32 %v10383_v42, %v2510_v32  ;;  %v7242_v4 = vld [vmem:[%s14369_s8 + $0x44] sm:$0xf0]  ;;  %7629 = vtanh.f32 %v2668_v58 }
 0x422   : > { %14923 = vst [vmem:[#allocation24_spill] sm:$0xff] %v10562_v61  ;;  %v7624_v48 = vpop.eup %7623  ;;  %v2515_v43 = vadd.f32 %v10388_v8, %v10139_v40  ;;  %v10579_v60 = vor.u32 %v7242_v4, %v6875_v12  ;;  %v7258_v42 = vld [vmem:[%s14369_s8 + $0xc4] sm:$0xf0]  ;;  %v2987_v16 = vmul.f32 %v10560_v35, %v10560_v35  ;;  %v2788_v34 = vmul.f32 0.5, %v7622_v56 }
 0x423   : > { %v3078_v29 = vadd.f32 %v3077_v21, %v2983_v37  ;;  %v2670_v32 = vmul.f32 0.5, %v10361_v15  ;;  %v10587_v52 = vor.u32 %v7258_v42, %v6939_v63  ;;  %v2939_v37 = vadd.f32 %v2938_v54, %v10548_v11 }
 0x424   : > { %v10487_v20 = vpop.f32.mrf.mxu2  ;;  %v2790_v58 = vmul.f32 0.5, %v7624_v48  ;;  %3364 = vmatpush.bf16.msra.mxu0 %v10579_v60  ;;  %v2989_v21 = vmul.f32 %v10562_v61, %v10562_v61  ;;  %v10593_v12 = vadd.f32 0.5, %v2786_v36  ;;  %v2672_v4 = vmul.f32 0.5, %v2599_v39 }
 0x425   : > { %v7626_v8 = vpop.eup %7625  ;;  %v3079_v10 = vadd.f32 %v3078_v29, %v2985_v51  ;;  %3377 = vmatpush.bf16.msra.mxu1 %v10587_v52  ;;  %v2604_v15 = vadd.f32 %v10390_v2, %v2515_v43  ;;  %v2520_v54 = vadd.f32 %v10412_v30, %v10139_v40  ;;  %v2940_v51 = vadd.f32 %v2939_v37, %v10560_v35 }
 0x426   : > { %v10493_v31 = vpop.f32.mrf.mxu3  ;;  %14924 = vst [vmem:[#allocation45_spill] sm:$0xff] %v10593_v12  ;;  %v7628_v48 = vpop.eup %7627  ;;  %v10604_v29 = vadd.f32 0.5, %v2788_v34  ;;  %7631 = vtanh.f32 %v2670_v32  ;;  %v10606_v39 = vadd.f32 0.5, %v2790_v58  ;;  %v2792_v42 = vmul.f32 0.5, %v7626_v8  ;;  %v6861_v34 = vld [vmem:[%s14369_s8 + $0x28] sm:$0xf0] }
 0x427   : > { %v3080_v63 = vadd.f32 %v3079_v10, %v2987_v16  ;;  %v7630_v36 = vpop.eup %7629  ;;  %v2674_v11 = vmul.f32 0.5, %v10386_v5  ;;  %v2941_v2 = vadd.f32 %v2940_v51, %v10562_v61  ;;  %v2991_v30 = vmul.f32 %v10593_v12, %v10593_v12  ;;  %v7237_v16 = vld [vmem:[%s14369_s8 + $0x24] sm:$0xf]  ;;  %v6925_v10 = vld [vmem:[%s14369_s8 + $0xa8] sm:$0xf0] }
 0x428   : > { %7633 = vtanh.f32 %v2672_v4  ;;  %v7253_v32 = vld [vmem:[%s14369_s8 + $0xa4] sm:$0xf]  ;;  %v2676_v5 = vmul.f32 0.5, %v2604_v15  ;;  %v2609_v37 = vadd.f32 %v10415_v47, %v2520_v54  ;;  %v2525_v58 = vadd.f32 %v10438_v9, %v10139_v40 }
 0x429   : > { %v3081_v43 = vadd.f32 %v3080_v63, %v2989_v21  ;;  %v10624_v8 = vor.u32 %v7237_v16, %v6861_v34  ;;  %v2993_v21 = vmul.f32 %v10604_v29, %v10604_v29  ;;  %v2794_v4 = vmul.f32 0.5, %v7628_v48 }
 0x42a   : > { %v2796_v51 = vmul.f32 0.5, %v7630_v36  ;;  %v10631_v63 = vor.u32 %v7253_v32, %v6925_v10  ;;  %v2942_v15 = vadd.f32 %v2941_v2, %v10593_v12  ;;  %7635 = vtanh.f32 %v2674_v11 }
 0x42b   : > { %v2678_v47 = vmul.f32 0.5, %v10393_v45  ;;  %v2528_v9 = vadd.f32 %v10462_v23, %v10139_v40  ;;  %3765 = vmatpush.bf16.msrb.mxu2 %v10624_v8  ;;  %v3082_v16 = vadd.f32 %v3081_v43, %v2991_v30  ;;  %v2995_v34 = vmul.f32 %v10606_v39, %v10606_v39 }
 0x42c   : > { %v10521_v49 = vpop.f32.mrf.mxu2  ;;  %v7632_v54 = vpop.eup %7631  ;;  %v10640_v61 = vadd.f32 0.5, %v2792_v42  ;;  %3854 = vmatpush.bf16.msrb.mxu3 %v10631_v63  ;;  %v2943_v36 = vadd.f32 %v2942_v15, %v10604_v29  ;;  %7637 = vtanh.f32 %v2676_v5  ;;  %v2680_v11 = vmul.f32 0.5, %v2609_v37 }
 0x42d   : > { %v2614_v45 = vadd.f32 %v10440_v17, %v2525_v58  ;;  %v3083_v32 = vadd.f32 %v3082_v16, %v2993_v21  ;;  %v10647_v10 = vadd.f32 0.5, %v2794_v4  ;;  %v10649_v43 = vadd.f32 0.5, %v2796_v51  ;;  %v6867_v4 = vld [vmem:[%s14369_s8 + $0x30] sm:$0xf] }
 0x42e   : > { %v10528_v27 = vpop.f32.mrf.mxu3  ;;  %14925 = vst [vmem:[#allocation47_spill] sm:$0xff] %v10640_v61  ;;  %v7634_v23 = vpop.eup %7633  ;;  %v2530_v42 = vadd.f32 %v10487_v20, %v10139_v40  ;;  %v2798_v30 = vmul.f32 0.5, %v7632_v54  ;;  %7639 = vtanh.f32 %v2678_v47  ;;  %v2682_v12 = vmul.f32 0.5, %v10436_v41  ;;  %v7240_v20 = vld [vmem:[%s14369_s8 + $0x34] sm:$0xf0] }
 0x42f   : > { %14926 = vst [vmem:[#allocation27_spill] sm:$0xff] %v10647_v10  ;;  %v2617_v5 = vadd.f32 %v10465_v22, %v2528_v9  ;;  %v2944_v37 = vadd.f32 %v2943_v36, %v10606_v39  ;;  %v3084_v17 = vadd.f32 %v3083_v32, %v2995_v34  ;;  %v2997_v58 = vmul.f32 %v10640_v61, %v10640_v61  ;;  %v6931_v41 = vld [vmem:[%s14369_s8 + $0xb0] sm:$0xf] }
 0x430   : > { %v2533_v21 = vadd.f32 %v10521_v49, %v10139_v40  ;;  %v7636_v22 = vpop.eup %7635  ;;  %v2800_v51 = vmul.f32 0.5, %v7634_v23  ;;  %7641 = vtanh.f32 %v2680_v11  ;;  %v2684_v15 = vmul.f32 0.5, %v2614_v45  ;;  %v7256_v49 = vld [vmem:[%s14369_s8 + $0xb4] sm:$0xf0] }
 0x431   : > { %v10669_v47 = vor.u32 %v7240_v20, %v6867_v4  ;;  %v2999_v9 = vmul.f32 %v10647_v10, %v10647_v10  ;;  %v2619_v54 = vadd.f32 %v10493_v31, %v2530_v42  ;;  %v10679_v34 = vor.u32 %v7256_v49, %v6931_v41 }
 0x432   : > { %v7638_v36 = vpop.eup %7637  ;;  %v2945_v11 = vadd.f32 %v2944_v37, %v10640_v61  ;;  %v10682_v45 = vadd.f32 0.5, %v2798_v30  ;;  %7643 = vtanh.f32 %v2682_v12  ;;  %v2686_v23 = vmul.f32 0.5, %v2617_v5 }
 0x433   : > { %3365 = vmatpush.bf16.msra.mxu0 %v10669_v47  ;;  %v3085_v32 = vadd.f32 %v3084_v17, %v2997_v58  ;;  %v3001_v4 = vmul.f32 %v10649_v43, %v10649_v43  ;;  %v2802_v20 = vmul.f32 0.5, %v7636_v22  ;;  %v2622_v31 = vadd.f32 %v10528_v27, %v2533_v21  ;;  %3378 = vmatpush.bf16.msra.mxu1 %v10679_v34 }
 0x434   : > { %v10553_v62 = vpop.f32.mrf.mxu2  ;;  %v2946_v41 = vadd.f32 %v2945_v11, %v10647_v10  ;;  %v10690_v37 = vadd.f32 0.5, %v2800_v51  ;;  %7645 = vtanh.f32 %v2684_v15  ;;  %v2804_v17 = vmul.f32 0.5, %v7638_v36 }
 0x435   : > { %v2535_v16 = vadd.f32 %v10553_v62, %v10139_v40  ;;  %v7640_v62 = vpop.eup %7639  ;;  %v3086_v5 = vadd.f32 %v3085_v32, %v2999_v9  ;;  %v2688_v58 = vmul.f32 0.5, %v2619_v54  ;;  %v3003_v21 = vmul.f32 %v10682_v45, %v10682_v45 }
 0x436   : > { %v10557_v13 = vpop.f32.mrf.mxu3  ;;  %v7642_v49 = vpop.eup %7641  ;;  %v2947_v27 = vadd.f32 %v2946_v41, %v10649_v43  ;;  %7647 = vtanh.f32 %v2686_v23  ;;  %v10699_v15 = vadd.f32 0.5, %v2802_v20  ;;  %v2806_v10 = vmul.f32 0.5, %v7640_v62 }
 0x437   : > { %v2624_v22 = vadd.f32 %v10557_v13, %v2535_v16  ;;  %v3087_v11 = vadd.f32 %v3086_v5, %v3001_v4  ;;  %v3005_v13 = vmul.f32 %v10690_v37, %v10690_v37  ;;  %v10706_v36 = vadd.f32 0.5, %v2804_v17 }
 0x438   : > { %v7644_v61 = vpop.eup %7643  ;;  %v2948_v9 = vadd.f32 %v2947_v27, %v10682_v45  ;;  %v2808_v23 = vmul.f32 0.5, %v7642_v49  ;;  %7649 = vtanh.f32 %v2688_v58  ;;  %v3007_v62 = vmul.f32 %v10699_v15, %v10699_v15 }
 0x439   : > { %v3088_v4 = vadd.f32 %v3087_v11, %v3003_v21  ;;  %v10712_v41 = vadd.f32 0.5, %v2806_v10  ;;  %v2810_v5 = vmul.f32 0.5, %v7644_v61  ;;  %v3009_v27 = vmul.f32 %v10706_v36, %v10706_v36 }
 0x43a   : > { %v7646_v32 = vpop.eup %7645  ;;  %v2949_v20 = vadd.f32 %v2948_v9, %v10690_v37  ;;  %v10717_v21 = vadd.f32 0.5, %v2808_v23 }
 0x43b   : > { %14927 = vst [vmem:[#allocation46_spill] sm:$0xff] %v10712_v41  ;;  %v3011_v9 = vmul.f32 %v10712_v41, %v10712_v41 }
 0x43c   : > { %v10595_v57 = vpop.f32.mrf.mxu2  ;;  %14928 = vst [vmem:[#allocation48_spill] sm:$0xff] %v10717_v21  ;;  %v2950_v10 = vadd.f32 %v2949_v20, %v10699_v15 }
 0x43d   : > { %v2538_v12 = vadd.f32 %v10595_v57, %v10139_v40  ;;  %v2690_v57 = vmul.f32 0.5, %v2622_v31 }
 0x43e   : > { %v10601_v56 = vpop.f32.mrf.mxu3  ;;  %v2951_v23 = vadd.f32 %v2950_v10, %v10706_v36 }
 0x43f   : > { %v2627_v54 = vadd.f32 %v10601_v56, %v2538_v12  ;;  %7651 = vtanh.f32 %v2690_v57  ;;  %v3089_v12 = vadd.f32 %v3088_v4, %v3005_v13 }
 0x441   : > { %v2694_v17 = vmul.f32 0.5, %v2627_v54  ;;  %v3090_v57 = vadd.f32 %v3089_v12, %v3007_v62 }
 0x443   : > { %v3091_v4 = vadd.f32 %v3090_v57, %v3009_v27 }
 0x444   : > { %v2539_v48 = vpop.f32.mrf.mxu2 }
 0x445   : > { %v2540_v51 = vadd.f32 %v2539_v48, %v10139_v40  ;;  %v2692_v48 = vmul.f32 0.5, %v2624_v22 }
 0x446   : > { %v10645_v2 = vpop.f32.mrf.mxu3 }
 0x447   : > { %v2629_v31 = vadd.f32 %v10645_v2, %v2540_v51  ;;  %v2812_v2 = vmul.f32 0.5, %v7646_v32  ;;  %7653 = vtanh.f32 %v2692_v48  ;;  %v3013_v48 = vmul.f32 %v10717_v21, %v10717_v21 }
 0x448   : > { %7655 = vtanh.f32 %v2694_v17 }
 0x449   : > { %v2696_v51 = vmul.f32 0.5, %v2629_v31  ;;  %v10727_v32 = vadd.f32 0.5, %v2812_v2 }
 0x44b   : > { %14930 = vst [vmem:[#allocation51_spill] sm:$0xff] %v10727_v32  ;;  %7657 = vtanh.f32 %v2696_v51  ;;  %v6923_v51 = vld [vmem:[%s14369_s8 + $0xa0] sm:$0xf] }
 0x44c   : > { %v2542_v42 = vpop.f32.mrf.mxu2 }
 0x44d   : > { %v2543_v16 = vadd.f32 %v2542_v42, %v10139_v40  ;;  %v7648_v42 = vpop.eup %7647 }
 0x44e   : > { %v2631_v30 = vpop.f32.mrf.mxu3  ;;  %v7650_v11 = vpop.eup %7649  ;;  %v2814_v13 = vmul.f32 0.5, %v7648_v42 }
 0x44f   : > { %v2632_v49 = vadd.f32 %v2631_v30, %v2543_v16  ;;  %v10722_v30 = vadd.f32 0.5, %v2810_v5  ;;  %v7652_v16 = vpop.eup %7651  ;;  %v2816_v20 = vmul.f32 0.5, %v7650_v11  ;;  %v3092_v5 = vadd.f32 %v3091_v4, %v3011_v9 }
 0x450   : > { %v7654_v62 = vpop.eup %7653  ;;  %v10732_v12 = vadd.f32 0.5, %v2814_v13  ;;  %v3017_v9 = vmul.f32 %v10727_v32, %v10727_v32 }
 0x451   : > { %14929 = vst [vmem:[#allocation49_spill] sm:$0xff] %v10722_v30  ;;  %v2698_v54 = vmul.f32 0.5, %v2632_v49  ;;  %v3015_v42 = vmul.f32 %v10722_v30, %v10722_v30  ;;  %v6859_v49 = vld [vmem:[%s14369_s8 + $0x20] sm:$0xf]  ;;  %v3093_v57 = vadd.f32 %v3092_v5, %v3013_v48  ;;  %v6851_v48 = vld [vmem:[%s14369_s8 + $0x10] sm:$0xf] }
 0x452   : > { %14931 = vst [vmem:[#allocation29_spill] sm:$0xff] %v10732_v12 }
 0x453   : > { %7659 = vtanh.f32 %v2698_v54  ;;  %v7656_v54 = vpop.eup %7655 }
 0x454   : > { %v2544_v56 = vpop.f32.mrf.mxu2 }
 0x455   : > { %v2545_v58 = vadd.f32 %v2544_v56, %v10139_v40  ;;  %v2952_v56 = vadd.f32 %v2951_v23, %v10712_v41  ;;  %v2820_v23 = vmul.f32 0.5, %v7654_v62  ;;  %v3019_v62 = vmul.f32 %v10732_v12, %v10732_v12 }
 0x456   : > { %v2633_v22 = vpop.f32.mrf.mxu3 }
 0x457   : > { %v2634_v61 = vadd.f32 %v2633_v22, %v2545_v58  ;;  %v7238_v58 = vld [vmem:[%s14369_s8 + $0x24] sm:$0xf0]  ;;  %v2818_v22 = vmul.f32 0.5, %v7652_v16  ;;  %v2953_v11 = vadd.f32 %v2952_v56, %v10717_v21  ;;  %v10754_v16 = vadd.f32 0.5, %v2816_v20  ;;  %v7236_v56 = vld [vmem:[%s14369_s8 + $0x14] sm:$0xf0] }
 0x458   : > { %v10741_v10 = vor.u32 %v7238_v58, %v6859_v49  ;;  %v3094_v49 = vadd.f32 %v3093_v57, %v3015_v42  ;;  %v6915_v20 = vld [vmem:[%s14369_s8 + $0x90] sm:$0xf]  ;;  %v10772_v58 = vor.u32 %v7236_v56, %v6851_v48 }
 0x459   : > { %v2700_v31 = vmul.f32 0.5, %v2634_v61  ;;  %v7254_v61 = vld [vmem:[%s14369_s8 + $0xa4] sm:$0xf0]  ;;  %v10770_v5 = vadd.f32 0.5, %v2818_v22 }
 0x45a   : > { %v10752_v13 = vor.u32 %v7254_v61, %v6923_v51  ;;  %3366 = vmatpush.bf16.msra.mxu0 %v10741_v10  ;;  %v2822_v51 = vmul.f32 0.5, %v7656_v54  ;;  %v3095_v57 = vadd.f32 %v3094_v49, %v3017_v9  ;;  %v6843_v54 = vld [vmem:[%s14369_s8] sm:$0xf]  ;;  %v7234_v9 = vld [vmem:[%s14369_s8 + $0x4] sm:$0xf0] }
 0x45b   : > { %7661 = vtanh.f32 %v2700_v31  ;;  %v7658_v31 = vpop.eup %7657 }
 0x45c   : > { %v2547_v17 = vpop.f32.mrf.mxu2  ;;  %3379 = vmatpush.bf16.msra.mxu1 %v10752_v13  ;;  %v2824_v48 = vmul.f32 0.5, %v7658_v31  ;;  %v3096_v49 = vadd.f32 %v3095_v57, %v3019_v62  ;;  %v6907_v31 = vld [vmem:[%s14369_s8 + $0x80] sm:$0xf] }
 0x45d   : > { %v2548_v27 = vadd.f32 %v2547_v17, %v10139_v40  ;;  %v2954_v17 = vadd.f32 %v2953_v11, %v10722_v30  ;;  %v7660_v11 = vpop.eup %7659  ;;  %v3021_v30 = vmul.f32 %v10754_v16, %v10754_v16 }
 0x45e   : > { %v2636_v2 = vpop.f32.mrf.mxu3  ;;  %3367 = vmatpush.bf16.msra.mxu0 %v10772_v58  ;;  %v2826_v62 = vmul.f32 0.5, %v7660_v11 }
 0x45f   : > { %v2637_v4 = vadd.f32 %v2636_v2, %v2548_v27  ;;  %v7252_v27 = vld [vmem:[%s14369_s8 + $0x94] sm:$0xf0]  ;;  %v2955_v2 = vadd.f32 %v2954_v17, %v10727_v32  ;;  %v3097_v21 = vadd.f32 %v3096_v49, %v3021_v30 }
 0x460   : > { %v10778_v61 = vor.u32 %v7252_v27, %v6915_v20  ;;  %v3023_v20 = vmul.f32 %v10770_v5, %v10770_v5  ;;  %v7250_v27 = vld [vmem:[%s14369_s8 + $0x84] sm:$0xf0] }
 0x461   : > { %v2702_v42 = vmul.f32 0.5, %v2637_v4  ;;  %v2956_v22 = vadd.f32 %v2955_v2, %v10732_v12  ;;  %v10784_v4 = vadd.f32 0.5, %v2820_v23  ;;  %v7662_v17 = vpop.eup %7661  ;;  %v10805_v12 = vadd.f32 0.5, %v2822_v51 }
 0x462   : > { %3380 = vmatpush.bf16.msra.mxu1 %v10778_v61  ;;  %v10807_v32 = vor.u32 %v7250_v27, %v6907_v31  ;;  %v2828_v41 = vmul.f32 0.5, %v7662_v17  ;;  %v3098_v11 = vadd.f32 %v3097_v21, %v3023_v20 }
 0x463   : > { %7663 = vtanh.f32 %v2702_v42  ;;  %14932 = vst [vmem:[#allocation31_spill] sm:$0xff] %v10784_v4  ;;  %v10796_v42 = vor.u32 %v7234_v9, %v6843_v54  ;;  %v2957_v2 = vadd.f32 %v2956_v22, %v10754_v16  ;;  %v3025_v54 = vmul.f32 %v10784_v4, %v10784_v4 }
 0x464   : > { %v2549_v56 = vpop.f32.mrf.mxu2  ;;  %14933 = vst [vmem:[#allocation50_spill] sm:$0xff] %v10805_v12  ;;  %v10813_v9 = vadd.f32 0.5, %v2824_v48  ;;  %v3027_v49 = vmul.f32 %v10805_v12, %v10805_v12  ;;  %v10826_v27 = vadd.f32 0.5, %v2828_v41 }
 0x465   : > { %v2550_v23 = vadd.f32 %v2549_v56, %v10139_v40  ;;  %3368 = vmatpush.bf16.msra.mxu0 %v10796_v42  ;;  %v2958_v56 = vadd.f32 %v2957_v2, %v10770_v5  ;;  %v3099_v48 = vadd.f32 %v3098_v11, %v3025_v54 }
 0x466   : > { %v2638_v57 = vpop.f32.mrf.mxu3  ;;  %14934 = vst [vmem:[#allocation52_spill] sm:$0xff] %v10813_v9  ;;  %3381 = vmatpush.bf16.msra.mxu1 %v10807_v32 }
 0x467   : > { %v2639_v40 = vadd.f32 %v2638_v57, %v2550_v23  ;;  %v2959_v30 = vadd.f32 %v2958_v56, %v10784_v4  ;;  %v10821_v23 = vadd.f32 0.5, %v2826_v62  ;;  %14936 = vst [vmem:[#allocation54_spill] sm:$0xff] %v10826_v27 }
 0x469   : > { %3387 = vmatpush.bf16.msrb.mxu0 %v10291_v26  ;;  %v7664_v51 = vpop.eup %7663  ;;  %v2704_v22 = vmul.f32 0.5, %v2639_v40  ;;  %14935 = vst [vmem:[#allocation53_spill] sm:$0xff] %v10821_v23  ;;  %v2960_v17 = vadd.f32 %v2959_v30, %v10805_v12  ;;  %v3029_v26 = vmul.f32 %v10813_v9, %v10813_v9  ;;  %v3031_v20 = vmul.f32 %v10821_v23, %v10821_v23  ;;  %v7251_v30 = vld [vmem:[%s14369_s8 + $0x94] sm:$0xf] }
 0x46a   : > { %3400 = vmatpush.bf16.msrb.mxu1 %v10298_v14  ;;  %v2830_v31 = vmul.f32 0.5, %v7664_v51  ;;  %v3100_v14 = vadd.f32 %v3099_v48, %v3027_v49  ;;  %v3033_v40 = vmul.f32 %v10826_v27, %v10826_v27 }
 0x46b   : > { %7665 = vtanh.f32 %v2704_v22  ;;  %v2961_v21 = vadd.f32 %v2960_v17, %v10813_v9  ;;  %v6917_v17 = vld [vmem:[%s14369_s8 + $0x98] sm:$0xf0] }
 0x46c   : > { %v10833_v2 = vadd.f32 0.5, %v2830_v31  ;;  %v3101_v62 = vadd.f32 %v3100_v14, %v3029_v26  ;;  %v6920_v26 = vor.u32 %v7251_v30, %v6917_v17 }
 0x46d   : > { %3388 = vmatpush.bf16.msrb.mxu0 %v10336_v3  ;;  %v2962_v57 = vadd.f32 %v2961_v21, %v10821_v23  ;;  %v14979_v23 = vld [vmem:[#allocation48_spill] sm:$0xff] }
 0x46e   : > { %3401 = vmatpush.bf16.msrb.mxu1 %v10341_v50  ;;  %14937 = vst [vmem:[#allocation55_spill] sm:$0xff] %v10833_v2  ;;  %v3102_v3 = vadd.f32 %v3101_v62, %v3031_v20  ;;  %v3035_v56 = vmul.f32 %v10833_v2, %v10833_v2  ;;  %3855 = vmatpush.bf16.msrb.mxu3 %v6920_v26 }
 0x46f   : > { %v2963_v50 = vadd.f32 %v2962_v57, %v10826_v27  ;;  %v14939_v62 = vsub.f32 %v10276_v33, %v10280_v53 }
 0x470   : > { %v3103_v51 = vadd.f32 %v3102_v3, %v3033_v40  ;;  %v10872_v40 = vld [vmem:[%s603_s29] sm:$0xf] }
 0x471   : > { %3389 = vmatpush.bf16.msrb.mxu0 %v10372_v59  ;;  %v7666_v41 = vpop.eup %7665  ;;  %v2964_v11 = vadd.f32 %v2963_v50, %v10833_v2  ;;  %v7235_v59 = vld [vmem:[%s14369_s8 + $0x14] sm:$0xf]  ;;  %v3118_v57 = vmax.f32 %v14939_v62, 0.0  ;;  %v14974_v2 = vld [vmem:[#allocation24_spill] sm:$0xff] }
 0x472   : > { %3402 = vmatpush.bf16.msrb.mxu1 %v10377_v44  ;;  %v2832_v54 = vmul.f32 0.5, %v7666_v41  ;;  %v6853_v44 = vld [vmem:[%s14369_s8 + $0x18] sm:$0xf0]  ;;  %v3104_v49 = vadd.f32 %v3103_v51, %v3035_v56  ;;  %v3181_v56 = vperm.slane %v10872_v40, 1 }
 0x473   : > { %v6856_v48 = vor.u32 %v7235_v59, %v6853_v44  ;;  %v7249_v59 = vld [vmem:[%s14369_s8 + $0x84] sm:$0xf] }
 0x474   : > { %v10844_v22 = vadd.f32 0.5, %v2832_v54  ;;  %v10878_v54 = vadd.f32 1e-05, %v3118_v57  ;;  %v3185_v33 = vpack.c.bf16 %v3181_v56, %v3181_v56 }
 0x475   : > { %3390 = vmatpush.bf16.msrb.mxu0 %v10404_v0  ;;  %3766 = vmatpush.bf16.msrb.mxu2 %v6856_v48 }
 0x476   : > { %14938 = vst [vmem:[#allocation56_spill] sm:$0xff] %v10844_v22  ;;  %3403 = vmatpush.bf16.msrb.mxu1 %v10409_v38  ;;  %v2965_v31 = vadd.f32 %v2964_v11, %v10844_v22  ;;  %v3037_v0 = vmul.f32 %v10844_v22, %v10844_v22  ;;  %7667 = vrsqrt.f32 %v10878_v54  ;;  %vm3128_vm13 = vweird.f32 %v10878_v54 }
 0x478   : > { %v2966_v14 = vrot.slane %v2965_v31, 4  ;;  %v3105_v21 = vadd.f32 %v3104_v49, %v3037_v0  ;;  %v3189_v49 = vshrl.u32 %v3185_v33, 16  ;;  %v6909_v0 = vld [vmem:[%s14369_s8 + $0x88] sm:$0xf0] }
 0x479   : > { %3391 = vmatpush.bf16.msrb.mxu0 %v10478_v19  ;;  %v6912_v17 = vor.u32 %v7249_v59, %v6909_v0  ;;  %v14945_v0 = vld [vmem:[#allocation6_spill] sm:$0xff]  ;;  %v14972_v59 = vld [vmem:[#allocation43_spill] sm:$0xff] }
 0x47a   : > { %3404 = vmatpush.bf16.msrb.mxu1 %v10483_v18  ;;  %v2967_v38 = vadd.f32 %v2966_v14, %v2965_v31  ;;  %v3106_v20 = vrot.slane %v3105_v21, 4  ;;  %v3182_v18 = vperm.slane %v10872_v40, 3  ;;  %3369 = vmatmul.bf16.vlgmr.msra.gmra.mxu0 %v3189_v49 }
 0x47b   : > { %3856 = vmatpush.bf16.msrb.mxu3 %v6912_v17 }
 0x47c   : > { %v2968_v41 = vrot.slane %v2967_v38, 2  ;;  %v3107_v3 = vadd.f32 %v3106_v20, %v3105_v21  ;;  %v3186_v53 = vpack.c.bf16 %v3182_v18, %v3182_v18  ;;  %v10901_v62 = vpop.eup %7667  ;;  %v14958_v18 = vld [vmem:[#allocation37_spill] sm:$0xff] }
 0x47d   : > { %3392 = vmatpush.bf16.msrb.mxu0 %v10624_v8  ;;  %v7233_v8 = vld [vmem:[%s14369_s8 + $0x4] sm:$0xf]  ;;  %vm3129_vm15 = vweird.f32 %v10901_v62 }
 0x47e   : > { %3405 = vmatpush.bf16.msrb.mxu1 %v10631_v63  ;;  %v2969_v19 = vadd.f32 %v2968_v41, %v2967_v38  ;;  %v3108_v50 = vrot.slane %v3107_v3, 2  ;;  %v6845_v63 = vld [vmem:[%s14369_s8 + $0x8] sm:$0xf0]  ;;  %v3192_v31 = vshrl.u32 %v3186_v53, 16  ;;  %vm3130_vm4 = vmor %vm3128_vm13, %vm3129_vm15 }
 0x480   : > { %v2970_v51 = vrot.slane %v2969_v19, 1  ;;  %v3109_v11 = vadd.f32 %v3108_v50, %v3107_v3  ;;  %3382 = vmatmul.bf16.vlgmr.msra.gmra.mxu1 %v3192_v31  ;;  %v3123_v3 = vmul.f32 %v10901_v62, %v10878_v54 }
 0x481   : > { %3393 = vmatpush.bf16.msrb.mxu0 %v6856_v48  ;;  %v6848_v48 = vor.u32 %v7233_v8, %v6845_v63  ;;  %v14942_v8 = vld [vmem:[#allocation26_spill] sm:$0xff]  ;;  %v14943_v63 = vld [vmem:[#allocation4_spill] sm:$0xff] }
 0x482   : > { %3406 = vmatpush.bf16.msrb.mxu1 %v6920_v26  ;;  %v2971_v44 = vadd.f32 %v2970_v51, %v2969_v19  ;;  %v3110_v30 = vrot.slane %v3109_v11, 1  ;;  %v3124_v56 = vmul.f32 %v10901_v62, %v3123_v3  ;;  %v14950_v3 = vld [vmem:[#allocation10_spill] sm:$0xff]  ;;  %v14953_v51 = vld [vmem:[#allocation9_spill] sm:$0xff]  ;;  %v14956_v19 = vld [vmem:[#allocation36_spill] sm:$0xff] }
 0x483   : > { %3767 = vmatpush.bf16.msrb.mxu2 %v6848_v48 }
 0x484   : > { %v10894_v26 = vmul.f32 %v2971_v44, %v14916_v1  ;;  %v3111_v14 = vadd.f32 %v3110_v30, %v3109_v11  ;;  %v3125_v33 = vmul.f32 0.5, %v3124_v56  ;;  %v14944_v44 = vld [vmem:[#allocation3_spill] sm:$0xff]  ;;  %v14957_v56 = vld [vmem:[#allocation14_spill] sm:$0xff]  ;;  %v14965_v30 = vld [vmem:[#allocation41_spill] sm:$0xff] }
 0x485   : > { %3394 = vmatpush.bf16.msrb.mxu0 %v6848_v48  ;;  %v14984_v9 = vsub.f32 %v14944_v44, %v14942_v8 }
 0x486   : > { %3407 = vmatpush.bf16.msrb.mxu1 %v6912_v17  ;;  %v3113_v21 = vmul.f32 %v3111_v14, %v14916_v1  ;;  %v3115_v38 = vmul.f32 %v10894_v26, %v10894_v26  ;;  %v14946_v17 = vld [vmem:[#allocation5_spill] sm:$0xff]  ;;  %v3414_v1 = vsub.f32 %v10519_v24, %v10894_v26 }
 0x488   : > { %v3117_v20 = vsub.f32 %v3113_v21, %v3115_v38  ;;  %v3126_v38 = vsub.f32 1.5, %v3125_v33  ;;  %v14955_v33 = vld [vmem:[#allocation34_spill] sm:$0xff] }
 0x489   : > { %3582 = vmatpush.bf16.msra.mxu0 %v10426_v7  ;;  %v14940_v7 = vld [vmem:[#allocation25_spill] sm:$0xff]  ;;  %v14964_v21 = vld [vmem:[#allocation18_spill] sm:$0xff] }
 0x48a   : > { %3671 = vmatpush.bf16.msra.mxu1 %v10431_v46  ;;  %v3119_v57 = vmax.f32 %v3117_v20, 0.0  ;;  %v14941_v46 = vld [vmem:[#allocation28_spill] sm:$0xff]  ;;  %3395 = vmatmul.bf16.vlgmr.msrb.gmra.mxu0 %v3189_v49  ;;  %v3127_v50 = vmul.f32 %v10901_v62, %v3126_v38  ;;  %v14966_v49 = vld [vmem:[#allocation17_spill] sm:$0xff]  ;;  %v3422_v38 = vsub.f32 %v14972_v59, %v10894_v26 }
 0x48b   : > { %v14949_v20 = vld [vmem:[#allocation8_spill] sm:$0xff] }
 0x48c   : > { %v3121_v41 = vadd.f32 1e-05, %v3119_v57  ;;  %v3131_v22 = vsel %vm3130_vm4, %v10901_v62, %v3127_v50  ;;  %v14973_v62 = vld [vmem:[#allocation44_spill] sm:$0xff] }
 0x48d   : > { %3583 = vmatpush.bf16.msra.mxu0 %v10452_v28  ;;  %v14963_v28 = vld [vmem:[#allocation16_spill] sm:$0xff]  ;;  %v3424_v50 = vsub.f32 %v14973_v62, %v10894_v26 }
 0x48e   : > { %3672 = vmatpush.bf16.msra.mxu1 %v10458_v25  ;;  %7669 = vrsqrt.f32 %v3121_v41  ;;  %v14954_v25 = vld [vmem:[#allocation11_spill] sm:$0xff]  ;;  %vm3138_vm0 = vweird.f32 %v3121_v41 }
 0x490   : > { %3408 = vmatmul.bf16.vlgmr.msrb.gmra.mxu1 %v3192_v31  ;;  %v14948_v31 = vld [vmem:[#allocation32_spill] sm:$0xff] }
 0x491   : > { %3584 = vmatpush.bf16.msra.mxu0 %v14940_v7  ;;  %v14960_v7 = vld [vmem:[#allocation15_spill] sm:$0xff] }
 0x492   : > { %3673 = vmatpush.bf16.msra.mxu1 %v14941_v46  ;;  %v14951_v46 = vld [vmem:[#allocation33_spill] sm:$0xff] }
 0x494   : > { %v7670_v11 = vpop.eup %7669 }
 0x495   : > { %3585 = vmatpush.bf16.msra.mxu0 %v10579_v60  ;;  %v3133_v53 = vmul.f32 %v7670_v11, %v3121_v41  ;;  %vm3139_vm14 = vweird.f32 %v7670_v11 }
 0x496   : > { %3674 = vmatpush.bf16.msra.mxu1 %v10587_v52  ;;  %v14947_v52 = vld [vmem:[#allocation7_spill] sm:$0xff]  ;;  %vm3140_vm3 = vmor %vm3138_vm0, %vm3139_vm14 }
 0x497   : > { %v3134_v60 = vmul.f32 %v7670_v11, %v3133_v53 }
 0x499   : > { %3586 = vmatpush.bf16.msra.mxu0 %v10669_v47  ;;  %v3135_v53 = vmul.f32 0.5, %v3134_v60  ;;  %v14952_v47 = vld [vmem:[#allocation35_spill] sm:$0xff] }
 0x49a   : > { %3675 = vmatpush.bf16.msra.mxu1 %v10679_v34  ;;  %v14959_v34 = vld [vmem:[#allocation13_spill] sm:$0xff] }
 0x49b   : > { %v3136_v57 = vsub.f32 1.5, %v3135_v53  ;;  %v14961_v53 = vld [vmem:[#allocation38_spill] sm:$0xff] }
 0x49d   : > { %3587 = vmatpush.bf16.msra.mxu0 %v10741_v10  ;;  %v3137_v14 = vmul.f32 %v7670_v11, %v3136_v57  ;;  %v14962_v10 = vld [vmem:[#allocation40_spill] sm:$0xff] }
 0x49e   : > { %3676 = vmatpush.bf16.msra.mxu1 %v10752_v13 }
 0x49f   : > { %v3141_v41 = vsel %vm3140_vm3, %v7670_v11, %v3137_v14  ;;  %v3420_v14 = vsub.f32 %v10534_v55, %v10894_v26  ;;  %v14975_v55 = vld [vmem:[#allocation45_spill] sm:$0xff] }
 0x4a0   : > { %v3144_v57 = vrot.slane %v3141_v41, 6  ;;  %v3426_v41 = vsub.f32 %v10560_v35, %v10894_v26  ;;  %v3430_v59 = vsub.f32 %v14975_v55, %v10894_v26  ;;  %v14976_v35 = vld [vmem:[#allocation47_spill] sm:$0xff] }
 0x4a1   : > { %3588 = vmatpush.bf16.msra.mxu0 %v10772_v58  ;;  %v3416_v58 = vsub.f32 %v10516_v6, %v10894_v26  ;;  %v3428_v6 = vsub.f32 %v14974_v2, %v10894_v26  ;;  %v14977_v2 = vld [vmem:[#allocation27_spill] sm:$0xff] }
 0x4a2   : > { %3677 = vmatpush.bf16.msra.mxu1 %v10778_v61  ;;  %v14971_v61 = vld [vmem:[#allocation30_spill] sm:$0xff]  ;;  %v3145_v24 = vsel %vm995_vm1, %v3131_v22, %v3144_v57  ;;  %v3432_v22 = vsub.f32 %v10604_v29, %v10894_v26  ;;  %v3434_v57 = vsub.f32 %v10606_v39, %v10894_v26  ;;  %v3438_v62 = vsub.f32 %v14977_v2, %v10894_v26  ;;  %v14982_v39 = vld [vmem:[#allocation29_spill] sm:$0xff] }
 0x4a3   : > { %v3418_v11 = vsub.f32 %v14971_v61, %v10894_v26  ;;  %v3147_v27 = vmul.f32 %v3145_v24, %v10872_v40  ;;  %v3436_v61 = vsub.f32 %v14976_v35, %v10894_v26  ;;  %v3442_v24 = vsub.f32 %v10682_v45, %v10894_v26  ;;  %v14978_v35 = vld [vmem:[#allocation46_spill] sm:$0xff]  ;;  %v14980_v45 = vld [vmem:[#allocation49_spill] sm:$0xff] }
 0x4a4   : > { %v3444_v29 = vsub.f32 %v10690_v37, %v10894_v26  ;;  %v14981_v37 = vld [vmem:[#allocation51_spill] sm:$0xff]  ;;  %v14985_v2 = vsub.f32 %v14945_v0, %v14942_v8  ;;  %v14988_v0 = vsub.f32 %v14948_v31, %v14942_v8  ;;  %v14990_v31 = vsub.f32 %v14950_v3, %v14942_v8 }
 0x4a5   : > { %3589 = vmatpush.bf16.msra.mxu0 %v10796_v42  ;;  %v3440_v42 = vsub.f32 %v10649_v43, %v10894_v26  ;;  %v3478_v40 = vperm.slane %v3147_v27, 0  ;;  %v14992_v3 = vsub.f32 %v14952_v47, %v14942_v8 }
 0x4a6   : > { %3678 = vmatpush.bf16.msra.mxu1 %v10807_v32  ;;  %v3479_v32 = vperm.slane %v3147_v27, 2 }
 0x4a7   : > { %v11036_v54 = vperm.slane %v3478_v40, 0  ;;  %v14986_v40 = vsub.f32 %v14946_v17, %v14942_v8 }
 0x4a8   : > { %v11038_v27 = vperm.slane %v3479_v32, 0  ;;  %v14983_v32 = vsub.f32 %v14943_v63, %v14942_v8 }
 0x4a9   : > { %v3486_v12 = vmul.f32 %v11036_v54, %v14984_v9  ;;  %v3488_v48 = vmul.f32 %v11036_v54, %v14985_v2  ;;  %v3490_v63 = vmul.f32 %v11036_v54, %v14986_v40  ;;  %v14987_v9 = vsub.f32 %v14947_v52, %v14942_v8 }
 0x4aa   : > { %v3484_v13 = vmul.f32 %v11036_v54, %v14983_v32  ;;  %v3485_v43 = vmul.f32 %v11038_v27, %v3414_v1  ;;  %v3487_v55 = vmul.f32 %v11038_v27, %v3416_v58  ;;  %v3489_v32 = vmul.f32 %v11038_v27, %v3418_v11 }
 0x4ab   : > { %v3491_v1 = vmul.f32 %v11038_v27, %v3420_v14  ;;  %v3492_v58 = vmul.f32 %v11036_v54, %v14987_v9  ;;  %v3494_v2 = vmul.f32 %v11036_v54, %v14988_v0  ;;  %v11080_v4 = vpack.c.bf16 %v3490_v63, %v3488_v48 }
 0x4ac   : > { %v3548_v60 = vpack.c.bf16 %v3486_v12, %v3484_v13  ;;  %v3549_v44 = vpack.c.bf16 %v3487_v55, %v3485_v43  ;;  %v3493_v11 = vmul.f32 %v11038_v27, %v3422_v38  ;;  %v3495_v14 = vmul.f32 %v11038_v27, %v3424_v50 }
 0x4ad   : > { %v11082_v17 = vpack.c.bf16 %v3491_v1, %v3489_v32  ;;  %v11086_v12 = vpack.c.bf16 %v3494_v2, %v3492_v58  ;;  %v14989_v52 = vsub.f32 %v14949_v20, %v14942_v8  ;;  %v3498_v48 = vmul.f32 %v11036_v54, %v14990_v31 }
 0x4ae   : > { %3590 = vmatmul.bf16.vlgmr.msra.gmra.mxu0 %v3548_v60  ;;  %3679 = vmatmul.bf16.vlgmr.msra.gmra.mxu1 %v3549_v44  ;;  %v11096_v55 = vpack.c.bf16 %v3495_v14, %v3493_v11  ;;  %v3497_v38 = vmul.f32 %v11038_v27, %v3426_v41  ;;  %v3499_v50 = vmul.f32 %v11038_v27, %v3428_v6 }
 0x4af   : > { %v3496_v13 = vmul.f32 %v11036_v54, %v14989_v52  ;;  %3768 = vmatmul.bf16.vlgmr.msrb.gmra.mxu2 %v3548_v60  ;;  %3857 = vmatmul.bf16.vlgmr.msrb.gmra.mxu3 %v3549_v44  ;;  %v14991_v20 = vsub.f32 %v14951_v46, %v14942_v8  ;;  %v3502_v63 = vmul.f32 %v11036_v54, %v14992_v3 }
 0x4b0   : > { %v3501_v60 = vmul.f32 %v11038_v27, %v3430_v59  ;;  %v11111_v32 = vpack.c.bf16 %v3499_v50, %v3497_v38  ;;  %v3503_v41 = vmul.f32 %v11038_v27, %v3432_v22  ;;  %v14993_v6 = vsub.f32 %v14953_v51, %v14942_v8 }
 0x4b1   : > { %v11100_v43 = vpack.c.bf16 %v3498_v48, %v3496_v13  ;;  %v3500_v40 = vmul.f32 %v11036_v54, %v14991_v20  ;;  %v14994_v46 = vsub.f32 %v14954_v25, %v14942_v8  ;;  %v3505_v47 = vmul.f32 %v11038_v27, %v3434_v57  ;;  %v14999_v13 = vld [vmem:[#allocation39_spill] sm:$0xff] }
 0x4b2   : > { %v3504_v1 = vmul.f32 %v11036_v54, %v14993_v6  ;;  %v3507_v59 = vmul.f32 %v11038_v27, %v3436_v61  ;;  %v14995_v58 = vsub.f32 %v14955_v33, %v14942_v8  ;;  %v11130_v0 = vpack.c.bf16 %v3503_v41, %v3501_v60  ;;  %v14997_v61 = vld [vmem:[#allocation12_spill] sm:$0xff] }
 0x4b3   : > { %v3506_v44 = vmul.f32 %v11036_v54, %v14994_v46  ;;  %v11122_v9 = vpack.c.bf16 %v3502_v63, %v3500_v40  ;;  %v14996_v25 = vsub.f32 %v14956_v19, %v14942_v8  ;;  %v3509_v11 = vmul.f32 %v11038_v27, %v3438_v62 }
 0x4b4   : > { %v3508_v22 = vmul.f32 %v11036_v54, %v14995_v58  ;;  %v11139_v14 = vpack.c.bf16 %v3507_v59, %v3505_v47  ;;  %v3511_v57 = vmul.f32 %v11038_v27, %v3440_v42  ;;  %v14998_v33 = vsub.f32 %v14997_v61, %v14942_v8 }
 0x4b5   : > { %v11132_v51 = vpack.c.bf16 %v3506_v44, %v3504_v1  ;;  %v3510_v2 = vmul.f32 %v11036_v54, %v14996_v25  ;;  %v15000_v31 = vsub.f32 %v14999_v13, %v14942_v8  ;;  %v3513_v19 = vmul.f32 %v11038_v27, %v3442_v24 }
 0x4b6   : > { %v3512_v52 = vmul.f32 %v11036_v54, %v14998_v33  ;;  %v3515_v62 = vmul.f32 %v11038_v27, %v3444_v29  ;;  %v15001_v50 = vsub.f32 %v14957_v56, %v14942_v8  ;;  %v11158_v20 = vpack.c.bf16 %v3511_v57, %v3509_v11 }
 0x4b7   : > { %v3514_v48 = vmul.f32 %v11036_v54, %v15000_v31  ;;  %v11150_v38 = vpack.c.bf16 %v3510_v2, %v3508_v22  ;;  %v15002_v3 = vsub.f32 %v14958_v18, %v14942_v8  ;;  %v15003_v60 = vsub.f32 %v10699_v15, %v10894_v26 }
 0x4b8   : > { %v3516_v42 = vmul.f32 %v11036_v54, %v15001_v50  ;;  %v11170_v29 = vpack.c.bf16 %v3515_v62, %v3513_v19  ;;  %v15004_v56 = vsub.f32 %v10706_v36, %v10894_v26  ;;  %v15005_v6 = vsub.f32 %v14959_v34, %v14942_v8 }
 0x4b9   : > { %v11160_v40 = vpack.c.bf16 %v3514_v48, %v3512_v52  ;;  %v3518_v63 = vmul.f32 %v11036_v54, %v15002_v3  ;;  %v3517_v24 = vmul.f32 %v11038_v27, %v15003_v60  ;;  %v15006_v18 = vsub.f32 %v14960_v7, %v14942_v8 }
 0x4ba   : > { %v3519_v41 = vmul.f32 %v11038_v27, %v15004_v56  ;;  %v3520_v1 = vmul.f32 %v11036_v54, %v15005_v6  ;;  %v15007_v44 = vsub.f32 %v14978_v35, %v10894_v26  ;;  %v15008_v36 = vsub.f32 %v14979_v23, %v10894_v26 }
 0x4bb   : > { %v3522_v46 = vmul.f32 %v11036_v54, %v15006_v18  ;;  %v11184_v15 = vpack.c.bf16 %v3518_v63, %v3516_v42  ;;  %v15009_v34 = vsub.f32 %v14961_v53, %v14942_v8  ;;  %v15010_v25 = vsub.f32 %v14962_v10, %v14942_v8  ;;  %v15020_v63 = vld [vmem:[#allocation31_spill] sm:$0xff]  ;;  %v15026_v18 = vld [vmem:[#allocation50_spill] sm:$0xff] }
 0x4bc   : > { %v3521_v47 = vmul.f32 %v11038_v27, %v15007_v44  ;;  %v3523_v59 = vmul.f32 %v11038_v27, %v15008_v36  ;;  %v11198_v7 = vpack.c.bf16 %v3519_v41, %v3517_v24  ;;  %v15011_v2 = vsub.f32 %v14980_v45, %v10894_v26  ;;  %v15022_v24 = vld [vmem:[#allocation19_spill] sm:$0xff] }
 0x4bd   : > { %v3524_v58 = vmul.f32 %v11036_v54, %v15009_v34  ;;  %v11200_v22 = vpack.c.bf16 %v3522_v46, %v3520_v1  ;;  %v3526_v35 = vmul.f32 %v11036_v54, %v15010_v25  ;;  %v15012_v53 = vsub.f32 %v14981_v37, %v10894_v26  ;;  %v15030_v25 = vld [vmem:[#allocation20_spill] sm:$0xff] }
 0x4be   : > { %v3525_v23 = vmul.f32 %v11038_v27, %v15011_v2  ;;  %v11210_v11 = vpack.c.bf16 %v3523_v59, %v3521_v47  ;;  %v15013_v61 = vsub.f32 %v14963_v28, %v14942_v8  ;;  %v15014_v10 = vsub.f32 %v14964_v21, %v14942_v8  ;;  %3595 = vmatmul.bf16.gmra.mxu0 %v11080_v4  ;;  %v15028_v47 = vld [vmem:[#allocation52_spill] sm:$0xff] }
 0x4bf   : > { %v3527_v57 = vmul.f32 %v11038_v27, %v15012_v53  ;;  %v11224_v45 = vpack.c.bf16 %v3526_v35, %v3524_v58  ;;  %v15015_v13 = vsub.f32 %v14982_v39, %v10894_v26  ;;  %v15016_v37 = vsub.f32 %v10754_v16, %v10894_v26  ;;  %3684 = vmatmul.bf16.gmra.mxu1 %v11082_v17  ;;  %v15032_v53 = vld [vmem:[#allocation22_spill] sm:$0xff] }
 0x4c0   : > { %v3528_v33 = vmul.f32 %v11036_v54, %v15013_v61  ;;  %v3530_v52 = vmul.f32 %v11036_v54, %v15014_v10  ;;  %v15017_v28 = vsub.f32 %v14965_v30, %v14942_v8  ;;  %v15018_v50 = vsub.f32 %v14966_v49, %v14942_v8  ;;  %v15024_v49 = vld [vmem:[#allocation42_spill] sm:$0xff]  ;;  %3773 = vmatmul.bf16.gmra.mxu2 %v11080_v4 }
 0x4c1   : > { %v3529_v31 = vmul.f32 %v11038_v27, %v15015_v13  ;;  %v3531_v48 = vmul.f32 %v11038_v27, %v15016_v37  ;;  %v11238_v21 = vpack.c.bf16 %v3527_v57, %v3525_v23  ;;  %v15019_v42 = vsub.f32 %v10770_v5, %v10894_v26  ;;  %3862 = vmatmul.bf16.gmra.mxu3 %v11082_v17  ;;  %v15036_v10 = vld [vmem:[#allocation54_spill] sm:$0xff] }
 0x4c2   : > { %v3532_v19 = vmul.f32 %v11036_v54, %v15017_v28  ;;  %v11240_v62 = vpack.c.bf16 %v3530_v52, %v3528_v33  ;;  %v3534_v39 = vmul.f32 %v11036_v54, %v15018_v50  ;;  %v15021_v30 = vsub.f32 %v15020_v63, %v10894_v26  ;;  %v15034_v33 = vld [vmem:[#allocation53_spill] sm:$0xff]  ;;  %v15040_v28 = vld [vmem:[#allocation23_spill] sm:$0xff]  ;;  %v15044_v63 = vld [vmem:[#allocation56_spill] sm:$0xff] }
 0x4c3   : > { %v3533_v16 = vmul.f32 %v11038_v27, %v15019_v42  ;;  %v11250_v3 = vpack.c.bf16 %v3531_v48, %v3529_v31  ;;  %v15023_v56 = vsub.f32 %v15022_v24, %v14942_v8  ;;  %v15025_v6 = vsub.f32 %v15024_v49, %v14942_v8  ;;  %v15038_v31 = vld [vmem:[#allocation21_spill] sm:$0xff] }
 0x4c4   : > { %v3535_v60 = vmul.f32 %v11038_v27, %v15021_v30  ;;  %v11266_v5 = vpack.c.bf16 %v3534_v39, %v3532_v19  ;;  %v15027_v46 = vsub.f32 %v15026_v18, %v10894_v26  ;;  %v15029_v36 = vsub.f32 %v15028_v47, %v10894_v26  ;;  %v15042_v39 = vld [vmem:[#allocation55_spill] sm:$0xff] }
 0x4c5   : > { %v3536_v41 = vmul.f32 %v11036_v54, %v15023_v56  ;;  %v3538_v1 = vmul.f32 %v11036_v54, %v15025_v6  ;;  %v15031_v35 = vsub.f32 %v15030_v25, %v14942_v8  ;;  %v15033_v57 = vsub.f32 %v15032_v53, %v14942_v8 }
 0x4c6   : > { %v3537_v44 = vmul.f32 %v11038_v27, %v15027_v46  ;;  %v3539_v59 = vmul.f32 %v11038_v27, %v15029_v36  ;;  %v11278_v34 = vpack.c.bf16 %v3535_v60, %v3533_v16  ;;  %v15035_v4 = vsub.f32 %v15034_v33, %v10894_v26 }
 0x4c7   : > { %v11280_v58 = vpack.c.bf16 %v3538_v1, %v3536_v41  ;;  %v3540_v2 = vmul.f32 %v11036_v54, %v15031_v35  ;;  %v3542_v61 = vmul.f32 %v11036_v54, %v15033_v57  ;;  %v15037_v52 = vsub.f32 %v15036_v10, %v10894_v26 }
 0x4c8   : > { %v11286_v23 = vpack.c.bf16 %v3539_v59, %v3537_v44  ;;  %v3541_v17 = vmul.f32 %v11038_v27, %v15035_v4  ;;  %v15039_v37 = vsub.f32 %v15038_v31, %v14942_v8  ;;  %v15041_v19 = vsub.f32 %v15040_v28, %v14942_v8 }
 0x4c9   : > { %v3543_v13 = vmul.f32 %v11038_v27, %v15037_v52  ;;  %v15043_v42 = vsub.f32 %v15042_v39, %v10894_v26  ;;  %v15045_v30 = vsub.f32 %v15044_v63, %v10894_v26  ;;  %v11316_v24 = vpack.c.bf16 %v3542_v61, %v3540_v2  ;;  %v3187_v26 = vld [vmem:[%s14370_s9] sm:$0x3] }
 0x4ca   : > { %v3544_v48 = vmul.f32 %v11036_v54, %v15039_v37  ;;  %v3546_v50 = vmul.f32 %v11036_v54, %v15041_v19  ;;  %v3357_v8 = vperm.slane %v3187_v26, 0 }
 0x4cb   : > { %v3545_v16 = vmul.f32 %v11038_v27, %v15043_v42  ;;  %v3547_v60 = vmul.f32 %v11038_v27, %v15045_v30  ;;  %v11318_v56 = vpack.c.bf16 %v3543_v13, %v3541_v17 }
 0x4cc   : > { %v11320_v41 = vpack.c.bf16 %v3546_v50, %v3544_v48 }
 0x4cd   : > { %v11322_v49 = vpack.c.bf16 %v3547_v60, %v3545_v16 }
 0x4ce   : > { %3600 = vmatmul.bf16.gmra.mxu0 %v11086_v12 }
 0x4cf   : > { %3689 = vmatmul.bf16.gmra.mxu1 %v11096_v55 }
 0x4d0   : > { %3778 = vmatmul.bf16.gmra.mxu2 %v11086_v12 }
 0x4d1   : > { %3867 = vmatmul.bf16.gmra.mxu3 %v11096_v55 }
 0x4de   : > { %3605 = vmatmul.bf16.gmra.mxu0 %v11100_v43 }
 0x4df   : > { %3694 = vmatmul.bf16.gmra.mxu1 %v11111_v32 }
 0x4e0   : > { %3783 = vmatmul.bf16.gmra.mxu2 %v11100_v43 }
 0x4e1   : > { %3872 = vmatmul.bf16.gmra.mxu3 %v11111_v32 }
 0x4ee   : > { %3610 = vmatmul.bf16.gmra.mxu0 %v11122_v9 }
 0x4ef   : > { %3699 = vmatmul.bf16.gmra.mxu1 %v11130_v0 }
 0x4f0   : > { %3788 = vmatmul.bf16.gmra.mxu2 %v11122_v9  ;;  %v3358_v9 = vperm.slane %v3187_v26, 1 }
 0x4f1   : > { %3877 = vmatmul.bf16.gmra.mxu3 %v11130_v0 }
 0x4f7   : > { %v3370_v54 = vpop.f32.mrf.mxu0 }
 0x4f8   : > { %v3371_v12 = vadd.f32 %v3370_v54, %v3357_v8  ;;  %v7027_v8 = vld [vmem:[%s14372_s11 + $0x70] sm:$0xf]  ;;  %v7280_v54 = vld [vmem:[%s14372_s11 + $0x74] sm:$0xf0] }
 0x4fd   : > { %v3383_v27 = vpop.f32.mrf.mxu1 }
 0x4fe   : > { %3615 = vmatmul.bf16.gmra.mxu0 %v11132_v51  ;;  %v3384_v55 = vadd.f32 %v3383_v27, %v3371_v12  ;;  %v11400_v27 = vor.u32 %v7280_v54, %v7027_v8  ;;  %v7091_v12 = vld [vmem:[%s14372_s11 + $0xf0] sm:$0xf]  ;;  %v7278_v8 = vld [vmem:[%s14372_s11 + $0x64] sm:$0xf0] }
 0x4ff   : > { %3704 = vmatmul.bf16.gmra.mxu1 %v11139_v14  ;;  %v3372_v43 = vpop.f32.mrf.mxu0 }
 0x500   : > { %3793 = vmatmul.bf16.gmra.mxu2 %v11132_v51  ;;  %v11351_v46 = vperm.slane %v3384_v55, 0  ;;  %15046 = vst [vmem:[#allocation25_spill] sm:$0xff] %v11400_v27  ;;  %v7296_v55 = vld [vmem:[%s14372_s11 + $0xf4] sm:$0xf0]  ;;  %4658 = vmatpush.bf16.msrb.mxu0 %v11400_v27 }
 0x501   : > { %3882 = vmatmul.bf16.gmra.mxu3 %v11139_v14  ;;  %v11408_v43 = vor.u32 %v7296_v55, %v7091_v12  ;;  %v7083_v12 = vld [vmem:[%s14372_s11 + $0xe0] sm:$0xf]  ;;  %v7294_v55 = vld [vmem:[%s14372_s11 + $0xe4] sm:$0xf0] }
 0x503   : > { %15047 = vst [vmem:[#allocation28_spill] sm:$0xff] %v11408_v43  ;;  %4671 = vmatpush.bf16.msrb.mxu1 %v11408_v43 }
 0x505   : > { %v3385_v32 = vpop.f32.mrf.mxu1 }
 0x507   : > { %v3396_v0 = vpop.f32.mrf.mxu0 }
 0x508   : > { %v3397_v6 = vadd.f32 %v3396_v0, %v3358_v9 }
 0x50d   : > { %v3409_v51 = vpop.f32.mrf.mxu1 }
 0x50e   : > { %3620 = vmatmul.bf16.gmra.mxu0 %v11150_v38  ;;  %v3410_v14 = vadd.f32 %v3409_v51, %v3397_v6 }
 0x50f   : > { %3709 = vmatmul.bf16.gmra.mxu1 %v11158_v20  ;;  %v3398_v1 = vpop.f32.mrf.mxu0 }
 0x510   : > { %3798 = vmatmul.bf16.gmra.mxu2 %v11150_v38  ;;  %v11360_v36 = vperm.slane %v3410_v14, 0 }
 0x511   : > { %3887 = vmatmul.bf16.gmra.mxu3 %v11158_v20 }
 0x515   : > { %v3411_v18 = vpop.f32.mrf.mxu1 }
 0x51e   : > { %3625 = vmatmul.bf16.gmra.mxu0 %v11160_v40 }
 0x51f   : > { %3714 = vmatmul.bf16.gmra.mxu1 %v11170_v29 }
 0x520   : > { %3803 = vmatmul.bf16.gmra.mxu2 %v11160_v40 }
 0x521   : > { %3892 = vmatmul.bf16.gmra.mxu3 %v11170_v29 }
 0x52b   : > { %v3591_v38 = vpop.f32.mrf.mxu0  ;;  %v3680_v44 = vpop.f32.mrf.mxu1 }
 0x52c   : > { %v3592_v20 = vadd.f32 %v3591_v38, %v11351_v46 }
 0x52e   : > { %v11354_v47 = vadd.f32 %v3680_v44, %v3592_v20  ;;  %3630 = vmatmul.bf16.gmra.mxu0 %v11184_v15 }
 0x52f   : > { %3719 = vmatmul.bf16.gmra.mxu1 %v11198_v7 }
 0x530   : > { %3808 = vmatmul.bf16.gmra.mxu2 %v11184_v15 }
 0x531   : > { %3897 = vmatmul.bf16.gmra.mxu3 %v11198_v7 }
 0x532   : > { %v3769_v40 = vpop.f32.mrf.mxu2  ;;  %v3858_v29 = vpop.f32.mrf.mxu3 }
 0x533   : > { %v3770_v59 = vadd.f32 %v3769_v40, %v11360_v36  ;;  %v3593_v25 = vpop.f32.mrf.mxu0  ;;  %v3682_v35 = vpop.f32.mrf.mxu1 }
 0x534   : > { %v3594_v2 = vadd.f32 %v3593_v25, %v11351_v46 }
 0x535   : > { %v11364_v53 = vadd.f32 %v3858_v29, %v3770_v59 }
 0x536   : > { %v11366_v57 = vadd.f32 %v3682_v35, %v3594_v2 }
 0x53a   : > { %v3771_v61 = vpop.f32.mrf.mxu2  ;;  %v3860_v33 = vpop.f32.mrf.mxu3 }
 0x53b   : > { %v3772_v15 = vadd.f32 %v3771_v61, %v11360_v36  ;;  %v3596_v4 = vpop.f32.mrf.mxu0 }
 0x53c   : > { %v3685_v7 = vpop.f32.mrf.mxu1  ;;  %v3597_v17 = vadd.f32 %v3596_v4, %v11351_v46 }
 0x53d   : > { %v11370_v10 = vadd.f32 %v3860_v33, %v3772_v15 }
 0x53e   : > { %v11372_v52 = vadd.f32 %v3685_v7, %v3597_v17  ;;  %3635 = vmatmul.bf16.gmra.mxu0 %v11200_v22  ;;  %v7279_v17 = vld [vmem:[%s14372_s11 + $0x74] sm:$0xf] }
 0x53f   : > { %3724 = vmatmul.bf16.gmra.mxu1 %v11210_v11 }
 0x540   : > { %3813 = vmatmul.bf16.gmra.mxu2 %v11200_v22 }
 0x541   : > { %3902 = vmatmul.bf16.gmra.mxu3 %v11210_v11 }
 0x543   : > { %v3774_v13 = vpop.f32.mrf.mxu2  ;;  %v3598_v48 = vpop.f32.mrf.mxu0 }
 0x544   : > { %v3863_v31 = vpop.f32.mrf.mxu3  ;;  %v3775_v37 = vadd.f32 %v3774_v13, %v11360_v36  ;;  %v3687_v28 = vpop.f32.mrf.mxu1  ;;  %v3599_v19 = vadd.f32 %v3598_v48, %v11351_v46  ;;  %v7295_v13 = vld [vmem:[%s14372_s11 + $0xf4] sm:$0xf] }
 0x546   : > { %v11380_v50 = vadd.f32 %v3863_v31, %v3775_v37  ;;  %v11382_v39 = vadd.f32 %v3687_v28, %v3599_v19  ;;  %v7093_v31 = vld [vmem:[%s14372_s11 + $0xf8] sm:$0xf0] }
 0x547   : > { %v11448_v37 = vor.u32 %v7295_v13, %v7093_v31 }
 0x549   : > { %15048 = vst [vmem:[#allocation26_spill] sm:$0xff] %v11448_v37  ;;  %5146 = vmatpush.bf16.msra.mxu3 %v11448_v37 }
 0x54b   : > { %v3776_v42 = vpop.f32.mrf.mxu2  ;;  %v3601_v30 = vpop.f32.mrf.mxu0 }
 0x54c   : > { %v3865_v16 = vpop.f32.mrf.mxu3  ;;  %v3777_v63 = vadd.f32 %v3776_v42, %v11360_v36  ;;  %v3690_v22 = vpop.f32.mrf.mxu1  ;;  %v3602_v11 = vadd.f32 %v3601_v30, %v11351_v46 }
 0x54e   : > { %v11386_v60 = vadd.f32 %v3865_v16, %v3777_v63  ;;  %v11388_v26 = vadd.f32 %v3690_v22, %v3602_v11  ;;  %3640 = vmatmul.bf16.gmra.mxu0 %v11224_v45  ;;  %v7019_v11 = vld [vmem:[%s14372_s11 + $0x60] sm:$0xf] }
 0x54f   : > { %3729 = vmatmul.bf16.gmra.mxu1 %v11238_v21  ;;  %v11468_v54 = vor.u32 %v7278_v8, %v7019_v11  ;;  %v7276_v11 = vld [vmem:[%s14372_s11 + $0x54] sm:$0xf0] }
 0x550   : > { %3818 = vmatmul.bf16.gmra.mxu2 %v11224_v45 }
 0x551   : > { %3907 = vmatmul.bf16.gmra.mxu3 %v11238_v21  ;;  %15049 = vst [vmem:[#allocation4_spill] sm:$0xff] %v11468_v54  ;;  %4659 = vmatpush.bf16.msrb.mxu0 %v11468_v54 }
 0x553   : > { %v3779_v32 = vpop.f32.mrf.mxu2  ;;  %v3603_v21 = vpop.f32.mrf.mxu0 }
 0x554   : > { %v3868_v9 = vpop.f32.mrf.mxu3  ;;  %v3780_v45 = vadd.f32 %v3779_v32, %v11360_v36  ;;  %v3692_v0 = vpop.f32.mrf.mxu1  ;;  %v3604_v51 = vadd.f32 %v3603_v21, %v11351_v46  ;;  %v11476_v32 = vor.u32 %v7294_v55, %v7083_v12  ;;  %v7075_v12 = vld [vmem:[%s14372_s11 + $0xd0] sm:$0xf]  ;;  %v7292_v55 = vld [vmem:[%s14372_s11 + $0xd4] sm:$0xf0] }
 0x556   : > { %v11414_v6 = vadd.f32 %v3868_v9, %v3780_v45  ;;  %v11416_v14 = vadd.f32 %v3692_v0, %v3604_v51  ;;  %15050 = vst [vmem:[#allocation3_spill] sm:$0xff] %v11476_v32  ;;  %4672 = vmatpush.bf16.msrb.mxu1 %v11476_v32 }
 0x55b   : > { %v3781_v1 = vpop.f32.mrf.mxu2  ;;  %v3606_v44 = vpop.f32.mrf.mxu0 }
 0x55c   : > { %v3870_v18 = vpop.f32.mrf.mxu3  ;;  %v3782_v38 = vadd.f32 %v3781_v1, %v11360_v36  ;;  %v3695_v20 = vpop.f32.mrf.mxu1  ;;  %v3607_v40 = vadd.f32 %v3606_v44, %v11351_v46 }
 0x55e   : > { %v11420_v29 = vadd.f32 %v3870_v18, %v3782_v38  ;;  %v11422_v59 = vadd.f32 %v3695_v20, %v3607_v40  ;;  %3645 = vmatmul.bf16.gmra.mxu0 %v11240_v62 }
 0x55f   : > { %3734 = vmatmul.bf16.gmra.mxu1 %v11250_v3 }
 0x560   : > { %3823 = vmatmul.bf16.gmra.mxu2 %v11240_v62  ;;  %v7029_v62 = vld [vmem:[%s14372_s11 + $0x78] sm:$0xf0] }
 0x561   : > { %3912 = vmatmul.bf16.gmra.mxu3 %v11250_v3  ;;  %v11440_v3 = vor.u32 %v7279_v17, %v7029_v62  ;;  %v7085_v62 = vld [vmem:[%s14372_s11 + $0xe8] sm:$0xf0] }
 0x563   : > { %v3784_v25 = vpop.f32.mrf.mxu2  ;;  %v3608_v61 = vpop.f32.mrf.mxu0  ;;  %5057 = vmatpush.bf16.msra.mxu2 %v11440_v3 }
 0x564   : > { %v3873_v35 = vpop.f32.mrf.mxu3  ;;  %v3785_v2 = vadd.f32 %v3784_v25, %v11360_v36  ;;  %v3697_v33 = vpop.f32.mrf.mxu1  ;;  %v3609_v15 = vadd.f32 %v3608_v61, %v11351_v46 }
 0x566   : > { %v11430_v4 = vadd.f32 %v3873_v35, %v3785_v2  ;;  %v11432_v7 = vadd.f32 %v3697_v33, %v3609_v15  ;;  %v7277_v15 = vld [vmem:[%s14372_s11 + $0x64] sm:$0xf] }
 0x56b   : > { %v3786_v48 = vpop.f32.mrf.mxu2  ;;  %v3611_v42 = vpop.f32.mrf.mxu0 }
 0x56c   : > { %v3875_v28 = vpop.f32.mrf.mxu3  ;;  %v3787_v19 = vadd.f32 %v3786_v48, %v11360_v36  ;;  %v3700_v16 = vpop.f32.mrf.mxu1  ;;  %v3612_v63 = vadd.f32 %v3611_v42, %v11351_v46 }
 0x56e   : > { %v11454_v30 = vadd.f32 %v3875_v28, %v3787_v19  ;;  %v11456_v22 = vadd.f32 %v3700_v16, %v3612_v63  ;;  %3650 = vmatmul.bf16.gmra.mxu0 %v11266_v5  ;;  %v7011_v63 = vld [vmem:[%s14372_s11 + $0x50] sm:$0xf] }
 0x56f   : > { %3739 = vmatmul.bf16.gmra.mxu1 %v11278_v34  ;;  %v11540_v8 = vor.u32 %v7276_v11, %v7011_v63  ;;  %v3938_v63 = vmul.f32 0.5, %v11354_v47  ;;  %v7291_v47 = vld [vmem:[%s14372_s11 + $0xd4] sm:$0xf] }
 0x570   : > { %3828 = vmatmul.bf16.gmra.mxu2 %v11266_v5 }
 0x571   : > { %3917 = vmatmul.bf16.gmra.mxu3 %v11278_v34  ;;  %15053 = vst [vmem:[#allocation7_spill] sm:$0xff] %v11540_v8  ;;  %4660 = vmatpush.bf16.msrb.mxu0 %v11540_v8  ;;  %7671 = vtanh.f32 %v3938_v63 }
 0x573   : > { %v3789_v9 = vpop.f32.mrf.mxu2  ;;  %v11481_v34 = vpop.f32.mrf.mxu0 }
 0x574   : > { %v3878_v45 = vpop.f32.mrf.mxu3  ;;  %v3790_v5 = vadd.f32 %v3789_v9, %v11360_v36  ;;  %v11483_v21 = vpop.f32.mrf.mxu1  ;;  %v11548_v9 = vor.u32 %v7292_v55, %v7075_v12  ;;  %v3939_v12 = vmul.f32 0.5, %v11364_v53  ;;  %v3940_v55 = vmul.f32 0.5, %v11366_v57  ;;  %v7077_v53 = vld [vmem:[%s14372_s11 + $0xd8] sm:$0xf0] }
 0x576   : > { %v11485_v0 = vadd.f32 %v3878_v45, %v3790_v5  ;;  %15054 = vst [vmem:[#allocation32_spill] sm:$0xff] %v11548_v9  ;;  %4673 = vmatpush.bf16.msrb.mxu1 %v11548_v9  ;;  %7673 = vtanh.f32 %v3939_v12  ;;  %v7003_v12 = vld [vmem:[%s14372_s11 + $0x40] sm:$0xf] }
 0x577   : > { %7675 = vtanh.f32 %v3940_v55 }
 0x57b   : > { %v11487_v51 = vpop.f32.mrf.mxu2  ;;  %v3616_v18 = vpop.f32.mrf.mxu0 }
 0x57c   : > { %v11489_v1 = vpop.f32.mrf.mxu3  ;;  %v3705_v38 = vpop.f32.mrf.mxu1  ;;  %v3617_v44 = vadd.f32 %v3616_v18, %v11351_v46 }
 0x57e   : > { %v11492_v20 = vadd.f32 %v3705_v38, %v3617_v44  ;;  %3655 = vmatmul.bf16.gmra.mxu0 %v11280_v58 }
 0x57f   : > { %3744 = vmatmul.bf16.gmra.mxu1 %v11286_v23 }
 0x580   : > { %3833 = vmatmul.bf16.gmra.mxu2 %v11280_v58  ;;  %v7021_v58 = vld [vmem:[%s14372_s11 + $0x68] sm:$0xf0] }
 0x581   : > { %3922 = vmatmul.bf16.gmra.mxu3 %v11286_v23  ;;  %v11511_v17 = vor.u32 %v7277_v15, %v7021_v58  ;;  %v7293_v23 = vld [vmem:[%s14372_s11 + $0xe4] sm:$0xf] }
 0x582   : > { %v11519_v13 = vor.u32 %v7293_v23, %v7085_v62 }
 0x583   : > { %v3794_v40 = vpop.f32.mrf.mxu2  ;;  %v11499_v2 = vpop.f32.mrf.mxu0  ;;  %15051 = vst [vmem:[#allocation6_spill] sm:$0xff] %v11511_v17  ;;  %5058 = vmatpush.bf16.msra.mxu2 %v11511_v17 }
 0x584   : > { %v3883_v25 = vpop.f32.mrf.mxu3  ;;  %v3795_v35 = vadd.f32 %v3794_v40, %v11360_v36  ;;  %v11501_v61 = vpop.f32.mrf.mxu1  ;;  %15052 = vst [vmem:[#allocation5_spill] sm:$0xff] %v11519_v13  ;;  %5147 = vmatpush.bf16.msra.mxu3 %v11519_v13  ;;  %v3951_v13 = vmul.f32 0.5, %v11430_v4 }
 0x586   : > { %v11503_v33 = vadd.f32 %v3883_v25, %v3795_v35 }
 0x58b   : > { %v11522_v31 = vpop.f32.mrf.mxu2  ;;  %v3621_v28 = vpop.f32.mrf.mxu0 }
 0x58c   : > { %v11524_v48 = vpop.f32.mrf.mxu3  ;;  %v3710_v19 = vpop.f32.mrf.mxu1  ;;  %v3622_v42 = vadd.f32 %v3621_v28, %v11351_v46 }
 0x58e   : > { %v11528_v16 = vadd.f32 %v3710_v19, %v3622_v42  ;;  %3660 = vmatmul.bf16.gmra.mxu0 %v11316_v24 }
 0x58f   : > { %3749 = vmatmul.bf16.gmra.mxu1 %v11318_v56 }
 0x590   : > { %3838 = vmatmul.bf16.gmra.mxu2 %v11316_v24 }
 0x591   : > { %3927 = vmatmul.bf16.gmra.mxu3 %v11318_v56 }
 0x593   : > { %v3799_v45 = vpop.f32.mrf.mxu2  ;;  %v11553_v56 = vpop.f32.mrf.mxu0 }
 0x594   : > { %v3888_v5 = vpop.f32.mrf.mxu3  ;;  %v3800_v24 = vadd.f32 %v3799_v45, %v11360_v36  ;;  %v11555_v18 = vpop.f32.mrf.mxu1 }
 0x596   : > { %v11557_v38 = vadd.f32 %v3888_v5, %v3800_v24  ;;  %v3941_v5 = vmul.f32 0.5, %v11370_v10  ;;  %v11595_v24 = vor.u32 %v7291_v47, %v7077_v53  ;;  %v3943_v10 = vmul.f32 0.5, %v11380_v50  ;;  %v7067_v50 = vld [vmem:[%s14372_s11 + $0xc0] sm:$0xf] }
 0x598   : > { %15056 = vst [vmem:[#allocation10_spill] sm:$0xff] %v11595_v24  ;;  %5148 = vmatpush.bf16.msra.mxu3 %v11595_v24  ;;  %7677 = vtanh.f32 %v3941_v5  ;;  %v3945_v5 = vmul.f32 0.5, %v11386_v60  ;;  %v3950_v24 = vmul.f32 0.5, %v11422_v59 }
 0x59b   : > { %v11559_v44 = vpop.f32.mrf.mxu2  ;;  %v3626_v25 = vpop.f32.mrf.mxu0 }
 0x59c   : > { %v11561_v40 = vpop.f32.mrf.mxu3  ;;  %v3715_v35 = vpop.f32.mrf.mxu1  ;;  %v3627_v15 = vadd.f32 %v3626_v25, %v11351_v46 }
 0x59e   : > { %v11564_v58 = vadd.f32 %v3715_v35, %v3627_v15  ;;  %3665 = vmatmul.bf16.gmra.mxu0 %v11320_v41  ;;  %v3942_v35 = vmul.f32 0.5, %v11372_v52  ;;  %v7672_v52 = vpop.eup %7671 }
 0x59f   : > { %3754 = vmatmul.bf16.gmra.mxu1 %v11322_v49  ;;  %v7674_v55 = vpop.eup %7673 }
 0x5a0   : > { %3843 = vmatmul.bf16.gmra.mxu2 %v11320_v41  ;;  %v7275_v41 = vld [vmem:[%s14372_s11 + $0x54] sm:$0xf]  ;;  %7679 = vtanh.f32 %v3942_v35  ;;  %v7676_v53 = vpop.eup %7675  ;;  %v4067_v9 = vmul.f32 0.5, %v7674_v55  ;;  %v3948_v55 = vmul.f32 0.5, %v11416_v14 }
 0x5a1   : > { %3932 = vmatmul.bf16.gmra.mxu3 %v11322_v49  ;;  %v7013_v49 = vld [vmem:[%s14372_s11 + $0x58] sm:$0xf0]  ;;  %7681 = vtanh.f32 %v3943_v10  ;;  %v7678_v35 = vpop.eup %7677 }
 0x5a2   : > { %v11586_v45 = vor.u32 %v7275_v41, %v7013_v49  ;;  %v7274_v41 = vld [vmem:[%s14372_s11 + $0x44] sm:$0xf0]  ;;  %v4069_v60 = vmul.f32 0.5, %v7678_v35  ;;  %v11641_v43 = vadd.f32 0.5, %v4067_v9 }
 0x5a3   : > { %v3804_v23 = vpop.f32.mrf.mxu2  ;;  %v11571_v19 = vpop.f32.mrf.mxu0  ;;  %v11615_v49 = vor.u32 %v7274_v41, %v7003_v12 }
 0x5a4   : > { %v3893_v62 = vpop.f32.mrf.mxu3  ;;  %v3805_v28 = vadd.f32 %v3804_v23, %v11360_v36  ;;  %v11573_v42 = vpop.f32.mrf.mxu1  ;;  %15055 = vst [vmem:[#allocation8_spill] sm:$0xff] %v11586_v45  ;;  %5059 = vmatpush.bf16.msra.mxu2 %v11586_v45 }
 0x5a5   : > { %15057 = vst [vmem:[#allocation33_spill] sm:$0xff] %v11615_v49  ;;  %4661 = vmatpush.bf16.msrb.mxu0 %v11615_v49 }
 0x5a6   : > { %v11576_v11 = vadd.f32 %v3893_v62, %v3805_v28  ;;  %v3944_v28 = vmul.f32 0.5, %v11382_v39  ;;  %v7290_v39 = vld [vmem:[%s14372_s11 + $0xc4] sm:$0xf0]  ;;  %15061 = vst [vmem:[#allocation34_spill] sm:$0xff] %v11641_v43 }
 0x5a7   : > { %v11623_v47 = vor.u32 %v7290_v39, %v7067_v50  ;;  %v4066_v50 = vmul.f32 0.5, %v7672_v52  ;;  %v4068_v39 = vmul.f32 0.5, %v7676_v53  ;;  %v11643_v52 = vadd.f32 0.5, %v4069_v60 }
 0x5a8   : > { %7683 = vtanh.f32 %v3944_v28  ;;  %v7680_v28 = vpop.eup %7679 }
 0x5a9   : > { %15058 = vst [vmem:[#allocation35_spill] sm:$0xff] %v11623_v47  ;;  %4674 = vmatpush.bf16.msrb.mxu1 %v11623_v47  ;;  %7685 = vtanh.f32 %v3945_v5  ;;  %v7682_v8 = vpop.eup %7681  ;;  %v11637_v47 = vadd.f32 0.5, %v4066_v50  ;;  %v4070_v54 = vmul.f32 0.5, %v7680_v28  ;;  %v4274_v60 = vmul.f32 %v11643_v52, %v11643_v52 }
 0x5aa   : > { %15062 = vst [vmem:[#allocation36_spill] sm:$0xff] %v11643_v52  ;;  %v4071_v53 = vmul.f32 0.5, %v7682_v8 }
 0x5ab   : > { %v11598_v25 = vpop.f32.mrf.mxu2  ;;  %v3631_v15 = vpop.f32.mrf.mxu0  ;;  %15059 = vst [vmem:[#allocation9_spill] sm:$0xff] %v11637_v47  ;;  %v4271_v9 = vmul.f32 %v11637_v47, %v11637_v47  ;;  %v11655_v28 = vadd.f32 0.5, %v4070_v54 }
 0x5ac   : > { %v11600_v57 = vpop.f32.mrf.mxu3  ;;  %v3720_v23 = vpop.f32.mrf.mxu1  ;;  %v3632_v62 = vadd.f32 %v3631_v15, %v11351_v46  ;;  %v3946_v15 = vmul.f32 0.5, %v11388_v26  ;;  %v3947_v26 = vmul.f32 0.5, %v11414_v6 }
 0x5ad   : > { %15063 = vst [vmem:[#allocation14_spill] sm:$0xff] %v11655_v28 }
 0x5ae   : > { %v11607_v63 = vadd.f32 %v3720_v23, %v3632_v62  ;;  %7687 = vtanh.f32 %v3946_v15  ;;  %v7684_v32 = vpop.eup %7683 }
 0x5af   : > { %v4072_v5 = vmul.f32 0.5, %v7684_v32  ;;  %7689 = vtanh.f32 %v3947_v26  ;;  %v7686_v6 = vpop.eup %7685  ;;  %v4272_v32 = vmul.f32 %v11641_v43, %v11641_v43 }
 0x5b0   : > { %7691 = vtanh.f32 %v3948_v55  ;;  %v4073_v27 = vmul.f32 0.5, %v7686_v6  ;;  %v4275_v55 = vmul.f32 %v11655_v28, %v11655_v28 }
 0x5b1   : > { %v11664_v26 = vadd.f32 0.5, %v4072_v5  ;;  %v3952_v5 = vmul.f32 0.5, %v11432_v7  ;;  %v4372_v59 = vadd.f32 %v4274_v60, %v4272_v32 }
 0x5b3   : > { %v3809_v23 = vpop.f32.mrf.mxu2  ;;  %v11630_v41 = vpop.f32.mrf.mxu0  ;;  %v4277_v4 = vmul.f32 %v11664_v26, %v11664_v26 }
 0x5b4   : > { %v3898_v62 = vpop.f32.mrf.mxu3  ;;  %v3810_v12 = vadd.f32 %v3809_v23, %v11360_v36  ;;  %v11632_v10 = vpop.f32.mrf.mxu1  ;;  %v11639_v23 = vadd.f32 0.5, %v4068_v39 }
 0x5b5   : > { %v7688_v39 = vpop.eup %7687 }
 0x5b6   : > { %v11634_v49 = vadd.f32 %v3898_v62, %v3810_v12  ;;  %15060 = vst [vmem:[#allocation11_spill] sm:$0xff] %v11639_v23  ;;  %v3949_v62 = vmul.f32 0.5, %v11420_v29  ;;  %v4273_v8 = vmul.f32 %v11639_v23, %v11639_v23  ;;  %v11662_v29 = vadd.f32 0.5, %v4071_v53  ;;  %v7690_v17 = vpop.eup %7689 }
 0x5b7   : > { %v4195_v54 = vadd.f32 %v11639_v23, %v11637_v47  ;;  %v4232_v53 = vadd.f32 %v11643_v52, %v11641_v43  ;;  %v4075_v60 = vmul.f32 0.5, %v7690_v17  ;;  %v3954_v47 = vmul.f32 0.5, %v11456_v22  ;;  %v7289_v22 = vld [vmem:[%s14372_s11 + $0xc4] sm:$0xf] }
 0x5b8   : > { %15064 = vst [vmem:[#allocation37_spill] sm:$0xff] %v11662_v29  ;;  %7693 = vtanh.f32 %v3949_v62  ;;  %v4335_v37 = vadd.f32 %v4273_v8, %v4271_v9  ;;  %v3614_v62 = vadd.f32 %v11481_v34, %v11351_v46  ;;  %v3792_v9 = vadd.f32 %v11487_v51, %v11360_v36 }
 0x5b9   : > { %v4196_v6 = vadd.f32 %v4195_v54, %v11655_v28  ;;  %7695 = vtanh.f32 %v3950_v24  ;;  %v3953_v24 = vmul.f32 0.5, %v11454_v30  ;;  %v7273_v30 = vld [vmem:[%s14372_s11 + $0x44] sm:$0xf] }
 0x5ba   : > { %7697 = vtanh.f32 %v3951_v13  ;;  %v4336_v43 = vadd.f32 %v4335_v37, %v4275_v55  ;;  %v3881_v37 = vadd.f32 %v11489_v1, %v3792_v9  ;;  %v7069_v1 = vld [vmem:[%s14372_s11 + $0xc8] sm:$0xf0] }
 0x5bb   : > { %v11646_v35 = vpop.f32.mrf.mxu2  ;;  %v3636_v12 = vpop.f32.mrf.mxu0  ;;  %7699 = vtanh.f32 %v3952_v5  ;;  %v4197_v23 = vadd.f32 %v4196_v6, %v11664_v26  ;;  %v11713_v5 = vadd.f32 0.5, %v4075_v60  ;;  %v3619_v60 = vadd.f32 %v11499_v2, %v11351_v46 }
 0x5bc   : > { %v11648_v15 = vpop.f32.mrf.mxu3  ;;  %v3725_v50 = vpop.f32.mrf.mxu1  ;;  %v3637_v14 = vadd.f32 %v3636_v12, %v11351_v46  ;;  %v4074_v12 = vmul.f32 0.5, %v7688_v39  ;;  %v11684_v39 = vadd.f32 0.5, %v4073_v27  ;;  %v4233_v27 = vadd.f32 %v4232_v53, %v11662_v29  ;;  %v7005_v53 = vld [vmem:[%s14372_s11 + $0x48] sm:$0xf0] }
 0x5bd   : > { %v4337_v55 = vadd.f32 %v4336_v43, %v4277_v4  ;;  %15067 = vst [vmem:[#allocation38_spill] sm:$0xff] %v11713_v5  ;;  %7701 = vtanh.f32 %v3953_v24  ;;  %v3955_v43 = vmul.f32 0.5, %v11485_v0  ;;  %v3957_v24 = vmul.f32 0.5, %v3881_v37 }
 0x5be   : > { %v11667_v45 = vadd.f32 %v3725_v50, %v3637_v14  ;;  %v4276_v50 = vmul.f32 %v11662_v29, %v11662_v29  ;;  %15065 = vst [vmem:[#allocation13_spill] sm:$0xff] %v11684_v39  ;;  %v7692_v14 = vpop.eup %7691  ;;  %v11688_v32 = vadd.f32 0.5, %v4074_v12  ;;  %v3703_v12 = vadd.f32 %v11483_v21, %v3614_v62 }
 0x5bf   : > { %v7694_v51 = vpop.eup %7693  ;;  %v4278_v13 = vmul.f32 %v11684_v39, %v11684_v39  ;;  %v11724_v62 = vor.u32 %v7289_v22, %v7069_v1  ;;  %v4234_v9 = vadd.f32 %v4233_v27, %v11684_v39  ;;  %7703 = vtanh.f32 %v3954_v47 }
 0x5c0   : > { %15066 = vst [vmem:[#allocation15_spill] sm:$0xff] %v11688_v32  ;;  %v4373_v28 = vadd.f32 %v4372_v59, %v4276_v50  ;;  %v4279_v21 = vmul.f32 %v11688_v32, %v11688_v32  ;;  %v11715_v59 = vor.u32 %v7273_v30, %v7005_v53  ;;  %v7696_v6 = vpop.eup %7695  ;;  %v4077_v50 = vmul.f32 0.5, %v7694_v51 }
 0x5c1   : > { %v7698_v4 = vpop.eup %7697  ;;  %5149 = vmatpush.bf16.msra.mxu3 %v11724_v62  ;;  %v3958_v2 = vmul.f32 0.5, %v11492_v20  ;;  %7705 = vtanh.f32 %v3955_v43  ;;  %v3708_v37 = vadd.f32 %v11501_v61, %v3619_v60  ;;  %v3797_v20 = vadd.f32 %v11522_v31, %v11360_v36  ;;  %v7272_v43 = vld [vmem:[%s14372_s11 + $0x34] sm:$0xf0]  ;;  %v7059_v31 = vld [vmem:[%s14372_s11 + $0xb0] sm:$0xf] }
 0x5c2   : > { %5060 = vmatpush.bf16.msra.mxu2 %v11715_v59  ;;  %v4374_v30 = vadd.f32 %v4373_v28, %v4278_v13  ;;  %v4338_v27 = vadd.f32 %v4337_v55, %v4279_v21  ;;  %v11740_v39 = vadd.f32 0.5, %v4077_v50  ;;  %v4079_v28 = vmul.f32 0.5, %v7698_v4  ;;  %v6995_v50 = vld [vmem:[%s14372_s11 + $0x30] sm:$0xf] }
 0x5c3   : > { %v3814_v8 = vpop.f32.mrf.mxu2  ;;  %v11691_v52 = vpop.f32.mrf.mxu0  ;;  %v4280_v13 = vmul.f32 %v11713_v5, %v11713_v5  ;;  %v3886_v29 = vadd.f32 %v11524_v48, %v3797_v20  ;;  %v3802_v20 = vadd.f32 %v11559_v44, %v11360_v36  ;;  %v3962_v44 = vmul.f32 0.5, %v11528_v16 }
 0x5c4   : > { %v3903_v7 = vpop.f32.mrf.mxu3  ;;  %v3815_v54 = vadd.f32 %v3814_v8, %v11360_v36  ;;  %v11693_v34 = vpop.f32.mrf.mxu1  ;;  %v4076_v8 = vmul.f32 0.5, %v7692_v14  ;;  %v3956_v14 = vmul.f32 0.5, %v3703_v12  ;;  %v4078_v12 = vmul.f32 0.5, %v7696_v6  ;;  %15069 = vst [vmem:[#allocation16_spill] sm:$0xff] %v11740_v39 }
 0x5c6   : > { %v11699_v17 = vadd.f32 %v3903_v7, %v3815_v54  ;;  %v4198_v7 = vadd.f32 %v4197_v23, %v11688_v32  ;;  %v7700_v54 = vpop.eup %7699  ;;  %v11731_v53 = vadd.f32 0.5, %v4076_v8  ;;  %v4235_v23 = vadd.f32 %v4234_v9, %v11713_v5 }
 0x5c7   : > { %v4080_v8 = vmul.f32 0.5, %v7700_v54  ;;  %7707 = vtanh.f32 %v3956_v14  ;;  %v7702_v55 = vpop.eup %7701  ;;  %v11759_v4 = vadd.f32 0.5, %v4078_v12  ;;  %v11761_v9 = vor.u32 %v7272_v43, %v6995_v50  ;;  %v7288_v14 = vld [vmem:[%s14372_s11 + $0xb4] sm:$0xf0] }
 0x5c8   : > { %15068 = vst [vmem:[#allocation40_spill] sm:$0xff] %v11731_v53  ;;  %v4281_v21 = vmul.f32 %v11731_v53, %v11731_v53  ;;  %7709 = vtanh.f32 %v3957_v24  ;;  %v4199_v61 = vadd.f32 %v4198_v7, %v11731_v53  ;;  %v7704_v60 = vpop.eup %7703  ;;  %v4282_v54 = vmul.f32 %v11740_v39, %v11740_v39 }
 0x5c9   : > { %15070 = vst [vmem:[#allocation18_spill] sm:$0xff] %v11759_v4  ;;  %7711 = vtanh.f32 %v3958_v2  ;;  %v11771_v24 = vadd.f32 0.5, %v4079_v28  ;;  %v3959_v7 = vmul.f32 0.5, %v11503_v33  ;;  %v11774_v12 = vor.u32 %v7288_v14, %v7059_v31  ;;  %4662 = vmatpush.bf16.msrb.mxu0 %v11761_v9  ;;  %v7706_v50 = vpop.eup %7705 }
 0x5ca   : > { %15071 = vst [vmem:[#allocation41_spill] sm:$0xff] %v11761_v9  ;;  %v4375_v2 = vadd.f32 %v4374_v30, %v4280_v13  ;;  %v4339_v43 = vadd.f32 %v4338_v27, %v4281_v21  ;;  %v4236_v5 = vadd.f32 %v4235_v23, %v11740_v39  ;;  %v3624_v28 = vadd.f32 %v11553_v56, %v11351_v46 }
 0x5cb   : > { %v11733_v0 = vpop.f32.mrf.mxu2  ;;  %v3641_v22 = vpop.f32.mrf.mxu0  ;;  %15072 = vst [vmem:[#allocation17_spill] sm:$0xff] %v11774_v12  ;;  %4675 = vmatpush.bf16.msrb.mxu1 %v11774_v12  ;;  %v4200_v13 = vadd.f32 %v4199_v61, %v11759_v4  ;;  %v4284_v56 = vmul.f32 %v11771_v24, %v11771_v24  ;;  %7713 = vtanh.f32 %v3959_v7 }
 0x5cc   : > { %v11735_v51 = vpop.f32.mrf.mxu3  ;;  %v3730_v1 = vpop.f32.mrf.mxu1  ;;  %v3642_v47 = vadd.f32 %v3641_v22, %v11351_v46  ;;  %v11776_v22 = vadd.f32 0.5, %v4080_v8  ;;  %v4283_v8 = vmul.f32 %v11759_v4, %v11759_v4  ;;  %v4376_v21 = vadd.f32 %v4375_v2, %v4282_v54 }
 0x5cd   : > { %v7708_v30 = vpop.eup %7707  ;;  %v3961_v4 = vmul.f32 0.5, %v3886_v29  ;;  %v3713_v54 = vadd.f32 %v11555_v18, %v3624_v28  ;;  %v4237_v7 = vadd.f32 %v4236_v5, %v11771_v24  ;;  %v3963_v29 = vmul.f32 0.5, %v11557_v38 }
 0x5ce   : > { %v11750_v6 = vadd.f32 %v3730_v1, %v3642_v47  ;;  %v4081_v1 = vmul.f32 0.5, %v7702_v55  ;;  %v3960_v47 = vmul.f32 0.5, %v3708_v37  ;;  %v4082_v37 = vmul.f32 0.5, %v7704_v60  ;;  %v7710_v48 = vpop.eup %7709 }
 0x5cf   : > { %v7712_v61 = vpop.eup %7711  ;;  %v4285_v31 = vmul.f32 %v11776_v22, %v11776_v22  ;;  %v4083_v60 = vmul.f32 0.5, %v7706_v50  ;;  %v4084_v39 = vmul.f32 0.5, %v7708_v30  ;;  %v4340_v2 = vadd.f32 %v4339_v43, %v4283_v8 }
 0x5d0   : > { %v11798_v14 = vadd.f32 0.5, %v4081_v1  ;;  %7715 = vtanh.f32 %v3960_v47  ;;  %v11804_v32 = vadd.f32 0.5, %v4082_v37  ;;  %v4201_v12 = vadd.f32 %v4200_v13, %v11776_v22 }
 0x5d1   : > { %v4085_v9 = vmul.f32 0.5, %v7710_v48  ;;  %v4086_v1 = vmul.f32 0.5, %v7712_v61  ;;  %v3891_v47 = vadd.f32 %v11561_v40, %v3802_v20  ;;  %v7714_v18 = vpop.eup %7713  ;;  %v11811_v43 = vadd.f32 0.5, %v4083_v60 }
 0x5d2   : > { %v4238_v50 = vadd.f32 %v4237_v7, %v11798_v14  ;;  %v11813_v5 = vadd.f32 0.5, %v4084_v39  ;;  %7717 = vtanh.f32 %v3961_v4  ;;  %v3964_v28 = vmul.f32 0.5, %v3713_v54 }
 0x5d3   : > { %v3819_v53 = vpop.f32.mrf.mxu2  ;;  %v11788_v55 = vpop.f32.mrf.mxu0  ;;  %15073 = vst [vmem:[#allocation30_spill] sm:$0xff] %v11811_v43  ;;  %v4286_v40 = vmul.f32 %v11798_v14, %v11798_v14  ;;  %v4287_v8 = vmul.f32 %v11804_v32, %v11804_v32  ;;  %7719 = vtanh.f32 %v3962_v44  ;;  %v3629_v38 = vadd.f32 %v11571_v19, %v11351_v46 }
 0x5d4   : > { %v3908_v33 = vpop.f32.mrf.mxu3  ;;  %v3820_v27 = vadd.f32 %v3819_v53, %v11360_v36  ;;  %v11790_v23 = vpop.f32.mrf.mxu1  ;;  %v4202_v4 = vadd.f32 %v4201_v12, %v11804_v32  ;;  %v11830_v48 = vadd.f32 0.5, %v4085_v9  ;;  %v4087_v20 = vmul.f32 0.5, %v7714_v18 }
 0x5d5   : > { %7721 = vtanh.f32 %v3963_v29  ;;  %v3966_v61 = vmul.f32 0.5, %v11564_v58  ;;  %v4288_v19 = vmul.f32 %v11811_v43, %v11811_v43  ;;  %v4289_v60 = vmul.f32 %v11813_v5, %v11813_v5 }
 0x5d6   : > { %v11800_v53 = vadd.f32 %v3908_v33, %v3820_v27  ;;  %v4377_v33 = vadd.f32 %v4376_v21, %v4284_v56  ;;  %v4341_v27 = vadd.f32 %v4340_v2, %v4285_v31  ;;  %v7716_v13 = vpop.eup %7715  ;;  %15074 = vst [vmem:[#allocation43_spill] sm:$0xff] %v11830_v48  ;;  %v11832_v21 = vadd.f32 0.5, %v4086_v1 }
 0x5d7   : > { %v3965_v56 = vmul.f32 0.5, %v3891_v47  ;;  %v3807_v31 = vadd.f32 %v11598_v25, %v11360_v36  ;;  %v4088_v54 = vmul.f32 0.5, %v7716_v13  ;;  %7723 = vtanh.f32 %v3964_v28 }
 0x5d8   : > { %15075 = vst [vmem:[#allocation44_spill] sm:$0xff] %v11832_v21  ;;  %v4378_v9 = vadd.f32 %v4377_v33, %v4286_v40  ;;  %v4342_v12 = vadd.f32 %v4341_v27, %v4287_v8  ;;  %v4239_v2 = vadd.f32 %v4238_v50, %v11811_v43  ;;  %v3718_v7 = vadd.f32 %v11573_v42, %v3629_v38  ;;  %v7718_v44 = vpop.eup %7717 }
 0x5d9   : > { %v4203_v58 = vadd.f32 %v4202_v4, %v11813_v5  ;;  %v4290_v25 = vmul.f32 %v11830_v48, %v11830_v48  ;;  %v4291_v1 = vmul.f32 %v11832_v21, %v11832_v21  ;;  %7725 = vtanh.f32 %v3965_v56  ;;  %v7720_v47 = vpop.eup %7719 }
 0x5da   : > { %v11848_v29 = vadd.f32 0.5, %v4087_v20  ;;  %7727 = vtanh.f32 %v3966_v61  ;;  %v3967_v33 = vmul.f32 0.5, %v11576_v11  ;;  %v3896_v27 = vadd.f32 %v11600_v57, %v3807_v31 }
 0x5db   : > { %v11815_v16 = vpop.f32.mrf.mxu2  ;;  %v11825_v37 = vpop.f32.mrf.mxu0  ;;  %v4379_v50 = vadd.f32 %v4378_v9, %v4288_v19  ;;  %v4343_v42 = vadd.f32 %v4342_v12, %v4289_v60  ;;  %v11852_v18 = vadd.f32 0.5, %v4088_v54  ;;  %v3634_v28 = vadd.f32 %v11630_v41, %v11351_v46 }
 0x5dc   : > { %v11817_v30 = vpop.f32.mrf.mxu3  ;;  %v11827_v39 = vpop.f32.mrf.mxu1  ;;  %15076 = vst [vmem:[#allocation24_spill] sm:$0xff] %v11848_v29  ;;  %v4240_v38 = vadd.f32 %v4239_v2, %v11830_v48  ;;  %v4204_v4 = vadd.f32 %v4203_v58, %v11832_v21  ;;  %v3968_v56 = vmul.f32 0.5, %v3718_v7  ;;  %v3812_v11 = vadd.f32 %v11646_v35, %v11360_v36 }
 0x5dd   : > { %15077 = vst [vmem:[#allocation45_spill] sm:$0xff] %v11852_v18  ;;  %v7722_v8 = vpop.eup %7721  ;;  %v4380_v31 = vadd.f32 %v4379_v50, %v4290_v25  ;;  %v4344_v41 = vadd.f32 %v4343_v42, %v4291_v1  ;;  %v4089_v19 = vmul.f32 0.5, %v7718_v44  ;;  %v4090_v60 = vmul.f32 0.5, %v7720_v47  ;;  %v7271_v44 = vld [vmem:[%s14372_s11 + $0x34] sm:$0xf] }
 0x5de   : > { %v7724_v61 = vpop.eup %7723  ;;  %v4241_v54 = vadd.f32 %v4240_v38, %v11848_v29  ;;  %v4292_v9 = vmul.f32 %v11848_v29, %v11848_v29  ;;  %7729 = vtanh.f32 %v3967_v33  ;;  %v3969_v12 = vmul.f32 0.5, %v3896_v27  ;;  %v6997_v25 = vld [vmem:[%s14372_s11 + $0x38] sm:$0xf0] }
 0x5df   : > { %v7726_v2 = vpop.eup %7725  ;;  %v4293_v35 = vmul.f32 %v11852_v18, %v11852_v18  ;;  %v4091_v7 = vmul.f32 0.5, %v7722_v8  ;;  %v3970_v58 = vmul.f32 0.5, %v11607_v63  ;;  %v3723_v21 = vadd.f32 %v11632_v10, %v3634_v28  ;;  %v7287_v63 = vld [vmem:[%s14372_s11 + $0xb4] sm:$0xf]  ;;  %v7061_v10 = vld [vmem:[%s14372_s11 + $0xb8] sm:$0xf0] }
 0x5e0   : > { %v7728_v1 = vpop.eup %7727  ;;  %v4092_v47 = vmul.f32 0.5, %v7724_v61  ;;  %7731 = vtanh.f32 %v3968_v56  ;;  %v3901_v33 = vadd.f32 %v11648_v15, %v3812_v11  ;;  %v11882_v27 = vor.u32 %v7271_v44, %v6997_v25 }
 0x5e1   : > { %v4205_v50 = vadd.f32 %v4204_v4, %v11852_v18  ;;  %v11891_v42 = vadd.f32 0.5, %v4089_v19  ;;  %v11893_v28 = vadd.f32 0.5, %v4090_v60  ;;  %v11895_v8 = vor.u32 %v7287_v63, %v7061_v10  ;;  %v6987_v10 = vld [vmem:[%s14372_s11 + $0x20] sm:$0xf] }
 0x5e2   : > { %v4093_v38 = vmul.f32 0.5, %v7726_v2  ;;  %7733 = vtanh.f32 %v3969_v12  ;;  %v3971_v15 = vmul.f32 0.5, %v11634_v49  ;;  %v3639_v56 = vadd.f32 %v11691_v52, %v11351_v46  ;;  %5061 = vmatpush.bf16.msra.mxu2 %v11882_v27 }
 0x5e3   : > { %v11856_v13 = vpop.f32.mrf.mxu2  ;;  %v11864_v57 = vpop.f32.mrf.mxu0  ;;  %15078 = vst [vmem:[#allocation47_spill] sm:$0xff] %v11891_v42  ;;  %v4381_v11 = vadd.f32 %v4380_v31, %v4292_v9  ;;  %v4094_v61 = vmul.f32 0.5, %v7728_v1  ;;  %7735 = vtanh.f32 %v3970_v58  ;;  %v3972_v44 = vmul.f32 0.5, %v3723_v21  ;;  %5150 = vmatpush.bf16.msra.mxu3 %v11895_v8 }
 0x5e4   : > { %v11858_v40 = vpop.f32.mrf.mxu3  ;;  %v11866_v20 = vpop.f32.mrf.mxu1  ;;  %15079 = vst [vmem:[#allocation27_spill] sm:$0xff] %v11893_v28  ;;  %v4345_v2 = vadd.f32 %v4344_v41, %v4293_v35  ;;  %v11906_v12 = vadd.f32 0.5, %v4091_v7  ;;  %v11908_v49 = vadd.f32 0.5, %v4092_v47  ;;  %v3973_v25 = vmul.f32 0.5, %v3901_v33 }
 0x5e5   : > { %v7730_v60 = vpop.eup %7729  ;;  %v4242_v31 = vadd.f32 %v4241_v54, %v11891_v42  ;;  %v4294_v21 = vmul.f32 %v11891_v42, %v11891_v42  ;;  %v4295_v9 = vmul.f32 %v11893_v28, %v11893_v28  ;;  %v3974_v58 = vmul.f32 0.5, %v11667_v45  ;;  %v7270_v45 = vld [vmem:[%s14372_s11 + $0x24] sm:$0xf0] }
 0x5e6   : > { %15080 = vst [vmem:[#allocation46_spill] sm:$0xff] %v11906_v12  ;;  %v7732_v41 = vpop.eup %7731  ;;  %v11920_v35 = vadd.f32 0.5, %v4093_v38  ;;  %7737 = vtanh.f32 %v3971_v15  ;;  %v3728_v7 = vadd.f32 %v11693_v34, %v3639_v56  ;;  %v3817_v1 = vadd.f32 %v11733_v0, %v11360_v36  ;;  %v7051_v15 = vld [vmem:[%s14372_s11 + $0xa0] sm:$0xf]  ;;  %v7286_v56 = vld [vmem:[%s14372_s11 + $0xa4] sm:$0xf0] }
 0x5e7   : > { %15081 = vst [vmem:[#allocation48_spill] sm:$0xff] %v11908_v49  ;;  %v4206_v47 = vadd.f32 %v4205_v50, %v11893_v28  ;;  %v11926_v54 = vadd.f32 0.5, %v4094_v61  ;;  %v4095_v33 = vmul.f32 0.5, %v7730_v60  ;;  %7739 = vtanh.f32 %v3972_v44 }
 0x5e8   : > { %v7734_v38 = vpop.eup %7733  ;;  %v4296_v34 = vmul.f32 %v11906_v12, %v11906_v12  ;;  %v4297_v0 = vmul.f32 %v11908_v49, %v11908_v49  ;;  %7741 = vtanh.f32 %v3973_v25  ;;  %v11938_v50 = vor.u32 %v7270_v45, %v6987_v10 }
 0x5e9   : > { %15082 = vst [vmem:[#allocation49_spill] sm:$0xff] %v11926_v54  ;;  %v7736_v61 = vpop.eup %7735  ;;  %v4096_v44 = vmul.f32 0.5, %v7732_v41  ;;  %7743 = vtanh.f32 %v3974_v58  ;;  %v3975_v60 = vmul.f32 0.5, %v11699_v17  ;;  %v11947_v28 = vor.u32 %v7286_v56, %v7051_v15 }
 0x5ea   : > { %v4382_v42 = vadd.f32 %v4381_v11, %v4294_v21  ;;  %v4346_v29 = vadd.f32 %v4345_v2, %v4295_v9  ;;  %v3976_v25 = vmul.f32 0.5, %v3728_v7  ;;  %v3906_v10 = vadd.f32 %v11735_v51, %v3817_v1  ;;  %4663 = vmatpush.bf16.msrb.mxu0 %v11938_v50 }
 0x5eb   : > { %v11901_v4 = vpop.f32.mrf.mxu2  ;;  %v11910_v52 = vpop.f32.mrf.mxu0  ;;  %v4243_v45 = vadd.f32 %v4242_v31, %v11906_v12  ;;  %v4298_v18 = vmul.f32 %v11920_v35, %v11920_v35  ;;  %v4299_v41 = vmul.f32 %v11926_v54, %v11926_v54  ;;  %v11956_v58 = vadd.f32 0.5, %v4095_v33  ;;  %4676 = vmatpush.bf16.msrb.mxu1 %v11947_v28 }
 0x5ec   : > { %v11903_v19 = vpop.f32.mrf.mxu3  ;;  %v11912_v63 = vpop.f32.mrf.mxu1  ;;  %v4383_v51 = vadd.f32 %v4382_v42, %v4296_v34  ;;  %v4207_v2 = vadd.f32 %v4206_v47, %v11908_v49  ;;  %v4097_v21 = vmul.f32 0.5, %v7734_v38  ;;  %v4098_v31 = vmul.f32 0.5, %v7736_v61 }
 0x5ed   : > { %15083 = vst [vmem:[#allocation51_spill] sm:$0xff] %v11956_v58  ;;  %v7738_v11 = vpop.eup %7737  ;;  %v4347_v56 = vadd.f32 %v4346_v29, %v4297_v0  ;;  %v11968_v33 = vadd.f32 0.5, %v4096_v44  ;;  %7745 = vtanh.f32 %v3975_v60  ;;  %v3644_v12 = vadd.f32 %v11788_v55, %v11351_v46 }
 0x5ee   : > { %v7740_v1 = vpop.eup %7739  ;;  %v4244_v43 = vadd.f32 %v4243_v45, %v11920_v35  ;;  %v4208_v42 = vadd.f32 %v4207_v2, %v11926_v54  ;;  %7747 = vtanh.f32 %v3976_v25  ;;  %v3977_v47 = vmul.f32 0.5, %v3906_v10 }
 0x5ef   : > { %15084 = vst [vmem:[#allocation29_spill] sm:$0xff] %v11968_v33  ;;  %v7742_v48 = vpop.eup %7741  ;;  %v4384_v34 = vadd.f32 %v4383_v51, %v4298_v18  ;;  %v4348_v61 = vadd.f32 %v4347_v56, %v4299_v41  ;;  %v4300_v49 = vmul.f32 %v11956_v58, %v11956_v58  ;;  %v4099_v29 = vmul.f32 0.5, %v7738_v11 }
 0x5f0   : > { %v7744_v38 = vpop.eup %7743  ;;  %v11976_v0 = vadd.f32 0.5, %v4097_v21  ;;  %v11978_v44 = vadd.f32 0.5, %v4098_v31  ;;  %v4100_v60 = vmul.f32 0.5, %v7740_v1  ;;  %v3978_v55 = vmul.f32 0.5, %v11750_v6 }
 0x5f1   : > { %v4301_v45 = vmul.f32 %v11968_v33, %v11968_v33  ;;  %v4101_v2 = vmul.f32 0.5, %v7742_v48  ;;  %v3733_v25 = vadd.f32 %v11790_v23, %v3644_v12  ;;  %v3822_v18 = vadd.f32 %v11815_v16, %v11360_v36 }
 0x5f2   : > { %v4102_v10 = vmul.f32 0.5, %v7744_v38  ;;  %7749 = vtanh.f32 %v3977_v47  ;;  %v3979_v41 = vmul.f32 0.5, %v11800_v53  ;;  %v3647_v11 = vadd.f32 %v11825_v37, %v11351_v46 }
 0x5f3   : > { %v11958_v17 = vpop.f32.mrf.mxu2  ;;  %v11964_v9 = vpop.f32.mrf.mxu0  ;;  %v4245_v21 = vadd.f32 %v4244_v43, %v11956_v58  ;;  %v4385_v6 = vadd.f32 %v4384_v34, %v4300_v49  ;;  %v4209_v31 = vadd.f32 %v4208_v42, %v11968_v33  ;;  %v11991_v1 = vadd.f32 0.5, %v4099_v29 }
 0x5f4   : > { %v11960_v15 = vpop.f32.mrf.mxu3  ;;  %v11966_v7 = vpop.f32.mrf.mxu1  ;;  %v4302_v12 = vmul.f32 %v11976_v0, %v11976_v0  ;;  %v4303_v53 = vmul.f32 %v11978_v44, %v11978_v44  ;;  %v12001_v37 = vadd.f32 0.5, %v4100_v60  ;;  %7751 = vtanh.f32 %v3978_v55 }
 0x5f5   : > { %v7746_v51 = vpop.eup %7745  ;;  %15085 = vst [vmem:[#allocation12_spill] sm:$0xff] %v11991_v1  ;;  %v4349_v56 = vadd.f32 %v4348_v61, %v4301_v45  ;;  %v4246_v42 = vadd.f32 %v4245_v21, %v11976_v0  ;;  %v3980_v47 = vmul.f32 0.5, %v3733_v25  ;;  %v3911_v38 = vadd.f32 %v11817_v30, %v3822_v18 }
 0x5f6   : > { %v7748_v16 = vpop.eup %7747  ;;  %v12009_v34 = vadd.f32 0.5, %v4101_v2  ;;  %v12011_v29 = vadd.f32 0.5, %v4102_v10  ;;  %7753 = vtanh.f32 %v3979_v41  ;;  %v3736_v58 = vadd.f32 %v11827_v39, %v3647_v11 }
 0x5f7   : > { %v4210_v60 = vadd.f32 %v4209_v31, %v11978_v44  ;;  %v4304_v55 = vmul.f32 %v11991_v1, %v11991_v1  ;;  %v4103_v33 = vmul.f32 0.5, %v7746_v51  ;;  %v4104_v54 = vmul.f32 0.5, %v7748_v16 }
 0x5f8   : > { %v7750_v61 = vpop.eup %7749  ;;  %v4386_v45 = vadd.f32 %v4385_v6, %v4302_v12  ;;  %v4350_v21 = vadd.f32 %v4349_v56, %v4303_v53  ;;  %v4305_v30 = vmul.f32 %v12001_v37, %v12001_v37  ;;  %v3825_v2 = vadd.f32 %v11856_v13, %v11360_v36 }
 0x5f9   : > { %v4247_v25 = vadd.f32 %v4246_v42, %v11991_v1  ;;  %7755 = vtanh.f32 %v3980_v47  ;;  %v3981_v39 = vmul.f32 0.5, %v3911_v38  ;;  %v3649_v18 = vadd.f32 %v11864_v57, %v11351_v46 }
 0x5fa   : > { %v7752_v10 = vpop.eup %7751  ;;  %v4211_v41 = vadd.f32 %v4210_v60, %v12001_v37  ;;  %v4306_v11 = vmul.f32 %v12009_v34, %v12009_v34  ;;  %v4307_v51 = vmul.f32 %v12011_v29, %v12011_v29  ;;  %v3982_v6 = vmul.f32 0.5, %v3736_v58 }
 0x5fb   : > { %v11993_v48 = vpop.f32.mrf.mxu2  ;;  %v12003_v43 = vpop.f32.mrf.mxu0  ;;  %v4387_v31 = vadd.f32 %v4386_v45, %v4304_v55  ;;  %v12029_v16 = vadd.f32 0.5, %v4103_v33  ;;  %v12031_v13 = vadd.f32 0.5, %v4104_v54  ;;  %v4105_v12 = vmul.f32 0.5, %v7750_v61 }
 0x5fc   : > { %v11995_v23 = vpop.f32.mrf.mxu3  ;;  %v12005_v49 = vpop.f32.mrf.mxu1  ;;  %v4351_v42 = vadd.f32 %v4350_v21, %v4305_v30  ;;  %v4248_v47 = vadd.f32 %v4247_v25, %v12009_v34  ;;  %v3914_v38 = vadd.f32 %v11858_v40, %v3825_v2  ;;  %v3827_v60 = vadd.f32 %v11901_v4, %v11360_v36 }
 0x5fd   : > { %15086 = vst [vmem:[#allocation39_spill] sm:$0xff] %v12029_v16  ;;  %v7754_v57 = vpop.eup %7753  ;;  %v4212_v54 = vadd.f32 %v4211_v41, %v12011_v29  ;;  %v4106_v33 = vmul.f32 0.5, %v7752_v10  ;;  %7757 = vtanh.f32 %v3981_v39  ;;  %v3738_v61 = vadd.f32 %v11866_v20, %v3649_v18  ;;  %v7269_v20 = vld [vmem:[%s14372_s11 + $0x24] sm:$0xf]  ;;  %v6989_v39 = vld [vmem:[%s14372_s11 + $0x28] sm:$0xf0] }
 0x5fe   : > { %v4388_v45 = vadd.f32 %v4387_v31, %v4306_v11  ;;  %v4352_v1 = vadd.f32 %v4351_v42, %v4307_v51  ;;  %7759 = vtanh.f32 %v3982_v6  ;;  %v3652_v21 = vadd.f32 %v11910_v52, %v11351_v46  ;;  %v7285_v11 = vld [vmem:[%s14372_s11 + $0xa4] sm:$0xf]  ;;  %v7053_v51 = vld [vmem:[%s14372_s11 + $0xa8] sm:$0xf0] }
 0x5ff   : > { %v7756_v30 = vpop.eup %7755  ;;  %v4308_v40 = vmul.f32 %v12029_v16, %v12029_v16  ;;  %v4309_v4 = vmul.f32 %v12031_v13, %v12031_v13  ;;  %v12051_v2 = vadd.f32 0.5, %v4105_v12  ;;  %v4107_v25 = vmul.f32 0.5, %v7754_v57 }
 0x600   : > { %v4249_v52 = vadd.f32 %v4248_v47, %v12029_v16  ;;  %v3983_v18 = vmul.f32 0.5, %v3914_v38  ;;  %v3916_v10 = vadd.f32 %v11903_v19, %v3827_v60  ;;  %v12061_v41 = vor.u32 %v7269_v20, %v6989_v39 }
 0x601   : > { %15087 = vst [vmem:[#allocation31_spill] sm:$0xff] %v12051_v2  ;;  %v12069_v6 = vadd.f32 0.5, %v4106_v33  ;;  %v3984_v31 = vmul.f32 0.5, %v3738_v61  ;;  %v3654_v12 = vadd.f32 %v11964_v9, %v11351_v46  ;;  %v12073_v57 = vor.u32 %v7285_v11, %v7053_v51 }
 0x602   : > { %v4213_v19 = vadd.f32 %v4212_v54, %v12031_v13  ;;  %v4108_v42 = vmul.f32 0.5, %v7756_v30  ;;  %v3741_v47 = vadd.f32 %v11912_v63, %v3652_v21  ;;  %v3830_v38 = vadd.f32 %v11958_v17, %v11360_v36  ;;  %5062 = vmatpush.bf16.msra.mxu2 %v12061_v41 }
 0x603   : > { %v12033_v53 = vpop.f32.mrf.mxu2  ;;  %v3658_v58 = vpop.f32.mrf.mxu0  ;;  %v4389_v20 = vadd.f32 %v4388_v45, %v4308_v40  ;;  %v4353_v33 = vadd.f32 %v4352_v1, %v4309_v4  ;;  %v4310_v61 = vmul.f32 %v12051_v2, %v12051_v2  ;;  %v12082_v39 = vadd.f32 0.5, %v4107_v25  ;;  %5151 = vmatpush.bf16.msra.mxu3 %v12073_v57 }
 0x604   : > { %v12035_v56 = vpop.f32.mrf.mxu3  ;;  %v12041_v55 = vpop.f32.mrf.mxu1  ;;  %v4250_v63 = vadd.f32 %v4249_v52, %v12051_v2  ;;  %7761 = vtanh.f32 %v3983_v18  ;;  %v3985_v17 = vmul.f32 0.5, %v3916_v10  ;;  %v3657_v21 = vadd.f32 %v12003_v43, %v11351_v46 }
 0x605   : > { %v7758_v60 = vpop.eup %7757  ;;  %15088 = vst [vmem:[#allocation19_spill] sm:$0xff] %v12082_v39  ;;  %v4214_v30 = vadd.f32 %v4213_v19, %v12069_v6  ;;  %v4311_v40 = vmul.f32 %v12069_v6, %v12069_v6  ;;  %7763 = vtanh.f32 %v3984_v31  ;;  %v3743_v4 = vadd.f32 %v11966_v7, %v3654_v12  ;;  %v6979_v19 = vld [vmem:[%s14372_s11 + $0x10] sm:$0xf]  ;;  %v7268_v7 = vld [vmem:[%s14372_s11 + $0x14] sm:$0xf0] }
 0x606   : > { %v7760_v54 = vpop.eup %7759  ;;  %v12094_v25 = vadd.f32 0.5, %v4108_v42  ;;  %v3986_v51 = vmul.f32 0.5, %v3741_v47  ;;  %v3919_v52 = vadd.f32 %v11960_v15, %v3830_v38  ;;  %v3659_v18 = vadd.f32 %v3658_v58, %v11351_v46  ;;  %v7043_v12 = vld [vmem:[%s14372_s11 + $0x90] sm:$0xf]  ;;  %v7284_v42 = vld [vmem:[%s14372_s11 + $0x94] sm:$0xf0] }
 0x607   : > { %v4390_v10 = vadd.f32 %v4389_v20, %v4310_v61  ;;  %v4312_v43 = vmul.f32 %v12082_v39, %v12082_v39  ;;  %v4109_v2 = vmul.f32 0.5, %v7758_v60  ;;  %v4110_v16 = vmul.f32 0.5, %v7760_v54 }
 0x608   : > { %15089 = vst [vmem:[#allocation42_spill] sm:$0xff] %v12094_v25  ;;  %7765 = vtanh.f32 %v3985_v17  ;;  %v3746_v31 = vadd.f32 %v12005_v49, %v3657_v21  ;;  %v12108_v58 = vor.u32 %v7268_v7, %v6979_v19  ;;  %v4354_v47 = vadd.f32 %v4353_v33, %v4311_v40 }
 0x609   : > { %v3988_v38 = vmul.f32 0.5, %v3743_v4  ;;  %v3832_v60 = vadd.f32 %v11993_v48, %v11360_v36  ;;  %v12118_v20 = vor.u32 %v7284_v42, %v7043_v12  ;;  %v4251_v61 = vadd.f32 %v4250_v63, %v12082_v39 }
 0x60a   : > { %v7762_v49 = vpop.eup %7761  ;;  %7767 = vtanh.f32 %v3986_v51  ;;  %v3987_v54 = vmul.f32 0.5, %v3919_v52  ;;  %v3748_v17 = vadd.f32 %v12041_v55, %v3659_v18  ;;  %4664 = vmatpush.bf16.msrb.mxu0 %v12108_v58  ;;  %v4313_v33 = vmul.f32 %v12094_v25, %v12094_v25 }
 0x60b   : > { %v3836_v9 = vpop.f32.mrf.mxu2  ;;  %v3661_v45 = vpop.f32.mrf.mxu0  ;;  %v12126_v40 = vadd.f32 0.5, %v4109_v2  ;;  %v12128_v48 = vadd.f32 0.5, %v4110_v16  ;;  %4677 = vmatpush.bf16.msrb.mxu1 %v12118_v20  ;;  %v4391_v63 = vadd.f32 %v4390_v10, %v4312_v43  ;;  %v3990_v51 = vmul.f32 0.5, %v3746_v31 }
 0x60c   : > { %v12084_v11 = vpop.f32.mrf.mxu3  ;;  %v3750_v1 = vpop.f32.mrf.mxu1  ;;  %v3662_v15 = vadd.f32 %v3661_v45, %v11351_v46  ;;  %v4215_v45 = vadd.f32 %v4214_v30, %v12094_v25  ;;  %v3835_v55 = vadd.f32 %v12033_v53, %v11360_v36  ;;  %v4111_v30 = vmul.f32 0.5, %v7762_v49 }
 0x60d   : > { %v7764_v21 = vpop.eup %7763  ;;  %15090 = vst [vmem:[#allocation50_spill] sm:$0xff] %v12126_v40  ;;  %7769 = vtanh.f32 %v3988_v38  ;;  %v3921_v12 = vadd.f32 %v11995_v23, %v3832_v60  ;;  %v3992_v39 = vmul.f32 0.5, %v3748_v17  ;;  %v3837_v25 = vadd.f32 %v3836_v9, %v11360_v36 }
 0x60e   : > { %15091 = vst [vmem:[#allocation52_spill] sm:$0xff] %v12128_v48  ;;  %v3751_v52 = vadd.f32 %v3750_v1, %v3662_v15  ;;  %v7766_v16 = vpop.eup %7765  ;;  %v4112_v42 = vmul.f32 0.5, %v7764_v21  ;;  %7771 = vtanh.f32 %v3987_v54  ;;  %v4355_v10 = vadd.f32 %v4354_v47, %v4313_v33 }
 0x60f   : > { %v4314_v43 = vmul.f32 %v12126_v40, %v12126_v40  ;;  %v4315_v53 = vmul.f32 %v12128_v48, %v12128_v48  ;;  %7773 = vtanh.f32 %v3990_v51  ;;  %v3924_v23 = vadd.f32 %v12035_v56, %v3835_v55 }
 0x610   : > { %v7768_v31 = vpop.eup %7767  ;;  %v3994_v15 = vmul.f32 0.5, %v3751_v52  ;;  %v4252_v60 = vadd.f32 %v4251_v61, %v12126_v40  ;;  %v12143_v49 = vadd.f32 0.5, %v4111_v30  ;;  %v4113_v9 = vmul.f32 0.5, %v7766_v16 }
 0x611   : > { %v3989_v47 = vmul.f32 0.5, %v3921_v12  ;;  %v4216_v54 = vadd.f32 %v4215_v45, %v12128_v48  ;;  %v12146_v17 = vadd.f32 0.5, %v4112_v42  ;;  %7775 = vtanh.f32 %v3992_v39 }
 0x612   : > { %v3926_v21 = vadd.f32 %v12084_v11, %v3837_v25  ;;  %v4392_v51 = vadd.f32 %v4391_v63, %v4314_v43  ;;  %v4114_v56 = vmul.f32 0.5, %v7768_v31  ;;  %v3991_v61 = vmul.f32 0.5, %v3924_v23 }
 0x613   : > { %v3839_v4 = vpop.f32.mrf.mxu2  ;;  %v3663_v18 = vpop.f32.mrf.mxu0  ;;  %7777 = vtanh.f32 %v3994_v15  ;;  %v4316_v39 = vmul.f32 %v12143_v49, %v12143_v49  ;;  %v12152_v16 = vadd.f32 0.5, %v4113_v9  ;;  %v4317_v63 = vmul.f32 %v12146_v17, %v12146_v17 }
 0x614   : > { %v3928_v19 = vpop.f32.mrf.mxu3  ;;  %v3752_v7 = vpop.f32.mrf.mxu1  ;;  %v3664_v2 = vadd.f32 %v3663_v18, %v11351_v46  ;;  %v3840_v38 = vadd.f32 %v3839_v4, %v11360_v36  ;;  %v4356_v18 = vadd.f32 %v4355_v10, %v4315_v53  ;;  %7779 = vtanh.f32 %v3989_v47 }
 0x615   : > { %v7770_v33 = vpop.eup %7769  ;;  %v3993_v10 = vmul.f32 0.5, %v3926_v21  ;;  %v4253_v23 = vadd.f32 %v4252_v60, %v12143_v49  ;;  %v4217_v15 = vadd.f32 %v4216_v54, %v12146_v17  ;;  %v4393_v9 = vadd.f32 %v4392_v51, %v4316_v39 }
 0x616   : > { %v3753_v1 = vadd.f32 %v3752_v7, %v3664_v2  ;;  %v7772_v7 = vpop.eup %7771  ;;  %v3929_v30 = vadd.f32 %v3928_v19, %v3840_v38  ;;  %v4116_v42 = vmul.f32 0.5, %v7770_v33  ;;  %v12157_v19 = vadd.f32 0.5, %v4114_v56 }
 0x617   : > { %v7774_v25 = vpop.eup %7773  ;;  %v4115_v53 = vmul.f32 0.5, %v7772_v7  ;;  %v4318_v47 = vmul.f32 %v12152_v16, %v12152_v16 }
 0x618   : > { %v3996_v55 = vmul.f32 0.5, %v3753_v1  ;;  %v7776_v31 = vpop.eup %7775  ;;  %v3995_v38 = vmul.f32 0.5, %v3929_v30  ;;  %v12163_v56 = vadd.f32 0.5, %v4116_v42  ;;  %v4319_v60 = vmul.f32 %v12157_v19, %v12157_v19 }
 0x619   : > { %v7778_v21 = vpop.eup %7777  ;;  %v4120_v54 = vmul.f32 0.5, %v7776_v31  ;;  %v4254_v30 = vadd.f32 %v4253_v23, %v12152_v16 }
 0x61a   : > { %7781 = vtanh.f32 %v3996_v55  ;;  %15092 = vst [vmem:[#allocation20_spill] sm:$0xff] %v12163_v56  ;;  %v7780_v7 = vpop.eup %7779 }
 0x61b   : > { %v3841_v52 = vpop.f32.mrf.mxu2  ;;  %v3666_v2 = vpop.f32.mrf.mxu0  ;;  %7783 = vtanh.f32 %v3991_v61 }
 0x61c   : > { %v3930_v4 = vpop.f32.mrf.mxu3  ;;  %v3842_v12 = vadd.f32 %v3841_v52, %v11360_v36  ;;  %v3755_v45 = vpop.f32.mrf.mxu1  ;;  %v3667_v11 = vadd.f32 %v3666_v2, %v11351_v46  ;;  %v4118_v52 = vmul.f32 0.5, %v7774_v25  ;;  %7785 = vtanh.f32 %v3993_v10 }
 0x61d   : > { %v4218_v2 = vadd.f32 %v4217_v15, %v12157_v19 }
 0x61e   : > { %v3931_v43 = vadd.f32 %v3930_v4, %v3842_v12  ;;  %v3756_v1 = vadd.f32 %v3755_v45, %v3667_v11  ;;  %v4357_v4 = vadd.f32 %v4356_v18, %v4317_v63  ;;  %v12167_v12 = vadd.f32 0.5, %v4115_v53 }
 0x61f   : > { %v4394_v11 = vadd.f32 %v4393_v9, %v4318_v47  ;;  %v12172_v25 = vadd.f32 0.5, %v4118_v52  ;;  %v4122_v63 = vmul.f32 0.5, %v7778_v21  ;;  %v4117_v53 = vmul.f32 0.5, %v7780_v7 }
 0x620   : > { %v3998_v33 = vmul.f32 0.5, %v3756_v1  ;;  %v3997_v55 = vmul.f32 0.5, %v3931_v43  ;;  %15093 = vst [vmem:[#allocation22_spill] sm:$0xff] %v12167_v12  ;;  %v7782_v39 = vpop.eup %7781  ;;  %v4321_v43 = vmul.f32 %v12163_v56, %v12163_v56  ;;  %v4358_v23 = vadd.f32 %v4357_v4, %v4319_v60 }
 0x621   : > { %v7784_v10 = vpop.eup %7783  ;;  %v4255_v15 = vadd.f32 %v4254_v30, %v12167_v12  ;;  %v4320_v47 = vmul.f32 %v12167_v12, %v12167_v12  ;;  %v4124_v52 = vmul.f32 0.5, %v7782_v39  ;;  %v12187_v30 = vadd.f32 0.5, %v4117_v53  ;;  %v7282_v53 = vld [vmem:[%s14372_s11 + $0x84] sm:$0xf0] }
 0x622   : > { %7787 = vtanh.f32 %v3998_v33  ;;  %v7786_v9 = vpop.eup %7785  ;;  %v4119_v7 = vmul.f32 0.5, %v7784_v10 }
 0x623   : > { %v3844_v51 = vpop.f32.mrf.mxu2  ;;  %7789 = vtanh.f32 %v3995_v38  ;;  %v3668_v45 = vpop.f32.mrf.mxu0  ;;  %v12178_v38 = vadd.f32 0.5, %v4120_v54  ;;  %v4359_v54 = vadd.f32 %v4358_v23, %v4321_v43  ;;  %v7035_v43 = vld [vmem:[%s14372_s11 + $0x80] sm:$0xf]  ;;  %v12206_v23 = vadd.f32 0.5, %v4124_v52 }
 0x624   : > { %v3933_v61 = vpop.f32.mrf.mxu3  ;;  %v3845_v18 = vadd.f32 %v3844_v51, %v11360_v36  ;;  %v3669_v42 = vadd.f32 %v3668_v45, %v11351_v46  ;;  %7791 = vtanh.f32 %v3997_v55  ;;  %v3757_v31 = vpop.f32.mrf.mxu1  ;;  %v4219_v46 = vadd.f32 %v4218_v2, %v12163_v56  ;;  %v6971_v2 = vld [vmem:[%s14372_s11] sm:$0xf]  ;;  %v7266_v45 = vld [vmem:[%s14372_s11 + $0x4] sm:$0xf0] }
 0x625   : > { %15094 = vst [vmem:[#allocation53_spill] sm:$0xff] %v12178_v38  ;;  %v4323_v55 = vmul.f32 %v12172_v25, %v12172_v25  ;;  %v4325_v39 = vmul.f32 %v12178_v38, %v12178_v38  ;;  %v12197_v10 = vor.u32 %v7266_v45, %v6971_v2  ;;  %v4395_v12 = vadd.f32 %v4394_v11, %v4320_v47 }
 0x626   : > { %v3934_v1 = vadd.f32 %v3933_v61, %v3845_v18  ;;  %v3758_v33 = vadd.f32 %v3757_v31, %v3669_v42  ;;  %v12185_v61 = vadd.f32 0.5, %v4122_v63  ;;  %v4121_v63 = vmul.f32 0.5, %v7786_v9  ;;  %15096 = vst [vmem:[#allocation21_spill] sm:$0xff] %v12206_v23 }
 0x627   : > { %v4220_v31 = vadd.f32 %v4219_v46, %v12172_v25  ;;  %v12209_v9 = vor.u32 %v7282_v53, %v7035_v43  ;;  %4665 = vmatpush.bf16.msrb.mxu0 %v12197_v10  ;;  %v4256_v11 = vadd.f32 %v4255_v15, %v12187_v30 }
 0x628   : > { %v3999_v21 = vmul.f32 0.5, %v3934_v1  ;;  %v7788_v51 = vpop.eup %7787  ;;  %15095 = vst [vmem:[#allocation54_spill] sm:$0xff] %v12185_v61  ;;  %v4000_v4 = vmul.f32 0.5, %v3758_v33 }
 0x629   : > { %v7790_v60 = vpop.eup %7789  ;;  %v4126_v18 = vmul.f32 0.5, %v7788_v51  ;;  %v12211_v51 = vadd.f32 0.5, %v4119_v7  ;;  %v4221_v56 = vadd.f32 %v4220_v31, %v12178_v38  ;;  %4678 = vmatpush.bf16.msrb.mxu1 %v12209_v9  ;;  %v12223_v7 = vadd.f32 0.5, %v4121_v63 }
 0x62a   : > { %7793 = vtanh.f32 %v3999_v21  ;;  %v7792_v1 = vpop.eup %7791  ;;  %v4360_v21 = vadd.f32 %v4359_v54, %v4323_v55  ;;  %v4123_v2 = vmul.f32 0.5, %v7790_v60  ;;  %v15100_v54 = vld [vmem:[#allocation26_spill] sm:$0xff] }
 0x62b   : > { %7795 = vtanh.f32 %v4000_v4  ;;  %v3846_v42 = vpop.f32.mrf.mxu2  ;;  %15097 = vst [vmem:[#allocation23_spill] sm:$0xff] %v12211_v51  ;;  %v4327_v4 = vmul.f32 %v12185_v61, %v12185_v61  ;;  %v12217_v46 = vadd.f32 0.5, %v4126_v18  ;;  %4684 = vmatpush.bf16.msra.mxu0 %v11440_v3  ;;  %v4125_v60 = vmul.f32 0.5, %v7792_v1 }
 0x62c   : > { %v3847_v33 = vadd.f32 %v3846_v42, %v11360_v36  ;;  %v3935_v45 = vpop.f32.mrf.mxu3  ;;  %v4322_v36 = vmul.f32 %v12187_v30, %v12187_v30  ;;  %v4361_v55 = vadd.f32 %v4360_v21, %v4325_v39  ;;  %15099 = vst [vmem:[#allocation56_spill] sm:$0xff] %v12223_v7  ;;  %v4222_v47 = vadd.f32 %v4221_v56, %v12185_v61  ;;  %v15102_v56 = vld [vmem:[#allocation6_spill] sm:$0xff] }
 0x62d   : > { %15098 = vst [vmem:[#allocation55_spill] sm:$0xff] %v12217_v46  ;;  %4697 = vmatpush.bf16.msra.mxu1 %v15100_v54  ;;  %v4329_v18 = vmul.f32 %v12206_v23, %v12206_v23  ;;  %v4324_v3 = vmul.f32 %v12211_v51, %v12211_v51  ;;  %v12232_v39 = vadd.f32 0.5, %v4123_v2  ;;  %v12241_v54 = vadd.f32 0.5, %v4125_v60 }
 0x62e   : > { %v3936_v52 = vadd.f32 %v3935_v45, %v3847_v33  ;;  %v4362_v31 = vadd.f32 %v4361_v55, %v4327_v4  ;;  %v4223_v1 = vadd.f32 %v4222_v47, %v12206_v23  ;;  %v4331_v33 = vmul.f32 %v12217_v46, %v12217_v46  ;;  %v15104_v4 = vld [vmem:[#allocation5_spill] sm:$0xff]  ;;  %v15144_v23 = vld [vmem:[#allocation51_spill] sm:$0xff] }
 0x62f   : > { %15101 = vst [vmem:[#allocation26_spill] sm:$0xff] %v12232_v39  ;;  %4685 = vmatpush.bf16.msra.mxu0 %v15102_v56  ;;  %v4396_v21 = vadd.f32 %v4395_v12, %v4322_v36  ;;  %v4257_v45 = vadd.f32 %v4256_v11, %v12211_v51  ;;  %v4328_v12 = vmul.f32 %v12232_v39, %v12232_v39  ;;  %v15107_v56 = vld [vmem:[#allocation8_spill] sm:$0xff] }
 0x630   : > { %v7794_v42 = vpop.eup %7793  ;;  %v4001_v43 = vmul.f32 0.5, %v3936_v52  ;;  %v4326_v52 = vmul.f32 %v12223_v7, %v12223_v7  ;;  %15103 = vst [vmem:[#allocation6_spill] sm:$0xff] %v12241_v54  ;;  %v4363_v2 = vadd.f32 %v4362_v31, %v4329_v18  ;;  %v4224_v55 = vadd.f32 %v4223_v1, %v12217_v46  ;;  %v15108_v1 = vld [vmem:[#allocation10_spill] sm:$0xff]  ;;  %v15137_v46 = vld [vmem:[#allocation24_spill] sm:$0xff] }
 0x631   : > { %v7796_v53 = vpop.eup %7795  ;;  %v4127_v63 = vmul.f32 0.5, %v7794_v42  ;;  %4698 = vmatpush.bf16.msra.mxu1 %v15104_v4  ;;  %v4397_v47 = vadd.f32 %v4396_v21, %v4324_v3  ;;  %v4330_v3 = vmul.f32 %v12241_v54, %v12241_v54 }
 0x632   : > { %v4128_v15 = vmul.f32 0.5, %v7796_v53  ;;  %7797 = vtanh.f32 %v4001_v43  ;;  %v4258_v43 = vadd.f32 %v4257_v45, %v12223_v7  ;;  %v4364_v11 = vadd.f32 %v4363_v2, %v4331_v33 }
 0x633   : > { %v12250_v36 = vadd.f32 0.5, %v4127_v63  ;;  %4686 = vmatpush.bf16.msra.mxu0 %v15107_v56  ;;  %v4398_v18 = vadd.f32 %v4397_v47, %v4326_v52 }
 0x634   : > { %v12245_v42 = vadd.f32 0.5, %v4128_v15  ;;  %v4259_v31 = vadd.f32 %v4258_v43, %v12232_v39 }
 0x635   : > { %15106 = vst [vmem:[#allocation57_spill] sm:$0xff] %v12250_v36  ;;  %4699 = vmatpush.bf16.msra.mxu1 %v15108_v1  ;;  %v4399_v45 = vadd.f32 %v4398_v18, %v4328_v12  ;;  %v4332_v4 = vmul.f32 %v12250_v36, %v12250_v36 }
 0x636   : > { %15105 = vst [vmem:[#allocation5_spill] sm:$0xff] %v12245_v42  ;;  %v4225_v53 = vadd.f32 %v4224_v55, %v12245_v42  ;;  %v4333_v60 = vmul.f32 %v12245_v42, %v12245_v42  ;;  %v4260_v33 = vadd.f32 %v4259_v31, %v12241_v54  ;;  %v15134_v42 = vld [vmem:[#allocation43_spill] sm:$0xff]  ;;  %v15148_v54 = vld [vmem:[#allocation42_spill] sm:$0xff] }
 0x637   : > { %4687 = vmatpush.bf16.msra.mxu0 %v11715_v59  ;;  %v4400_v52 = vadd.f32 %v4399_v45, %v4330_v3 }
 0x638   : > { %v7798_v15 = vpop.eup %7797  ;;  %v4226_v21 = vrot.slane %v4225_v53, 4  ;;  %v4365_v63 = vadd.f32 %v4364_v11, %v4333_v60  ;;  %v4261_v47 = vadd.f32 %v4260_v33, %v12250_v36  ;;  %v15133_v36 = vld [vmem:[#allocation30_spill] sm:$0xff] }
 0x639   : > { %v4129_v2 = vmul.f32 0.5, %v7798_v15  ;;  %4700 = vmatpush.bf16.msra.mxu1 %v11724_v62  ;;  %v4401_v60 = vadd.f32 %v4400_v52, %v4332_v4  ;;  %v7045_v4 = vld [vmem:[%s14372_s11 + $0x98] sm:$0xf0]  ;;  %v12290_v52 = vld [vmem:[%s608_s19] sm:$0xf] }
 0x63a   : > { %v4227_v55 = vadd.f32 %v4226_v21, %v4225_v53  ;;  %v4366_v56 = vrot.slane %v4365_v63, 4  ;;  %v7267_v21 = vld [vmem:[%s14372_s11 + $0x14] sm:$0xf] }
 0x63b   : > { %v12265_v43 = vadd.f32 0.5, %v4129_v2  ;;  %4688 = vmatpush.bf16.msra.mxu0 %v11882_v27 }
 0x63c   : > { %v4228_v11 = vrot.slane %v4227_v55, 2  ;;  %v4367_v12 = vadd.f32 %v4366_v56, %v4365_v63  ;;  %v6981_v63 = vld [vmem:[%s14372_s11 + $0x18] sm:$0xf0] }
 0x63d   : > { %15109 = vst [vmem:[#allocation8_spill] sm:$0xff] %v12265_v43  ;;  %v4262_v18 = vadd.f32 %v4261_v47, %v12265_v43  ;;  %v4334_v31 = vmul.f32 %v12265_v43, %v12265_v43  ;;  %4701 = vmatpush.bf16.msra.mxu1 %v11895_v8  ;;  %v6984_v33 = vor.u32 %v7267_v21, %v6981_v63  ;;  %v7283_v8 = vld [vmem:[%s14372_s11 + $0x94] sm:$0xf]  ;;  %v15136_v43 = vld [vmem:[#allocation45_spill] sm:$0xff] }
 0x63e   : > { %v4229_v53 = vadd.f32 %v4228_v11, %v4227_v55  ;;  %v4368_v1 = vrot.slane %v4367_v12, 2  ;;  %v7048_v56 = vor.u32 %v7283_v8, %v7045_v4  ;;  %v7281_v4 = vld [vmem:[%s14372_s11 + $0x84] sm:$0xf] }
 0x63f   : > { %v4263_v59 = vrot.slane %v4262_v18, 4  ;;  %v4402_v3 = vadd.f32 %v4401_v60, %v4334_v31  ;;  %4689 = vmatpush.bf16.msra.mxu0 %v12061_v41  ;;  %5063 = vmatpush.bf16.msra.mxu2 %v6984_v33  ;;  %v4478_v31 = vperm.slane %v12290_v52, 1 }
 0x640   : > { %v4230_v62 = vrot.slane %v4229_v53, 1  ;;  %v4369_v15 = vadd.f32 %v4368_v1, %v4367_v12  ;;  %v15110_v12 = vld [vmem:[#allocation2_spill] sm:$0xff]  ;;  %5152 = vmatpush.bf16.msra.mxu3 %v7048_v56 }
 0x641   : > { %v4264_v45 = vadd.f32 %v4263_v59, %v4262_v18  ;;  %v4403_v27 = vrot.slane %v4402_v3, 4  ;;  %4702 = vmatpush.bf16.msra.mxu1 %v12073_v57  ;;  %v4482_v57 = vpack.c.bf16 %v4478_v31, %v4478_v31 }
 0x642   : > { %v4231_v2 = vadd.f32 %v4230_v62, %v4229_v53  ;;  %v4370_v55 = vrot.slane %v4369_v15, 1  ;;  %v4479_v53 = vperm.slane %v12290_v52, 3 }
 0x643   : > { %v4265_v47 = vrot.slane %v4264_v45, 2  ;;  %v4404_v11 = vadd.f32 %v4403_v27, %v4402_v3  ;;  %4690 = vmatpush.bf16.msra.mxu0 %v6984_v33  ;;  %v7037_v33 = vld [vmem:[%s14372_s11 + $0x88] sm:$0xf0] }
 0x644   : > { %v12294_v60 = vmul.f32 %v4231_v2, %v15110_v12  ;;  %v4371_v18 = vadd.f32 %v4370_v55, %v4369_v15  ;;  %v4483_v63 = vpack.c.bf16 %v4479_v53, %v4479_v53  ;;  %v7265_v15 = vld [vmem:[%s14372_s11 + $0x4] sm:$0xf] }
 0x645   : > { %v4266_v1 = vadd.f32 %v4265_v47, %v4264_v45  ;;  %v4405_v59 = vrot.slane %v4404_v11, 2  ;;  %4703 = vmatpush.bf16.msra.mxu1 %v7048_v56  ;;  %v6973_v45 = vld [vmem:[%s14372_s11 + $0x8] sm:$0xf0]  ;;  %v4486_v56 = vshrl.u32 %v4482_v57, 16 }
 0x646   : > { %v4409_v41 = vmul.f32 %v4371_v18, %v15110_v12  ;;  %v4411_v62 = vmul.f32 %v12294_v60, %v12294_v60  ;;  %v6976_v8 = vor.u32 %v7265_v15, %v6973_v45  ;;  %v4489_v47 = vshrl.u32 %v4483_v63, 16  ;;  %v15113_v63 = vld [vmem:[#allocation4_spill] sm:$0xff]  ;;  %v15114_v15 = vld [vmem:[#allocation3_spill] sm:$0xff] }
 0x647   : > { %v4267_v3 = vrot.slane %v4266_v1, 1  ;;  %v4406_v21 = vadd.f32 %v4405_v59, %v4404_v11  ;;  %v7040_v18 = vor.u32 %v7281_v4, %v7037_v33  ;;  %4666 = vmatmul.bf16.vlgmr.msrb.gmra.mxu0 %v4486_v56  ;;  %v15116_v33 = vld [vmem:[#allocation32_spill] sm:$0xff] }
 0x648   : > { %v4413_v27 = vsub.f32 %v4409_v41, %v4411_v62  ;;  %4691 = vmatpush.bf16.msra.mxu0 %v6976_v8  ;;  %5064 = vmatpush.bf16.msra.mxu2 %v6976_v8  ;;  %v15111_v41 = vld [vmem:[#allocation25_spill] sm:$0xff]  ;;  %v15115_v8 = vld [vmem:[#allocation7_spill] sm:$0xff] }
 0x649   : > { %v4268_v2 = vadd.f32 %v4267_v3, %v4266_v1  ;;  %v4407_v55 = vrot.slane %v4406_v21, 1  ;;  %4679 = vmatmul.bf16.vlgmr.msrb.gmra.mxu1 %v4489_v47  ;;  %v15112_v3 = vld [vmem:[#allocation28_spill] sm:$0xff]  ;;  %5153 = vmatpush.bf16.msra.mxu3 %v7040_v18 }
 0x64a   : > { %v4415_v11 = vmax.f32 %v4413_v27, 0.0  ;;  %4704 = vmatpush.bf16.msra.mxu1 %v7040_v18  ;;  %v15119_v18 = vld [vmem:[#allocation9_spill] sm:$0xff] }
 0x64b   : > { %v12314_v31 = vmul.f32 %v4268_v2, %v15110_v12  ;;  %v4408_v53 = vadd.f32 %v4407_v55, %v4406_v21  ;;  %v15117_v55 = vld [vmem:[#allocation33_spill] sm:$0xff] }
 0x64c   : > { %v12316_v59 = vadd.f32 1e-05, %v4415_v11  ;;  %4879 = vmatpush.bf16.msrb.mxu0 %v15111_v41  ;;  %v15118_v11 = vld [vmem:[#allocation35_spill] sm:$0xff] }
 0x64d   : > { %v4410_v1 = vmul.f32 %v4408_v53, %v15110_v12  ;;  %v4412_v62 = vmul.f32 %v12314_v31, %v12314_v31  ;;  %v15120_v41 = vld [vmem:[#allocation11_spill] sm:$0xff]  ;;  %v15135_v12 = vld [vmem:[#allocation44_spill] sm:$0xff] }
 0x64e   : > { %4968 = vmatpush.bf16.msrb.mxu1 %v15112_v3  ;;  %7799 = vrsqrt.f32 %v12316_v59  ;;  %v15121_v3 = vld [vmem:[#allocation14_spill] sm:$0xff]  ;;  %vm4425_vm5 = vweird.f32 %v12316_v59 }
 0x64f   : > { %v4414_v57 = vsub.f32 %v4410_v1, %v4412_v62 }
 0x650   : > { %4880 = vmatpush.bf16.msrb.mxu0 %v15113_v63  ;;  %v15126_v63 = vld [vmem:[#allocation18_spill] sm:$0xff] }
 0x651   : > { %v4416_v21 = vmax.f32 %v4414_v57, 0.0  ;;  %v15128_v57 = vld [vmem:[#allocation36_spill] sm:$0xff] }
 0x652   : > { %4969 = vmatpush.bf16.msrb.mxu1 %v15114_v15 }
 0x653   : > { %v4418_v45 = vadd.f32 1e-05, %v4416_v21  ;;  %v15129_v21 = vld [vmem:[#allocation37_spill] sm:$0xff] }
 0x654   : > { %v12326_v27 = vpop.eup %7799  ;;  %4881 = vmatpush.bf16.msrb.mxu0 %v15115_v8 }
 0x655   : > { %v4420_v4 = vmul.f32 %v12326_v27, %v12316_v59  ;;  %7801 = vrsqrt.f32 %v4418_v45  ;;  %vm4426_vm7 = vweird.f32 %v12326_v27  ;;  %vm4435_vm8 = vweird.f32 %v4418_v45 }
 0x656   : > { %4970 = vmatpush.bf16.msrb.mxu1 %v15116_v33  ;;  %v15127_v33 = vld [vmem:[#allocation34_spill] sm:$0xff]  ;;  %vm4427_vm10 = vmor %vm4425_vm5, %vm4426_vm7 }
 0x657   : > { %v4421_v2 = vmul.f32 %v12326_v27, %v4420_v4  ;;  %4692 = vmatmul.bf16.vlgmr.msra.gmra.mxu0 %v4486_v56  ;;  %v15122_v4 = vld [vmem:[#allocation41_spill] sm:$0xff]  ;;  %v15153_v48 = vsub.f32 %v15127_v33, %v12314_v31  ;;  %v15157_v33 = vsub.f32 %v11664_v26, %v12294_v60 }
 0x658   : > { %4882 = vmatpush.bf16.msrb.mxu0 %v15117_v55  ;;  %v15124_v55 = vld [vmem:[#allocation15_spill] sm:$0xff] }
 0x659   : > { %4705 = vmatmul.bf16.vlgmr.msra.gmra.mxu1 %v4489_v47  ;;  %v4422_v8 = vmul.f32 0.5, %v4421_v2  ;;  %v15123_v47 = vld [vmem:[#allocation17_spill] sm:$0xff] }
 0x65a   : > { %4971 = vmatpush.bf16.msrb.mxu1 %v15118_v11  ;;  %v15125_v11 = vld [vmem:[#allocation40_spill] sm:$0xff] }
 0x65b   : > { %v7802_v62 = vpop.eup %7801  ;;  %v4423_v56 = vsub.f32 1.5, %v4422_v8  ;;  %v15161_v26 = vsub.f32 %v15125_v11, %v12294_v60  ;;  %v15164_v11 = vsub.f32 %v15126_v63, %v12294_v60 }
 0x65c   : > { %v4430_v15 = vmul.f32 %v7802_v62, %v4418_v45  ;;  %4883 = vmatpush.bf16.msrb.mxu0 %v15122_v4  ;;  %vm4436_vm6 = vweird.f32 %v7802_v62  ;;  %v15139_v45 = vld [vmem:[#allocation27_spill] sm:$0xff] }
 0x65d   : > { %vm4437_vm9 = vmor %vm4435_vm8, %vm4436_vm6 }
 0x65e   : > { %4972 = vmatpush.bf16.msrb.mxu1 %v15123_v47  ;;  %v4431_v4 = vmul.f32 %v7802_v62, %v4430_v15  ;;  %v15132_v47 = vld [vmem:[#allocation16_spill] sm:$0xff] }
 0x660   : > { %v4432_v2 = vmul.f32 0.5, %v4431_v4  ;;  %4884 = vmatpush.bf16.msrb.mxu0 %v11938_v50  ;;  %v15130_v4 = vld [vmem:[#allocation13_spill] sm:$0xff]  ;;  %v15131_v50 = vld [vmem:[#allocation38_spill] sm:$0xff] }
 0x662   : > { %4973 = vmatpush.bf16.msrb.mxu1 %v11947_v28  ;;  %v4433_v53 = vsub.f32 1.5, %v4432_v2  ;;  %v4424_v2 = vmul.f32 %v12326_v27, %v4423_v56  ;;  %v15138_v56 = vld [vmem:[#allocation47_spill] sm:$0xff]  ;;  %v15142_v28 = vld [vmem:[#allocation49_spill] sm:$0xff] }
 0x664   : > { %v4434_v8 = vmul.f32 %v7802_v62, %v4433_v53  ;;  %4885 = vmatpush.bf16.msrb.mxu0 %v12108_v58  ;;  %v15140_v58 = vld [vmem:[#allocation48_spill] sm:$0xff]  ;;  %v4428_v53 = vsel %vm4427_vm10, %v12326_v27, %v4424_v2 }
 0x665   : > { %v15145_v27 = vld [vmem:[#allocation12_spill] sm:$0xff] }
 0x666   : > { %4974 = vmatpush.bf16.msrb.mxu1 %v12118_v20  ;;  %v4438_v39 = vsel %vm4437_vm9, %v7802_v62, %v4434_v8  ;;  %v15141_v20 = vld [vmem:[#allocation46_spill] sm:$0xff]  ;;  %v15143_v62 = vld [vmem:[#allocation29_spill] sm:$0xff]  ;;  %v15154_v8 = vsub.f32 %v15120_v41, %v12294_v60  ;;  %v15158_v41 = vsub.f32 %v15129_v21, %v12314_v31 }
 0x667   : > { %v4441_v15 = vrot.slane %v4438_v39, 6  ;;  %v15150_v39 = vld [vmem:[#allocation20_spill] sm:$0xff] }
 0x668   : > { %4886 = vmatpush.bf16.msrb.mxu0 %v12197_v10  ;;  %v15155_v10 = vsub.f32 %v15128_v57, %v12314_v31  ;;  %v15159_v57 = vsub.f32 %v15130_v4, %v12314_v31  ;;  %v15162_v4 = vsub.f32 %v15131_v50, %v12314_v31 }
 0x669   : > { %v4442_v1 = vsel %vm995_vm1, %v4428_v53, %v4441_v15  ;;  %v15146_v15 = vld [vmem:[#allocation39_spill] sm:$0xff] }
 0x66a   : > { %4975 = vmatpush.bf16.msrb.mxu1 %v12209_v9  ;;  %v4444_v61 = vmul.f32 %v4442_v1, %v12290_v52  ;;  %v15147_v53 = vld [vmem:[#allocation31_spill] sm:$0xff]  ;;  %v15151_v9 = vld [vmem:[#allocation22_spill] sm:$0xff] }
 0x66c   : > { %v4775_v7 = vperm.slane %v4444_v61, 0  ;;  %v4776_v59 = vperm.slane %v4444_v61, 2 }
 0x66e   : > { %v12467_v52 = vperm.slane %v4775_v7, 0  ;;  %v12469_v61 = vperm.slane %v4776_v59, 0  ;;  %v15152_v59 = vsub.f32 %v15119_v18, %v12294_v60  ;;  %v15156_v18 = vsub.f32 %v15121_v3, %v12294_v60 }
 0x66f   : > { %v15160_v3 = vsub.f32 %v15124_v55, %v12294_v60 }
 0x670   : > { %v4781_v40 = vmul.f32 %v12467_v52, %v15152_v59  ;;  %v4782_v1 = vmul.f32 %v12469_v61, %v15153_v48  ;;  %v4783_v2 = vmul.f32 %v12467_v52, %v15154_v8  ;;  %v4784_v7 = vmul.f32 %v12469_v61, %v15155_v10 }
 0x671   : > { %v4785_v59 = vmul.f32 %v12467_v52, %v15156_v18  ;;  %v4787_v48 = vmul.f32 %v12467_v52, %v15157_v33  ;;  %v4786_v8 = vmul.f32 %v12469_v61, %v15158_v41  ;;  %v4788_v10 = vmul.f32 %v12469_v61, %v15159_v57 }
 0x672   : > { %v4845_v51 = vpack.c.bf16 %v4783_v2, %v4781_v40  ;;  %v4846_v38 = vpack.c.bf16 %v4784_v7, %v4782_v1  ;;  %v4789_v18 = vmul.f32 %v12467_v52, %v15160_v3  ;;  %v4791_v33 = vmul.f32 %v12467_v52, %v15161_v26 }
 0x673   : > { %v12523_v21 = vpack.c.bf16 %v4787_v48, %v4785_v59  ;;  %v12525_v41 = vpack.c.bf16 %v4788_v10, %v4786_v8  ;;  %v4790_v40 = vmul.f32 %v12469_v61, %v15162_v4  ;;  %v15163_v2 = vsub.f32 %v15132_v47, %v12314_v31 }
 0x674   : > { %4887 = vmatmul.bf16.vlgmr.msrb.gmra.mxu0 %v4845_v51  ;;  %4976 = vmatmul.bf16.vlgmr.msrb.gmra.mxu1 %v4846_v38  ;;  %v12535_v1 = vpack.c.bf16 %v4791_v33, %v4789_v18  ;;  %v4793_v7 = vmul.f32 %v12467_v52, %v15164_v11  ;;  %v15165_v59 = vsub.f32 %v11776_v22, %v12294_v60 }
 0x675   : > { %v4792_v55 = vmul.f32 %v12469_v61, %v15163_v2  ;;  %5065 = vmatmul.bf16.vlgmr.msra.gmra.mxu2 %v4845_v51  ;;  %5154 = vmatmul.bf16.vlgmr.msra.gmra.mxu3 %v4846_v38  ;;  %v15166_v47 = vsub.f32 %v11771_v24, %v12314_v31  ;;  %v15167_v57 = vsub.f32 %v11798_v14, %v12314_v31 }
 0x676   : > { %v4795_v50 = vmul.f32 %v12467_v52, %v15165_v59  ;;  %v15168_v22 = vsub.f32 %v11804_v32, %v12294_v60  ;;  %v15169_v38 = vsub.f32 %v11813_v5, %v12294_v60  ;;  %v15170_v24 = vsub.f32 %v15133_v36, %v12314_v31 }
 0x677   : > { %v12545_v48 = vpack.c.bf16 %v4792_v55, %v4790_v40  ;;  %v4794_v8 = vmul.f32 %v12469_v61, %v15166_v47  ;;  %v4796_v63 = vmul.f32 %v12469_v61, %v15167_v57  ;;  %v15171_v26 = vsub.f32 %v15134_v42, %v12314_v31 }
 0x678   : > { %v12555_v10 = vpack.c.bf16 %v4795_v50, %v4793_v7  ;;  %v4797_v51 = vmul.f32 %v12467_v52, %v15168_v22  ;;  %v4799_v3 = vmul.f32 %v12467_v52, %v15169_v38  ;;  %v4798_v18 = vmul.f32 %v12469_v61, %v15170_v24 }
 0x679   : > { %v12569_v14 = vpack.c.bf16 %v4796_v63, %v4794_v8  ;;  %v4800_v33 = vmul.f32 %v12469_v61, %v15171_v26  ;;  %v15172_v32 = vsub.f32 %v15135_v12, %v12294_v60  ;;  %v15173_v5 = vsub.f32 %v15136_v43, %v12294_v60 }
 0x67a   : > { %v12583_v36 = vpack.c.bf16 %v4799_v3, %v4797_v51  ;;  %v15174_v2 = vsub.f32 %v15137_v46, %v12314_v31  ;;  %v15175_v42 = vsub.f32 %v15138_v56, %v12314_v31  ;;  %v15176_v12 = vsub.f32 %v15139_v45, %v12294_v60 }
 0x67b   : > { %v4801_v4 = vmul.f32 %v12467_v52, %v15172_v32  ;;  %v4803_v40 = vmul.f32 %v12467_v52, %v15173_v5  ;;  %v12597_v43 = vpack.c.bf16 %v4800_v33, %v4798_v18  ;;  %v15177_v50 = vsub.f32 %v15140_v58, %v12294_v60 }
 0x67c   : > { %v4802_v55 = vmul.f32 %v12469_v61, %v15174_v2  ;;  %v4804_v11 = vmul.f32 %v12469_v61, %v15175_v42  ;;  %v4805_v7 = vmul.f32 %v12467_v52, %v15176_v12  ;;  %v15178_v47 = vsub.f32 %v15141_v20, %v12314_v31 }
 0x67d   : > { %v12599_v59 = vpack.c.bf16 %v4803_v40, %v4801_v4  ;;  %v4807_v46 = vmul.f32 %v12467_v52, %v15177_v50  ;;  %v15179_v45 = vsub.f32 %v11920_v35, %v12314_v31  ;;  %v15180_v63 = vsub.f32 %v15142_v28, %v12294_v60 }
 0x67e   : > { %v4806_v56 = vmul.f32 %v12469_v61, %v15178_v47  ;;  %v12609_v8 = vpack.c.bf16 %v4804_v11, %v4802_v55  ;;  %v15181_v58 = vsub.f32 %v15143_v62, %v12294_v60  ;;  %v15182_v38 = vsub.f32 %v15144_v23, %v12314_v31  ;;  %v15194_v47 = vld [vmem:[#allocation19_spill] sm:$0xff] }
 0x67f   : > { %v4808_v57 = vmul.f32 %v12469_v61, %v15179_v45  ;;  %v4809_v22 = vmul.f32 %v12467_v52, %v15180_v63  ;;  %v12623_v20 = vpack.c.bf16 %v4807_v46, %v4805_v7  ;;  %v15183_v35 = vsub.f32 %v11976_v0, %v12314_v31 }
 0x680   : > { %v4811_v51 = vmul.f32 %v12467_v52, %v15181_v58  ;;  %v4810_v3 = vmul.f32 %v12469_v61, %v15182_v38  ;;  %v15184_v28 = vsub.f32 %v11978_v44, %v12294_v60  ;;  %v15185_v33 = vsub.f32 %v12001_v37, %v12294_v60 }
 0x681   : > { %v4812_v24 = vmul.f32 %v12469_v61, %v15183_v35  ;;  %v12637_v62 = vpack.c.bf16 %v4808_v57, %v4806_v56  ;;  %v15186_v32 = vsub.f32 %v15145_v27, %v12314_v31  ;;  %v15187_v44 = vsub.f32 %v12009_v34, %v12314_v31  ;;  %v15196_v57 = vld [vmem:[#allocation50_spill] sm:$0xff] }
 0x682   : > { %v4813_v18 = vmul.f32 %v12467_v52, %v15184_v28  ;;  %v12639_v26 = vpack.c.bf16 %v4811_v51, %v4809_v22  ;;  %v4815_v23 = vmul.f32 %v12467_v52, %v15185_v33  ;;  %v15188_v40 = vsub.f32 %v12011_v29, %v12294_v60  ;;  %v15198_v22 = vld [vmem:[#allocation52_spill] sm:$0xff] }
 0x683   : > { %v4814_v0 = vmul.f32 %v12469_v61, %v15186_v32  ;;  %v12649_v4 = vpack.c.bf16 %v4812_v24, %v4810_v3  ;;  %v4816_v5 = vmul.f32 %v12469_v61, %v15187_v44  ;;  %v15189_v37 = vsub.f32 %v12031_v13, %v12294_v60 }
 0x684   : > { %v4817_v2 = vmul.f32 %v12467_v52, %v15188_v40  ;;  %v12663_v27 = vpack.c.bf16 %v4815_v23, %v4813_v18  ;;  %v15190_v42 = vsub.f32 %v15146_v15, %v12314_v31  ;;  %v15191_v34 = vsub.f32 %v15147_v53, %v12314_v31  ;;  %4892 = vmatmul.bf16.gmra.mxu0 %v12523_v21 }
 0x685   : > { %v4819_v55 = vmul.f32 %v12467_v52, %v15189_v37  ;;  %v15192_v29 = vsub.f32 %v12069_v6, %v12294_v60  ;;  %v12677_v13 = vpack.c.bf16 %v4816_v5, %v4814_v0  ;;  %v15193_v46 = vsub.f32 %v15148_v54, %v12294_v60  ;;  %4981 = vmatmul.bf16.gmra.mxu1 %v12525_v41 }
 0x686   : > { %v4818_v11 = vmul.f32 %v12469_v61, %v15190_v42  ;;  %v4820_v12 = vmul.f32 %v12469_v61, %v15191_v34  ;;  %v15195_v56 = vsub.f32 %v15194_v47, %v12314_v31  ;;  %v15197_v6 = vsub.f32 %v15196_v57, %v12314_v31  ;;  %5070 = vmatmul.bf16.gmra.mxu2 %v12523_v21  ;;  %v15216_v57 = vld [vmem:[#allocation21_spill] sm:$0xff] }
 0x687   : > { %v4821_v7 = vmul.f32 %v12467_v52, %v15192_v29  ;;  %v12679_v50 = vpack.c.bf16 %v4819_v55, %v4817_v2  ;;  %v4823_v15 = vmul.f32 %v12467_v52, %v15193_v46  ;;  %v15199_v58 = vsub.f32 %v15198_v22, %v12294_v60  ;;  %5159 = vmatmul.bf16.gmra.mxu3 %v12525_v41  ;;  %v15218_v22 = vld [vmem:[#allocation26_spill] sm:$0xff] }
 0x688   : > { %v4822_v53 = vmul.f32 %v12469_v61, %v15195_v56  ;;  %v12689_v45 = vpack.c.bf16 %v4820_v12, %v4818_v11  ;;  %v4824_v63 = vmul.f32 %v12469_v61, %v15197_v6  ;;  %v15200_v54 = vsub.f32 %v12146_v17, %v12294_v60  ;;  %v15210_v11 = vld [vmem:[#allocation23_spill] sm:$0xff]  ;;  %v15212_v12 = vld [vmem:[#allocation56_spill] sm:$0xff] }
 0x689   : > { %v4825_v51 = vmul.f32 %v12467_v52, %v15199_v58  ;;  %v12703_v3 = vpack.c.bf16 %v4823_v15, %v4821_v7  ;;  %v15201_v35 = vsub.f32 %v12143_v49, %v12314_v31  ;;  %v15202_v28 = vsub.f32 %v12152_v16, %v12314_v31  ;;  %v15214_v15 = vld [vmem:[#allocation54_spill] sm:$0xff] }
 0x68a   : > { %v4827_v38 = vmul.f32 %v12467_v52, %v15200_v54  ;;  %v15203_v33 = vsub.f32 %v12157_v19, %v12294_v60  ;;  %v12717_v17 = vpack.c.bf16 %v4824_v63, %v4822_v53  ;;  %v15204_v0 = vsub.f32 %v15150_v39, %v12294_v60  ;;  %v15208_v39 = vld [vmem:[#allocation53_spill] sm:$0xff]  ;;  %v15220_v58 = vld [vmem:[#allocation6_spill] sm:$0xff] }
 0x68b   : > { %v4826_v24 = vmul.f32 %v12469_v61, %v15201_v35  ;;  %v4828_v18 = vmul.f32 %v12469_v61, %v15202_v28  ;;  %v15205_v44 = vsub.f32 %v15151_v9, %v12314_v31  ;;  %v15206_v19 = vsub.f32 %v12187_v30, %v12314_v31  ;;  %v15224_v28 = vld [vmem:[#allocation5_spill] sm:$0xff] }
 0x68c   : > { %v4829_v23 = vmul.f32 %v12467_v52, %v15203_v33  ;;  %v12719_v32 = vpack.c.bf16 %v4827_v38, %v4825_v51  ;;  %v4831_v49 = vmul.f32 %v12467_v52, %v15204_v0  ;;  %v15207_v2 = vsub.f32 %v12172_v25, %v12294_v60  ;;  %v15222_v38 = vld [vmem:[#allocation55_spill] sm:$0xff] }
 0x68d   : > { %v4830_v16 = vmul.f32 %v12469_v61, %v15205_v44  ;;  %v12729_v5 = vpack.c.bf16 %v4828_v18, %v4826_v24  ;;  %v4832_v40 = vmul.f32 %v12469_v61, %v15206_v19  ;;  %v15209_v55 = vsub.f32 %v15208_v39, %v12294_v60  ;;  %v15228_v44 = vld [vmem:[#allocation8_spill] sm:$0xff] }
 0x68e   : > { %v4833_v37 = vmul.f32 %v12467_v52, %v15207_v2  ;;  %v12745_v9 = vpack.c.bf16 %v4831_v49, %v4829_v23  ;;  %v15211_v30 = vsub.f32 %v15210_v11, %v12314_v31  ;;  %v15213_v25 = vsub.f32 %v15212_v12, %v12314_v31  ;;  %v15226_v23 = vld [vmem:[#allocation57_spill] sm:$0xff] }
 0x68f   : > { %v4835_v42 = vmul.f32 %v12467_v52, %v15209_v55  ;;  %v12757_v7 = vpack.c.bf16 %v4832_v40, %v4830_v16  ;;  %v15215_v47 = vsub.f32 %v15214_v15, %v12294_v60  ;;  %v15217_v6 = vsub.f32 %v15216_v57, %v12294_v60 }
 0x690   : > { %v4834_v34 = vmul.f32 %v12469_v61, %v15211_v30  ;;  %v4836_v29 = vmul.f32 %v12469_v61, %v15213_v25  ;;  %v15219_v21 = vsub.f32 %v15218_v22, %v12314_v31  ;;  %v15221_v51 = vsub.f32 %v15220_v58, %v12314_v31 }
 0x691   : > { %v12759_v46 = vpack.c.bf16 %v4835_v42, %v4833_v37  ;;  %v4837_v56 = vmul.f32 %v12467_v52, %v15215_v47  ;;  %v4839_v63 = vmul.f32 %v12467_v52, %v15217_v6  ;;  %v15223_v35 = vsub.f32 %v15222_v38, %v12294_v60 }
 0x692   : > { %v12765_v53 = vpack.c.bf16 %v4836_v29, %v4834_v34  ;;  %v4838_v41 = vmul.f32 %v12469_v61, %v15219_v21  ;;  %v4840_v54 = vmul.f32 %v12469_v61, %v15221_v51  ;;  %v15225_v18 = vsub.f32 %v15224_v28, %v12294_v60  ;;  %v4484_v60 = vld [vmem:[%s14373_s12] sm:$0x3] }
 0x693   : > { %v4841_v24 = vmul.f32 %v12467_v52, %v15223_v35  ;;  %v15227_v0 = vsub.f32 %v15226_v23, %v12314_v31  ;;  %v15229_v16 = vsub.f32 %v15228_v44, %v12314_v31  ;;  %v12795_v40 = vpack.c.bf16 %v4839_v63, %v4837_v56 }
 0x694   : > { %v4843_v33 = vmul.f32 %v12467_v52, %v15225_v18  ;;  %v12797_v2 = vpack.c.bf16 %v4840_v54, %v4838_v41  ;;  %4897 = vmatmul.bf16.gmra.mxu0 %v12535_v1  ;;  %v4654_v31 = vperm.slane %v4484_v60, 0 }
 0x695   : > { %v4842_v49 = vmul.f32 %v12469_v61, %v15227_v0  ;;  %v4844_v19 = vmul.f32 %v12469_v61, %v15229_v16  ;;  %4986 = vmatmul.bf16.gmra.mxu1 %v12545_v48 }
 0x696   : > { %v12799_v37 = vpack.c.bf16 %v4843_v33, %v4841_v24  ;;  %5075 = vmatmul.bf16.gmra.mxu2 %v12535_v1 }
 0x697   : > { %v12801_v39 = vpack.c.bf16 %v4844_v19, %v4842_v49  ;;  %5164 = vmatmul.bf16.gmra.mxu3 %v12545_v48 }
 0x6a4   : > { %4902 = vmatmul.bf16.gmra.mxu0 %v12555_v10 }
 0x6a5   : > { %4991 = vmatmul.bf16.gmra.mxu1 %v12569_v14 }
 0x6a6   : > { %5080 = vmatmul.bf16.gmra.mxu2 %v12555_v10 }
 0x6a7   : > { %5169 = vmatmul.bf16.gmra.mxu3 %v12569_v14 }
 0x6b4   : > { %4907 = vmatmul.bf16.gmra.mxu0 %v12583_v36 }
 0x6b5   : > { %4996 = vmatmul.bf16.gmra.mxu1 %v12597_v43 }
 0x6b6   : > { %5085 = vmatmul.bf16.gmra.mxu2 %v12583_v36  ;;  %v4655_v36 = vperm.slane %v4484_v60, 1 }
 0x6b7   : > { %5174 = vmatmul.bf16.gmra.mxu3 %v12597_v43 }
 0x6c4   : > { %4912 = vmatmul.bf16.gmra.mxu0 %v12599_v59  ;;  %v4667_v52 = vpop.f32.mrf.mxu0 }
 0x6c5   : > { %5001 = vmatmul.bf16.gmra.mxu1 %v12609_v8  ;;  %v4668_v1 = vadd.f32 %v4667_v52, %v4654_v31 }
 0x6c6   : > { %5090 = vmatmul.bf16.gmra.mxu2 %v12599_v59  ;;  %v4680_v61 = vpop.f32.mrf.mxu1 }
 0x6c7   : > { %5179 = vmatmul.bf16.gmra.mxu3 %v12609_v8  ;;  %v4681_v48 = vadd.f32 %v4680_v61, %v4668_v1 }
 0x6c9   : > { %v12830_v30 = vperm.slane %v4681_v48, 0 }
 0x6cc   : > { %v4669_v10 = vpop.f32.mrf.mxu0 }
 0x6ce   : > { %v4682_v14 = vpop.f32.mrf.mxu1 }
 0x6d4   : > { %4917 = vmatmul.bf16.gmra.mxu0 %v12623_v20  ;;  %v4693_v43 = vpop.f32.mrf.mxu0 }
 0x6d5   : > { %5006 = vmatmul.bf16.gmra.mxu1 %v12637_v62  ;;  %v4694_v55 = vadd.f32 %v4693_v43, %v4655_v36  ;;  %v7304_v43 = vld [vmem:[%s14375_s14 + $0x38] sm:$0xff] }
 0x6d6   : > { %5095 = vmatmul.bf16.gmra.mxu2 %v12623_v20  ;;  %v4706_v59 = vpop.f32.mrf.mxu1  ;;  %5886 = vmatpush.bf16.msra.mxu0 %v7304_v43 }
 0x6d7   : > { %5184 = vmatmul.bf16.gmra.mxu3 %v12637_v62  ;;  %v4707_v8 = vadd.f32 %v4706_v59, %v4694_v55 }
 0x6d9   : > { %v12839_v25 = vperm.slane %v4707_v8, 0 }
 0x6dc   : > { %v4695_v42 = vpop.f32.mrf.mxu0 }
 0x6de   : > { %v4708_v11 = vpop.f32.mrf.mxu1 }
 0x6e4   : > { %4922 = vmatmul.bf16.gmra.mxu0 %v12639_v26 }
 0x6e5   : > { %5011 = vmatmul.bf16.gmra.mxu1 %v12649_v4 }
 0x6e6   : > { %5100 = vmatmul.bf16.gmra.mxu2 %v12639_v26 }
 0x6e7   : > { %5189 = vmatmul.bf16.gmra.mxu3 %v12649_v4 }
 0x6f1   : > { %v4888_v20 = vpop.f32.mrf.mxu0  ;;  %v4977_v34 = vpop.f32.mrf.mxu1 }
 0x6f2   : > { %v4889_v62 = vadd.f32 %v4888_v20, %v12830_v30 }
 0x6f4   : > { %v12833_v12 = vadd.f32 %v4977_v34, %v4889_v62  ;;  %4927 = vmatmul.bf16.gmra.mxu0 %v12663_v27 }
 0x6f5   : > { %5016 = vmatmul.bf16.gmra.mxu1 %v12677_v13 }
 0x6f6   : > { %5105 = vmatmul.bf16.gmra.mxu2 %v12663_v27 }
 0x6f7   : > { %5194 = vmatmul.bf16.gmra.mxu3 %v12677_v13 }
 0x6f8   : > { %v5066_v26 = vpop.f32.mrf.mxu2  ;;  %v5155_v4 = vpop.f32.mrf.mxu3 }
 0x6f9   : > { %v5067_v29 = vadd.f32 %v5066_v26, %v12839_v25  ;;  %v4890_v15 = vpop.f32.mrf.mxu0  ;;  %v4979_v47 = vpop.f32.mrf.mxu1 }
 0x6fa   : > { %v4891_v56 = vadd.f32 %v4890_v15, %v12830_v30 }
 0x6fb   : > { %v12843_v57 = vadd.f32 %v5155_v4, %v5067_v29 }
 0x6fc   : > { %v12845_v6 = vadd.f32 %v4979_v47, %v4891_v56 }
 0x700   : > { %v5068_v63 = vpop.f32.mrf.mxu2  ;;  %v5157_v22 = vpop.f32.mrf.mxu3 }
 0x701   : > { %v5069_v27 = vadd.f32 %v5068_v63, %v12839_v25  ;;  %v4893_v21 = vpop.f32.mrf.mxu0 }
 0x702   : > { %v4982_v13 = vpop.f32.mrf.mxu1  ;;  %v4894_v41 = vadd.f32 %v4893_v21, %v12830_v30 }
 0x703   : > { %v12849_v58 = vadd.f32 %v5157_v22, %v5069_v27 }
 0x704   : > { %v12851_v51 = vadd.f32 %v4982_v13, %v4894_v41  ;;  %4932 = vmatmul.bf16.gmra.mxu0 %v12679_v50 }
 0x705   : > { %5021 = vmatmul.bf16.gmra.mxu1 %v12689_v45 }
 0x706   : > { %5110 = vmatmul.bf16.gmra.mxu2 %v12679_v50 }
 0x707   : > { %5199 = vmatmul.bf16.gmra.mxu3 %v12689_v45 }
 0x709   : > { %v5071_v54 = vpop.f32.mrf.mxu2  ;;  %v4895_v24 = vpop.f32.mrf.mxu0 }
 0x70a   : > { %v5160_v38 = vpop.f32.mrf.mxu3  ;;  %v5072_v35 = vadd.f32 %v5071_v54, %v12839_v25  ;;  %v4984_v28 = vpop.f32.mrf.mxu1  ;;  %v4896_v18 = vadd.f32 %v4895_v24, %v12830_v30 }
 0x70c   : > { %v12859_v33 = vadd.f32 %v5160_v38, %v5072_v35  ;;  %v12861_v23 = vadd.f32 %v4984_v28, %v4896_v18 }
 0x711   : > { %v5073_v0 = vpop.f32.mrf.mxu2  ;;  %v4898_v16 = vpop.f32.mrf.mxu0 }
 0x712   : > { %v5162_v49 = vpop.f32.mrf.mxu3  ;;  %v5074_v44 = vadd.f32 %v5073_v0, %v12839_v25  ;;  %v4987_v50 = vpop.f32.mrf.mxu1  ;;  %v4899_v45 = vadd.f32 %v4898_v16, %v12830_v30 }
 0x714   : > { %v12865_v19 = vadd.f32 %v5162_v49, %v5074_v44  ;;  %v12867_v60 = vadd.f32 %v4987_v50, %v4899_v45  ;;  %4937 = vmatmul.bf16.gmra.mxu0 %v12703_v3  ;;  %v7303_v49 = vld [vmem:[%s14375_s14 + $0x30] sm:$0xff] }
 0x715   : > { %5026 = vmatmul.bf16.gmra.mxu1 %v12717_v17  ;;  %5887 = vmatpush.bf16.msra.mxu0 %v7303_v49 }
 0x716   : > { %5115 = vmatmul.bf16.gmra.mxu2 %v12703_v3  ;;  %v7312_v3 = vld [vmem:[%s14375_s14 + $0x78] sm:$0xff] }
 0x717   : > { %5204 = vmatmul.bf16.gmra.mxu3 %v12717_v17  ;;  %5899 = vmatpush.bf16.msra.mxu1 %v7312_v3 }
 0x719   : > { %v5076_v31 = vpop.f32.mrf.mxu2  ;;  %v4900_v1 = vpop.f32.mrf.mxu0 }
 0x71a   : > { %v5165_v52 = vpop.f32.mrf.mxu3  ;;  %v5077_v61 = vadd.f32 %v5076_v31, %v12839_v25  ;;  %v4989_v48 = vpop.f32.mrf.mxu1  ;;  %v4901_v10 = vadd.f32 %v4900_v1, %v12830_v30 }
 0x71c   : > { %v12875_v14 = vadd.f32 %v5165_v52, %v5077_v61  ;;  %v12877_v36 = vadd.f32 %v4989_v48, %v4901_v10 }
 0x721   : > { %v5078_v17 = vpop.f32.mrf.mxu2  ;;  %v4903_v8 = vpop.f32.mrf.mxu0 }
 0x722   : > { %v5167_v59 = vpop.f32.mrf.mxu3  ;;  %v5079_v55 = vadd.f32 %v5078_v17, %v12839_v25  ;;  %v4992_v42 = vpop.f32.mrf.mxu1  ;;  %v4904_v11 = vadd.f32 %v4903_v8, %v12830_v30 }
 0x724   : > { %v12887_v20 = vadd.f32 %v5167_v59, %v5079_v55  ;;  %v12889_v34 = vadd.f32 %v4992_v42, %v4904_v11  ;;  %4942 = vmatmul.bf16.gmra.mxu0 %v12719_v32 }
 0x725   : > { %5031 = vmatmul.bf16.gmra.mxu1 %v12729_v5 }
 0x726   : > { %5120 = vmatmul.bf16.gmra.mxu2 %v12719_v32 }
 0x727   : > { %5209 = vmatmul.bf16.gmra.mxu3 %v12729_v5 }
 0x729   : > { %v5081_v62 = vpop.f32.mrf.mxu2  ;;  %v4905_v29 = vpop.f32.mrf.mxu0 }
 0x72a   : > { %v5170_v26 = vpop.f32.mrf.mxu3  ;;  %v5082_v4 = vadd.f32 %v5081_v62, %v12839_v25  ;;  %v4994_v15 = vpop.f32.mrf.mxu1  ;;  %v4906_v47 = vadd.f32 %v4905_v29, %v12830_v30 }
 0x72c   : > { %v12897_v56 = vadd.f32 %v5170_v26, %v5082_v4  ;;  %v12899_v63 = vadd.f32 %v4994_v15, %v4906_v47 }
 0x731   : > { %v5083_v22 = vpop.f32.mrf.mxu2  ;;  %v4908_v13 = vpop.f32.mrf.mxu0 }
 0x732   : > { %v5172_v27 = vpop.f32.mrf.mxu3  ;;  %v5084_v21 = vadd.f32 %v5083_v22, %v12839_v25  ;;  %v4997_v32 = vpop.f32.mrf.mxu1  ;;  %v4909_v5 = vadd.f32 %v4908_v13, %v12830_v30 }
 0x734   : > { %v12903_v41 = vadd.f32 %v5172_v27, %v5084_v21  ;;  %v12905_v54 = vadd.f32 %v4997_v32, %v4909_v5  ;;  %4947 = vmatmul.bf16.gmra.mxu0 %v12745_v9  ;;  %v7302_v27 = vld [vmem:[%s14375_s14 + $0x28] sm:$0xff] }
 0x735   : > { %5036 = vmatmul.bf16.gmra.mxu1 %v12757_v7  ;;  %5888 = vmatpush.bf16.msra.mxu0 %v7302_v27  ;;  %v5241_v27 = vmul.f32 0.5, %v12861_v23 }
 0x736   : > { %5125 = vmatmul.bf16.gmra.mxu2 %v12745_v9  ;;  %v7311_v9 = vld [vmem:[%s14375_s14 + $0x70] sm:$0xff] }
 0x737   : > { %5214 = vmatmul.bf16.gmra.mxu3 %v12757_v7  ;;  %5900 = vmatpush.bf16.msra.mxu1 %v7311_v9 }
 0x739   : > { %v5086_v38 = vpop.f32.mrf.mxu2  ;;  %v12912_v28 = vpop.f32.mrf.mxu0 }
 0x73a   : > { %v5175_v35 = vpop.f32.mrf.mxu3  ;;  %v5087_v24 = vadd.f32 %v5086_v38, %v12839_v25  ;;  %v12914_v18 = vpop.f32.mrf.mxu1 }
 0x73c   : > { %v12916_v0 = vadd.f32 %v5175_v35, %v5087_v24 }
 0x741   : > { %v5088_v7 = vpop.f32.mrf.mxu2  ;;  %v4913_v50 = vpop.f32.mrf.mxu0 }
 0x742   : > { %v5177_v44 = vpop.f32.mrf.mxu3  ;;  %v5089_v16 = vadd.f32 %v5088_v7, %v12839_v25  ;;  %v5002_v45 = vpop.f32.mrf.mxu1  ;;  %v4914_v31 = vadd.f32 %v4913_v50, %v12830_v30 }
 0x744   : > { %v12926_v52 = vadd.f32 %v5177_v44, %v5089_v16  ;;  %v12928_v61 = vadd.f32 %v5002_v45, %v4914_v31  ;;  %4952 = vmatmul.bf16.gmra.mxu0 %v12759_v46 }
 0x745   : > { %5041 = vmatmul.bf16.gmra.mxu1 %v12765_v53 }
 0x746   : > { %5130 = vmatmul.bf16.gmra.mxu2 %v12759_v46 }
 0x747   : > { %5219 = vmatmul.bf16.gmra.mxu3 %v12765_v53 }
 0x749   : > { %v5091_v1 = vpop.f32.mrf.mxu2  ;;  %v12935_v43 = vpop.f32.mrf.mxu0 }
 0x74a   : > { %v5180_v48 = vpop.f32.mrf.mxu3  ;;  %v5092_v10 = vadd.f32 %v5091_v1, %v12839_v25  ;;  %v12937_v3 = vpop.f32.mrf.mxu1  ;;  %v5235_v1 = vmul.f32 0.5, %v12833_v12 }
 0x74c   : > { %v12939_v17 = vadd.f32 %v5180_v48, %v5092_v10  ;;  %7803 = vtanh.f32 %v5235_v1 }
 0x751   : > { %v5093_v59 = vpop.f32.mrf.mxu2  ;;  %v4918_v42 = vpop.f32.mrf.mxu0 }
 0x752   : > { %v5182_v55 = vpop.f32.mrf.mxu3  ;;  %v5094_v8 = vadd.f32 %v5093_v59, %v12839_v25  ;;  %v5007_v11 = vpop.f32.mrf.mxu1  ;;  %v4919_v46 = vadd.f32 %v4918_v42, %v12830_v30  ;;  %v5238_v42 = vmul.f32 0.5, %v12849_v58 }
 0x753   : > { %v7804_v58 = vpop.eup %7803 }
 0x754   : > { %v12943_v62 = vadd.f32 %v5182_v55, %v5094_v8  ;;  %v12945_v53 = vadd.f32 %v5007_v11, %v4919_v46  ;;  %4957 = vmatmul.bf16.gmra.mxu0 %v12795_v40  ;;  %v5237_v55 = vmul.f32 0.5, %v12845_v6  ;;  %v5239_v46 = vmul.f32 0.5, %v12851_v51 }
 0x755   : > { %5046 = vmatmul.bf16.gmra.mxu1 %v12797_v2 }
 0x756   : > { %5135 = vmatmul.bf16.gmra.mxu2 %v12795_v40  ;;  %v7310_v40 = vld [vmem:[%s14375_s14 + $0x68] sm:$0xff] }
 0x757   : > { %5224 = vmatmul.bf16.gmra.mxu3 %v12797_v2  ;;  %5901 = vmatpush.bf16.msra.mxu1 %v7310_v40 }
 0x759   : > { %v5096_v26 = vpop.f32.mrf.mxu2  ;;  %v12952_v15 = vpop.f32.mrf.mxu0 }
 0x75a   : > { %v5185_v4 = vpop.f32.mrf.mxu3  ;;  %v5097_v29 = vadd.f32 %v5096_v26, %v12839_v25  ;;  %v12954_v47 = vpop.f32.mrf.mxu1 }
 0x75c   : > { %v12956_v22 = vadd.f32 %v5185_v4, %v5097_v29  ;;  %v5240_v29 = vmul.f32 0.5, %v12859_v33  ;;  %v5243_v33 = vmul.f32 0.5, %v12867_v60 }
 0x761   : > { %v5098_v2 = vpop.f32.mrf.mxu2  ;;  %v4923_v32 = vpop.f32.mrf.mxu0 }
 0x762   : > { %v5187_v21 = vpop.f32.mrf.mxu3  ;;  %v5099_v13 = vadd.f32 %v5098_v2, %v12839_v25  ;;  %v5012_v5 = vpop.f32.mrf.mxu1  ;;  %v4924_v38 = vadd.f32 %v4923_v32, %v12830_v30  ;;  %v5242_v2 = vmul.f32 0.5, %v12865_v19  ;;  %v7309_v32 = vld [vmem:[%s14375_s14 + $0x60] sm:$0xff] }
 0x763   : > { %5902 = vmatpush.bf16.msra.mxu1 %v7309_v32 }
 0x764   : > { %v12966_v35 = vadd.f32 %v5187_v21, %v5099_v13  ;;  %v12968_v24 = vadd.f32 %v5012_v5, %v4924_v38  ;;  %4962 = vmatmul.bf16.gmra.mxu0 %v12799_v37  ;;  %v7301_v21 = vld [vmem:[%s14375_s14 + $0x20] sm:$0xff]  ;;  %v5363_v38 = vmul.f32 0.5, %v7804_v58 }
 0x765   : > { %5051 = vmatmul.bf16.gmra.mxu1 %v12801_v39  ;;  %5889 = vmatpush.bf16.msra.mxu0 %v7301_v21 }
 0x766   : > { %5140 = vmatmul.bf16.gmra.mxu2 %v12799_v37  ;;  %v13011_v60 = vadd.f32 0.5, %v5363_v38 }
 0x767   : > { %5229 = vmatmul.bf16.gmra.mxu3 %v12801_v39  ;;  %v5236_v39 = vmul.f32 0.5, %v12843_v57 }
 0x769   : > { %v5101_v49 = vpop.f32.mrf.mxu2  ;;  %v12975_v44 = vpop.f32.mrf.mxu0  ;;  %7805 = vtanh.f32 %v5236_v39 }
 0x76a   : > { %v5190_v9 = vpop.f32.mrf.mxu3  ;;  %v5102_v7 = vadd.f32 %v5101_v49, %v12839_v25  ;;  %v12977_v16 = vpop.f32.mrf.mxu1  ;;  %7807 = vtanh.f32 %v5237_v55 }
 0x76b   : > { %7809 = vtanh.f32 %v5238_v42  ;;  %v5244_v42 = vmul.f32 0.5, %v12875_v14 }
 0x76c   : > { %v12979_v50 = vadd.f32 %v5190_v9, %v5102_v7  ;;  %7811 = vtanh.f32 %v5239_v46 }
 0x76d   : > { %7813 = vtanh.f32 %v5240_v29 }
 0x76e   : > { %7815 = vtanh.f32 %v5241_v27 }
 0x76f   : > { %v7806_v51 = vpop.eup %7805  ;;  %7817 = vtanh.f32 %v5242_v2  ;;  %v5246_v2 = vmul.f32 0.5, %v12887_v20 }
 0x770   : > { %v7808_v13 = vpop.eup %7807  ;;  %v5364_v7 = vmul.f32 0.5, %v7806_v51  ;;  %7819 = vtanh.f32 %v5243_v33  ;;  %v5568_v51 = vmul.f32 %v13011_v60, %v13011_v60 }
 0x771   : > { %v5103_v45 = vpop.f32.mrf.mxu2  ;;  %v4928_v10 = vpop.f32.mrf.mxu0  ;;  %v5365_v49 = vmul.f32 0.5, %v7808_v13  ;;  %7821 = vtanh.f32 %v5244_v42 }
 0x772   : > { %v5192_v31 = vpop.f32.mrf.mxu3  ;;  %v5104_v48 = vadd.f32 %v5103_v45, %v12839_v25  ;;  %v5017_v37 = vpop.f32.mrf.mxu1  ;;  %v4929_v59 = vadd.f32 %v4928_v10, %v12830_v30  ;;  %v13021_v29 = vadd.f32 0.5, %v5364_v7 }
 0x773   : > { %v7810_v5 = vpop.eup %7809  ;;  %v13015_v55 = vadd.f32 0.5, %v5365_v49 }
 0x774   : > { %v12986_v8 = vadd.f32 %v5192_v31, %v5104_v48  ;;  %v12989_v11 = vadd.f32 %v5017_v37, %v4929_v59  ;;  %v7812_v23 = vpop.eup %7811  ;;  %v5366_v48 = vmul.f32 0.5, %v7810_v5  ;;  %15230 = vst [vmem:[#allocation10_spill] sm:$0xff] %v13021_v29  ;;  %v5569_v20 = vmul.f32 %v13021_v29, %v13021_v29 }
 0x775   : > { %v5367_v10 = vmul.f32 0.5, %v7812_v23  ;;  %v7814_v59 = vpop.eup %7813  ;;  %v5570_v14 = vmul.f32 %v13015_v55, %v13015_v55 }
 0x776   : > { %v13023_v58 = vadd.f32 0.5, %v5366_v48  ;;  %v5368_v13 = vmul.f32 0.5, %v7814_v59 }
 0x777   : > { %v13025_v27 = vadd.f32 0.5, %v5367_v10  ;;  %v5249_v10 = vmul.f32 0.5, %v12899_v63  ;;  %v5632_v59 = vadd.f32 %v5570_v14, %v5568_v51 }
 0x778   : > { %15231 = vst [vmem:[#allocation25_spill] sm:$0xff] %v13023_v58  ;;  %v13049_v48 = vadd.f32 0.5, %v5368_v13 }
 0x779   : > { %v5106_v12 = vpop.f32.mrf.mxu2  ;;  %v12993_v4 = vpop.f32.mrf.mxu0  ;;  %15232 = vst [vmem:[#allocation28_spill] sm:$0xff] %v13025_v27  ;;  %v5572_v7 = vmul.f32 %v13025_v27, %v13025_v27 }
 0x77a   : > { %v5195_v26 = vpop.f32.mrf.mxu3  ;;  %v5107_v57 = vadd.f32 %v5106_v12, %v12839_v25  ;;  %v12995_v6 = vpop.f32.mrf.mxu1  ;;  %15233 = vst [vmem:[#allocation4_spill] sm:$0xff] %v13049_v48  ;;  %v5573_v14 = vmul.f32 %v13049_v48, %v13049_v48 }
 0x77b   : > { %v7816_v12 = vpop.eup %7815 }
 0x77c   : > { %v12999_v40 = vadd.f32 %v5195_v26, %v5107_v57  ;;  %v5245_v26 = vmul.f32 0.5, %v12877_v36  ;;  %v7818_v57 = vpop.eup %7817  ;;  %v5247_v36 = vmul.f32 0.5, %v12889_v34  ;;  %v5369_v33 = vmul.f32 0.5, %v7816_v12 }
 0x77d   : > { %v7820_v21 = vpop.eup %7819  ;;  %v5370_v23 = vmul.f32 0.5, %v7818_v57  ;;  %v5571_v34 = vmul.f32 %v13023_v58, %v13023_v58  ;;  %v5529_v57 = vadd.f32 %v13023_v58, %v13021_v29 }
 0x77e   : > { %7823 = vtanh.f32 %v5245_v26  ;;  %v13054_v42 = vadd.f32 0.5, %v5369_v33  ;;  %v7822_v26 = vpop.eup %7821 }
 0x77f   : > { %7825 = vtanh.f32 %v5246_v2  ;;  %v13056_v12 = vadd.f32 0.5, %v5370_v23  ;;  %v5530_v51 = vadd.f32 %v5529_v57, %v13049_v48 }
 0x780   : > { %7827 = vtanh.f32 %v5247_v36  ;;  %v5633_v36 = vadd.f32 %v5632_v59, %v5572_v7 }
 0x781   : > { %v5108_v19 = vpop.f32.mrf.mxu2  ;;  %v4933_v31 = vpop.f32.mrf.mxu0  ;;  %15234 = vst [vmem:[#allocation3_spill] sm:$0xff] %v13056_v12 }
 0x782   : > { %v5197_v9 = vpop.f32.mrf.mxu3  ;;  %v5109_v45 = vadd.f32 %v5108_v19, %v12839_v25  ;;  %v5022_v1 = vpop.f32.mrf.mxu1  ;;  %v4934_v37 = vadd.f32 %v4933_v31, %v12830_v30  ;;  %v5248_v31 = vmul.f32 0.5, %v12897_v56  ;;  %v5669_v56 = vadd.f32 %v5571_v34, %v5569_v20 }
 0x783   : > { %v5372_v20 = vmul.f32 0.5, %v7822_v26 }
 0x784   : > { %v13013_v39 = vadd.f32 %v5197_v9, %v5109_v45  ;;  %v13018_v46 = vadd.f32 %v5022_v1, %v4934_v37  ;;  %v5492_v9 = vadd.f32 %v13015_v55, %v13011_v60  ;;  %v5371_v45 = vmul.f32 0.5, %v7820_v21  ;;  %v7824_v13 = vpop.eup %7823 }
 0x785   : > { %v4911_v37 = vadd.f32 %v12912_v28, %v12830_v30  ;;  %v5250_v21 = vmul.f32 0.5, %v12903_v41  ;;  %7829 = vtanh.f32 %v5248_v31  ;;  %v5251_v28 = vmul.f32 0.5, %v12905_v54  ;;  %v7826_v23 = vpop.eup %7825 }
 0x786   : > { %v5493_v2 = vadd.f32 %v5492_v9, %v13025_v27  ;;  %v13062_v63 = vadd.f32 0.5, %v5371_v45  ;;  %7831 = vtanh.f32 %v5249_v10  ;;  %v5574_v41 = vmul.f32 %v13054_v42, %v13054_v42  ;;  %v7828_v7 = vpop.eup %7827 }
 0x787   : > { %v5373_v45 = vmul.f32 0.5, %v7824_v13  ;;  %7833 = vtanh.f32 %v5250_v21  ;;  %v5374_v57 = vmul.f32 0.5, %v7826_v23  ;;  %v5670_v13 = vadd.f32 %v5669_v56, %v5573_v14 }
 0x788   : > { %v5576_v10 = vmul.f32 %v13062_v63, %v13062_v63  ;;  %7835 = vtanh.f32 %v5251_v28  ;;  %v5494_v26 = vadd.f32 %v5493_v2, %v13054_v42  ;;  %v5634_v58 = vadd.f32 %v5633_v36, %v5574_v41 }
 0x789   : > { %v5111_v32 = vpop.f32.mrf.mxu2  ;;  %v13034_v49 = vpop.f32.mrf.mxu0  ;;  %v13086_v27 = vadd.f32 0.5, %v5372_v20  ;;  %v13088_v28 = vadd.f32 0.5, %v5373_v45  ;;  %v13093_v56 = vadd.f32 0.5, %v5374_v57 }
 0x78a   : > { %v5200_v5 = vpop.f32.mrf.mxu3  ;;  %v5112_v38 = vadd.f32 %v5111_v32, %v12839_v25  ;;  %v13036_v19 = vpop.f32.mrf.mxu1  ;;  %v5000_v32 = vadd.f32 %v12914_v18, %v4911_v37  ;;  %v4916_v18 = vadd.f32 %v12935_v43, %v12830_v30  ;;  %v5252_v37 = vmul.f32 0.5, %v12916_v0 }
 0x78b   : > { %v7830_v21 = vpop.eup %7829  ;;  %v5531_v43 = vadd.f32 %v5530_v51, %v13056_v12  ;;  %15235 = vst [vmem:[#allocation7_spill] sm:$0xff] %v13086_v27  ;;  %v5254_v0 = vmul.f32 0.5, %v12926_v52  ;;  %v5635_v23 = vadd.f32 %v5634_v58, %v5576_v10  ;;  %v5255_v51 = vmul.f32 0.5, %v12928_v61 }
 0x78c   : > { %v13047_v1 = vadd.f32 %v5200_v5, %v5112_v38  ;;  %v5575_v38 = vmul.f32 %v13056_v12, %v13056_v12  ;;  %v7832_v29 = vpop.eup %7831  ;;  %7837 = vtanh.f32 %v5252_v37  ;;  %15236 = vst [vmem:[#allocation32_spill] sm:$0xff] %v13093_v56  ;;  %v5376_v36 = vmul.f32 0.5, %v7830_v21 }
 0x78d   : > { %v5377_v52 = vmul.f32 0.5, %v7832_v29  ;;  %v5577_v45 = vmul.f32 %v13086_v27, %v13086_v27  ;;  %v5578_v61 = vmul.f32 %v13088_v28, %v13088_v28 }
 0x78e   : > { %v5671_v2 = vadd.f32 %v5670_v13, %v5575_v38  ;;  %v13114_v37 = vadd.f32 0.5, %v5376_v36  ;;  %v5579_v13 = vmul.f32 %v13093_v56, %v13093_v56 }
 0x790   : > { %15237 = vst [vmem:[#allocation33_spill] sm:$0xff] %v13114_v37 }
 0x791   : > { %v5113_v5 = vpop.f32.mrf.mxu2  ;;  %v4938_v9 = vpop.f32.mrf.mxu0 }
 0x792   : > { %v5202_v33 = vpop.f32.mrf.mxu3  ;;  %v5114_v54 = vadd.f32 %v5113_v5, %v12839_v25  ;;  %v5027_v34 = vpop.f32.mrf.mxu1  ;;  %v4939_v31 = vadd.f32 %v4938_v9, %v12830_v30  ;;  %v5253_v5 = vmul.f32 0.5, %v5000_v32  ;;  %v5375_v9 = vmul.f32 0.5, %v7828_v7 }
 0x793   : > { %v5495_v32 = vadd.f32 %v5494_v26, %v13062_v63 }
 0x794   : > { %v13080_v59 = vadd.f32 %v5202_v33, %v5114_v54  ;;  %v13083_v48 = vadd.f32 %v5027_v34, %v4939_v31  ;;  %v5005_v33 = vadd.f32 %v12937_v3, %v4916_v18  ;;  %v7834_v54 = vpop.eup %7833  ;;  %7839 = vtanh.f32 %v5253_v5  ;;  %v7300_v5 = vld [vmem:[%s14375_s14 + $0x18] sm:$0xff] }
 0x795   : > { %v7836_v20 = vpop.eup %7835  ;;  %v13096_v34 = vadd.f32 0.5, %v5375_v9  ;;  %v5256_v3 = vmul.f32 0.5, %v12939_v17  ;;  %7841 = vtanh.f32 %v5254_v0  ;;  %v5532_v31 = vadd.f32 %v5531_v43, %v13086_v27  ;;  %5890 = vmatpush.bf16.msra.mxu0 %v7300_v5 }
 0x796   : > { %v5257_v18 = vmul.f32 0.5, %v5005_v33  ;;  %v5496_v29 = vadd.f32 %v5495_v32, %v13088_v28  ;;  %v4921_v17 = vadd.f32 %v12952_v15, %v12830_v30  ;;  %v5378_v26 = vmul.f32 0.5, %v7834_v54  ;;  %v7838_v21 = vpop.eup %7837  ;;  %v7308_v15 = vld [vmem:[%s14375_s14 + $0x58] sm:$0xff] }
 0x797   : > { %v5379_v57 = vmul.f32 0.5, %v7836_v20  ;;  %7843 = vtanh.f32 %v5255_v51  ;;  %v5580_v43 = vmul.f32 %v13096_v34, %v13096_v34  ;;  %v13123_v9 = vadd.f32 0.5, %v5377_v52  ;;  %5903 = vmatpush.bf16.msra.mxu1 %v7308_v15 }
 0x798   : > { %7845 = vtanh.f32 %v5256_v3  ;;  %v5672_v33 = vadd.f32 %v5671_v2, %v5577_v45  ;;  %v5636_v32 = vadd.f32 %v5635_v23, %v5578_v61  ;;  %v5258_v54 = vmul.f32 0.5, %v12943_v62 }
 0x799   : > { %v5116_v14 = vpop.f32.mrf.mxu2  ;;  %v13100_v7 = vpop.f32.mrf.mxu0  ;;  %7847 = vtanh.f32 %v5257_v18  ;;  %v5533_v36 = vadd.f32 %v5532_v31, %v13093_v56  ;;  %v5497_v51 = vadd.f32 %v5496_v29, %v13096_v34  ;;  %v5581_v52 = vmul.f32 %v13114_v37, %v13114_v37 }
 0x79a   : > { %v5205_v41 = vpop.f32.mrf.mxu3  ;;  %v5117_v38 = vadd.f32 %v5116_v14, %v12839_v25  ;;  %v13102_v58 = vpop.f32.mrf.mxu1  ;;  %v5259_v14 = vmul.f32 0.5, %v12945_v53  ;;  %v13135_v3 = vadd.f32 0.5, %v5378_v26  ;;  %v13137_v2 = vadd.f32 0.5, %v5379_v57 }
 0x79b   : > { %v7840_v0 = vpop.eup %7839  ;;  %v5380_v23 = vmul.f32 0.5, %v7838_v21  ;;  %v5673_v45 = vadd.f32 %v5672_v33, %v5579_v13  ;;  %v5637_v61 = vadd.f32 %v5636_v32, %v5580_v43  ;;  %v5582_v53 = vmul.f32 %v13123_v9, %v13123_v9 }
 0x79c   : > { %v13112_v10 = vadd.f32 %v5205_v41, %v5117_v38  ;;  %v5010_v41 = vadd.f32 %v12954_v47, %v4921_v17  ;;  %v7842_v20 = vpop.eup %7841  ;;  %15238 = vst [vmem:[#allocation35_spill] sm:$0xff] %v13135_v3  ;;  %v5381_v47 = vmul.f32 0.5, %v7840_v0  ;;  %v5534_v17 = vadd.f32 %v5533_v36, %v13114_v37 }
 0x79d   : > { %v7844_v29 = vpop.eup %7843  ;;  %7849 = vtanh.f32 %v5258_v54  ;;  %v5260_v26 = vmul.f32 0.5, %v12956_v22  ;;  %v4926_v57 = vadd.f32 %v12975_v44, %v12830_v30  ;;  %v5498_v21 = vadd.f32 %v5497_v51, %v13123_v9 }
 0x79e   : > { %v7846_v5 = vpop.eup %7845  ;;  %v5382_v13 = vmul.f32 0.5, %v7842_v20  ;;  %7851 = vtanh.f32 %v5259_v14  ;;  %v5261_v43 = vmul.f32 0.5, %v5010_v41  ;;  %v5674_v0 = vadd.f32 %v5673_v45, %v5581_v52 }
 0x79f   : > { %v7848_v15 = vpop.eup %7847  ;;  %v5583_v33 = vmul.f32 %v13135_v3, %v13135_v3  ;;  %v5584_v32 = vmul.f32 %v13137_v2, %v13137_v2  ;;  %v13158_v54 = vadd.f32 0.5, %v5380_v23  ;;  %v5638_v22 = vadd.f32 %v5637_v61, %v5582_v53 }
 0x7a0   : > { %v13160_v36 = vadd.f32 0.5, %v5381_v47  ;;  %v5383_v44 = vmul.f32 0.5, %v7844_v29  ;;  %v5262_v37 = vmul.f32 0.5, %v12966_v35  ;;  %v5535_v51 = vadd.f32 %v5534_v17, %v13135_v3 }
 0x7a1   : > { %v13139_v62 = vpop.f32.mrf.mxu2  ;;  %v13145_v18 = vpop.f32.mrf.mxu0  ;;  %15239 = vst [vmem:[#allocation9_spill] sm:$0xff] %v13158_v54  ;;  %7853 = vtanh.f32 %v5260_v26  ;;  %v5263_v14 = vmul.f32 0.5, %v12968_v24  ;;  %v5015_v41 = vadd.f32 %v12977_v16, %v4926_v57  ;;  %v13166_v20 = vadd.f32 0.5, %v5382_v13 }
 0x7a2   : > { %v13141_v38 = vpop.f32.mrf.mxu3  ;;  %v13147_v31 = vpop.f32.mrf.mxu1  ;;  %v5384_v52 = vmul.f32 0.5, %v7846_v5  ;;  %v5385_v45 = vmul.f32 0.5, %v7848_v15  ;;  %7855 = vtanh.f32 %v5261_v43  ;;  %v5675_v56 = vadd.f32 %v5674_v0, %v5583_v33 }
 0x7a3   : > { %15240 = vst [vmem:[#allocation11_spill] sm:$0xff] %v13166_v20  ;;  %v7850_v23 = vpop.eup %7849  ;;  %v5499_v61 = vadd.f32 %v5498_v21, %v13137_v2  ;;  %v5639_v53 = vadd.f32 %v5638_v22, %v5584_v32  ;;  %v5585_v35 = vmul.f32 %v13158_v54, %v13158_v54  ;;  %v5586_v16 = vmul.f32 %v13160_v36, %v13160_v36 }
 0x7a4   : > { %v7852_v24 = vpop.eup %7851  ;;  %v13177_v17 = vadd.f32 0.5, %v5383_v44  ;;  %7857 = vtanh.f32 %v5262_v37  ;;  %v5264_v26 = vmul.f32 0.5, %v12979_v50  ;;  %v5536_v21 = vadd.f32 %v5535_v51, %v13158_v54 }
 0x7a5   : > { %7859 = vtanh.f32 %v5263_v14  ;;  %v5265_v13 = vmul.f32 0.5, %v5015_v41  ;;  %v4931_v43 = vadd.f32 %v12993_v4, %v12830_v30  ;;  %v5500_v15 = vadd.f32 %v5499_v61, %v13160_v36 }
 0x7a6   : > { %v5587_v0 = vmul.f32 %v13166_v20, %v13166_v20  ;;  %v13190_v33 = vadd.f32 0.5, %v5384_v52  ;;  %v13192_v37 = vadd.f32 0.5, %v5385_v45  ;;  %v5676_v32 = vadd.f32 %v5675_v56, %v5585_v35 }
 0x7a7   : > { %v7854_v50 = vpop.eup %7853  ;;  %v5386_v22 = vmul.f32 0.5, %v7850_v23  ;;  %v5387_v44 = vmul.f32 0.5, %v7852_v24  ;;  %v5266_v51 = vmul.f32 0.5, %v12986_v8  ;;  %v5640_v41 = vadd.f32 %v5639_v53, %v5586_v16 }
 0x7a8   : > { %15241 = vst [vmem:[#allocation14_spill] sm:$0xff] %v13190_v33  ;;  %v7856_v14 = vpop.eup %7855  ;;  %v5588_v4 = vmul.f32 %v13177_v17, %v13177_v17  ;;  %7861 = vtanh.f32 %v5264_v26  ;;  %v5267_v61 = vmul.f32 0.5, %v12989_v11  ;;  %v5537_v54 = vadd.f32 %v5536_v21, %v13166_v20 }
 0x7a9   : > { %v13171_v47 = vpop.f32.mrf.mxu2  ;;  %v13180_v57 = vpop.f32.mrf.mxu0  ;;  %v5501_v52 = vadd.f32 %v5500_v15, %v13177_v17  ;;  %7863 = vtanh.f32 %v5265_v13  ;;  %v5020_v45 = vadd.f32 %v12995_v6, %v4931_v43  ;;  %v5677_v23 = vadd.f32 %v5676_v32, %v5587_v0 }
 0x7aa   : > { %v13173_v29 = vpop.f32.mrf.mxu3  ;;  %v13182_v5 = vpop.f32.mrf.mxu1  ;;  %v5589_v8 = vmul.f32 %v13190_v33, %v13190_v33  ;;  %v5590_v53 = vmul.f32 %v13192_v37, %v13192_v37  ;;  %v5388_v35 = vmul.f32 0.5, %v7854_v50  ;;  %v13205_v16 = vadd.f32 0.5, %v5386_v22 }
 0x7ab   : > { %v7858_v56 = vpop.eup %7857  ;;  %v13207_v11 = vadd.f32 0.5, %v5387_v44  ;;  %v5389_v26 = vmul.f32 0.5, %v7856_v14  ;;  %7865 = vtanh.f32 %v5266_v51  ;;  %v5641_v6 = vadd.f32 %v5640_v41, %v5588_v4 }
 0x7ac   : > { %v7860_v24 = vpop.eup %7859  ;;  %15242 = vst [vmem:[#allocation41_spill] sm:$0xff] %v13205_v16  ;;  %7867 = vtanh.f32 %v5267_v61  ;;  %v5268_v43 = vmul.f32 0.5, %v12999_v40  ;;  %v4936_v15 = vadd.f32 %v13034_v49, %v12830_v30  ;;  %v5538_v32 = vadd.f32 %v5537_v54, %v13190_v33 }
 0x7ad   : > { %15243 = vst [vmem:[#allocation17_spill] sm:$0xff] %v13207_v11  ;;  %v5502_v22 = vadd.f32 %v5501_v52, %v13192_v37  ;;  %v5390_v44 = vmul.f32 0.5, %v7858_v56  ;;  %v5269_v51 = vmul.f32 0.5, %v5020_v45  ;;  %v5678_v20 = vadd.f32 %v5677_v23, %v5589_v8 }
 0x7ae   : > { %v7862_v14 = vpop.eup %7861  ;;  %v13222_v3 = vadd.f32 0.5, %v5388_v35  ;;  %v5391_v41 = vmul.f32 0.5, %v7860_v24  ;;  %v5270_v40 = vmul.f32 0.5, %v13013_v39  ;;  %v5642_v61 = vadd.f32 %v5641_v6, %v5590_v53 }
 0x7af   : > { %v7864_v4 = vpop.eup %7863  ;;  %v5591_v49 = vmul.f32 %v13205_v16, %v13205_v16  ;;  %v5592_v27 = vmul.f32 %v13207_v11, %v13207_v11  ;;  %v13229_v54 = vadd.f32 0.5, %v5389_v26  ;;  %v5539_v52 = vadd.f32 %v5538_v32, %v13205_v16 }
 0x7b0   : > { %15244 = vst [vmem:[#allocation15_spill] sm:$0xff] %v13222_v3  ;;  %v5503_v45 = vadd.f32 %v5502_v22, %v13207_v11  ;;  %7869 = vtanh.f32 %v5268_v43  ;;  %v5025_v56 = vadd.f32 %v13036_v19, %v4936_v15  ;;  %v13234_v8 = vadd.f32 0.5, %v5390_v44 }
 0x7b1   : > { %v13209_v21 = vpop.f32.mrf.mxu2  ;;  %v13216_v0 = vpop.f32.mrf.mxu0  ;;  %15245 = vst [vmem:[#allocation40_spill] sm:$0xff] %v13229_v54  ;;  %v5392_v39 = vmul.f32 0.5, %v7862_v14  ;;  %7871 = vtanh.f32 %v5269_v51  ;;  %v5271_v53 = vmul.f32 0.5, %v13018_v46  ;;  %v5593_v24 = vmul.f32 %v13222_v3, %v13222_v3 }
 0x7b2   : > { %v13211_v13 = vpop.f32.mrf.mxu3  ;;  %v13218_v50 = vpop.f32.mrf.mxu1  ;;  %15246 = vst [vmem:[#allocation18_spill] sm:$0xff] %v13234_v8  ;;  %v13239_v26 = vadd.f32 0.5, %v5391_v41  ;;  %v5393_v6 = vmul.f32 0.5, %v7864_v4  ;;  %7873 = vtanh.f32 %v5270_v40  ;;  %v5679_v32 = vadd.f32 %v5678_v20, %v5591_v49 }
 0x7b3   : > { %v7866_v23 = vpop.eup %7865  ;;  %v5643_v22 = vadd.f32 %v5642_v61, %v5592_v27  ;;  %v5594_v19 = vmul.f32 %v13229_v54, %v13229_v54  ;;  %v5272_v43 = vmul.f32 0.5, %v13047_v1  ;;  %v5540_v46 = vadd.f32 %v5539_v52, %v13222_v3 }
 0x7b4   : > { %v7868_v35 = vpop.eup %7867  ;;  %15247 = vst [vmem:[#allocation34_spill] sm:$0xff] %v13239_v26  ;;  %v5504_v51 = vadd.f32 %v5503_v45, %v13229_v54  ;;  %v5394_v14 = vmul.f32 0.5, %v7866_v23  ;;  %v5273_v41 = vmul.f32 0.5, %v5025_v56  ;;  %v5595_v27 = vmul.f32 %v13234_v8, %v13234_v8 }
 0x7b5   : > { %v13256_v20 = vadd.f32 0.5, %v5392_v39  ;;  %v5395_v1 = vmul.f32 0.5, %v7868_v35  ;;  %7875 = vtanh.f32 %v5271_v53  ;;  %v5680_v61 = vadd.f32 %v5679_v32, %v5593_v24  ;;  %v13269_v53 = vld [vmem:[%s14375_s14 + $0x10] sm:$0xff] }
 0x7b6   : > { %v7870_v4 = vpop.eup %7869  ;;  %v5596_v49 = vmul.f32 %v13239_v26, %v13239_v26  ;;  %v13260_v52 = vadd.f32 0.5, %v5393_v6  ;;  %v4941_v45 = vadd.f32 %v13100_v7, %v12830_v30  ;;  %v5644_v23 = vadd.f32 %v5643_v22, %v5594_v19  ;;  %v13278_v32 = vld [vmem:[%s14375_s14 + $0x50] sm:$0xff]  ;;  %5891 = vmatpush.bf16.msra.mxu0 %v13269_v53 }
 0x7b7   : > { %15248 = vst [vmem:[#allocation36_spill] sm:$0xff] %v13256_v20  ;;  %v7872_v56 = vpop.eup %7871  ;;  %v5541_v3 = vadd.f32 %v5540_v46, %v13234_v8  ;;  %7877 = vtanh.f32 %v5272_v43  ;;  %v5274_v39 = vmul.f32 0.5, %v13080_v59  ;;  %v5505_v24 = vadd.f32 %v5504_v51, %v13239_v26  ;;  %5904 = vmatpush.bf16.msra.mxu1 %v13278_v32 }
 0x7b8   : > { %15249 = vst [vmem:[#allocation37_spill] sm:$0xff] %v13260_v52  ;;  %v7874_v35 = vpop.eup %7873  ;;  %v13272_v6 = vadd.f32 0.5, %v5394_v14  ;;  %7879 = vtanh.f32 %v5273_v41  ;;  %v5275_v7 = vmul.f32 0.5, %v13083_v48  ;;  %v5681_v22 = vadd.f32 %v5680_v61, %v5595_v27 }
 0x7b9   : > { %v13244_v15 = vpop.f32.mrf.mxu2  ;;  %v13250_v16 = vpop.f32.mrf.mxu0  ;;  %v5597_v59 = vmul.f32 %v13256_v20, %v13256_v20  ;;  %v13282_v19 = vadd.f32 0.5, %v5395_v1  ;;  %v5396_v43 = vmul.f32 0.5, %v7870_v4  ;;  %v5645_v46 = vadd.f32 %v5644_v23, %v5596_v49 }
 0x7ba   : > { %v13246_v44 = vpop.f32.mrf.mxu3  ;;  %v13252_v40 = vpop.f32.mrf.mxu1  ;;  %v5598_v51 = vmul.f32 %v13260_v52, %v13260_v52  ;;  %v5397_v14 = vmul.f32 0.5, %v7872_v56  ;;  %v5030_v48 = vadd.f32 %v13102_v58, %v4941_v45  ;;  %v5542_v27 = vadd.f32 %v5541_v3, %v13256_v20 }
 0x7bb   : > { %v7876_v41 = vpop.eup %7875  ;;  %v5398_v61 = vmul.f32 0.5, %v7874_v35  ;;  %7881 = vtanh.f32 %v5274_v39  ;;  %v5119_v1 = vadd.f32 %v13139_v62, %v12839_v25  ;;  %v5506_v49 = vadd.f32 %v5505_v24, %v13260_v52 }
 0x7bc   : > { %v5599_v56 = vmul.f32 %v13272_v6, %v13272_v6  ;;  %7883 = vtanh.f32 %v5275_v7  ;;  %v4944_v58 = vadd.f32 %v13145_v18, %v12830_v30  ;;  %v5682_v39 = vadd.f32 %v5681_v22, %v5597_v59 }
 0x7bd   : > { %v7878_v23 = vpop.eup %7877  ;;  %v5600_v62 = vmul.f32 %v13282_v19, %v13282_v19  ;;  %v13307_v35 = vadd.f32 0.5, %v5396_v43  ;;  %v5276_v24 = vmul.f32 0.5, %v13112_v10  ;;  %v5646_v52 = vadd.f32 %v5645_v46, %v5598_v51 }
 0x7be   : > { %v7880_v20 = vpop.eup %7879  ;;  %v13310_v33 = vadd.f32 0.5, %v5397_v14  ;;  %v5399_v7 = vmul.f32 0.5, %v7876_v41  ;;  %v5277_v12 = vmul.f32 0.5, %v5030_v48  ;;  %v5543_v18 = vadd.f32 %v5542_v27, %v13272_v6 }
 0x7bf   : > { %v5507_v26 = vadd.f32 %v5506_v49, %v13282_v19  ;;  %v13314_v54 = vadd.f32 0.5, %v5398_v61  ;;  %v5208_v22 = vadd.f32 %v13141_v38, %v5119_v1  ;;  %v5683_v59 = vadd.f32 %v5682_v39, %v5599_v56 }
 0x7c0   : > { %v5400_v11 = vmul.f32 0.5, %v7878_v23  ;;  %v5033_v43 = vadd.f32 %v13147_v31, %v4944_v58  ;;  %v5122_v10 = vadd.f32 %v13171_v47, %v12839_v25  ;;  %v5647_v51 = vadd.f32 %v5646_v52, %v5600_v62 }
 0x7c1   : > { %v13292_v4 = vpop.f32.mrf.mxu2  ;;  %v13301_v45 = vpop.f32.mrf.mxu0  ;;  %v5601_v14 = vmul.f32 %v13307_v35, %v13307_v35  ;;  %v5401_v48 = vmul.f32 0.5, %v7880_v20  ;;  %7885 = vtanh.f32 %v5276_v24  ;;  %v5602_v27 = vmul.f32 %v13310_v33, %v13310_v33 }
 0x7c2   : > { %v13294_v8 = vpop.f32.mrf.mxu3  ;;  %v13303_v3 = vpop.f32.mrf.mxu1  ;;  %v13324_v61 = vadd.f32 0.5, %v5399_v7  ;;  %7887 = vtanh.f32 %v5277_v12  ;;  %v4946_v38 = vadd.f32 %v13180_v57, %v12830_v30  ;;  %v5544_v31 = vadd.f32 %v5543_v18, %v13307_v35 }
 0x7c3   : > { %v7882_v46 = vpop.eup %7881  ;;  %v5508_v47 = vadd.f32 %v5507_v26, %v13310_v33  ;;  %v5603_v52 = vmul.f32 %v13314_v54, %v13314_v54  ;;  %v5278_v1 = vmul.f32 0.5, %v5208_v22  ;;  %v13336_v56 = vadd.f32 0.5, %v5400_v11 }
 0x7c4   : > { %v7884_v41 = vpop.eup %7883  ;;  %v5402_v58 = vmul.f32 0.5, %v7882_v46  ;;  %v5279_v23 = vmul.f32 0.5, %v5033_v43  ;;  %v5211_v12 = vadd.f32 %v13173_v29, %v5122_v10  ;;  %v5684_v62 = vadd.f32 %v5683_v59, %v5601_v14 }
 0x7c5   : > { %15250 = vst [vmem:[#allocation13_spill] sm:$0xff] %v13336_v56  ;;  %v13341_v24 = vadd.f32 0.5, %v5401_v48  ;;  %v5403_v26 = vmul.f32 0.5, %v7884_v41  ;;  %v5124_v7 = vadd.f32 %v13209_v21, %v12839_v25  ;;  %v5648_v18 = vadd.f32 %v5647_v51, %v5602_v27 }
 0x7c6   : > { %v5604_v22 = vmul.f32 %v13324_v61, %v13324_v61  ;;  %v5035_v11 = vadd.f32 %v13182_v5, %v4946_v38  ;;  %v4949_v43 = vadd.f32 %v13216_v0, %v12830_v30  ;;  %v5545_v10 = vadd.f32 %v5544_v31, %v13314_v54 }
 0x7c7   : > { %v7886_v29 = vpop.eup %7885  ;;  %v5685_v46 = vadd.f32 %v5684_v62, %v5603_v52  ;;  %v5509_v59 = vadd.f32 %v5508_v47, %v13324_v61  ;;  %7889 = vtanh.f32 %v5278_v1  ;;  %v5605_v21 = vmul.f32 %v13336_v56, %v13336_v56 }
 0x7c8   : > { %v7888_v14 = vpop.eup %7887  ;;  %v13354_v51 = vadd.f32 0.5, %v5402_v58  ;;  %7891 = vtanh.f32 %v5279_v23  ;;  %v5280_v48 = vmul.f32 0.5, %v5211_v12  ;;  %v5606_v5 = vmul.f32 %v13341_v24, %v13341_v24 }
 0x7c9   : > { %v13332_v20 = vpop.f32.mrf.mxu2  ;;  %v4955_v39 = vpop.f32.mrf.mxu0  ;;  %v13358_v41 = vadd.f32 0.5, %v5403_v26  ;;  %v5213_v0 = vadd.f32 %v13211_v13, %v5124_v7  ;;  %v4951_v27 = vadd.f32 %v13250_v16, %v12830_v30  ;;  %v5649_v38 = vadd.f32 %v5648_v18, %v5604_v22 }
 0x7ca   : > { %v13334_v49 = vpop.f32.mrf.mxu3  ;;  %v13339_v57 = vpop.f32.mrf.mxu1  ;;  %v5404_v31 = vmul.f32 0.5, %v7886_v29  ;;  %v5281_v47 = vmul.f32 0.5, %v5035_v11  ;;  %v5038_v52 = vadd.f32 %v13218_v50, %v4949_v43  ;;  %v5546_v1 = vadd.f32 %v5545_v10, %v13336_v56 }
 0x7cb   : > { %v5510_v58 = vadd.f32 %v5509_v59, %v13341_v24  ;;  %v5405_v23 = vmul.f32 0.5, %v7888_v14  ;;  %v5127_v12 = vadd.f32 %v13244_v15, %v12839_v25  ;;  %v5686_v13 = vadd.f32 %v5685_v46, %v5605_v21 }
 0x7cc   : > { %v5607_v16 = vmul.f32 %v13354_v51, %v13354_v51  ;;  %7893 = vtanh.f32 %v5280_v48  ;;  %v4954_v7 = vadd.f32 %v13301_v45, %v12830_v30  ;;  %v5650_v11 = vadd.f32 %v5649_v38, %v5606_v5 }
 0x7cd   : > { %v7890_v22 = vpop.eup %7889  ;;  %v5608_v43 = vmul.f32 %v13358_v41, %v13358_v41  ;;  %v5282_v29 = vmul.f32 0.5, %v5213_v0  ;;  %v5040_v15 = vadd.f32 %v13252_v40, %v4951_v27  ;;  %v13377_v59 = vadd.f32 0.5, %v5404_v31 }
 0x7ce   : > { %v7892_v10 = vpop.eup %7891  ;;  %7895 = vtanh.f32 %v5281_v47  ;;  %v5283_v46 = vmul.f32 0.5, %v5038_v52  ;;  %v4956_v14 = vadd.f32 %v4955_v39, %v12830_v30  ;;  %v5547_v21 = vadd.f32 %v5546_v1, %v13354_v51 }
 0x7cf   : > { %v5511_v45 = vadd.f32 %v5510_v58, %v13358_v41  ;;  %v13382_v48 = vadd.f32 0.5, %v5405_v23  ;;  %v5216_v5 = vadd.f32 %v13246_v44, %v5127_v12  ;;  %v5687_v38 = vadd.f32 %v5686_v13, %v5607_v16 }
 0x7d0   : > { %v5406_v56 = vmul.f32 0.5, %v7890_v22  ;;  %v5043_v0 = vadd.f32 %v13303_v3, %v4954_v7  ;;  %v5651_v27 = vadd.f32 %v5650_v11, %v5608_v43  ;;  %v5407_v31 = vmul.f32 0.5, %v7892_v10 }
 0x7d1   : > { %v5133_v62 = vpop.f32.mrf.mxu2  ;;  %v4958_v50 = vpop.f32.mrf.mxu0  ;;  %7897 = vtanh.f32 %v5282_v29  ;;  %v5285_v47 = vmul.f32 0.5, %v5040_v15  ;;  %v5609_v39 = vmul.f32 %v13377_v59, %v13377_v59  ;;  %v5129_v1 = vadd.f32 %v13292_v4, %v12839_v25 }
 0x7d2   : > { %v13368_v26 = vpop.f32.mrf.mxu3  ;;  %v5047_v18 = vpop.f32.mrf.mxu1  ;;  %v4959_v40 = vadd.f32 %v4958_v50, %v12830_v30  ;;  %7899 = vtanh.f32 %v5283_v46  ;;  %v5045_v44 = vadd.f32 %v13339_v57, %v4956_v14  ;;  %v5548_v58 = vadd.f32 %v5547_v21, %v13377_v59 }
 0x7d3   : > { %v7894_v52 = vpop.eup %7893  ;;  %v5512_v3 = vadd.f32 %v5511_v45, %v13382_v48  ;;  %v5610_v23 = vmul.f32 %v13382_v48, %v13382_v48  ;;  %v5284_v12 = vmul.f32 0.5, %v5216_v5  ;;  %v13396_v50 = vadd.f32 0.5, %v5406_v56 }
 0x7d4   : > { %v7896_v7 = vpop.eup %7895  ;;  %v5287_v22 = vmul.f32 0.5, %v5043_v0  ;;  %v5132_v11 = vadd.f32 %v13332_v20, %v12839_v25  ;;  %v5048_v4 = vadd.f32 %v5047_v18, %v4959_v40  ;;  %v13400_v29 = vadd.f32 0.5, %v5407_v31  ;;  %v13408_v18 = vld [vmem:[%s14375_s14 + $0x8] sm:$0xff] }
 0x7d5   : > { %v5408_v15 = vmul.f32 0.5, %v7894_v52  ;;  %7901 = vtanh.f32 %v5285_v47  ;;  %v5688_v46 = vadd.f32 %v5687_v38, %v5609_v39  ;;  %v5218_v14 = vadd.f32 %v13294_v8, %v5129_v1  ;;  %5892 = vmatpush.bf16.msra.mxu0 %v13408_v18 }
 0x7d6   : > { %v5289_v21 = vmul.f32 0.5, %v5045_v44  ;;  %v5134_v56 = vadd.f32 %v5133_v62, %v12839_v25  ;;  %v5652_v5 = vadd.f32 %v5651_v27, %v5610_v23  ;;  %v5409_v0 = vmul.f32 0.5, %v7896_v7 }
 0x7d7   : > { %v7898_v45 = vpop.eup %7897  ;;  %7903 = vtanh.f32 %v5284_v12  ;;  %v5221_v31 = vadd.f32 %v13334_v49, %v5132_v11  ;;  %v5291_v38 = vmul.f32 0.5, %v5048_v4  ;;  %v5549_v47 = vadd.f32 %v5548_v58, %v13396_v50 }
 0x7d8   : > { %v7900_v40 = vpop.eup %7899  ;;  %7905 = vtanh.f32 %v5287_v22  ;;  %v5611_v62 = vmul.f32 %v13396_v50, %v13396_v50  ;;  %v5612_v27 = vmul.f32 %v13400_v29, %v13400_v29  ;;  %v13417_v52 = vadd.f32 0.5, %v5408_v15 }
 0x7d9   : > { %v5136_v13 = vpop.f32.mrf.mxu2  ;;  %v4960_v43 = vpop.f32.mrf.mxu0  ;;  %v5513_v39 = vadd.f32 %v5512_v3, %v13400_v29  ;;  %v5286_v1 = vmul.f32 0.5, %v5218_v14  ;;  %7907 = vtanh.f32 %v5289_v21  ;;  %v5223_v49 = vadd.f32 %v13368_v26, %v5134_v56 }
 0x7da   : > { %v5225_v16 = vpop.f32.mrf.mxu3  ;;  %v5049_v57 = vpop.f32.mrf.mxu1  ;;  %v4961_v10 = vadd.f32 %v4960_v43, %v12830_v30  ;;  %v5137_v8 = vadd.f32 %v5136_v13, %v12839_v25  ;;  %15251 = vst [vmem:[#allocation38_spill] sm:$0xff] %v13417_v52  ;;  %v13422_v23 = vadd.f32 0.5, %v5409_v0  ;;  %v5410_v58 = vmul.f32 0.5, %v7898_v45 }
 0x7db   : > { %v7902_v44 = vpop.eup %7901  ;;  %v5411_v12 = vmul.f32 0.5, %v7900_v40  ;;  %v5288_v11 = vmul.f32 0.5, %v5221_v31  ;;  %7909 = vtanh.f32 %v5291_v38  ;;  %v5653_v14 = vadd.f32 %v5652_v5, %v5612_v27 }
 0x7dc   : > { %v5050_v20 = vadd.f32 %v5049_v57, %v4961_v10  ;;  %v5226_v4 = vadd.f32 %v5225_v16, %v5137_v8  ;;  %v5689_v10 = vadd.f32 %v5688_v46, %v5611_v62  ;;  %v5613_v26 = vmul.f32 %v13417_v52, %v13417_v52 }
 0x7dd   : > { %v7904_v3 = vpop.eup %7903  ;;  %v5413_v45 = vmul.f32 0.5, %v7902_v44  ;;  %7911 = vtanh.f32 %v5286_v1  ;;  %v5290_v0 = vmul.f32 0.5, %v5223_v49  ;;  %v5614_v16 = vmul.f32 %v13422_v23, %v13422_v23 }
 0x7de   : > { %v5293_v13 = vmul.f32 0.5, %v5050_v20  ;;  %v7906_v56 = vpop.eup %7905  ;;  %v13430_v40 = vadd.f32 0.5, %v5410_v58  ;;  %v13432_v46 = vadd.f32 0.5, %v5411_v12  ;;  %v5412_v5 = vmul.f32 0.5, %v7904_v3 }
 0x7df   : > { %v7908_v38 = vpop.eup %7907  ;;  %v5292_v8 = vmul.f32 0.5, %v5226_v4  ;;  %v5550_v62 = vadd.f32 %v5549_v47, %v13417_v52  ;;  %v5514_v27 = vadd.f32 %v5513_v39, %v13422_v23  ;;  %v5415_v1 = vmul.f32 0.5, %v7906_v56 }
 0x7e0   : > { %15252 = vst [vmem:[#allocation16_spill] sm:$0xff] %v13430_v40  ;;  %7913 = vtanh.f32 %v5293_v13  ;;  %v5654_v13 = vadd.f32 %v5653_v14, %v5614_v16  ;;  %v5615_v12 = vmul.f32 %v13430_v40, %v13430_v40  ;;  %v5616_v47 = vmul.f32 %v13432_v46, %v13432_v46 }
 0x7e1   : > { %v5138_v7 = vpop.f32.mrf.mxu2  ;;  %v4963_v57 = vpop.f32.mrf.mxu0  ;;  %15253 = vst [vmem:[#allocation30_spill] sm:$0xff] %v13432_v46  ;;  %7915 = vtanh.f32 %v5288_v11  ;;  %v13442_v39 = vadd.f32 0.5, %v5412_v5  ;;  %v5551_v14 = vadd.f32 %v5550_v62, %v13430_v40 }
 0x7e2   : > { %v5227_v22 = vpop.f32.mrf.mxu3  ;;  %v5139_v43 = vadd.f32 %v5138_v7, %v12839_v25  ;;  %v5052_v15 = vpop.f32.mrf.mxu1  ;;  %v4964_v21 = vadd.f32 %v4963_v57, %v12830_v30  ;;  %v5690_v7 = vadd.f32 %v5689_v10, %v5613_v26  ;;  %7917 = vtanh.f32 %v5290_v0 }
 0x7e3   : > { %v7910_v44 = vpop.eup %7909  ;;  %v13446_v26 = vadd.f32 0.5, %v5415_v1  ;;  %v5515_v0 = vadd.f32 %v5514_v27, %v13432_v46  ;;  %v5655_v1 = vadd.f32 %v5654_v13, %v5616_v47 }
 0x7e4   : > { %v5228_v20 = vadd.f32 %v5227_v22, %v5139_v43  ;;  %v5053_v31 = vadd.f32 %v5052_v15, %v4964_v21  ;;  %v13436_v22 = vadd.f32 0.5, %v5413_v45  ;;  %v5417_v43 = vmul.f32 0.5, %v7908_v38  ;;  %v7912_v57 = vpop.eup %7911 }
 0x7e5   : > { %15255 = vst [vmem:[#allocation44_spill] sm:$0xff] %v13446_v26  ;;  %v5419_v21 = vmul.f32 0.5, %v7910_v44  ;;  %v5691_v38 = vadd.f32 %v5690_v7, %v5615_v12  ;;  %v5414_v5 = vmul.f32 0.5, %v7912_v57  ;;  %v5617_v44 = vmul.f32 %v13442_v39, %v13442_v39 }
 0x7e6   : > { %v5295_v49 = vmul.f32 0.5, %v5053_v31  ;;  %15254 = vst [vmem:[#allocation43_spill] sm:$0xff] %v13436_v22  ;;  %v5294_v58 = vmul.f32 0.5, %v5228_v20  ;;  %v7914_v10 = vpop.eup %7913  ;;  %v5618_v20 = vmul.f32 %v13436_v22, %v13436_v22  ;;  %v5620_v27 = vmul.f32 %v13446_v26, %v13446_v26 }
 0x7e7   : > { %v7916_v45 = vpop.eup %7915  ;;  %v5516_v12 = vadd.f32 %v5515_v0, %v13436_v22  ;;  %v13461_v13 = vadd.f32 0.5, %v5414_v5 }
 0x7e8   : > { %7919 = vtanh.f32 %v5295_v49  ;;  %v7918_v62 = vpop.eup %7917  ;;  %v5416_v46 = vmul.f32 0.5, %v7916_v45  ;;  %v5552_v45 = vadd.f32 %v5551_v14, %v13442_v39 }
 0x7e9   : > { %v5141_v11 = vpop.f32.mrf.mxu2  ;;  %7921 = vtanh.f32 %v5292_v8  ;;  %v4965_v3 = vpop.f32.mrf.mxu0  ;;  %v13452_v8 = vadd.f32 0.5, %v5417_v43  ;;  %v5656_v43 = vadd.f32 %v5655_v1, %v5618_v20  ;;  %15258 = vst [vmem:[#allocation47_spill] sm:$0xff] %v13461_v13 }
 0x7ea   : > { %v5230_v4 = vpop.f32.mrf.mxu3  ;;  %v5142_v15 = vadd.f32 %v5141_v11, %v12839_v25  ;;  %v4966_v56 = vadd.f32 %v4965_v3, %v12830_v30  ;;  %7923 = vtanh.f32 %v5294_v58  ;;  %v5054_v31 = vpop.f32.mrf.mxu1  ;;  %v5421_v30 = vmul.f32 0.5, %v7914_v10 }
 0x7eb   : > { %15256 = vst [vmem:[#allocation45_spill] sm:$0xff] %v13452_v8  ;;  %v13458_v58 = vadd.f32 0.5, %v5419_v21  ;;  %v5622_v47 = vmul.f32 %v13452_v8, %v13452_v8  ;;  %v5517_v21 = vadd.f32 %v5516_v12, %v13446_v26  ;;  %v5657_v20 = vadd.f32 %v5656_v43, %v5620_v27 }
 0x7ec   : > { %v5231_v16 = vadd.f32 %v5230_v4, %v5142_v15  ;;  %v5055_v49 = vadd.f32 %v5054_v31, %v4966_v56  ;;  %v5418_v15 = vmul.f32 0.5, %v7918_v62  ;;  %v13470_v31 = vadd.f32 0.5, %v5416_v46 }
 0x7ed   : > { %15257 = vst [vmem:[#allocation24_spill] sm:$0xff] %v13458_v58  ;;  %v5624_v5 = vmul.f32 %v13458_v58, %v13458_v58  ;;  %v5692_v62 = vadd.f32 %v5691_v38, %v5617_v44  ;;  %v5553_v27 = vadd.f32 %v5552_v45, %v13461_v13 }
 0x7ee   : > { %v5296_v11 = vmul.f32 0.5, %v5231_v16  ;;  %v7920_v3 = vpop.eup %7919  ;;  %v5297_v4 = vmul.f32 0.5, %v5055_v49  ;;  %v13467_v16 = vadd.f32 0.5, %v5421_v30  ;;  %15260 = vst [vmem:[#allocation48_spill] sm:$0xff] %v13470_v31  ;;  %v5619_v30 = vmul.f32 %v13461_v13, %v13461_v13 }
 0x7ef   : > { %v7922_v7 = vpop.eup %7921  ;;  %v5423_v57 = vmul.f32 0.5, %v7920_v3  ;;  %v13479_v12 = vadd.f32 0.5, %v5418_v15 }
 0x7f0   : > { %7925 = vtanh.f32 %v5296_v11  ;;  %v7924_v56 = vpop.eup %7923  ;;  %15259 = vst [vmem:[#allocation27_spill] sm:$0xff] %v13467_v16  ;;  %v5420_v49 = vmul.f32 0.5, %v7922_v7  ;;  %v5518_v11 = vadd.f32 %v5517_v21, %v13452_v8  ;;  %v5626_v38 = vmul.f32 %v13467_v16, %v13467_v16 }
 0x7f1   : > { %7927 = vtanh.f32 %v5297_v4  ;;  %v5143_v10 = vpop.f32.mrf.mxu2  ;;  %v13475_v3 = vadd.f32 0.5, %v5423_v57  ;;  %v5658_v4 = vadd.f32 %v5657_v20, %v5622_v47  ;;  %15262 = vst [vmem:[#allocation49_spill] sm:$0xff] %v13479_v12  ;;  %v5621_v57 = vmul.f32 %v13470_v31, %v13470_v31 }
 0x7f2   : > { %v5144_v0 = vadd.f32 %v5143_v10, %v12839_v25  ;;  %v5232_v1 = vpop.f32.mrf.mxu3  ;;  %v5422_v25 = vmul.f32 0.5, %v7924_v56  ;;  %v5519_v43 = vadd.f32 %v5518_v11, %v13458_v58  ;;  %v13487_v21 = vadd.f32 0.5, %v5420_v49 }
 0x7f3   : > { %15261 = vst [vmem:[#allocation46_spill] sm:$0xff] %v13475_v3  ;;  %v5659_v10 = vadd.f32 %v5658_v4, %v5624_v5  ;;  %v5628_v56 = vmul.f32 %v13475_v3, %v13475_v3  ;;  %v5554_v20 = vadd.f32 %v5553_v27, %v13470_v31 }
 0x7f4   : > { %v5233_v14 = vadd.f32 %v5232_v1, %v5144_v0  ;;  %15263 = vst [vmem:[#allocation29_spill] sm:$0xff] %v13487_v21  ;;  %v5520_v15 = vadd.f32 %v5519_v43, %v13467_v16  ;;  %v5693_v0 = vadd.f32 %v5692_v62, %v5619_v30  ;;  %v5623_v1 = vmul.f32 %v13479_v12, %v13479_v12  ;;  %v13508_v62 = vld [vmem:[%s14375_s14 + $0x48] sm:$0xff] }
 0x7f5   : > { %v13495_v11 = vadd.f32 0.5, %v5422_v25  ;;  %v5625_v43 = vmul.f32 %v13487_v21, %v13487_v21  ;;  %5905 = vmatpush.bf16.msra.mxu1 %v13508_v62  ;;  %v15286_v16 = vld [vmem:[#allocation18_spill] sm:$0xff] }
 0x7f6   : > { %v7926_v46 = vpop.eup %7925  ;;  %v5298_v44 = vmul.f32 0.5, %v5233_v14  ;;  %v5660_v14 = vadd.f32 %v5659_v10, %v5626_v38  ;;  %v5521_v5 = vadd.f32 %v5520_v15, %v13475_v3  ;;  %v5694_v4 = vadd.f32 %v5693_v0, %v5621_v57  ;;  %v15283_v3 = vld [vmem:[#allocation14_spill] sm:$0xff] }
 0x7f7   : > { %v7928_v7 = vpop.eup %7927  ;;  %v5424_v47 = vmul.f32 0.5, %v7926_v46  ;;  %15264 = vst [vmem:[#allocation51_spill] sm:$0xff] %v13495_v11  ;;  %v5555_v46 = vadd.f32 %v5554_v20, %v13479_v12  ;;  %v5627_v57 = vmul.f32 %v13495_v11, %v13495_v11 }
 0x7f8   : > { %v5425_v45 = vmul.f32 0.5, %v7928_v7  ;;  %7929 = vtanh.f32 %v5298_v44  ;;  %v5661_v30 = vadd.f32 %v5660_v14, %v5628_v56  ;;  %v5695_v38 = vadd.f32 %v5694_v4, %v5623_v1 }
 0x7f9   : > { %v13503_v44 = vadd.f32 0.5, %v5424_v47  ;;  %v5556_v7 = vadd.f32 %v5555_v46, %v13487_v21 }
 0x7fa   : > { %v13498_v49 = vadd.f32 0.5, %v5425_v45  ;;  %v5696_v45 = vadd.f32 %v5695_v38, %v5625_v43 }
 0x7fb   : > { %15266 = vst [vmem:[#allocation39_spill] sm:$0xff] %v13503_v44  ;;  %v5557_v0 = vadd.f32 %v5556_v7, %v13495_v11  ;;  %v5629_v56 = vmul.f32 %v13503_v44, %v13503_v44  ;;  %v15284_v11 = vld [vmem:[#allocation41_spill] sm:$0xff] }
 0x7fc   : > { %15265 = vst [vmem:[#allocation12_spill] sm:$0xff] %v13498_v49  ;;  %v5522_v25 = vadd.f32 %v5521_v5, %v13498_v49  ;;  %v5630_v27 = vmul.f32 %v13498_v49, %v13498_v49  ;;  %v5697_v1 = vadd.f32 %v5696_v45, %v5627_v57  ;;  %v15292_v49 = vld [vmem:[#allocation44_spill] sm:$0xff] }
 0x7fd   : > { %v5558_v4 = vadd.f32 %v5557_v0, %v13503_v44  ;;  %v15290_v44 = vld [vmem:[#allocation30_spill] sm:$0xff] }
 0x7fe   : > { %v7930_v10 = vpop.eup %7929  ;;  %v5523_v47 = vrot.slane %v5522_v25, 4  ;;  %v5662_v15 = vadd.f32 %v5661_v30, %v5630_v27  ;;  %v5698_v26 = vadd.f32 %v5697_v1, %v5629_v56  ;;  %v13534_v56 = vld [vmem:[%s14375_s14 + $0x40] sm:$0xff]  ;;  %v8063_v1 = vld [vmem:[%s14375_s14 + $0x38] sm:$0xff] }
 0x7ff   : > { %v5426_v20 = vmul.f32 0.5, %v7930_v10  ;;  %5906 = vmatpush.bf16.msra.mxu1 %v13534_v56 }
 0x800   : > { %v5524_v14 = vadd.f32 %v5523_v47, %v5522_v25  ;;  %v5663_v5 = vrot.slane %v5662_v15, 4 }
 0x801   : > { %v13521_v46 = vadd.f32 0.5, %v5426_v20 }
 0x802   : > { %v5525_v31 = vrot.slane %v5524_v14, 2  ;;  %v5664_v8 = vadd.f32 %v5663_v5, %v5662_v15  ;;  %v13529_v15 = vld [vmem:[%s14375_s14] sm:$0xff] }
 0x803   : > { %15267 = vst [vmem:[#allocation31_spill] sm:$0xff] %v13521_v46  ;;  %v5559_v13 = vadd.f32 %v5558_v4, %v13521_v46  ;;  %v5631_v43 = vmul.f32 %v13521_v46, %v13521_v46  ;;  %5893 = vmatpush.bf16.msra.mxu0 %v13529_v15  ;;  %v8064_v4 = vld [vmem:[%s14375_s14 + $0x78] sm:$0xff]  ;;  %v15285_v46 = vld [vmem:[#allocation15_spill] sm:$0xff] }
 0x804   : > { %v5526_v30 = vadd.f32 %v5525_v31, %v5524_v14  ;;  %v5665_v27 = vrot.slane %v5664_v8, 2  ;;  %v15268_v14 = vld [vmem:[#allocation2_spill] sm:$0xff]  ;;  %6169 = vmatpush.bf16.msrb.mxu1 %v8064_v4 }
 0x805   : > { %v5560_v38 = vrot.slane %v5559_v13, 4  ;;  %v5699_v7 = vadd.f32 %v5698_v26, %v5631_v43 }
 0x806   : > { %v5527_v25 = vrot.slane %v5526_v30, 1  ;;  %v5666_v10 = vadd.f32 %v5665_v27, %v5664_v8 }
 0x807   : > { %v5561_v57 = vadd.f32 %v5560_v38, %v5559_v13  ;;  %v5700_v47 = vrot.slane %v5699_v7, 4  ;;  %6080 = vmatpush.bf16.msrb.mxu0 %v8063_v1 }
 0x808   : > { %v5528_v45 = vadd.f32 %v5527_v25, %v5526_v30  ;;  %v5667_v0 = vrot.slane %v5666_v10, 1 }
 0x809   : > { %v5562_v31 = vrot.slane %v5561_v57, 2  ;;  %v5701_v20 = vadd.f32 %v5700_v47, %v5699_v7  ;;  %v13554_v7 = vld [vmem:[%s613_s0] sm:$0xf]  ;;  %v8065_v47 = vld [vmem:[%s14375_s14 + $0x30] sm:$0xff] }
 0x80a   : > { %v13537_v26 = vmul.f32 %v5528_v45, %v15268_v14  ;;  %v5668_v8 = vadd.f32 %v5667_v0, %v5666_v10  ;;  %v8066_v45 = vld [vmem:[%s14375_s14 + $0x70] sm:$0xff] }
 0x80b   : > { %v5563_v13 = vadd.f32 %v5562_v31, %v5561_v57  ;;  %v5702_v5 = vrot.slane %v5701_v20, 2  ;;  %6081 = vmatpush.bf16.msrb.mxu0 %v8065_v47  ;;  %6170 = vmatpush.bf16.msrb.mxu1 %v8066_v45  ;;  %v5775_v31 = vperm.slane %v13554_v7, 1  ;;  %v8070_v45 = vld [vmem:[%s14375_s14 + $0x60] sm:$0xff] }
 0x80c   : > { %v5706_v43 = vmul.f32 %v5668_v8, %v15268_v14  ;;  %v5708_v30 = vmul.f32 %v13537_v26, %v13537_v26 }
 0x80d   : > { %v5564_v27 = vrot.slane %v5563_v13, 1  ;;  %v5703_v38 = vadd.f32 %v5702_v5, %v5701_v20 }
 0x80e   : > { %v5710_v25 = vsub.f32 %v5706_v43, %v5708_v30  ;;  %v8067_v43 = vld [vmem:[%s14375_s14 + $0x28] sm:$0xff] }
 0x80f   : > { %v5565_v10 = vadd.f32 %v5564_v27, %v5563_v13  ;;  %v5704_v57 = vrot.slane %v5703_v38, 1  ;;  %v5779_v13 = vpack.c.bf16 %v5775_v31, %v5775_v31  ;;  %6082 = vmatpush.bf16.msrb.mxu0 %v8067_v43  ;;  %v8068_v27 = vld [vmem:[%s14375_s14 + $0x68] sm:$0xff]  ;;  %v15279_v43 = vld [vmem:[#allocation33_spill] sm:$0xff] }
 0x810   : > { %v5712_v0 = vmax.f32 %v5710_v25, 0.0  ;;  %6171 = vmatpush.bf16.msrb.mxu1 %v8068_v27 }
 0x811   : > { %v13564_v20 = vmul.f32 %v5565_v10, %v15268_v14  ;;  %v5705_v8 = vadd.f32 %v5704_v57, %v5703_v38  ;;  %v5783_v30 = vshrl.u32 %v5779_v13, 16  ;;  %v5776_v38 = vperm.slane %v13554_v7, 3  ;;  %v8069_v57 = vld [vmem:[%s14375_s14 + $0x20] sm:$0xff]  ;;  %v8071_v13 = vld [vmem:[%s14375_s14 + $0x18] sm:$0xff] }
 0x812   : > { %v13566_v5 = vadd.f32 1e-05, %v5712_v0 }
 0x813   : > { %v5707_v1 = vmul.f32 %v5705_v8, %v15268_v14  ;;  %v5709_v4 = vmul.f32 %v13564_v20, %v13564_v20  ;;  %5894 = vmatmul.bf16.vlgmr.msra.gmra.mxu0 %v5783_v30  ;;  %v5780_v14 = vpack.c.bf16 %v5776_v38, %v5776_v38  ;;  %v15269_v38 = vld [vmem:[#allocation28_spill] sm:$0xff] }
 0x814   : > { %7931 = vrsqrt.f32 %v13566_v5  ;;  %6083 = vmatpush.bf16.msrb.mxu0 %v8069_v57  ;;  %6172 = vmatpush.bf16.msrb.mxu1 %v8070_v45  ;;  %vm5722_vm12 = vweird.f32 %v13566_v5  ;;  %v15297_v40 = vsub.f32 %v15269_v38, %v13537_v26  ;;  %v15299_v38 = vsub.f32 %v13062_v63, %v13537_v26 }
 0x815   : > { %v5711_v25 = vsub.f32 %v5707_v1, %v5709_v4  ;;  %v5786_v47 = vshrl.u32 %v5780_v14, 16  ;;  %v8072_v1 = vld [vmem:[%s14375_s14 + $0x58] sm:$0xff] }
 0x817   : > { %v5713_v10 = vmax.f32 %v5711_v25, 0.0  ;;  %5907 = vmatmul.bf16.vlgmr.msra.gmra.mxu1 %v5786_v47  ;;  %v15274_v47 = vld [vmem:[#allocation25_spill] sm:$0xff] }
 0x818   : > { %6084 = vmatpush.bf16.msrb.mxu0 %v8071_v13  ;;  %6173 = vmatpush.bf16.msrb.mxu1 %v8072_v1  ;;  %v15270_v13 = vld [vmem:[#allocation17_spill] sm:$0xff]  ;;  %v5915_v25 = vsub.f32 %v15274_v47, %v13564_v20 }
 0x819   : > { %v5715_v0 = vadd.f32 1e-05, %v5713_v10 }
 0x81a   : > { %v13585_v31 = vpop.eup %7931 }
 0x81b   : > { %v5717_v8 = vmul.f32 %v13585_v31, %v13566_v5  ;;  %7933 = vrsqrt.f32 %v5715_v0  ;;  %vm5732_vm13 = vweird.f32 %v5715_v0  ;;  %vm5723_vm14 = vweird.f32 %v13585_v31  ;;  %v15289_v5 = vld [vmem:[#allocation13_spill] sm:$0xff] }
 0x81c   : > { %6085 = vmatpush.bf16.msrb.mxu0 %v13269_v53  ;;  %6174 = vmatpush.bf16.msrb.mxu1 %v13278_v32  ;;  %v15276_v32 = vld [vmem:[#allocation3_spill] sm:$0xff]  ;;  %vm5724_vm0 = vmor %vm5722_vm12, %vm5723_vm14 }
 0x81d   : > { %v5718_v4 = vmul.f32 %v13585_v31, %v5717_v8  ;;  %v5919_v14 = vsub.f32 %v15276_v32, %v13564_v20  ;;  %v15281_v32 = vld [vmem:[#allocation9_spill] sm:$0xff] }
 0x81f   : > { %v5719_v53 = vmul.f32 0.5, %v5718_v4 }
 0x820   : > { %6086 = vmatpush.bf16.msrb.mxu0 %v13408_v18  ;;  %6175 = vmatpush.bf16.msrb.mxu1 %v13508_v62  ;;  %v15273_v18 = vld [vmem:[#allocation10_spill] sm:$0xff] }
 0x821   : > { %v7934_v30 = vpop.eup %7933  ;;  %v5720_v10 = vsub.f32 1.5, %v5719_v53  ;;  %v5913_v45 = vsub.f32 %v15273_v18, %v13564_v20  ;;  %v15277_v53 = vld [vmem:[#allocation7_spill] sm:$0xff] }
 0x822   : > { %v5727_v57 = vmul.f32 %v7934_v30, %v5715_v0  ;;  %vm5733_vm11 = vweird.f32 %v7934_v30  ;;  %v15282_v0 = vld [vmem:[#allocation11_spill] sm:$0xff] }
 0x823   : > { %v5721_v18 = vmul.f32 %v13585_v31, %v5720_v10  ;;  %vm5734_vm15 = vmor %vm5732_vm13, %vm5733_vm11 }
 0x824   : > { %v5728_v4 = vmul.f32 %v7934_v30, %v5727_v57  ;;  %6087 = vmatpush.bf16.msrb.mxu0 %v13529_v15  ;;  %v15271_v57 = vld [vmem:[#allocation40_spill] sm:$0xff]  ;;  %6176 = vmatpush.bf16.msrb.mxu1 %v13534_v56 }
 0x825   : > { %v15275_v15 = vld [vmem:[#allocation4_spill] sm:$0xff]  ;;  %v5725_v10 = vsel %vm5724_vm0, %v13585_v31, %v5721_v18 }
 0x826   : > { %v5729_v1 = vmul.f32 0.5, %v5728_v4  ;;  %v15272_v4 = vld [vmem:[#allocation34_spill] sm:$0xff]  ;;  %v5917_v8 = vsub.f32 %v15275_v15, %v13564_v20  ;;  %v15278_v56 = vld [vmem:[#allocation32_spill] sm:$0xff]  ;;  %v15280_v15 = vld [vmem:[#allocation35_spill] sm:$0xff] }
 0x827   : > { %v5923_v27 = vsub.f32 %v15278_v56, %v13564_v20 }
 0x828   : > { %v5730_v62 = vsub.f32 1.5, %v5729_v1 }
 0x82a   : > { %v5731_v47 = vmul.f32 %v7934_v30, %v5730_v62  ;;  %v15288_v62 = vld [vmem:[#allocation36_spill] sm:$0xff] }
 0x82c   : > { %v5735_v1 = vsel %vm5734_vm15, %v7934_v30, %v5731_v47  ;;  %v15287_v30 = vld [vmem:[#allocation37_spill] sm:$0xff] }
 0x82d   : > { %v5738_v56 = vrot.slane %v5735_v1, 6 }
 0x82f   : > { %v5739_v1 = vsel %vm995_vm1, %v5725_v10, %v5738_v56  ;;  %v15291_v56 = vld [vmem:[#allocation47_spill] sm:$0xff]  ;;  %v15296_v10 = vsub.f32 %v13015_v55, %v13537_v26 }
 0x830   : > { %v5741_v18 = vmul.f32 %v5739_v1, %v13554_v7 }
 0x832   : > { %v5977_v1 = vperm.slane %v5741_v18, 0  ;;  %v5978_v58 = vperm.slane %v5741_v18, 2 }
 0x834   : > { %v13726_v47 = vperm.slane %v5977_v1, 0  ;;  %v13728_v18 = vperm.slane %v5978_v58, 0  ;;  %v15294_v1 = vld [vmem:[#allocation48_spill] sm:$0xff]  ;;  %v15295_v58 = vsub.f32 %v13011_v60, %v13537_v26  ;;  %v15298_v60 = vsub.f32 %v13054_v42, %v13537_v26 }
 0x835   : > { %v5965_v7 = vsub.f32 %v15294_v1, %v13564_v20  ;;  %v15300_v42 = vsub.f32 %v13088_v28, %v13537_v26  ;;  %v15346_v28 = vld [vmem:[#allocation45_spill] sm:$0xff] }
 0x836   : > { %v5983_v21 = vmul.f32 %v13726_v47, %v15295_v58  ;;  %v5984_v22 = vmul.f32 %v13728_v18, %v5913_v45  ;;  %v5985_v12 = vmul.f32 %v13726_v47, %v15296_v10  ;;  %v5986_v52 = vmul.f32 %v13728_v18, %v5915_v25 }
 0x837   : > { %v13756_v31 = vmul.f32 %v13726_v47, %v15297_v40  ;;  %v13762_v58 = vmul.f32 %v13726_v47, %v15298_v60  ;;  %v13765_v45 = vmul.f32 %v13728_v18, %v5917_v8  ;;  %v13768_v55 = vmul.f32 %v13728_v18, %v5919_v14 }
 0x838   : > { %v6047_v10 = vpack.c.bf16 %v5985_v12, %v5983_v21  ;;  %v6048_v25 = vpack.c.bf16 %v5986_v52, %v5984_v22  ;;  %v13774_v40 = vmul.f32 %v13726_v47, %v15299_v38  ;;  %v13780_v60 = vmul.f32 %v13726_v47, %v15300_v42 }
 0x839   : > { %v6049_v8 = vpack.c.bf16 %v13762_v58, %v13756_v31  ;;  %v6050_v14 = vpack.c.bf16 %v13768_v55, %v13765_v45  ;;  %v15301_v52 = vsub.f32 %v15277_v53, %v13564_v20  ;;  %v13793_v22 = vmul.f32 %v13728_v18, %v5923_v27  ;;  %v15341_v27 = vld [vmem:[#allocation43_spill] sm:$0xff]  ;;  %v15352_v58 = vld [vmem:[#allocation24_spill] sm:$0xff] }
 0x83a   : > { %6088 = vmatmul.bf16.vlgmr.msrb.gmra.mxu0 %v6047_v10  ;;  %6177 = vmatmul.bf16.vlgmr.msrb.gmra.mxu1 %v6048_v25  ;;  %v15302_v12 = vsub.f32 %v13096_v34, %v13537_v26  ;;  %v15303_v53 = vsub.f32 %v13123_v9, %v13537_v26  ;;  %v15304_v10 = vsub.f32 %v15279_v43, %v13564_v20  ;;  %v15354_v55 = vld [vmem:[#allocation27_spill] sm:$0xff] }
 0x83b   : > { %v13790_v63 = vmul.f32 %v13728_v18, %v15301_v52  ;;  %v15305_v34 = vsub.f32 %v15280_v15, %v13564_v20  ;;  %v15306_v9 = vsub.f32 %v13137_v2, %v13537_v26  ;;  %v15307_v43 = vsub.f32 %v13160_v36, %v13537_v26 }
 0x83c   : > { %v13801_v21 = vmul.f32 %v13726_v47, %v15302_v12  ;;  %v13807_v38 = vmul.f32 %v13726_v47, %v15303_v53  ;;  %v13815_v25 = vmul.f32 %v13728_v18, %v15304_v10  ;;  %v15308_v15 = vsub.f32 %v15281_v32, %v13564_v20 }
 0x83d   : > { %v13821_v42 = vmul.f32 %v13728_v18, %v15305_v34  ;;  %v13827_v52 = vmul.f32 %v13726_v47, %v15306_v9  ;;  %v13835_v53 = vmul.f32 %v13726_v47, %v15307_v43  ;;  %v15309_v2 = vsub.f32 %v15282_v0, %v13564_v20 }
 0x83e   : > { %v13841_v10 = vmul.f32 %v13728_v18, %v15308_v15  ;;  %v15310_v36 = vsub.f32 %v13177_v17, %v13537_v26  ;;  %v15311_v32 = vsub.f32 %v13192_v37, %v13537_v26  ;;  %v15312_v0 = vsub.f32 %v15283_v3, %v13564_v20 }
 0x83f   : > { %v13847_v34 = vmul.f32 %v13728_v18, %v15309_v2  ;;  %v15315_v9 = vsub.f32 %v15271_v57, %v13537_v26  ;;  %v15318_v57 = vsub.f32 %v15272_v4, %v13537_v26 }
 0x840   : > { %v13855_v43 = vmul.f32 %v13726_v47, %v15310_v36  ;;  %v13861_v15 = vmul.f32 %v13726_v47, %v15311_v32  ;;  %v13867_v2 = vmul.f32 %v13728_v18, %v15312_v0  ;;  %v15313_v36 = vsub.f32 %v15284_v11, %v13564_v20 }
 0x841   : > { %v15314_v32 = vsub.f32 %v15270_v13, %v13537_v26  ;;  %v13891_v17 = vmul.f32 %v13726_v47, %v15315_v9  ;;  %v15316_v11 = vsub.f32 %v15285_v46, %v13564_v20  ;;  %v15317_v13 = vsub.f32 %v15286_v16, %v13564_v20 }
 0x842   : > { %v13877_v37 = vmul.f32 %v13728_v18, %v15313_v36  ;;  %v13911_v9 = vmul.f32 %v13726_v47, %v15318_v57  ;;  %v15319_v46 = vsub.f32 %v15287_v30, %v13537_v26  ;;  %v15320_v16 = vsub.f32 %v15288_v62, %v13564_v20 }
 0x843   : > { %v13883_v3 = vmul.f32 %v13726_v47, %v15314_v32  ;;  %v13897_v36 = vmul.f32 %v13728_v18, %v15316_v11  ;;  %v13903_v32 = vmul.f32 %v13728_v18, %v15317_v13  ;;  %v15321_v57 = vsub.f32 %v13272_v6, %v13564_v20 }
 0x844   : > { %v13917_v11 = vmul.f32 %v13726_v47, %v15319_v46  ;;  %v13923_v13 = vmul.f32 %v13728_v18, %v15320_v16  ;;  %v15322_v46 = vsub.f32 %v13282_v19, %v13537_v26  ;;  %v15323_v0 = vsub.f32 %v13310_v33, %v13537_v26 }
 0x845   : > { %v13933_v30 = vmul.f32 %v13728_v18, %v15321_v57  ;;  %v15324_v6 = vsub.f32 %v13307_v35, %v13564_v20  ;;  %v15325_v19 = vsub.f32 %v13314_v54, %v13564_v20  ;;  %v15326_v33 = vsub.f32 %v13324_v61, %v13537_v26 }
 0x846   : > { %v13939_v62 = vmul.f32 %v13726_v47, %v15322_v46  ;;  %v13947_v4 = vmul.f32 %v13726_v47, %v15323_v0  ;;  %v15327_v35 = vsub.f32 %v13341_v24, %v13537_v26  ;;  %v15328_v54 = vsub.f32 %v15289_v5, %v13564_v20 }
 0x847   : > { %v13953_v57 = vmul.f32 %v13728_v18, %v15324_v6  ;;  %v13959_v46 = vmul.f32 %v13728_v18, %v15325_v19  ;;  %v6062_v16 = vpack.c.bf16 %v13933_v30, %v13923_v13  ;;  %v13967_v0 = vmul.f32 %v13726_v47, %v15326_v33  ;;  %v15336_v13 = vld [vmem:[#allocation38_spill] sm:$0xff] }
 0x848   : > { %v13973_v6 = vmul.f32 %v13726_v47, %v15327_v35  ;;  %v13979_v19 = vmul.f32 %v13728_v18, %v15328_v54  ;;  %v15329_v30 = vsub.f32 %v13354_v51, %v13564_v20  ;;  %v15330_v33 = vsub.f32 %v13358_v41, %v13537_v26 }
 0x849   : > { %v15331_v54 = vsub.f32 %v13382_v48, %v13537_v26  ;;  %v15332_v51 = vsub.f32 %v13377_v59, %v13564_v20  ;;  %v15333_v41 = vsub.f32 %v13396_v50, %v13564_v20  ;;  %v15334_v48 = vsub.f32 %v13400_v29, %v13537_v26 }
 0x84a   : > { %v13989_v24 = vmul.f32 %v13728_v18, %v15329_v30  ;;  %v13995_v5 = vmul.f32 %v13726_v47, %v15330_v33  ;;  %v15335_v59 = vsub.f32 %v13422_v23, %v13537_v26  ;;  %v15337_v50 = vsub.f32 %v15336_v13, %v13564_v20  ;;  %6093 = vmatmul.bf16.gmra.mxu0 %v6049_v8 }
 0x84b   : > { %v14003_v61 = vmul.f32 %v13726_v47, %v15331_v54  ;;  %v14009_v30 = vmul.f32 %v13728_v18, %v15332_v51  ;;  %v14015_v33 = vmul.f32 %v13728_v18, %v15333_v41  ;;  %v14023_v54 = vmul.f32 %v13726_v47, %v15334_v48  ;;  %v15338_v48 = vld [vmem:[#allocation16_spill] sm:$0xff]  ;;  %6182 = vmatmul.bf16.gmra.mxu1 %v6050_v14 }
 0x84c   : > { %v14029_v51 = vmul.f32 %v13726_v47, %v15335_v59  ;;  %v14035_v41 = vmul.f32 %v13728_v18, %v15337_v50  ;;  %v15339_v12 = vsub.f32 %v15338_v48, %v13564_v20  ;;  %v15340_v59 = vsub.f32 %v15290_v44, %v13537_v26  ;;  %v15362_v50 = vld [vmem:[#allocation12_spill] sm:$0xff] }
 0x84d   : > { %v15342_v35 = vsub.f32 %v15341_v27, %v13537_v26  ;;  %v15343_v48 = vsub.f32 %v13442_v39, %v13564_v20  ;;  %v15344_v44 = vsub.f32 %v15291_v56, %v13564_v20  ;;  %v15345_v27 = vsub.f32 %v15292_v49, %v13537_v26  ;;  %v15360_v49 = vld [vmem:[#allocation46_spill] sm:$0xff] }
 0x84e   : > { %v14045_v23 = vmul.f32 %v13728_v18, %v15339_v12  ;;  %v14051_v13 = vmul.f32 %v13726_v47, %v15340_v59  ;;  %v15347_v39 = vsub.f32 %v15346_v28, %v13537_v26  ;;  %v14091_v56 = vmul.f32 %v13728_v18, %v5965_v7  ;;  %v15358_v28 = vld [vmem:[#allocation51_spill] sm:$0xff] }
 0x84f   : > { %v14059_v29 = vmul.f32 %v13726_v47, %v15342_v35  ;;  %v14065_v12 = vmul.f32 %v13728_v18, %v15343_v48  ;;  %v14071_v59 = vmul.f32 %v13728_v18, %v15344_v44  ;;  %v14079_v35 = vmul.f32 %v13726_v47, %v15345_v27  ;;  %v15349_v44 = vld [vmem:[#allocation49_spill] sm:$0xff] }
 0x850   : > { %v14085_v48 = vmul.f32 %v13726_v47, %v15347_v39  ;;  %15348 = vst [vmem:[#allocation42_spill] sm:$0xff] %v14091_v56  ;;  %v15350_v1 = vsub.f32 %v15349_v44, %v13564_v20  ;;  %v15353_v8 = vsub.f32 %v15352_v58, %v13537_v26  ;;  %v15355_v14 = vsub.f32 %v15354_v55, %v13537_v26  ;;  %v15356_v39 = vld [vmem:[#allocation29_spill] sm:$0xff]  ;;  %v15364_v56 = vld [vmem:[#allocation39_spill] sm:$0xff] }
 0x851   : > { %v15357_v44 = vsub.f32 %v15356_v39, %v13564_v20  ;;  %v15359_v58 = vsub.f32 %v15358_v28, %v13564_v20  ;;  %v15361_v55 = vsub.f32 %v15360_v49, %v13537_v26  ;;  %v15363_v39 = vsub.f32 %v15362_v50, %v13537_v26 }
 0x852   : > { %v14107_v7 = vmul.f32 %v13728_v18, %v15350_v1  ;;  %v14115_v45 = vmul.f32 %v13726_v47, %v15353_v8  ;;  %v14121_v27 = vmul.f32 %v13726_v47, %v15355_v14  ;;  %v15365_v28 = vsub.f32 %v15364_v56, %v13564_v20 }
 0x853   : > { %v14127_v1 = vmul.f32 %v13728_v18, %v15357_v44  ;;  %v14135_v8 = vmul.f32 %v13728_v18, %v15359_v58  ;;  %v14141_v14 = vmul.f32 %v13726_v47, %v15361_v55  ;;  %v14147_v44 = vmul.f32 %v13726_v47, %v15363_v39 }
 0x854   : > { %15351 = vst [vmem:[#allocation20_spill] sm:$0xff] %v14107_v7  ;;  %v6075_v31 = vpack.c.bf16 %v14121_v27, %v14115_v45  ;;  %v14155_v58 = vmul.f32 %v13728_v18, %v15365_v28  ;;  %v15366_v7 = vld [vmem:[#allocation31_spill] sm:$0xff]  ;;  %v15368_v56 = vpack.c.bf16 %v13780_v60, %v13774_v40  ;;  %v15369_v39 = vpack.c.bf16 %v13793_v22, %v13790_v63 }
 0x855   : > { %v15367_v49 = vsub.f32 %v15366_v7, %v13564_v20  ;;  %v6076_v26 = vpack.c.bf16 %v14135_v8, %v14127_v1  ;;  %v6077_v47 = vpack.c.bf16 %v14147_v44, %v14141_v14  ;;  %v15370_v20 = vpack.c.bf16 %v13807_v38, %v13801_v21 }
 0x856   : > { %v15372_v7 = vpack.c.bf16 %v13835_v53, %v13827_v52  ;;  %v15373_v40 = vpack.c.bf16 %v13847_v34, %v13841_v10  ;;  %v15374_v60 = vpack.c.bf16 %v13861_v15, %v13855_v43  ;;  %v15375_v63 = vpack.c.bf16 %v13877_v37, %v13867_v2  ;;  %v5781_v10 = vld [vmem:[%s14376_s15] sm:$0x1] }
 0x857   : > { %v14161_v55 = vmul.f32 %v13728_v18, %v15367_v49  ;;  %v15371_v18 = vpack.c.bf16 %v13821_v42, %v13815_v25  ;;  %v15376_v38 = vpack.c.bf16 %v13891_v17, %v13883_v3  ;;  %v15377_v25 = vpack.c.bf16 %v13903_v32, %v13897_v36 }
 0x858   : > { %v15378_v53 = vpack.c.bf16 %v13917_v11, %v13911_v9  ;;  %v15379_v36 = vpack.c.bf16 %v13947_v4, %v13939_v62  ;;  %v15380_v32 = vpack.c.bf16 %v13959_v46, %v13953_v57  ;;  %v15381_v57 = vpack.c.bf16 %v13973_v6, %v13967_v0 }
 0x859   : > { %v6078_v50 = vpack.c.bf16 %v14161_v55, %v14155_v58  ;;  %v15382_v46 = vpack.c.bf16 %v13989_v24, %v13979_v19 }
 0x85a   : > { %6098 = vmatmul.bf16.gmra.mxu0 %v15368_v56 }
 0x85b   : > { %6187 = vmatmul.bf16.gmra.mxu1 %v15369_v39 }
 0x86a   : > { %6103 = vmatmul.bf16.gmra.mxu0 %v15370_v20 }
 0x86b   : > { %6192 = vmatmul.bf16.gmra.mxu1 %v15371_v18 }
 0x87a   : > { %6108 = vmatmul.bf16.gmra.mxu0 %v15372_v7 }
 0x87b   : > { %6197 = vmatmul.bf16.gmra.mxu1 %v15373_v40 }
 0x88a   : > { %6113 = vmatmul.bf16.gmra.mxu0 %v15374_v60 }
 0x88b   : > { %6202 = vmatmul.bf16.gmra.mxu1 %v15375_v63 }
 0x890   : > { %v5895_v22 = vpop.f32.mrf.mxu0 }
 0x891   : > { %v5896_v34 = vadd.f32 %v5895_v22, %v5781_v10 }
 0x894   : > { %v5908_v21 = vpop.f32.mrf.mxu1 }
 0x895   : > { %v5909_v43 = vadd.f32 %v5908_v21, %v5896_v34 }
 0x897   : > { %v14205_v15 = vperm.slane %v5909_v43, 0 }
 0x898   : > { %v5897_v42 = vpop.f32.mrf.mxu0 }
 0x89a   : > { %6118 = vmatmul.bf16.gmra.mxu0 %v15376_v38 }
 0x89b   : > { %6207 = vmatmul.bf16.gmra.mxu1 %v15377_v25 }
 0x89c   : > { %v5910_v52 = vpop.f32.mrf.mxu1 }
 0x8aa   : > { %6123 = vmatmul.bf16.gmra.mxu0 %v15378_v53 }
 0x8ab   : > { %6212 = vmatmul.bf16.gmra.mxu1 %v6062_v16 }
 0x8b7   : > { %v6089_v2 = vpop.f32.mrf.mxu0  ;;  %v6178_v17 = vpop.f32.mrf.mxu1 }
 0x8b8   : > { %v6090_v37 = vadd.f32 %v6089_v2, %v14205_v15 }
 0x8ba   : > { %v6179_v3 = vadd.f32 %v6178_v17, %v6090_v37  ;;  %6128 = vmatmul.bf16.gmra.mxu0 %v15379_v36 }
 0x8bb   : > { %6217 = vmatmul.bf16.gmra.mxu1 %v15380_v32 }
 0x8bc   : > { %v6258_v9 = vmul.f32 0.5, %v6179_v3 }
 0x8be   : > { %7935 = vtanh.f32 %v6258_v9 }
 0x8bf   : > { %v6091_v11 = vpop.f32.mrf.mxu0  ;;  %v6180_v16 = vpop.f32.mrf.mxu1 }
 0x8c0   : > { %v6092_v28 = vadd.f32 %v6091_v11, %v14205_v15 }
 0x8c2   : > { %v6181_v49 = vadd.f32 %v6180_v16, %v6092_v28  ;;  %v15383_v16 = vpack.c.bf16 %v14003_v61, %v13995_v5  ;;  %v15384_v28 = vpack.c.bf16 %v14015_v33, %v14009_v30 }
 0x8c4   : > { %v7936_v56 = vpop.eup %7935  ;;  %v6259_v39 = vmul.f32 0.5, %v6181_v49 }
 0x8c5   : > { %v6322_v20 = vmul.f32 0.5, %v7936_v56 }
 0x8c6   : > { %7937 = vtanh.f32 %v6259_v39 }
 0x8c7   : > { %v6354_v18 = vadd.f32 0.5, %v6322_v20  ;;  %v6094_v7 = vpop.f32.mrf.mxu0 }
 0x8c8   : > { %v6183_v40 = vpop.f32.mrf.mxu1  ;;  %v6095_v4 = vadd.f32 %v6094_v7, %v14205_v15 }
 0x8c9   : > { %v6386_v62 = vsub.f32 0.0, %v6354_v18 }
 0x8ca   : > { %v6184_v60 = vadd.f32 %v6183_v40, %v6095_v4  ;;  %6133 = vmatmul.bf16.gmra.mxu0 %v15381_v57 }
 0x8cb   : > { %6222 = vmatmul.bf16.gmra.mxu1 %v15382_v46  ;;  %v7161_v63 = vadd.f32 -1e-12, %v6386_v62 }
 0x8cc   : > { %v7938_v22 = vpop.eup %7937  ;;  %v6260_v21 = vmul.f32 0.5, %v6184_v60 }
 0x8cd   : > { %v6450_v38 = vmul.f32 1.442695, %v7161_v63  ;;  %v6323_v25 = vmul.f32 0.5, %v7938_v22 }
 0x8ce   : > { %7939 = vtanh.f32 %v6260_v21 }
 0x8cf   : > { %7941 = vpow2.f32 %v6450_v38  ;;  %v6355_v42 = vadd.f32 0.5, %v6323_v25  ;;  %v6096_v52 = vpop.f32.mrf.mxu0 }
 0x8d0   : > { %v6185_v53 = vpop.f32.mrf.mxu1  ;;  %v6097_v10 = vadd.f32 %v6096_v52, %v14205_v15 }
 0x8d1   : > { %v6387_v34 = vsub.f32 0.0, %v6355_v42 }
 0x8d2   : > { %v6186_v0 = vadd.f32 %v6185_v53, %v6097_v10  ;;  %v15385_v10 = vpack.c.bf16 %v14029_v51, %v14023_v54 }
 0x8d3   : > { %v7162_v6 = vadd.f32 -1e-12, %v6387_v34  ;;  %v15386_v34 = vpack.c.bf16 %v14045_v23, %v14035_v41 }
 0x8d4   : > { %v7940_v19 = vpop.eup %7939  ;;  %v6261_v24 = vmul.f32 0.5, %v6186_v0 }
 0x8d5   : > { %v7942_v43 = vpop.eup %7941  ;;  %v6452_v2 = vmul.f32 1.442695, %v7162_v6  ;;  %v6324_v17 = vmul.f32 0.5, %v7940_v19 }
 0x8d6   : > { %6514 = vst.msk [vmem:[%s14228_s18] sm:$0xff] %vm781_vm2, %v7942_v43  ;;  %7943 = vtanh.f32 %v6261_v24 }
 0x8d7   : > { %7945 = vpow2.f32 %v6452_v2  ;;  %v6356_v37 = vadd.f32 0.5, %v6324_v17  ;;  %v6099_v3 = vpop.f32.mrf.mxu0 }
 0x8d8   : > { %v6188_v36 = vpop.f32.mrf.mxu1  ;;  %v6100_v32 = vadd.f32 %v6099_v3, %v14205_v15 }
 0x8d9   : > { %v6388_v9 = vsub.f32 0.0, %v6356_v37 }
 0x8da   : > { %v6189_v11 = vadd.f32 %v6188_v36, %v6100_v32  ;;  %6138 = vmatmul.bf16.gmra.mxu0 %v15383_v16 }
 0x8db   : > { %6227 = vmatmul.bf16.gmra.mxu1 %v15384_v28  ;;  %v7163_v49 = vadd.f32 -1e-12, %v6388_v9 }
 0x8dc   : > { %v7944_v56 = vpop.eup %7943  ;;  %v6262_v39 = vmul.f32 0.5, %v6189_v11 }
 0x8dd   : > { %v7946_v20 = vpop.eup %7945  ;;  %v6454_v18 = vmul.f32 1.442695, %v7163_v49  ;;  %v6325_v7 = vmul.f32 0.5, %v7944_v56 }
 0x8de   : > { %6515 = vst.msk [vmem:[%s14228_s18 + $0x8] sm:$0xff] %vm781_vm2, %v7946_v20  ;;  %7947 = vtanh.f32 %v6262_v39 }
 0x8df   : > { %7949 = vpow2.f32 %v6454_v18  ;;  %v6357_v40 = vadd.f32 0.5, %v6325_v7  ;;  %v6101_v4 = vpop.f32.mrf.mxu0  ;;  %v15387_v7 = vpack.c.bf16 %v14059_v29, %v14051_v13 }
 0x8e0   : > { %v6190_v62 = vpop.f32.mrf.mxu1  ;;  %v6102_v61 = vadd.f32 %v6101_v4, %v14205_v15 }
 0x8e1   : > { %v6389_v5 = vsub.f32 0.0, %v6357_v40  ;;  %v15388_v40 = vpack.c.bf16 %v14071_v59, %v14065_v12 }
 0x8e2   : > { %v6191_v60 = vadd.f32 %v6190_v62, %v6102_v61 }
 0x8e3   : > { %v7164_v30 = vadd.f32 -1e-12, %v6389_v5 }
 0x8e4   : > { %v7948_v33 = vpop.eup %7947  ;;  %v6263_v57 = vmul.f32 0.5, %v6191_v60 }
 0x8e5   : > { %v7950_v46 = vpop.eup %7949  ;;  %v6456_v63 = vmul.f32 1.442695, %v7164_v30  ;;  %v6326_v22 = vmul.f32 0.5, %v7948_v33 }
 0x8e6   : > { %6516 = vst.msk [vmem:[%s14228_s18 + $0x10] sm:$0xff] %vm781_vm2, %v7950_v46  ;;  %7951 = vtanh.f32 %v6263_v57 }
 0x8e7   : > { %7953 = vpow2.f32 %v6456_v63  ;;  %v6358_v21 = vadd.f32 0.5, %v6326_v22  ;;  %v6104_v38 = vpop.f32.mrf.mxu0 }
 0x8e8   : > { %v6193_v25 = vpop.f32.mrf.mxu1  ;;  %v6105_v42 = vadd.f32 %v6104_v38, %v14205_v15 }
 0x8e9   : > { %v6390_v52 = vsub.f32 0.0, %v6358_v21 }
 0x8ea   : > { %v6194_v53 = vadd.f32 %v6193_v25, %v6105_v42  ;;  %6143 = vmatmul.bf16.gmra.mxu0 %v15385_v10 }
 0x8eb   : > { %6232 = vmatmul.bf16.gmra.mxu1 %v15386_v34  ;;  %v7165_v0 = vadd.f32 -1e-12, %v6390_v52 }
 0x8ec   : > { %v7952_v6 = vpop.eup %7951  ;;  %v6264_v19 = vmul.f32 0.5, %v6194_v53 }
 0x8ed   : > { %v7954_v24 = vpop.eup %7953  ;;  %v6458_v43 = vmul.f32 1.442695, %v7165_v0  ;;  %v6327_v2 = vmul.f32 0.5, %v7952_v6  ;;  %v15389_v6 = vpack.c.bf16 %v14085_v48, %v14079_v35 }
 0x8ee   : > { %6517 = vst.msk [vmem:[%s14228_s18 + $0x18] sm:$0xff] %vm781_vm2, %v7954_v24  ;;  %7955 = vtanh.f32 %v6264_v19  ;;  %v15390_v19 = vld [vmem:[#allocation20_spill] sm:$0xff]  ;;  %v15391_v24 = vld [vmem:[#allocation42_spill] sm:$0xff] }
 0x8ef   : > { %7957 = vpow2.f32 %v6458_v43  ;;  %v6359_v17 = vadd.f32 0.5, %v6327_v2  ;;  %v6106_v37 = vpop.f32.mrf.mxu0  ;;  %v15392_v43 = vpack.c.bf16 %v15390_v19, %v15391_v24 }
 0x8f0   : > { %v6195_v3 = vpop.f32.mrf.mxu1  ;;  %v6107_v54 = vadd.f32 %v6106_v37, %v14205_v15 }
 0x8f1   : > { %v6391_v51 = vsub.f32 0.0, %v6359_v17 }
 0x8f2   : > { %v6196_v36 = vadd.f32 %v6195_v3, %v6107_v54 }
 0x8f3   : > { %v7166_v41 = vadd.f32 -1e-12, %v6391_v51 }
 0x8f4   : > { %v7956_v23 = vpop.eup %7955  ;;  %v6265_v32 = vmul.f32 0.5, %v6196_v36 }
 0x8f5   : > { %v7958_v9 = vpop.eup %7957  ;;  %v6460_v11 = vmul.f32 1.442695, %v7166_v41  ;;  %v6328_v16 = vmul.f32 0.5, %v7956_v23 }
 0x8f6   : > { %6518 = vst.msk [vmem:[%s14228_s18 + $0x20] sm:$0xff] %vm781_vm2, %v7958_v9  ;;  %7959 = vtanh.f32 %v6265_v32 }
 0x8f7   : > { %7961 = vpow2.f32 %v6460_v11  ;;  %v6360_v28 = vadd.f32 0.5, %v6328_v16  ;;  %v6109_v49 = vpop.f32.mrf.mxu0 }
 0x8f8   : > { %v6198_v56 = vpop.f32.mrf.mxu1  ;;  %v6110_v39 = vadd.f32 %v6109_v49, %v14205_v15 }
 0x8f9   : > { %v6392_v20 = vsub.f32 0.0, %v6360_v28 }
 0x8fa   : > { %v6199_v18 = vadd.f32 %v6198_v56, %v6110_v39  ;;  %6148 = vmatmul.bf16.gmra.mxu0 %v15387_v7 }
 0x8fb   : > { %6237 = vmatmul.bf16.gmra.mxu1 %v15388_v40  ;;  %v7167_v4 = vadd.f32 -1e-12, %v6392_v20 }
 0x8fc   : > { %v7960_v62 = vpop.eup %7959  ;;  %v6266_v61 = vmul.f32 0.5, %v6199_v18 }
 0x8fd   : > { %v7962_v5 = vpop.eup %7961  ;;  %v6462_v60 = vmul.f32 1.442695, %v7167_v4  ;;  %v6329_v30 = vmul.f32 0.5, %v7960_v62 }
 0x8fe   : > { %6519 = vst.msk [vmem:[%s14228_s18 + $0x28] sm:$0xff] %vm781_vm2, %v7962_v5  ;;  %7963 = vtanh.f32 %v6266_v61 }
 0x8ff   : > { %7965 = vpow2.f32 %v6462_v60  ;;  %v6361_v33 = vadd.f32 0.5, %v6329_v30  ;;  %v6111_v57 = vpop.f32.mrf.mxu0 }
 0x900   : > { %v6200_v46 = vpop.f32.mrf.mxu1  ;;  %v6112_v29 = vadd.f32 %v6111_v57, %v14205_v15 }
 0x901   : > { %v6393_v13 = vsub.f32 0.0, %v6361_v33 }
 0x902   : > { %v6201_v63 = vadd.f32 %v6200_v46, %v6112_v29 }
 0x903   : > { %v7168_v12 = vadd.f32 -1e-12, %v6393_v13 }
 0x904   : > { %v7964_v59 = vpop.eup %7963  ;;  %v6267_v22 = vmul.f32 0.5, %v6201_v63 }
 0x905   : > { %v7966_v21 = vpop.eup %7965  ;;  %v6464_v38 = vmul.f32 1.442695, %v7168_v12  ;;  %v6330_v25 = vmul.f32 0.5, %v7964_v59 }
 0x906   : > { %6520 = vst.msk [vmem:[%s14228_s18 + $0x30] sm:$0xff] %vm781_vm2, %v7966_v21  ;;  %7967 = vtanh.f32 %v6267_v22 }
 0x907   : > { %7969 = vpow2.f32 %v6464_v38  ;;  %v6362_v42 = vadd.f32 0.5, %v6330_v25  ;;  %v6114_v52 = vpop.f32.mrf.mxu0 }
 0x908   : > { %v6203_v53 = vpop.f32.mrf.mxu1  ;;  %v6115_v10 = vadd.f32 %v6114_v52, %v14205_v15 }
 0x909   : > { %v6394_v34 = vsub.f32 0.0, %v6362_v42 }
 0x90a   : > { %v6204_v0 = vadd.f32 %v6203_v53, %v6115_v10  ;;  %6153 = vmatmul.bf16.gmra.mxu0 %v15389_v6 }
 0x90b   : > { %6242 = vmatmul.bf16.gmra.mxu1 %v15392_v43  ;;  %v7169_v2 = vadd.f32 -1e-12, %v6394_v34 }
 0x90c   : > { %v7968_v17 = vpop.eup %7967  ;;  %v6268_v37 = vmul.f32 0.5, %v6204_v0 }
 0x90d   : > { %v7970_v3 = vpop.eup %7969  ;;  %v6466_v54 = vmul.f32 1.442695, %v7169_v2  ;;  %v6331_v51 = vmul.f32 0.5, %v7968_v17 }
 0x90e   : > { %6521 = vst.msk [vmem:[%s14228_s18 + $0x38] sm:$0xff] %vm781_vm2, %v7970_v3  ;;  %7971 = vtanh.f32 %v6268_v37 }
 0x90f   : > { %7973 = vpow2.f32 %v6466_v54  ;;  %v6363_v36 = vadd.f32 0.5, %v6331_v51  ;;  %v6116_v41 = vpop.f32.mrf.mxu0 }
 0x910   : > { %v6205_v23 = vpop.f32.mrf.mxu1  ;;  %v6117_v35 = vadd.f32 %v6116_v41, %v14205_v15 }
 0x911   : > { %v6395_v48 = vsub.f32 0.0, %v6363_v36 }
 0x912   : > { %v6206_v32 = vadd.f32 %v6205_v23, %v6117_v35 }
 0x913   : > { %v7170_v9 = vadd.f32 -1e-12, %v6395_v48 }
 0x914   : > { %v7972_v11 = vpop.eup %7971  ;;  %v6269_v16 = vmul.f32 0.5, %v6206_v32 }
 0x915   : > { %v7974_v28 = vpop.eup %7973  ;;  %v6468_v49 = vmul.f32 1.442695, %v7170_v9  ;;  %v6332_v56 = vmul.f32 0.5, %v7972_v11 }
 0x916   : > { %6522 = vst.msk [vmem:[%s14228_s18 + $0x40] sm:$0xff] %vm781_vm2, %v7974_v28  ;;  %7975 = vtanh.f32 %v6269_v16 }
 0x917   : > { %7977 = vpow2.f32 %v6468_v49  ;;  %v6364_v39 = vadd.f32 0.5, %v6332_v56  ;;  %v6119_v20 = vpop.f32.mrf.mxu0 }
 0x918   : > { %v6208_v18 = vpop.f32.mrf.mxu1  ;;  %v6120_v7 = vadd.f32 %v6119_v20, %v14205_v15 }
 0x919   : > { %v6396_v40 = vsub.f32 0.0, %v6364_v39 }
 0x91a   : > { %v6209_v4 = vadd.f32 %v6208_v18, %v6120_v7  ;;  %6158 = vmatmul.bf16.gmra.mxu0 %v6075_v31 }
 0x91b   : > { %6247 = vmatmul.bf16.gmra.mxu1 %v6076_v26  ;;  %v7171_v62 = vadd.f32 -1e-12, %v6396_v40 }
 0x91c   : > { %v7976_v61 = vpop.eup %7975  ;;  %v6270_v5 = vmul.f32 0.5, %v6209_v4 }
 0x91d   : > { %v7978_v60 = vpop.eup %7977  ;;  %v6470_v30 = vmul.f32 1.442695, %v7171_v62  ;;  %v6333_v33 = vmul.f32 0.5, %v7976_v61 }
 0x91e   : > { %6523 = vst.msk [vmem:[%s14228_s18 + $0x48] sm:$0xff] %vm781_vm2, %v7978_v60  ;;  %7979 = vtanh.f32 %v6270_v5 }
 0x91f   : > { %7981 = vpow2.f32 %v6470_v30  ;;  %v6365_v57 = vadd.f32 0.5, %v6333_v33  ;;  %v6121_v46 = vpop.f32.mrf.mxu0 }
 0x920   : > { %v6210_v29 = vpop.f32.mrf.mxu1  ;;  %v6122_v31 = vadd.f32 %v6121_v46, %v14205_v15 }
 0x921   : > { %v6397_v45 = vsub.f32 0.0, %v6365_v57 }
 0x922   : > { %v6211_v27 = vadd.f32 %v6210_v29, %v6122_v31 }
 0x923   : > { %v7172_v1 = vadd.f32 -1e-12, %v6397_v45 }
 0x924   : > { %v7980_v8 = vpop.eup %7979  ;;  %v6271_v26 = vmul.f32 0.5, %v6211_v27 }
 0x925   : > { %v7982_v13 = vpop.eup %7981  ;;  %v6472_v63 = vmul.f32 1.442695, %v7172_v1  ;;  %v6334_v12 = vmul.f32 0.5, %v7980_v8 }
 0x926   : > { %6524 = vst.msk [vmem:[%s14228_s18 + $0x50] sm:$0xff] %vm781_vm2, %v7982_v13  ;;  %7983 = vtanh.f32 %v6271_v26 }
 0x927   : > { %7985 = vpow2.f32 %v6472_v63  ;;  %v6366_v59 = vadd.f32 0.5, %v6334_v12  ;;  %v6124_v22 = vpop.f32.mrf.mxu0 }
 0x928   : > { %v6213_v21 = vpop.f32.mrf.mxu1  ;;  %v6125_v38 = vadd.f32 %v6124_v22, %v14205_v15 }
 0x929   : > { %v6398_v25 = vsub.f32 0.0, %v6366_v59 }
 0x92a   : > { %v6214_v42 = vadd.f32 %v6213_v21, %v6125_v38  ;;  %6163 = vmatmul.bf16.gmra.mxu0 %v6077_v47 }
 0x92b   : > { %6252 = vmatmul.bf16.gmra.mxu1 %v6078_v50  ;;  %v7173_v52 = vadd.f32 -1e-12, %v6398_v25 }
 0x92c   : > { %v7984_v53 = vpop.eup %7983  ;;  %v6272_v10 = vmul.f32 0.5, %v6214_v42 }
 0x92d   : > { %v7986_v34 = vpop.eup %7985  ;;  %v6474_v0 = vmul.f32 1.442695, %v7173_v52  ;;  %v6335_v6 = vmul.f32 0.5, %v7984_v53 }
 0x92e   : > { %6525 = vst.msk [vmem:[%s14228_s18 + $0x58] sm:$0xff] %vm781_vm2, %v7986_v34  ;;  %7987 = vtanh.f32 %v6272_v10 }
 0x92f   : > { %7989 = vpow2.f32 %v6474_v0  ;;  %v6367_v19 = vadd.f32 0.5, %v6335_v6  ;;  %v6126_v24 = vpop.f32.mrf.mxu0 }
 0x930   : > { %v6215_v43 = vpop.f32.mrf.mxu1  ;;  %v6127_v14 = vadd.f32 %v6126_v24, %v14205_v15 }
 0x931   : > { %v6399_v44 = vsub.f32 0.0, %v6367_v19 }
 0x932   : > { %v6216_v47 = vadd.f32 %v6215_v43, %v6127_v14 }
 0x933   : > { %v7174_v58 = vadd.f32 -1e-12, %v6399_v44 }
 0x934   : > { %v7988_v55 = vpop.eup %7987  ;;  %v6273_v50 = vmul.f32 0.5, %v6216_v47 }
 0x935   : > { %v7990_v2 = vpop.eup %7989  ;;  %v6476_v17 = vmul.f32 1.442695, %v7174_v58  ;;  %v6336_v37 = vmul.f32 0.5, %v7988_v55 }
 0x936   : > { %6526 = vst.msk [vmem:[%s14228_s18 + $0x60] sm:$0xff] %vm781_vm2, %v7990_v2  ;;  %7991 = vtanh.f32 %v6273_v50 }
 0x937   : > { %7993 = vpow2.f32 %v6476_v17  ;;  %v6368_v3 = vadd.f32 0.5, %v6336_v37  ;;  %v6129_v54 = vpop.f32.mrf.mxu0 }
 0x938   : > { %v6218_v51 = vpop.f32.mrf.mxu1  ;;  %v6130_v36 = vadd.f32 %v6129_v54, %v14205_v15 }
 0x939   : > { %v6400_v41 = vsub.f32 0.0, %v6368_v3 }
 0x93a   : > { %v6219_v23 = vadd.f32 %v6218_v51, %v6130_v36 }
 0x93b   : > { %v7175_v35 = vadd.f32 -1e-12, %v6400_v41 }
 0x93c   : > { %v7992_v48 = vpop.eup %7991  ;;  %v6274_v32 = vmul.f32 0.5, %v6219_v23 }
 0x93d   : > { %v7994_v9 = vpop.eup %7993  ;;  %v6478_v11 = vmul.f32 1.442695, %v7175_v35  ;;  %v6337_v16 = vmul.f32 0.5, %v7992_v48 }
 0x93e   : > { %6527 = vst.msk [vmem:[%s14228_s18 + $0x68] sm:$0xff] %vm781_vm2, %v7994_v9  ;;  %7995 = vtanh.f32 %v6274_v32 }
 0x93f   : > { %7997 = vpow2.f32 %v6478_v11  ;;  %v6369_v28 = vadd.f32 0.5, %v6337_v16  ;;  %v6131_v49 = vpop.f32.mrf.mxu0 }
 0x940   : > { %v6220_v56 = vpop.f32.mrf.mxu1  ;;  %v6132_v39 = vadd.f32 %v6131_v49, %v14205_v15 }
 0x941   : > { %v6401_v20 = vsub.f32 0.0, %v6369_v28 }
 0x942   : > { %v6221_v18 = vadd.f32 %v6220_v56, %v6132_v39 }
 0x943   : > { %v7176_v7 = vadd.f32 -1e-12, %v6401_v20 }
 0x944   : > { %v7996_v40 = vpop.eup %7995  ;;  %v6275_v4 = vmul.f32 0.5, %v6221_v18 }
 0x945   : > { %v7998_v62 = vpop.eup %7997  ;;  %v6480_v61 = vmul.f32 1.442695, %v7176_v7  ;;  %v6338_v5 = vmul.f32 0.5, %v7996_v40 }
 0x946   : > { %6528 = vst.msk [vmem:[%s14228_s18 + $0x70] sm:$0xff] %vm781_vm2, %v7998_v62  ;;  %7999 = vtanh.f32 %v6275_v4 }
 0x947   : > { %8001 = vpow2.f32 %v6480_v61  ;;  %v6370_v60 = vadd.f32 0.5, %v6338_v5  ;;  %v6134_v30 = vpop.f32.mrf.mxu0 }
 0x948   : > { %v6223_v33 = vpop.f32.mrf.mxu1  ;;  %v6135_v57 = vadd.f32 %v6134_v30, %v14205_v15 }
 0x949   : > { %v6402_v46 = vsub.f32 0.0, %v6370_v60 }
 0x94a   : > { %v6224_v29 = vadd.f32 %v6223_v33, %v6135_v57 }
 0x94b   : > { %v7177_v31 = vadd.f32 -1e-12, %v6402_v46 }
 0x94c   : > { %v8000_v45 = vpop.eup %7999  ;;  %v6276_v27 = vmul.f32 0.5, %v6224_v29 }
 0x94d   : > { %v8002_v1 = vpop.eup %8001  ;;  %v6482_v8 = vmul.f32 1.442695, %v7177_v31  ;;  %v6339_v26 = vmul.f32 0.5, %v8000_v45 }
 0x94e   : > { %6529 = vst.msk [vmem:[%s14228_s18 + $0x78] sm:$0xff] %vm781_vm2, %v8002_v1  ;;  %8003 = vtanh.f32 %v6276_v27 }
 0x94f   : > { %8005 = vpow2.f32 %v6482_v8  ;;  %v6371_v13 = vadd.f32 0.5, %v6339_v26  ;;  %v6136_v63 = vpop.f32.mrf.mxu0 }
 0x950   : > { %v6225_v12 = vpop.f32.mrf.mxu1  ;;  %v6137_v59 = vadd.f32 %v6136_v63, %v14205_v15 }
 0x951   : > { %v6403_v22 = vsub.f32 0.0, %v6371_v13 }
 0x952   : > { %v6226_v21 = vadd.f32 %v6225_v12, %v6137_v59 }
 0x953   : > { %v7178_v38 = vadd.f32 -1e-12, %v6403_v22 }
 0x954   : > { %v8004_v25 = vpop.eup %8003  ;;  %v6277_v42 = vmul.f32 0.5, %v6226_v21 }
 0x955   : > { %v8006_v52 = vpop.eup %8005  ;;  %v6484_v53 = vmul.f32 1.442695, %v7178_v38  ;;  %v6340_v10 = vmul.f32 0.5, %v8004_v25 }
 0x956   : > { %6530 = vst.msk [vmem:[%s14228_s18 + $0x80] sm:$0xff] %vm781_vm2, %v8006_v52  ;;  %8007 = vtanh.f32 %v6277_v42 }
 0x957   : > { %8009 = vpow2.f32 %v6484_v53  ;;  %v6372_v34 = vadd.f32 0.5, %v6340_v10  ;;  %v6139_v0 = vpop.f32.mrf.mxu0 }
 0x958   : > { %v6228_v6 = vpop.f32.mrf.mxu1  ;;  %v6140_v19 = vadd.f32 %v6139_v0, %v14205_v15 }
 0x959   : > { %v6404_v24 = vsub.f32 0.0, %v6372_v34 }
 0x95a   : > { %v6229_v43 = vadd.f32 %v6228_v6, %v6140_v19 }
 0x95b   : > { %v7179_v14 = vadd.f32 -1e-12, %v6404_v24 }
 0x95c   : > { %v8008_v44 = vpop.eup %8007  ;;  %v6278_v47 = vmul.f32 0.5, %v6229_v43 }
 0x95d   : > { %v8010_v58 = vpop.eup %8009  ;;  %v6486_v55 = vmul.f32 1.442695, %v7179_v14  ;;  %v6341_v50 = vmul.f32 0.5, %v8008_v44 }
 0x95e   : > { %6531 = vst.msk [vmem:[%s14228_s18 + $0x88] sm:$0xff] %vm781_vm2, %v8010_v58  ;;  %8011 = vtanh.f32 %v6278_v47 }
 0x95f   : > { %8013 = vpow2.f32 %v6486_v55  ;;  %v6373_v2 = vadd.f32 0.5, %v6341_v50  ;;  %v6141_v17 = vpop.f32.mrf.mxu0 }
 0x960   : > { %v6230_v37 = vpop.f32.mrf.mxu1  ;;  %v6142_v3 = vadd.f32 %v6141_v17, %v14205_v15 }
 0x961   : > { %v6405_v54 = vsub.f32 0.0, %v6373_v2 }
 0x962   : > { %v6231_v51 = vadd.f32 %v6230_v37, %v6142_v3 }
 0x963   : > { %v7180_v36 = vadd.f32 -1e-12, %v6405_v54 }
 0x964   : > { %v8012_v41 = vpop.eup %8011  ;;  %v6279_v23 = vmul.f32 0.5, %v6231_v51 }
 0x965   : > { %v8014_v35 = vpop.eup %8013  ;;  %v6488_v48 = vmul.f32 1.442695, %v7180_v36  ;;  %v6342_v32 = vmul.f32 0.5, %v8012_v41 }
 0x966   : > { %6532 = vst.msk [vmem:[%s14228_s18 + $0x90] sm:$0xff] %vm781_vm2, %v8014_v35  ;;  %8015 = vtanh.f32 %v6279_v23 }
 0x967   : > { %8017 = vpow2.f32 %v6488_v48  ;;  %v6374_v9 = vadd.f32 0.5, %v6342_v32  ;;  %v6144_v11 = vpop.f32.mrf.mxu0 }
 0x968   : > { %v6233_v16 = vpop.f32.mrf.mxu1  ;;  %v6145_v28 = vadd.f32 %v6144_v11, %v14205_v15 }
 0x969   : > { %v6406_v49 = vsub.f32 0.0, %v6374_v9 }
 0x96a   : > { %v6234_v56 = vadd.f32 %v6233_v16, %v6145_v28 }
 0x96b   : > { %v7181_v39 = vadd.f32 -1e-12, %v6406_v49 }
 0x96c   : > { %v8016_v20 = vpop.eup %8015  ;;  %v6280_v18 = vmul.f32 0.5, %v6234_v56 }
 0x96d   : > { %v8018_v7 = vpop.eup %8017  ;;  %v6490_v40 = vmul.f32 1.442695, %v7181_v39  ;;  %v6343_v4 = vmul.f32 0.5, %v8016_v20 }
 0x96e   : > { %6533 = vst.msk [vmem:[%s14228_s18 + $0x98] sm:$0xff] %vm781_vm2, %v8018_v7  ;;  %8019 = vtanh.f32 %v6280_v18 }
 0x96f   : > { %8021 = vpow2.f32 %v6490_v40  ;;  %v6375_v62 = vadd.f32 0.5, %v6343_v4  ;;  %v6146_v61 = vpop.f32.mrf.mxu0 }
 0x970   : > { %v6235_v5 = vpop.f32.mrf.mxu1  ;;  %v6147_v60 = vadd.f32 %v6146_v61, %v14205_v15 }
 0x971   : > { %v6407_v30 = vsub.f32 0.0, %v6375_v62 }
 0x972   : > { %v6236_v33 = vadd.f32 %v6235_v5, %v6147_v60 }
 0x973   : > { %v7182_v57 = vadd.f32 -1e-12, %v6407_v30 }
 0x974   : > { %v8020_v46 = vpop.eup %8019  ;;  %v6281_v29 = vmul.f32 0.5, %v6236_v33 }
 0x975   : > { %v8022_v31 = vpop.eup %8021  ;;  %v6492_v45 = vmul.f32 1.442695, %v7182_v57  ;;  %v6344_v27 = vmul.f32 0.5, %v8020_v46 }
 0x976   : > { %6534 = vst.msk [vmem:[%s14228_s18 + $0xa0] sm:$0xff] %vm781_vm2, %v8022_v31  ;;  %8023 = vtanh.f32 %v6281_v29 }
 0x977   : > { %8025 = vpow2.f32 %v6492_v45  ;;  %v6376_v1 = vadd.f32 0.5, %v6344_v27  ;;  %v6149_v8 = vpop.f32.mrf.mxu0 }
 0x978   : > { %v6238_v26 = vpop.f32.mrf.mxu1  ;;  %v6150_v13 = vadd.f32 %v6149_v8, %v14205_v15 }
 0x979   : > { %v6408_v63 = vsub.f32 0.0, %v6376_v1 }
 0x97a   : > { %v6239_v12 = vadd.f32 %v6238_v26, %v6150_v13 }
 0x97b   : > { %v7183_v59 = vadd.f32 -1e-12, %v6408_v63 }
 0x97c   : > { %v8024_v22 = vpop.eup %8023  ;;  %v6282_v21 = vmul.f32 0.5, %v6239_v12 }
 0x97d   : > { %v8026_v38 = vpop.eup %8025  ;;  %v6494_v25 = vmul.f32 1.442695, %v7183_v59  ;;  %v6345_v42 = vmul.f32 0.5, %v8024_v22 }
 0x97e   : > { %6535 = vst.msk [vmem:[%s14228_s18 + $0xa8] sm:$0xff] %vm781_vm2, %v8026_v38  ;;  %8027 = vtanh.f32 %v6282_v21 }
 0x97f   : > { %8029 = vpow2.f32 %v6494_v25  ;;  %v6377_v52 = vadd.f32 0.5, %v6345_v42  ;;  %v6151_v53 = vpop.f32.mrf.mxu0 }
 0x980   : > { %v6240_v10 = vpop.f32.mrf.mxu1  ;;  %v6152_v34 = vadd.f32 %v6151_v53, %v14205_v15 }
 0x981   : > { %v6409_v0 = vsub.f32 0.0, %v6377_v52 }
 0x982   : > { %v6241_v6 = vadd.f32 %v6240_v10, %v6152_v34 }
 0x983   : > { %v7184_v19 = vadd.f32 -1e-12, %v6409_v0 }
 0x984   : > { %v8028_v24 = vpop.eup %8027  ;;  %v6283_v43 = vmul.f32 0.5, %v6241_v6 }
 0x985   : > { %v8030_v14 = vpop.eup %8029  ;;  %v6496_v44 = vmul.f32 1.442695, %v7184_v19  ;;  %v6346_v47 = vmul.f32 0.5, %v8028_v24 }
 0x986   : > { %6536 = vst.msk [vmem:[%s14228_s18 + $0xb0] sm:$0xff] %vm781_vm2, %v8030_v14  ;;  %8031 = vtanh.f32 %v6283_v43 }
 0x987   : > { %8033 = vpow2.f32 %v6496_v44  ;;  %v6378_v58 = vadd.f32 0.5, %v6346_v47  ;;  %v6154_v55 = vpop.f32.mrf.mxu0 }
 0x988   : > { %v6243_v50 = vpop.f32.mrf.mxu1  ;;  %v6155_v2 = vadd.f32 %v6154_v55, %v14205_v15 }
 0x989   : > { %v6410_v17 = vsub.f32 0.0, %v6378_v58 }
 0x98a   : > { %v6244_v37 = vadd.f32 %v6243_v50, %v6155_v2 }
 0x98b   : > { %v7185_v3 = vadd.f32 -1e-12, %v6410_v17 }
 0x98c   : > { %v8032_v54 = vpop.eup %8031  ;;  %v6284_v51 = vmul.f32 0.5, %v6244_v37 }
 0x98d   : > { %v8034_v36 = vpop.eup %8033  ;;  %v6498_v41 = vmul.f32 1.442695, %v7185_v3  ;;  %v6347_v23 = vmul.f32 0.5, %v8032_v54 }
 0x98e   : > { %6537 = vst.msk [vmem:[%s14228_s18 + $0xb8] sm:$0xff] %vm781_vm2, %v8034_v36  ;;  %8035 = vtanh.f32 %v6284_v51 }
 0x98f   : > { %8037 = vpow2.f32 %v6498_v41  ;;  %v6379_v35 = vadd.f32 0.5, %v6347_v23  ;;  %v6156_v48 = vpop.f32.mrf.mxu0 }
 0x990   : > { %v6245_v32 = vpop.f32.mrf.mxu1  ;;  %v6157_v9 = vadd.f32 %v6156_v48, %v14205_v15 }
 0x991   : > { %v6411_v11 = vsub.f32 0.0, %v6379_v35 }
 0x992   : > { %v6246_v16 = vadd.f32 %v6245_v32, %v6157_v9 }
 0x993   : > { %v7186_v28 = vadd.f32 -1e-12, %v6411_v11 }
 0x994   : > { %v8036_v49 = vpop.eup %8035  ;;  %v6285_v56 = vmul.f32 0.5, %v6246_v16 }
 0x995   : > { %v8038_v39 = vpop.eup %8037  ;;  %v6500_v20 = vmul.f32 1.442695, %v7186_v28  ;;  %v6348_v18 = vmul.f32 0.5, %v8036_v49 }
 0x996   : > { %6538 = vst.msk [vmem:[%s14228_s18 + $0xc0] sm:$0xff] %vm781_vm2, %v8038_v39  ;;  %8039 = vtanh.f32 %v6285_v56 }
 0x997   : > { %8041 = vpow2.f32 %v6500_v20  ;;  %v6380_v7 = vadd.f32 0.5, %v6348_v18  ;;  %v6159_v40 = vpop.f32.mrf.mxu0 }
 0x998   : > { %v6248_v4 = vpop.f32.mrf.mxu1  ;;  %v6160_v62 = vadd.f32 %v6159_v40, %v14205_v15 }
 0x999   : > { %v6412_v61 = vsub.f32 0.0, %v6380_v7 }
 0x99a   : > { %v6249_v5 = vadd.f32 %v6248_v4, %v6160_v62 }
 0x99b   : > { %v7187_v60 = vadd.f32 -1e-12, %v6412_v61 }
 0x99c   : > { %v8040_v30 = vpop.eup %8039  ;;  %v6286_v33 = vmul.f32 0.5, %v6249_v5 }
 0x99d   : > { %v8042_v57 = vpop.eup %8041  ;;  %v6502_v46 = vmul.f32 1.442695, %v7187_v60  ;;  %v6349_v29 = vmul.f32 0.5, %v8040_v30 }
 0x99e   : > { %6539 = vst.msk [vmem:[%s14228_s18 + $0xc8] sm:$0xff] %vm781_vm2, %v8042_v57  ;;  %8043 = vtanh.f32 %v6286_v33 }
 0x99f   : > { %8045 = vpow2.f32 %v6502_v46  ;;  %v6381_v31 = vadd.f32 0.5, %v6349_v29  ;;  %v6161_v45 = vpop.f32.mrf.mxu0 }
 0x9a0   : > { %v6250_v27 = vpop.f32.mrf.mxu1  ;;  %v6162_v1 = vadd.f32 %v6161_v45, %v14205_v15 }
 0x9a1   : > { %v6413_v8 = vsub.f32 0.0, %v6381_v31 }
 0x9a2   : > { %v6251_v26 = vadd.f32 %v6250_v27, %v6162_v1 }
 0x9a3   : > { %v7188_v13 = vadd.f32 -1e-12, %v6413_v8 }
 0x9a4   : > { %v8044_v63 = vpop.eup %8043  ;;  %v6287_v12 = vmul.f32 0.5, %v6251_v26 }
 0x9a5   : > { %v8046_v59 = vpop.eup %8045  ;;  %v6504_v22 = vmul.f32 1.442695, %v7188_v13  ;;  %v6350_v21 = vmul.f32 0.5, %v8044_v63 }
 0x9a6   : > { %6540 = vst.msk [vmem:[%s14228_s18 + $0xd0] sm:$0xff] %vm781_vm2, %v8046_v59  ;;  %8047 = vtanh.f32 %v6287_v12 }
 0x9a7   : > { %8049 = vpow2.f32 %v6504_v22  ;;  %v6382_v38 = vadd.f32 0.5, %v6350_v21  ;;  %v6164_v25 = vpop.f32.mrf.mxu0 }
 0x9a8   : > { %v6253_v42 = vpop.f32.mrf.mxu1  ;;  %v6165_v52 = vadd.f32 %v6164_v25, %v14205_v15 }
 0x9a9   : > { %v6414_v53 = vsub.f32 0.0, %v6382_v38 }
 0x9aa   : > { %v6254_v10 = vadd.f32 %v6253_v42, %v6165_v52 }
 0x9ab   : > { %v7189_v34 = vadd.f32 -1e-12, %v6414_v53 }
 0x9ac   : > { %v8048_v0 = vpop.eup %8047  ;;  %v6288_v6 = vmul.f32 0.5, %v6254_v10 }
 0x9ad   : > { %v8050_v19 = vpop.eup %8049  ;;  %v6506_v24 = vmul.f32 1.442695, %v7189_v34  ;;  %v6351_v43 = vmul.f32 0.5, %v8048_v0 }
 0x9ae   : > { %6541 = vst.msk [vmem:[%s14228_s18 + $0xd8] sm:$0xff] %vm781_vm2, %v8050_v19  ;;  %8051 = vtanh.f32 %v6288_v6 }
 0x9af   : > { %8053 = vpow2.f32 %v6506_v24  ;;  %v6383_v14 = vadd.f32 0.5, %v6351_v43  ;;  %v6166_v44 = vpop.f32.mrf.mxu0 }
 0x9b0   : > { %v6167_v47 = vadd.f32 %v6166_v44, %v14205_v15  ;;  %v6255_v55 = vpop.f32.mrf.mxu1 }
 0x9b1   : > { %v6415_v58 = vsub.f32 0.0, %v6383_v14 }
 0x9b2   : > { %v6256_v50 = vadd.f32 %v6255_v55, %v6167_v47 }
 0x9b3   : > { %v7190_v2 = vadd.f32 -1e-12, %v6415_v58 }
 0x9b4   : > { %v8052_v17 = vpop.eup %8051  ;;  %v6289_v37 = vmul.f32 0.5, %v6256_v50 }
 0x9b5   : > { %v8054_v3 = vpop.eup %8053  ;;  %v6508_v54 = vmul.f32 1.442695, %v7190_v2  ;;  %v6352_v51 = vmul.f32 0.5, %v8052_v17 }
 0x9b6   : > { %6542 = vst.msk [vmem:[%s14228_s18 + $0xe0] sm:$0xff] %vm781_vm2, %v8054_v3  ;;  %8055 = vtanh.f32 %v6289_v37 }
 0x9b7   : > { %8057 = vpow2.f32 %v6508_v54  ;;  %v6384_v36 = vadd.f32 0.5, %v6352_v51 }
 0x9b9   : > { %v6416_v41 = vsub.f32 0.0, %v6384_v36 }
 0x9bb   : > { %v7191_v23 = vadd.f32 -1e-12, %v6416_v41 }
 0x9bc   : > { %v8056_v15 = vpop.eup %8055 }
 0x9bd   : > { %v8058_v35 = vpop.eup %8057  ;;  %v6510_v48 = vmul.f32 1.442695, %v7191_v23  ;;  %v6353_v32 = vmul.f32 0.5, %v8056_v15 }
 0x9be   : > { %6543 = vst.msk [vmem:[%s14228_s18 + $0xe8] sm:$0xff] %vm781_vm2, %v8058_v35 }
 0x9bf   : > { %8059 = vpow2.f32 %v6510_v48  ;;  %v6385_v9 = vadd.f32 0.5, %v6353_v32 }
 0x9c1   : > { %v6417_v11 = vsub.f32 0.0, %v6385_v9 }
 0x9c3   : > { %v7192_v16 = vadd.f32 -1e-12, %v6417_v11 }
 0x9c5   : > { %v8060_v28 = vpop.eup %8059  ;;  %v6512_v49 = vmul.f32 1.442695, %v7192_v16 }
 0x9c6   : > { %6544 = vst.msk [vmem:[%s14228_s18 + $0xf0] sm:$0xff] %vm781_vm2, %v8060_v28 }
 0x9c7   : > { %8061 = vpow2.f32 %v6512_v49 }
 0x9cd   : > { %v8062_v56 = vpop.eup %8061 }
 0x9ce   : > { %6545 = vst.msk [vmem:[%s14228_s18 + $0xf8] sm:$0xff] %vm781_vm2, %v8062_v56 }
 0x9cf PF: > { %s26_s21 = sadd.s32 1, %s8079_s21  }
 0x9d0   : > { %p23_p4 = scmp.ge.s32.totalorder %s26_s21, 4  }
 0x9d2   :  { %25 = sbr.rel (!%p23_p4) target bundleno = 2 (0x2), region = 129 }

</bundles_post_ra>
